<compile_context>
chip_gen: v6e
topology: v6e:2x2x1
jax: 0.10.0
libtpu: 0.0.40
codegen_flags: <defaults>
</compile_context>

<pallas_src>
import functools
import math

import jax
import jax.numpy as jnp
from jax import lax
from jax.experimental import pallas as pl
from jax.experimental.pallas import tpu as pltpu

LN_EPS = 1e-5  # PyTorch LayerNorm default


def _mix(w, x, b=None, *, chains=1):
    """y = w @ x (+ b): small-K channel mix as unrolled VPU FMAs.

    w: (Cout, Cin) small weight, x: (Cin, M) lane-dense, b: (Cout, 1) or None.
    `chains` independent partial accumulators break the serial FMA dependence
    chain when Cin is larger (e.g. the dim_hid -> C FFN projection).
    """
    cout, cin = w.shape
    chains = max(1, min(chains, cin))
    parts = []
    for s0 in range(chains):
        acc = None
        for c in range(s0, cin, chains):
            t = w[:, c:c + 1] * x[c:c + 1, :]
            acc = t if acc is None else acc + t
        parts.append(acc)
    y = parts[0]
    for p in parts[1:]:
        y = y + p
    if b is not None:
        y = y + b
    return y


def _add_layernorm(x, r, w, b):
    """LayerNorm over axis 0 (channel axis) of (x + r); single-pass stats."""
    v = x + r
    mu = jnp.mean(v, axis=0, keepdims=True)
    var = jnp.mean(v * v, axis=0, keepdims=True) - mu * mu
    return (v - mu) * lax.rsqrt(var + LN_EPS) * w + b


def _mhsa_kernel(x_ref, wq_ref, bq_ref, wk_ref, bk_ref, wv_ref, bv_ref,
                 wo_ref, bo_ref, w1_ref, b1_ref, w2_ref, b2_ref,
                 ln1w_ref, ln1b_ref, ln2w_ref, ln2b_ref,
                 o_ref, *, num_head, num_layers):
    _, C, N = x_ref.shape
    hd = C // num_head

    # One batch element per grid step; lane-dense (C, N) internal layout.
    x = x_ref[0].astype(jnp.float32)

    for l in range(num_layers):
        wq_l, bq_l = wq_ref[l], bq_ref[l]      # (nh, hd, C), (nh, hd, 1)
        wk_l, bk_l = wk_ref[l], bk_ref[l]
        wv_l, bv_l = wv_ref[l], bv_ref[l]      # (nh, hd+1, C): last row -> ones
        wo_l = wo_ref[l]                       # (nh, C, hd)

        # ---------------- self-attention block (post-norm) -----------------
        sa = jnp.broadcast_to(bo_ref[l], (C, N)).astype(jnp.float32)
        for h in range(num_head):
            q = _mix(wq_l[h], x, bq_l[h])      # (hd, N); query pre-scaled
            k = _mix(wk_l[h], x, bk_l[h])      # (hd, N)
            v = _mix(wv_l[h], x, bv_l[h])      # (hd+1, N); last row == 1
            # scores[i, j] = sum_d q[d, i] * k[d, j]  -> (N, N); bf16 MXU, f32 acc
            s = lax.dot_general(q.astype(jnp.bfloat16), k.astype(jnp.bfloat16),
                                (((0,), (0,)), ((), ())),
                                preferred_element_type=jnp.float32)
            m = jnp.max(s, axis=-1, keepdims=True)
            p = jnp.exp((s - m).astype(jnp.bfloat16))   # unnormalized probs (bf16)
            # o_aug[d, i] = sum_j v_aug[d, j] * p[i, j]; row hd == softmax row sums
            o_aug = lax.dot_general(v.astype(jnp.bfloat16), p,
                                    (((1,), (1,)), ((), ())),
                                    preferred_element_type=jnp.float32)
            recip = pl.reciprocal(o_aug[hd:hd + 1, :], approx=True)   # (1, N)
            o_head = o_aug[:hd, :] * recip      # deferred softmax normalization
            sa = sa + _mix(wo_l[h], o_head)     # out_proj folded per head
        x = _add_layernorm(x, sa, ln1w_ref[l], ln1b_ref[l])

        # ---------------- feed-forward block -------------------------------
        hid = jnp.maximum(_mix(w1_ref[l], x, b1_ref[l]), 0.0)        # ReLU
        ff = _mix(w2_ref[l], hid, b2_ref[l], chains=4)
        x = _add_layernorm(x, ff, ln2w_ref[l], ln2b_ref[l])

    o_ref[0] = x.astype(o_ref.dtype)


def _zero_index_map(ndim):
    def imap(b):
        return (0,) * ndim
    return imap


def mhsa_forward(x_nchw, params, *, num_head):
    B, C, H, W = x_nchw.shape
    N = H * W
    assert C % num_head == 0
    nh = num_head
    hd = C // nh
    L = params['wqkv'].shape[0]
    dim_hid = params['w1'].shape[1]

    # 'b c h w -> b c (h w)' : pure reshape (same memory order), no transpose.
    x3 = x_nchw.reshape(B, C, N)

    # ---- trace-time weight preprocessing (constant-folded under jit) -------
    scale = 1.0 / math.sqrt(hd)
    wqkv, bqkv = params['wqkv'], params['bqkv']
    wq = wqkv[:, 0 * C:1 * C, :].reshape(L, nh, hd, C) * scale   # fold 1/sqrt(hd)
    wk = wqkv[:, 1 * C:2 * C, :].reshape(L, nh, hd, C)
    wv = wqkv[:, 2 * C:3 * C, :].reshape(L, nh, hd, C)
    bq = bqkv[:, 0 * C:1 * C].reshape(L, nh, hd, 1) * scale
    bk = bqkv[:, 1 * C:2 * C].reshape(L, nh, hd, 1)
    bv = bqkv[:, 2 * C:3 * C].reshape(L, nh, hd, 1)
    # Augment V with a constant-ones row per head: the PV matmul then emits the
    # per-query softmax row sums in (1, N) lane-dense layout (no transpose).
    wv = jnp.concatenate([wv, jnp.zeros((L, nh, 1, C), wv.dtype)], axis=2)
    bv = jnp.concatenate([bv, jnp.ones((L, nh, 1, 1), bv.dtype)], axis=2)
    # out_proj split per head: (L, C, C) -> (L, nh, C, hd)
    wo = params['wo'].reshape(L, C, nh, hd).transpose(0, 2, 1, 3)

    weight_args = (
        wq, bq, wk, bk, wv, bv,
        wo, params['bo'][..., None],
        params['w1'], params['b1'][..., None],
        params['w2'], params['b2'][..., None],
        params['ln1_w'][..., None], params['ln1_b'][..., None],
        params['ln2_w'][..., None], params['ln2_b'][..., None],
    )

    flops = L * B * (2 * 3 * C * C * N                 # q/k/v projections
                     + nh * 2 * (2 * hd + 1) * N * N   # QK^T + PV (+ ones row)
                     + 2 * C * C * N                   # out_proj
                     + 2 * 2 * C * dim_hid * N         # FFN
                     + 12 * C * N)                     # norms / residuals (approx)
    all_args = (x3,) + weight_args
    cost = pl.CostEstimate(
        flops=flops,
        transcendentals=L * B * nh * (N * N + N),      # softmax exps + recips
        bytes_accessed=sum(int(a.size) * a.dtype.itemsize for a in all_args)
        + B * C * N * 4)

    in_specs = ([pl.BlockSpec((1, C, N), lambda b: (b, 0, 0))]
                + [pl.BlockSpec(a.shape, _zero_index_map(a.ndim))
                   for a in weight_args])

    out = pl.pallas_call(
        functools.partial(_mhsa_kernel, num_head=num_head, num_layers=L),
        out_shape=jax.ShapeDtypeStruct((B, C, N), x_nchw.dtype),
        grid=(B,),
        in_specs=in_specs,
        out_specs=pl.BlockSpec((1, C, N), lambda b: (b, 0, 0)),
        compiler_params=pltpu.CompilerParams(
            dimension_semantics=("parallel",),          # v7x: 2 TCs share batches
            vmem_limit_bytes=32 * 1024 * 1024),         # fits v5e/v6e/v7x budgets
        cost_estimate=cost,
    )(*all_args)

    # '(h w) b c -> b c h w' counterpart: pure reshape.
    return out.reshape(B, C, H, W)


def init_params(key, C, num_head, dim_hid, num_layers):
    """Deterministic synthetic params matching the PyTorch module's shapes."""
    ks = jax.random.split(key, 12)
    rn = lambda i, shape, s: jax.random.normal(ks[i], shape, jnp.float32) * s
    s_attn = 1.0 / math.sqrt(C)
    layer = {
        'wqkv': rn(0, (3 * C, C), s_attn),        # MultiheadAttention.in_proj_weight
        'bqkv': rn(1, (3 * C,), 0.02),            # in_proj_bias
        'wo':   rn(2, (C, C), s_attn),            # out_proj.weight
        'bo':   rn(3, (C,), 0.02),
        'w1':   rn(4, (dim_hid, C), s_attn),      # linear1.weight
        'b1':   rn(5, (dim_hid,), 0.02),
        'w2':   rn(6, (C, dim_hid), 1.0 / math.sqrt(dim_hid)),   # linear2.weight
        'b2':   rn(7, (C,), 0.02),
        'ln1_w': 1.0 + 0.1 * rn(8, (C,), 1.0),
        'ln1_b': 0.1 * rn(9, (C,), 1.0),
        'ln2_w': 1.0 + 0.1 * rn(10, (C,), 1.0),
        'ln2_b': 0.1 * rn(11, (C,), 1.0),
    }
    # nn.TransformerEncoder deep-copies the layer -> all clones start identical.
    return {k: jnp.stack([v] * num_layers, axis=0) for k, v in layer.items()}


if __name__ == "__main__":
    B, C, H, W = 2, 4, 16, 16          # batch, num_channel, height, width
    num_head, dim_hid, num_layers = 2, 32, 2
    # dropout is a no-op at inference time

    key = jax.random.PRNGKey(0)
    pkey, xkey = jax.random.split(key)
    params = init_params(pkey, C, num_head, dim_hid, num_layers)
    x = jax.random.normal(xkey, (B, C, H, W), jnp.float32)

    fwd = jax.jit(functools.partial(mhsa_forward, num_head=num_head))
    out = fwd(x, params)
    jax.block_until_ready(out)
    assert out.shape == (B, C, H, W) and out.dtype == jnp.float32
    print("KERNEL_OK")
</pallas_src>

<mosaic_0001>
module attributes {stable_mosaic.version = 11 : i64} {
  func.func @_mhsa_kernel(%arg0: i32, %arg1: memref<1x4x256xf32, #tpu.memory_space<vmem>>, %arg2: memref<2x2x2x4xf32, #tpu.memory_space<vmem>>, %arg3: memref<2x2x2x1xf32, #tpu.memory_space<vmem>>, %arg4: memref<2x2x2x4xf32, #tpu.memory_space<vmem>>, %arg5: memref<2x2x2x1xf32, #tpu.memory_space<vmem>>, %arg6: memref<2x2x3x4xf32, #tpu.memory_space<vmem>>, %arg7: memref<2x2x3x1xf32, #tpu.memory_space<vmem>>, %arg8: memref<2x2x4x2xf32, #tpu.memory_space<vmem>>, %arg9: memref<2x4x1xf32, #tpu.memory_space<vmem>>, %arg10: memref<2x32x4xf32, #tpu.memory_space<vmem>>, %arg11: memref<2x32x1xf32, #tpu.memory_space<vmem>>, %arg12: memref<2x4x32xf32, #tpu.memory_space<vmem>>, %arg13: memref<2x4x1xf32, #tpu.memory_space<vmem>>, %arg14: memref<2x4x1xf32, #tpu.memory_space<vmem>>, %arg15: memref<2x4x1xf32, #tpu.memory_space<vmem>>, %arg16: memref<2x4x1xf32, #tpu.memory_space<vmem>>, %arg17: memref<2x4x1xf32, #tpu.memory_space<vmem>>, %arg18: memref<1x4x256xf32, #tpu.memory_space<vmem>>) attributes {dimension_semantics = [#tpu.dimension_semantics<parallel>], iteration_bounds = array<i64: 2>, scalar_prefetch = 0 : i64, scratch_operands = 0 : i64, tpu.core_type = #tpu.core_type<tc>, window_params = [{transform_indices = @transform_0, window_bounds = array<i64: 1, 4, 256>}, {pipeline_mode = #tpu.pipeline_mode<synchronous>, transform_indices = @transform_1, window_bounds = array<i64: 2, 2, 2, 4>}, {pipeline_mode = #tpu.pipeline_mode<synchronous>, transform_indices = @transform_2, window_bounds = array<i64: 2, 2, 2, 1>}, {pipeline_mode = #tpu.pipeline_mode<synchronous>, transform_indices = @transform_3, window_bounds = array<i64: 2, 2, 2, 4>}, {pipeline_mode = #tpu.pipeline_mode<synchronous>, transform_indices = @transform_4, window_bounds = array<i64: 2, 2, 2, 1>}, {pipeline_mode = #tpu.pipeline_mode<synchronous>, transform_indices = @transform_5, window_bounds = array<i64: 2, 2, 3, 4>}, {pipeline_mode = #tpu.pipeline_mode<synchronous>, transform_indices = @transform_6, window_bounds = array<i64: 2, 2, 3, 1>}, {pipeline_mode = #tpu.pipeline_mode<synchronous>, transform_indices = @transform_7, window_bounds = array<i64: 2, 2, 4, 2>}, {pipeline_mode = #tpu.pipeline_mode<synchronous>, transform_indices = @transform_8, window_bounds = array<i64: 2, 4, 1>}, {pipeline_mode = #tpu.pipeline_mode<synchronous>, transform_indices = @transform_9, window_bounds = array<i64: 2, 32, 4>}, {pipeline_mode = #tpu.pipeline_mode<synchronous>, transform_indices = @transform_10, window_bounds = array<i64: 2, 32, 1>}, {pipeline_mode = #tpu.pipeline_mode<synchronous>, transform_indices = @transform_11, window_bounds = array<i64: 2, 4, 32>}, {pipeline_mode = #tpu.pipeline_mode<synchronous>, transform_indices = @transform_12, window_bounds = array<i64: 2, 4, 1>}, {pipeline_mode = #tpu.pipeline_mode<synchronous>, transform_indices = @transform_13, window_bounds = array<i64: 2, 4, 1>}, {pipeline_mode = #tpu.pipeline_mode<synchronous>, transform_indices = @transform_14, window_bounds = array<i64: 2, 4, 1>}, {pipeline_mode = #tpu.pipeline_mode<synchronous>, transform_indices = @transform_15, window_bounds = array<i64: 2, 4, 1>}, {pipeline_mode = #tpu.pipeline_mode<synchronous>, transform_indices = @transform_16, window_bounds = array<i64: 2, 4, 1>}, {transform_indices = @transform_17, window_bounds = array<i64: 1, 4, 256>}]} {
    %c0 = arith.constant 0 : index
    %c0_0 = arith.constant 0 : index
    %c0_1 = arith.constant 0 : index
    %0 = vector.load %arg1[%c0, %c0_0, %c0_1] : memref<1x4x256xf32, #tpu.memory_space<vmem>>, vector<1x4x256xf32>
    %1 = vector.shape_cast %0 : vector<1x4x256xf32> to vector<4x256xf32>
    %c0_2 = arith.constant 0 : index
    %c0_3 = arith.constant 0 : index
    %c0_4 = arith.constant 0 : index
    %c0_5 = arith.constant 0 : index
    %2 = vector.load %arg2[%c0_2, %c0_3, %c0_4, %c0_5] : memref<2x2x2x4xf32, #tpu.memory_space<vmem>>, vector<1x2x2x4xf32>
    %3 = vector.shape_cast %2 : vector<1x2x2x4xf32> to vector<2x2x4xf32>
    %c0_6 = arith.constant 0 : index
    %c0_7 = arith.constant 0 : index
    %c0_8 = arith.constant 0 : index
    %c0_9 = arith.constant 0 : index
    %4 = vector.load %arg3[%c0_6, %c0_7, %c0_8, %c0_9] : memref<2x2x2x1xf32, #tpu.memory_space<vmem>>, vector<1x2x2x1xf32>
    %5 = vector.shape_cast %4 : vector<1x2x2x1xf32> to vector<2x2x1xf32>
    %c0_10 = arith.constant 0 : index
    %c0_11 = arith.constant 0 : index
    %c0_12 = arith.constant 0 : index
    %c0_13 = arith.constant 0 : index
    %6 = vector.load %arg4[%c0_10, %c0_11, %c0_12, %c0_13] : memref<2x2x2x4xf32, #tpu.memory_space<vmem>>, vector<1x2x2x4xf32>
    %7 = vector.shape_cast %6 : vector<1x2x2x4xf32> to vector<2x2x4xf32>
    %c0_14 = arith.constant 0 : index
    %c0_15 = arith.constant 0 : index
    %c0_16 = arith.constant 0 : index
    %c0_17 = arith.constant 0 : index
    %8 = vector.load %arg5[%c0_14, %c0_15, %c0_16, %c0_17] : memref<2x2x2x1xf32, #tpu.memory_space<vmem>>, vector<1x2x2x1xf32>
    %9 = vector.shape_cast %8 : vector<1x2x2x1xf32> to vector<2x2x1xf32>
    %c0_18 = arith.constant 0 : index
    %c0_19 = arith.constant 0 : index
    %c0_20 = arith.constant 0 : index
    %c0_21 = arith.constant 0 : index
    %10 = vector.load %arg6[%c0_18, %c0_19, %c0_20, %c0_21] : memref<2x2x3x4xf32, #tpu.memory_space<vmem>>, vector<1x2x3x4xf32>
    %11 = vector.shape_cast %10 : vector<1x2x3x4xf32> to vector<2x3x4xf32>
    %c0_22 = arith.constant 0 : index
    %c0_23 = arith.constant 0 : index
    %c0_24 = arith.constant 0 : index
    %c0_25 = arith.constant 0 : index
    %12 = vector.load %arg7[%c0_22, %c0_23, %c0_24, %c0_25] : memref<2x2x3x1xf32, #tpu.memory_space<vmem>>, vector<1x2x3x1xf32>
    %13 = vector.shape_cast %12 : vector<1x2x3x1xf32> to vector<2x3x1xf32>
    %c0_26 = arith.constant 0 : index
    %c0_27 = arith.constant 0 : index
    %c0_28 = arith.constant 0 : index
    %c0_29 = arith.constant 0 : index
    %14 = vector.load %arg8[%c0_26, %c0_27, %c0_28, %c0_29] : memref<2x2x4x2xf32, #tpu.memory_space<vmem>>, vector<1x2x4x2xf32>
    %15 = vector.shape_cast %14 : vector<1x2x4x2xf32> to vector<2x4x2xf32>
    %c0_30 = arith.constant 0 : index
    %c0_31 = arith.constant 0 : index
    %c0_32 = arith.constant 0 : index
    %16 = vector.load %arg9[%c0_30, %c0_31, %c0_32] : memref<2x4x1xf32, #tpu.memory_space<vmem>>, vector<1x4x1xf32>
    %17 = vector.shape_cast %16 : vector<1x4x1xf32> to vector<4x1xf32>
    %18 = vector.shape_cast %17 : vector<4x1xf32> to vector<4x1xf32>
    %19 = vector.broadcast %18 : vector<4x1xf32> to vector<4x256xf32>
    %20 = vector.extract_strided_slice %3 {offsets = [0, 0, 0], sizes = [1, 2, 4], strides = [1, 1, 1]} : vector<2x2x4xf32> to vector<1x2x4xf32>
    %21 = vector.shape_cast %20 : vector<1x2x4xf32> to vector<2x4xf32>
    %22 = vector.extract_strided_slice %5 {offsets = [0, 0, 0], sizes = [1, 2, 1], strides = [1, 1, 1]} : vector<2x2x1xf32> to vector<1x2x1xf32>
    %23 = vector.shape_cast %22 : vector<1x2x1xf32> to vector<2x1xf32>
    %24 = vector.extract_strided_slice %21 {offsets = [0, 0], sizes = [2, 1], strides = [1, 1]} : vector<2x4xf32> to vector<2x1xf32>
    %25 = vector.extract_strided_slice %1 {offsets = [0, 0], sizes = [1, 256], strides = [1, 1]} : vector<4x256xf32> to vector<1x256xf32>
    %26 = vector.broadcast %24 : vector<2x1xf32> to vector<2x256xf32>
    %27 = vector.broadcast %25 : vector<1x256xf32> to vector<2x256xf32>
    %28 = arith.mulf %26, %27 : vector<2x256xf32>
    %29 = vector.extract_strided_slice %21 {offsets = [0, 1], sizes = [2, 1], strides = [1, 1]} : vector<2x4xf32> to vector<2x1xf32>
    %30 = vector.extract_strided_slice %1 {offsets = [1, 0], sizes = [1, 256], strides = [1, 1]} : vector<4x256xf32> to vector<1x256xf32>
    %31 = vector.broadcast %29 : vector<2x1xf32> to vector<2x256xf32>
    %32 = vector.broadcast %30 : vector<1x256xf32> to vector<2x256xf32>
    %33 = arith.mulf %31, %32 : vector<2x256xf32>
    %34 = arith.addf %28, %33 : vector<2x256xf32>
    %35 = vector.extract_strided_slice %21 {offsets = [0, 2], sizes = [2, 1], strides = [1, 1]} : vector<2x4xf32> to vector<2x1xf32>
    %36 = vector.extract_strided_slice %1 {offsets = [2, 0], sizes = [1, 256], strides = [1, 1]} : vector<4x256xf32> to vector<1x256xf32>
    %37 = vector.broadcast %35 : vector<2x1xf32> to vector<2x256xf32>
    %38 = vector.broadcast %36 : vector<1x256xf32> to vector<2x256xf32>
    %39 = arith.mulf %37, %38 : vector<2x256xf32>
    %40 = arith.addf %34, %39 : vector<2x256xf32>
    %41 = vector.extract_strided_slice %21 {offsets = [0, 3], sizes = [2, 1], strides = [1, 1]} : vector<2x4xf32> to vector<2x1xf32>
    %42 = vector.extract_strided_slice %1 {offsets = [3, 0], sizes = [1, 256], strides = [1, 1]} : vector<4x256xf32> to vector<1x256xf32>
    %43 = vector.broadcast %41 : vector<2x1xf32> to vector<2x256xf32>
    %44 = vector.broadcast %42 : vector<1x256xf32> to vector<2x256xf32>
    %45 = arith.mulf %43, %44 : vector<2x256xf32>
    %46 = arith.addf %40, %45 : vector<2x256xf32>
    %47 = vector.broadcast %23 : vector<2x1xf32> to vector<2x256xf32>
    %48 = arith.addf %46, %47 : vector<2x256xf32>
    %49 = vector.extract_strided_slice %7 {offsets = [0, 0, 0], sizes = [1, 2, 4], strides = [1, 1, 1]} : vector<2x2x4xf32> to vector<1x2x4xf32>
    %50 = vector.shape_cast %49 : vector<1x2x4xf32> to vector<2x4xf32>
    %51 = vector.extract_strided_slice %9 {offsets = [0, 0, 0], sizes = [1, 2, 1], strides = [1, 1, 1]} : vector<2x2x1xf32> to vector<1x2x1xf32>
    %52 = vector.shape_cast %51 : vector<1x2x1xf32> to vector<2x1xf32>
    %53 = vector.extract_strided_slice %50 {offsets = [0, 0], sizes = [2, 1], strides = [1, 1]} : vector<2x4xf32> to vector<2x1xf32>
    %54 = vector.extract_strided_slice %1 {offsets = [0, 0], sizes = [1, 256], strides = [1, 1]} : vector<4x256xf32> to vector<1x256xf32>
    %55 = vector.broadcast %53 : vector<2x1xf32> to vector<2x256xf32>
    %56 = vector.broadcast %54 : vector<1x256xf32> to vector<2x256xf32>
    %57 = arith.mulf %55, %56 : vector<2x256xf32>
    %58 = vector.extract_strided_slice %50 {offsets = [0, 1], sizes = [2, 1], strides = [1, 1]} : vector<2x4xf32> to vector<2x1xf32>
    %59 = vector.extract_strided_slice %1 {offsets = [1, 0], sizes = [1, 256], strides = [1, 1]} : vector<4x256xf32> to vector<1x256xf32>
    %60 = vector.broadcast %58 : vector<2x1xf32> to vector<2x256xf32>
    %61 = vector.broadcast %59 : vector<1x256xf32> to vector<2x256xf32>
    %62 = arith.mulf %60, %61 : vector<2x256xf32>
    %63 = arith.addf %57, %62 : vector<2x256xf32>
    %64 = vector.extract_strided_slice %50 {offsets = [0, 2], sizes = [2, 1], strides = [1, 1]} : vector<2x4xf32> to vector<2x1xf32>
    %65 = vector.extract_strided_slice %1 {offsets = [2, 0], sizes = [1, 256], strides = [1, 1]} : vector<4x256xf32> to vector<1x256xf32>
    %66 = vector.broadcast %64 : vector<2x1xf32> to vector<2x256xf32>
    %67 = vector.broadcast %65 : vector<1x256xf32> to vector<2x256xf32>
    %68 = arith.mulf %66, %67 : vector<2x256xf32>
    %69 = arith.addf %63, %68 : vector<2x256xf32>
    %70 = vector.extract_strided_slice %50 {offsets = [0, 3], sizes = [2, 1], strides = [1, 1]} : vector<2x4xf32> to vector<2x1xf32>
    %71 = vector.extract_strided_slice %1 {offsets = [3, 0], sizes = [1, 256], strides = [1, 1]} : vector<4x256xf32> to vector<1x256xf32>
    %72 = vector.broadcast %70 : vector<2x1xf32> to vector<2x256xf32>
    %73 = vector.broadcast %71 : vector<1x256xf32> to vector<2x256xf32>
    %74 = arith.mulf %72, %73 : vector<2x256xf32>
    %75 = arith.addf %69, %74 : vector<2x256xf32>
    %76 = vector.broadcast %52 : vector<2x1xf32> to vector<2x256xf32>
    %77 = arith.addf %75, %76 : vector<2x256xf32>
    %78 = vector.extract_strided_slice %11 {offsets = [0, 0, 0], sizes = [1, 3, 4], strides = [1, 1, 1]} : vector<2x3x4xf32> to vector<1x3x4xf32>
    %79 = vector.shape_cast %78 : vector<1x3x4xf32> to vector<3x4xf32>
    %80 = vector.extract_strided_slice %13 {offsets = [0, 0, 0], sizes = [1, 3, 1], strides = [1, 1, 1]} : vector<2x3x1xf32> to vector<1x3x1xf32>
    %81 = vector.shape_cast %80 : vector<1x3x1xf32> to vector<3x1xf32>
    %82 = vector.extract_strided_slice %79 {offsets = [0, 0], sizes = [3, 1], strides = [1, 1]} : vector<3x4xf32> to vector<3x1xf32>
    %83 = vector.extract_strided_slice %1 {offsets = [0, 0], sizes = [1, 256], strides = [1, 1]} : vector<4x256xf32> to vector<1x256xf32>
    %84 = vector.broadcast %82 : vector<3x1xf32> to vector<3x256xf32>
    %85 = vector.broadcast %83 : vector<1x256xf32> to vector<3x256xf32>
    %86 = arith.mulf %84, %85 : vector<3x256xf32>
    %87 = vector.extract_strided_slice %79 {offsets = [0, 1], sizes = [3, 1], strides = [1, 1]} : vector<3x4xf32> to vector<3x1xf32>
    %88 = vector.extract_strided_slice %1 {offsets = [1, 0], sizes = [1, 256], strides = [1, 1]} : vector<4x256xf32> to vector<1x256xf32>
    %89 = vector.broadcast %87 : vector<3x1xf32> to vector<3x256xf32>
    %90 = vector.broadcast %88 : vector<1x256xf32> to vector<3x256xf32>
    %91 = arith.mulf %89, %90 : vector<3x256xf32>
    %92 = arith.addf %86, %91 : vector<3x256xf32>
    %93 = vector.extract_strided_slice %79 {offsets = [0, 2], sizes = [3, 1], strides = [1, 1]} : vector<3x4xf32> to vector<3x1xf32>
    %94 = vector.extract_strided_slice %1 {offsets = [2, 0], sizes = [1, 256], strides = [1, 1]} : vector<4x256xf32> to vector<1x256xf32>
    %95 = vector.broadcast %93 : vector<3x1xf32> to vector<3x256xf32>
    %96 = vector.broadcast %94 : vector<1x256xf32> to vector<3x256xf32>
    %97 = arith.mulf %95, %96 : vector<3x256xf32>
    %98 = arith.addf %92, %97 : vector<3x256xf32>
    %99 = vector.extract_strided_slice %79 {offsets = [0, 3], sizes = [3, 1], strides = [1, 1]} : vector<3x4xf32> to vector<3x1xf32>
    %100 = vector.extract_strided_slice %1 {offsets = [3, 0], sizes = [1, 256], strides = [1, 1]} : vector<4x256xf32> to vector<1x256xf32>
    %101 = vector.broadcast %99 : vector<3x1xf32> to vector<3x256xf32>
    %102 = vector.broadcast %100 : vector<1x256xf32> to vector<3x256xf32>
    %103 = arith.mulf %101, %102 : vector<3x256xf32>
    %104 = arith.addf %98, %103 : vector<3x256xf32>
    %105 = vector.broadcast %81 : vector<3x1xf32> to vector<3x256xf32>
    %106 = arith.addf %104, %105 : vector<3x256xf32>
    %107 = arith.truncf %48 : vector<2x256xf32> to vector<2x256xbf16>
    %108 = arith.truncf %77 : vector<2x256xf32> to vector<2x256xbf16>
    %cst = arith.constant dense<0.000000e+00> : vector<256x256xf32>
    %109 = tpu.matmul %107, %108, %cst {dimension_numbers = #tpu.dot_dimension_numbers<[0], [0], [1], [1], [0, 1, 1, 1], [], []>} : vector<2x256xbf16>, vector<2x256xbf16>, vector<256x256xf32> -> vector<256x256xf32>
    %cst_33 = arith.constant dense<0xFF800000> : vector<256xf32>
    %110 = vector.multi_reduction <maximumf>, %109, %cst_33 [1] : vector<256x256xf32> to vector<256xf32>
    %111 = vector.shape_cast %110 : vector<256xf32> to vector<256x1xf32>
    %112 = vector.broadcast %111 : vector<256x1xf32> to vector<256x256xf32>
    %113 = arith.subf %109, %112 : vector<256x256xf32>
    %114 = arith.truncf %113 : vector<256x256xf32> to vector<256x256xbf16>
    %115 = math.exp %114 : vector<256x256xbf16>
    %116 = arith.truncf %106 : vector<3x256xf32> to vector<3x256xbf16>
    %cst_34 = arith.constant dense<0.000000e+00> : vector<3x256xf32>
    %117 = tpu.matmul %116, %115, %cst_34 {dimension_numbers = #tpu.dot_dimension_numbers<[1], [1], [0], [0], [0, 0, 1, 0], [], []>} : vector<3x256xbf16>, vector<256x256xbf16>, vector<3x256xf32> -> vector<3x256xf32>
    %118 = vector.extract_strided_slice %117 {offsets = [2, 0], sizes = [1, 256], strides = [1, 1]} : vector<3x256xf32> to vector<1x256xf32>
    %119 = tpu.reciprocal %118 {approx = true} : vector<1x256xf32> -> vector<1x256xf32>
    %120 = vector.extract_strided_slice %117 {offsets = [0, 0], sizes = [2, 256], strides = [1, 1]} : vector<3x256xf32> to vector<2x256xf32>
    %121 = vector.broadcast %119 : vector<1x256xf32> to vector<2x256xf32>
    %122 = arith.mulf %120, %121 : vector<2x256xf32>
    %123 = vector.extract_strided_slice %15 {offsets = [0, 0, 0], sizes = [1, 4, 2], strides = [1, 1, 1]} : vector<2x4x2xf32> to vector<1x4x2xf32>
    %124 = vector.shape_cast %123 : vector<1x4x2xf32> to vector<4x2xf32>
    %125 = vector.extract_strided_slice %124 {offsets = [0, 0], sizes = [4, 1], strides = [1, 1]} : vector<4x2xf32> to vector<4x1xf32>
    %126 = vector.extract_strided_slice %122 {offsets = [0, 0], sizes = [1, 256], strides = [1, 1]} : vector<2x256xf32> to vector<1x256xf32>
    %127 = vector.broadcast %125 : vector<4x1xf32> to vector<4x256xf32>
    %128 = vector.broadcast %126 : vector<1x256xf32> to vector<4x256xf32>
    %129 = arith.mulf %127, %128 : vector<4x256xf32>
    %130 = vector.extract_strided_slice %124 {offsets = [0, 1], sizes = [4, 1], strides = [1, 1]} : vector<4x2xf32> to vector<4x1xf32>
    %131 = vector.extract_strided_slice %122 {offsets = [1, 0], sizes = [1, 256], strides = [1, 1]} : vector<2x256xf32> to vector<1x256xf32>
    %132 = vector.broadcast %130 : vector<4x1xf32> to vector<4x256xf32>
    %133 = vector.broadcast %131 : vector<1x256xf32> to vector<4x256xf32>
    %134 = arith.mulf %132, %133 : vector<4x256xf32>
    %135 = arith.addf %129, %134 : vector<4x256xf32>
    %136 = arith.addf %19, %135 : vector<4x256xf32>
    %137 = vector.extract_strided_slice %3 {offsets = [1, 0, 0], sizes = [1, 2, 4], strides = [1, 1, 1]} : vector<2x2x4xf32> to vector<1x2x4xf32>
    %138 = vector.shape_cast %137 : vector<1x2x4xf32> to vector<2x4xf32>
    %139 = vector.extract_strided_slice %5 {offsets = [1, 0, 0], sizes = [1, 2, 1], strides = [1, 1, 1]} : vector<2x2x1xf32> to vector<1x2x1xf32>
    %140 = vector.shape_cast %139 : vector<1x2x1xf32> to vector<2x1xf32>
    %141 = vector.extract_strided_slice %138 {offsets = [0, 0], sizes = [2, 1], strides = [1, 1]} : vector<2x4xf32> to vector<2x1xf32>
    %142 = vector.extract_strided_slice %1 {offsets = [0, 0], sizes = [1, 256], strides = [1, 1]} : vector<4x256xf32> to vector<1x256xf32>
    %143 = vector.broadcast %141 : vector<2x1xf32> to vector<2x256xf32>
    %144 = vector.broadcast %142 : vector<1x256xf32> to vector<2x256xf32>
    %145 = arith.mulf %143, %144 : vector<2x256xf32>
    %146 = vector.extract_strided_slice %138 {offsets = [0, 1], sizes = [2, 1], strides = [1, 1]} : vector<2x4xf32> to vector<2x1xf32>
    %147 = vector.extract_strided_slice %1 {offsets = [1, 0], sizes = [1, 256], strides = [1, 1]} : vector<4x256xf32> to vector<1x256xf32>
    %148 = vector.broadcast %146 : vector<2x1xf32> to vector<2x256xf32>
    %149 = vector.broadcast %147 : vector<1x256xf32> to vector<2x256xf32>
    %150 = arith.mulf %148, %149 : vector<2x256xf32>
    %151 = arith.addf %145, %150 : vector<2x256xf32>
    %152 = vector.extract_strided_slice %138 {offsets = [0, 2], sizes = [2, 1], strides = [1, 1]} : vector<2x4xf32> to vector<2x1xf32>
    %153 = vector.extract_strided_slice %1 {offsets = [2, 0], sizes = [1, 256], strides = [1, 1]} : vector<4x256xf32> to vector<1x256xf32>
    %154 = vector.broadcast %152 : vector<2x1xf32> to vector<2x256xf32>
    %155 = vector.broadcast %153 : vector<1x256xf32> to vector<2x256xf32>
    %156 = arith.mulf %154, %155 : vector<2x256xf32>
    %157 = arith.addf %151, %156 : vector<2x256xf32>
    %158 = vector.extract_strided_slice %138 {offsets = [0, 3], sizes = [2, 1], strides = [1, 1]} : vector<2x4xf32> to vector<2x1xf32>
    %159 = vector.extract_strided_slice %1 {offsets = [3, 0], sizes = [1, 256], strides = [1, 1]} : vector<4x256xf32> to vector<1x256xf32>
    %160 = vector.broadcast %158 : vector<2x1xf32> to vector<2x256xf32>
    %161 = vector.broadcast %159 : vector<1x256xf32> to vector<2x256xf32>
    %162 = arith.mulf %160, %161 : vector<2x256xf32>
    %163 = arith.addf %157, %162 : vector<2x256xf32>
    %164 = vector.broadcast %140 : vector<2x1xf32> to vector<2x256xf32>
    %165 = arith.addf %163, %164 : vector<2x256xf32>
    %166 = vector.extract_strided_slice %7 {offsets = [1, 0, 0], sizes = [1, 2, 4], strides = [1, 1, 1]} : vector<2x2x4xf32> to vector<1x2x4xf32>
    %167 = vector.shape_cast %166 : vector<1x2x4xf32> to vector<2x4xf32>
    %168 = vector.extract_strided_slice %9 {offsets = [1, 0, 0], sizes = [1, 2, 1], strides = [1, 1, 1]} : vector<2x2x1xf32> to vector<1x2x1xf32>
    %169 = vector.shape_cast %168 : vector<1x2x1xf32> to vector<2x1xf32>
    %170 = vector.extract_strided_slice %167 {offsets = [0, 0], sizes = [2, 1], strides = [1, 1]} : vector<2x4xf32> to vector<2x1xf32>
    %171 = vector.extract_strided_slice %1 {offsets = [0, 0], sizes = [1, 256], strides = [1, 1]} : vector<4x256xf32> to vector<1x256xf32>
    %172 = vector.broadcast %170 : vector<2x1xf32> to vector<2x256xf32>
    %173 = vector.broadcast %171 : vector<1x256xf32> to vector<2x256xf32>
    %174 = arith.mulf %172, %173 : vector<2x256xf32>
    %175 = vector.extract_strided_slice %167 {offsets = [0, 1], sizes = [2, 1], strides = [1, 1]} : vector<2x4xf32> to vector<2x1xf32>
    %176 = vector.extract_strided_slice %1 {offsets = [1, 0], sizes = [1, 256], strides = [1, 1]} : vector<4x256xf32> to vector<1x256xf32>
    %177 = vector.broadcast %175 : vector<2x1xf32> to vector<2x256xf32>
    %178 = vector.broadcast %176 : vector<1x256xf32> to vector<2x256xf32>
    %179 = arith.mulf %177, %178 : vector<2x256xf32>
    %180 = arith.addf %174, %179 : vector<2x256xf32>
    %181 = vector.extract_strided_slice %167 {offsets = [0, 2], sizes = [2, 1], strides = [1, 1]} : vector<2x4xf32> to vector<2x1xf32>
    %182 = vector.extract_strided_slice %1 {offsets = [2, 0], sizes = [1, 256], strides = [1, 1]} : vector<4x256xf32> to vector<1x256xf32>
    %183 = vector.broadcast %181 : vector<2x1xf32> to vector<2x256xf32>
    %184 = vector.broadcast %182 : vector<1x256xf32> to vector<2x256xf32>
    %185 = arith.mulf %183, %184 : vector<2x256xf32>
    %186 = arith.addf %180, %185 : vector<2x256xf32>
    %187 = vector.extract_strided_slice %167 {offsets = [0, 3], sizes = [2, 1], strides = [1, 1]} : vector<2x4xf32> to vector<2x1xf32>
    %188 = vector.extract_strided_slice %1 {offsets = [3, 0], sizes = [1, 256], strides = [1, 1]} : vector<4x256xf32> to vector<1x256xf32>
    %189 = vector.broadcast %187 : vector<2x1xf32> to vector<2x256xf32>
    %190 = vector.broadcast %188 : vector<1x256xf32> to vector<2x256xf32>
    %191 = arith.mulf %189, %190 : vector<2x256xf32>
    %192 = arith.addf %186, %191 : vector<2x256xf32>
    %193 = vector.broadcast %169 : vector<2x1xf32> to vector<2x256xf32>
    %194 = arith.addf %192, %193 : vector<2x256xf32>
    %195 = vector.extract_strided_slice %11 {offsets = [1, 0, 0], sizes = [1, 3, 4], strides = [1, 1, 1]} : vector<2x3x4xf32> to vector<1x3x4xf32>
    %196 = vector.shape_cast %195 : vector<1x3x4xf32> to vector<3x4xf32>
    %197 = vector.extract_strided_slice %13 {offsets = [1, 0, 0], sizes = [1, 3, 1], strides = [1, 1, 1]} : vector<2x3x1xf32> to vector<1x3x1xf32>
    %198 = vector.shape_cast %197 : vector<1x3x1xf32> to vector<3x1xf32>
    %199 = vector.extract_strided_slice %196 {offsets = [0, 0], sizes = [3, 1], strides = [1, 1]} : vector<3x4xf32> to vector<3x1xf32>
    %200 = vector.extract_strided_slice %1 {offsets = [0, 0], sizes = [1, 256], strides = [1, 1]} : vector<4x256xf32> to vector<1x256xf32>
    %201 = vector.broadcast %199 : vector<3x1xf32> to vector<3x256xf32>
    %202 = vector.broadcast %200 : vector<1x256xf32> to vector<3x256xf32>
    %203 = arith.mulf %201, %202 : vector<3x256xf32>
    %204 = vector.extract_strided_slice %196 {offsets = [0, 1], sizes = [3, 1], strides = [1, 1]} : vector<3x4xf32> to vector<3x1xf32>
    %205 = vector.extract_strided_slice %1 {offsets = [1, 0], sizes = [1, 256], strides = [1, 1]} : vector<4x256xf32> to vector<1x256xf32>
    %206 = vector.broadcast %204 : vector<3x1xf32> to vector<3x256xf32>
    %207 = vector.broadcast %205 : vector<1x256xf32> to vector<3x256xf32>
    %208 = arith.mulf %206, %207 : vector<3x256xf32>
    %209 = arith.addf %203, %208 : vector<3x256xf32>
    %210 = vector.extract_strided_slice %196 {offsets = [0, 2], sizes = [3, 1], strides = [1, 1]} : vector<3x4xf32> to vector<3x1xf32>
    %211 = vector.extract_strided_slice %1 {offsets = [2, 0], sizes = [1, 256], strides = [1, 1]} : vector<4x256xf32> to vector<1x256xf32>
    %212 = vector.broadcast %210 : vector<3x1xf32> to vector<3x256xf32>
    %213 = vector.broadcast %211 : vector<1x256xf32> to vector<3x256xf32>
    %214 = arith.mulf %212, %213 : vector<3x256xf32>
    %215 = arith.addf %209, %214 : vector<3x256xf32>
    %216 = vector.extract_strided_slice %196 {offsets = [0, 3], sizes = [3, 1], strides = [1, 1]} : vector<3x4xf32> to vector<3x1xf32>
    %217 = vector.extract_strided_slice %1 {offsets = [3, 0], sizes = [1, 256], strides = [1, 1]} : vector<4x256xf32> to vector<1x256xf32>
    %218 = vector.broadcast %216 : vector<3x1xf32> to vector<3x256xf32>
    %219 = vector.broadcast %217 : vector<1x256xf32> to vector<3x256xf32>
    %220 = arith.mulf %218, %219 : vector<3x256xf32>
    %221 = arith.addf %215, %220 : vector<3x256xf32>
    %222 = vector.broadcast %198 : vector<3x1xf32> to vector<3x256xf32>
    %223 = arith.addf %221, %222 : vector<3x256xf32>
    %224 = arith.truncf %165 : vector<2x256xf32> to vector<2x256xbf16>
    %225 = arith.truncf %194 : vector<2x256xf32> to vector<2x256xbf16>
    %cst_35 = arith.constant dense<0.000000e+00> : vector<256x256xf32>
    %226 = tpu.matmul %224, %225, %cst_35 {dimension_numbers = #tpu.dot_dimension_numbers<[0], [0], [1], [1], [0, 1, 1, 1], [], []>} : vector<2x256xbf16>, vector<2x256xbf16>, vector<256x256xf32> -> vector<256x256xf32>
    %cst_36 = arith.constant dense<0xFF800000> : vector<256xf32>
    %227 = vector.multi_reduction <maximumf>, %226, %cst_36 [1] : vector<256x256xf32> to vector<256xf32>
    %228 = vector.shape_cast %227 : vector<256xf32> to vector<256x1xf32>
    %229 = vector.broadcast %228 : vector<256x1xf32> to vector<256x256xf32>
    %230 = arith.subf %226, %229 : vector<256x256xf32>
    %231 = arith.truncf %230 : vector<256x256xf32> to vector<256x256xbf16>
    %232 = math.exp %231 : vector<256x256xbf16>
    %233 = arith.truncf %223 : vector<3x256xf32> to vector<3x256xbf16>
    %cst_37 = arith.constant dense<0.000000e+00> : vector<3x256xf32>
    %234 = tpu.matmul %233, %232, %cst_37 {dimension_numbers = #tpu.dot_dimension_numbers<[1], [1], [0], [0], [0, 0, 1, 0], [], []>} : vector<3x256xbf16>, vector<256x256xbf16>, vector<3x256xf32> -> vector<3x256xf32>
    %235 = vector.extract_strided_slice %234 {offsets = [2, 0], sizes = [1, 256], strides = [1, 1]} : vector<3x256xf32> to vector<1x256xf32>
    %236 = tpu.reciprocal %235 {approx = true} : vector<1x256xf32> -> vector<1x256xf32>
    %237 = vector.extract_strided_slice %234 {offsets = [0, 0], sizes = [2, 256], strides = [1, 1]} : vector<3x256xf32> to vector<2x256xf32>
    %238 = vector.broadcast %236 : vector<1x256xf32> to vector<2x256xf32>
    %239 = arith.mulf %237, %238 : vector<2x256xf32>
    %240 = vector.extract_strided_slice %15 {offsets = [1, 0, 0], sizes = [1, 4, 2], strides = [1, 1, 1]} : vector<2x4x2xf32> to vector<1x4x2xf32>
    %241 = vector.shape_cast %240 : vector<1x4x2xf32> to vector<4x2xf32>
    %242 = vector.extract_strided_slice %241 {offsets = [0, 0], sizes = [4, 1], strides = [1, 1]} : vector<4x2xf32> to vector<4x1xf32>
    %243 = vector.extract_strided_slice %239 {offsets = [0, 0], sizes = [1, 256], strides = [1, 1]} : vector<2x256xf32> to vector<1x256xf32>
    %244 = vector.broadcast %242 : vector<4x1xf32> to vector<4x256xf32>
    %245 = vector.broadcast %243 : vector<1x256xf32> to vector<4x256xf32>
    %246 = arith.mulf %244, %245 : vector<4x256xf32>
    %247 = vector.extract_strided_slice %241 {offsets = [0, 1], sizes = [4, 1], strides = [1, 1]} : vector<4x2xf32> to vector<4x1xf32>
    %248 = vector.extract_strided_slice %239 {offsets = [1, 0], sizes = [1, 256], strides = [1, 1]} : vector<2x256xf32> to vector<1x256xf32>
    %249 = vector.broadcast %247 : vector<4x1xf32> to vector<4x256xf32>
    %250 = vector.broadcast %248 : vector<1x256xf32> to vector<4x256xf32>
    %251 = arith.mulf %249, %250 : vector<4x256xf32>
    %252 = arith.addf %246, %251 : vector<4x256xf32>
    %253 = arith.addf %136, %252 : vector<4x256xf32>
    %c0_38 = arith.constant 0 : index
    %c0_39 = arith.constant 0 : index
    %c0_40 = arith.constant 0 : index
    %254 = vector.load %arg14[%c0_38, %c0_39, %c0_40] : memref<2x4x1xf32, #tpu.memory_space<vmem>>, vector<1x4x1xf32>
    %255 = vector.shape_cast %254 : vector<1x4x1xf32> to vector<4x1xf32>
    %c0_41 = arith.constant 0 : index
    %c0_42 = arith.constant 0 : index
    %c0_43 = arith.constant 0 : index
    %256 = vector.load %arg15[%c0_41, %c0_42, %c0_43] : memref<2x4x1xf32, #tpu.memory_space<vmem>>, vector<1x4x1xf32>
    %257 = vector.shape_cast %256 : vector<1x4x1xf32> to vector<4x1xf32>
    %258 = arith.addf %1, %253 : vector<4x256xf32>
    %cst_44 = arith.constant dense<0.000000e+00> : vector<256xf32>
    %259 = vector.multi_reduction <add>, %258, %cst_44 [0] : vector<4x256xf32> to vector<256xf32>
    %260 = vector.shape_cast %259 : vector<256xf32> to vector<1x256xf32>
    %cst_45 = arith.constant 4.000000e+00 : f32
    %261 = vector.broadcast %cst_45 : f32 to vector<1x256xf32>
    %262 = arith.divf %260, %261 : vector<1x256xf32>
    %263 = arith.mulf %258, %258 : vector<4x256xf32>
    %cst_46 = arith.constant dense<0.000000e+00> : vector<256xf32>
    %264 = vector.multi_reduction <add>, %263, %cst_46 [0] : vector<4x256xf32> to vector<256xf32>
    %265 = vector.shape_cast %264 : vector<256xf32> to vector<1x256xf32>
    %cst_47 = arith.constant 4.000000e+00 : f32
    %266 = vector.broadcast %cst_47 : f32 to vector<1x256xf32>
    %267 = arith.divf %265, %266 : vector<1x256xf32>
    %268 = arith.mulf %262, %262 : vector<1x256xf32>
    %269 = arith.subf %267, %268 : vector<1x256xf32>
    %270 = vector.broadcast %262 : vector<1x256xf32> to vector<4x256xf32>
    %271 = arith.subf %258, %270 : vector<4x256xf32>
    %cst_48 = arith.constant 9.99999974E-6 : f32
    %272 = vector.broadcast %cst_48 : f32 to vector<1x256xf32>
    %273 = arith.addf %269, %272 : vector<1x256xf32>
    %274 = math.rsqrt %273 : vector<1x256xf32>
    %275 = vector.broadcast %274 : vector<1x256xf32> to vector<4x256xf32>
    %276 = arith.mulf %271, %275 : vector<4x256xf32>
    %277 = vector.broadcast %255 : vector<4x1xf32> to vector<4x256xf32>
    %278 = arith.mulf %276, %277 : vector<4x256xf32>
    %279 = vector.broadcast %257 : vector<4x1xf32> to vector<4x256xf32>
    %280 = arith.addf %278, %279 : vector<4x256xf32>
    %c0_49 = arith.constant 0 : index
    %c0_50 = arith.constant 0 : index
    %c0_51 = arith.constant 0 : index
    %281 = vector.load %arg10[%c0_49, %c0_50, %c0_51] : memref<2x32x4xf32, #tpu.memory_space<vmem>>, vector<1x32x4xf32>
    %282 = vector.shape_cast %281 : vector<1x32x4xf32> to vector<32x4xf32>
    %c0_52 = arith.constant 0 : index
    %c0_53 = arith.constant 0 : index
    %c0_54 = arith.constant 0 : index
    %283 = vector.load %arg11[%c0_52, %c0_53, %c0_54] : memref<2x32x1xf32, #tpu.memory_space<vmem>>, vector<1x32x1xf32>
    %284 = vector.shape_cast %283 : vector<1x32x1xf32> to vector<32x1xf32>
    %285 = vector.extract_strided_slice %282 {offsets = [0, 0], sizes = [32, 1], strides = [1, 1]} : vector<32x4xf32> to vector<32x1xf32>
    %286 = vector.extract_strided_slice %280 {offsets = [0, 0], sizes = [1, 256], strides = [1, 1]} : vector<4x256xf32> to vector<1x256xf32>
    %287 = vector.broadcast %285 : vector<32x1xf32> to vector<32x256xf32>
    %288 = vector.broadcast %286 : vector<1x256xf32> to vector<32x256xf32>
    %289 = arith.mulf %287, %288 : vector<32x256xf32>
    %290 = vector.extract_strided_slice %282 {offsets = [0, 1], sizes = [32, 1], strides = [1, 1]} : vector<32x4xf32> to vector<32x1xf32>
    %291 = vector.extract_strided_slice %280 {offsets = [1, 0], sizes = [1, 256], strides = [1, 1]} : vector<4x256xf32> to vector<1x256xf32>
    %292 = vector.broadcast %290 : vector<32x1xf32> to vector<32x256xf32>
    %293 = vector.broadcast %291 : vector<1x256xf32> to vector<32x256xf32>
    %294 = arith.mulf %292, %293 : vector<32x256xf32>
    %295 = arith.addf %289, %294 : vector<32x256xf32>
    %296 = vector.extract_strided_slice %282 {offsets = [0, 2], sizes = [32, 1], strides = [1, 1]} : vector<32x4xf32> to vector<32x1xf32>
    %297 = vector.extract_strided_slice %280 {offsets = [2, 0], sizes = [1, 256], strides = [1, 1]} : vector<4x256xf32> to vector<1x256xf32>
    %298 = vector.broadcast %296 : vector<32x1xf32> to vector<32x256xf32>
    %299 = vector.broadcast %297 : vector<1x256xf32> to vector<32x256xf32>
    %300 = arith.mulf %298, %299 : vector<32x256xf32>
    %301 = arith.addf %295, %300 : vector<32x256xf32>
    %302 = vector.extract_strided_slice %282 {offsets = [0, 3], sizes = [32, 1], strides = [1, 1]} : vector<32x4xf32> to vector<32x1xf32>
    %303 = vector.extract_strided_slice %280 {offsets = [3, 0], sizes = [1, 256], strides = [1, 1]} : vector<4x256xf32> to vector<1x256xf32>
    %304 = vector.broadcast %302 : vector<32x1xf32> to vector<32x256xf32>
    %305 = vector.broadcast %303 : vector<1x256xf32> to vector<32x256xf32>
    %306 = arith.mulf %304, %305 : vector<32x256xf32>
    %307 = arith.addf %301, %306 : vector<32x256xf32>
    %308 = vector.broadcast %284 : vector<32x1xf32> to vector<32x256xf32>
    %309 = arith.addf %307, %308 : vector<32x256xf32>
    %cst_55 = arith.constant 0.000000e+00 : f32
    %310 = vector.broadcast %cst_55 : f32 to vector<32x256xf32>
    %311 = arith.maximumf %309, %310 : vector<32x256xf32>
    %c0_56 = arith.constant 0 : index
    %c0_57 = arith.constant 0 : index
    %c0_58 = arith.constant 0 : index
    %312 = vector.load %arg12[%c0_56, %c0_57, %c0_58] : memref<2x4x32xf32, #tpu.memory_space<vmem>>, vector<1x4x32xf32>
    %313 = vector.shape_cast %312 : vector<1x4x32xf32> to vector<4x32xf32>
    %c0_59 = arith.constant 0 : index
    %c0_60 = arith.constant 0 : index
    %c0_61 = arith.constant 0 : index
    %314 = vector.load %arg13[%c0_59, %c0_60, %c0_61] : memref<2x4x1xf32, #tpu.memory_space<vmem>>, vector<1x4x1xf32>
    %315 = vector.shape_cast %314 : vector<1x4x1xf32> to vector<4x1xf32>
    %316 = vector.extract_strided_slice %313 {offsets = [0, 0], sizes = [4, 1], strides = [1, 1]} : vector<4x32xf32> to vector<4x1xf32>
    %317 = vector.extract_strided_slice %311 {offsets = [0, 0], sizes = [1, 256], strides = [1, 1]} : vector<32x256xf32> to vector<1x256xf32>
    %318 = vector.broadcast %316 : vector<4x1xf32> to vector<4x256xf32>
    %319 = vector.broadcast %317 : vector<1x256xf32> to vector<4x256xf32>
    %320 = arith.mulf %318, %319 : vector<4x256xf32>
    %321 = vector.extract_strided_slice %313 {offsets = [0, 4], sizes = [4, 1], strides = [1, 1]} : vector<4x32xf32> to vector<4x1xf32>
    %322 = vector.extract_strided_slice %311 {offsets = [4, 0], sizes = [1, 256], strides = [1, 1]} : vector<32x256xf32> to vector<1x256xf32>
    %323 = vector.broadcast %321 : vector<4x1xf32> to vector<4x256xf32>
    %324 = vector.broadcast %322 : vector<1x256xf32> to vector<4x256xf32>
    %325 = arith.mulf %323, %324 : vector<4x256xf32>
    %326 = arith.addf %320, %325 : vector<4x256xf32>
    %327 = vector.extract_strided_slice %313 {offsets = [0, 8], sizes = [4, 1], strides = [1, 1]} : vector<4x32xf32> to vector<4x1xf32>
    %328 = vector.extract_strided_slice %311 {offsets = [8, 0], sizes = [1, 256], strides = [1, 1]} : vector<32x256xf32> to vector<1x256xf32>
    %329 = vector.broadcast %327 : vector<4x1xf32> to vector<4x256xf32>
    %330 = vector.broadcast %328 : vector<1x256xf32> to vector<4x256xf32>
    %331 = arith.mulf %329, %330 : vector<4x256xf32>
    %332 = arith.addf %326, %331 : vector<4x256xf32>
    %333 = vector.extract_strided_slice %313 {offsets = [0, 12], sizes = [4, 1], strides = [1, 1]} : vector<4x32xf32> to vector<4x1xf32>
    %334 = vector.extract_strided_slice %311 {offsets = [12, 0], sizes = [1, 256], strides = [1, 1]} : vector<32x256xf32> to vector<1x256xf32>
    %335 = vector.broadcast %333 : vector<4x1xf32> to vector<4x256xf32>
    %336 = vector.broadcast %334 : vector<1x256xf32> to vector<4x256xf32>
    %337 = arith.mulf %335, %336 : vector<4x256xf32>
    %338 = arith.addf %332, %337 : vector<4x256xf32>
    %339 = vector.extract_strided_slice %313 {offsets = [0, 16], sizes = [4, 1], strides = [1, 1]} : vector<4x32xf32> to vector<4x1xf32>
    %340 = vector.extract_strided_slice %311 {offsets = [16, 0], sizes = [1, 256], strides = [1, 1]} : vector<32x256xf32> to vector<1x256xf32>
    %341 = vector.broadcast %339 : vector<4x1xf32> to vector<4x256xf32>
    %342 = vector.broadcast %340 : vector<1x256xf32> to vector<4x256xf32>
    %343 = arith.mulf %341, %342 : vector<4x256xf32>
    %344 = arith.addf %338, %343 : vector<4x256xf32>
    %345 = vector.extract_strided_slice %313 {offsets = [0, 20], sizes = [4, 1], strides = [1, 1]} : vector<4x32xf32> to vector<4x1xf32>
    %346 = vector.extract_strided_slice %311 {offsets = [20, 0], sizes = [1, 256], strides = [1, 1]} : vector<32x256xf32> to vector<1x256xf32>
    %347 = vector.broadcast %345 : vector<4x1xf32> to vector<4x256xf32>
    %348 = vector.broadcast %346 : vector<1x256xf32> to vector<4x256xf32>
    %349 = arith.mulf %347, %348 : vector<4x256xf32>
    %350 = arith.addf %344, %349 : vector<4x256xf32>
    %351 = vector.extract_strided_slice %313 {offsets = [0, 24], sizes = [4, 1], strides = [1, 1]} : vector<4x32xf32> to vector<4x1xf32>
    %352 = vector.extract_strided_slice %311 {offsets = [24, 0], sizes = [1, 256], strides = [1, 1]} : vector<32x256xf32> to vector<1x256xf32>
    %353 = vector.broadcast %351 : vector<4x1xf32> to vector<4x256xf32>
    %354 = vector.broadcast %352 : vector<1x256xf32> to vector<4x256xf32>
    %355 = arith.mulf %353, %354 : vector<4x256xf32>
    %356 = arith.addf %350, %355 : vector<4x256xf32>
    %357 = vector.extract_strided_slice %313 {offsets = [0, 28], sizes = [4, 1], strides = [1, 1]} : vector<4x32xf32> to vector<4x1xf32>
    %358 = vector.extract_strided_slice %311 {offsets = [28, 0], sizes = [1, 256], strides = [1, 1]} : vector<32x256xf32> to vector<1x256xf32>
    %359 = vector.broadcast %357 : vector<4x1xf32> to vector<4x256xf32>
    %360 = vector.broadcast %358 : vector<1x256xf32> to vector<4x256xf32>
    %361 = arith.mulf %359, %360 : vector<4x256xf32>
    %362 = arith.addf %356, %361 : vector<4x256xf32>
    %363 = vector.extract_strided_slice %313 {offsets = [0, 1], sizes = [4, 1], strides = [1, 1]} : vector<4x32xf32> to vector<4x1xf32>
    %364 = vector.extract_strided_slice %311 {offsets = [1, 0], sizes = [1, 256], strides = [1, 1]} : vector<32x256xf32> to vector<1x256xf32>
    %365 = vector.broadcast %363 : vector<4x1xf32> to vector<4x256xf32>
    %366 = vector.broadcast %364 : vector<1x256xf32> to vector<4x256xf32>
    %367 = arith.mulf %365, %366 : vector<4x256xf32>
    %368 = vector.extract_strided_slice %313 {offsets = [0, 5], sizes = [4, 1], strides = [1, 1]} : vector<4x32xf32> to vector<4x1xf32>
    %369 = vector.extract_strided_slice %311 {offsets = [5, 0], sizes = [1, 256], strides = [1, 1]} : vector<32x256xf32> to vector<1x256xf32>
    %370 = vector.broadcast %368 : vector<4x1xf32> to vector<4x256xf32>
    %371 = vector.broadcast %369 : vector<1x256xf32> to vector<4x256xf32>
    %372 = arith.mulf %370, %371 : vector<4x256xf32>
    %373 = arith.addf %367, %372 : vector<4x256xf32>
    %374 = vector.extract_strided_slice %313 {offsets = [0, 9], sizes = [4, 1], strides = [1, 1]} : vector<4x32xf32> to vector<4x1xf32>
    %375 = vector.extract_strided_slice %311 {offsets = [9, 0], sizes = [1, 256], strides = [1, 1]} : vector<32x256xf32> to vector<1x256xf32>
    %376 = vector.broadcast %374 : vector<4x1xf32> to vector<4x256xf32>
    %377 = vector.broadcast %375 : vector<1x256xf32> to vector<4x256xf32>
    %378 = arith.mulf %376, %377 : vector<4x256xf32>
    %379 = arith.addf %373, %378 : vector<4x256xf32>
    %380 = vector.extract_strided_slice %313 {offsets = [0, 13], sizes = [4, 1], strides = [1, 1]} : vector<4x32xf32> to vector<4x1xf32>
    %381 = vector.extract_strided_slice %311 {offsets = [13, 0], sizes = [1, 256], strides = [1, 1]} : vector<32x256xf32> to vector<1x256xf32>
    %382 = vector.broadcast %380 : vector<4x1xf32> to vector<4x256xf32>
    %383 = vector.broadcast %381 : vector<1x256xf32> to vector<4x256xf32>
    %384 = arith.mulf %382, %383 : vector<4x256xf32>
    %385 = arith.addf %379, %384 : vector<4x256xf32>
    %386 = vector.extract_strided_slice %313 {offsets = [0, 17], sizes = [4, 1], strides = [1, 1]} : vector<4x32xf32> to vector<4x1xf32>
    %387 = vector.extract_strided_slice %311 {offsets = [17, 0], sizes = [1, 256], strides = [1, 1]} : vector<32x256xf32> to vector<1x256xf32>
    %388 = vector.broadcast %386 : vector<4x1xf32> to vector<4x256xf32>
    %389 = vector.broadcast %387 : vector<1x256xf32> to vector<4x256xf32>
    %390 = arith.mulf %388, %389 : vector<4x256xf32>
    %391 = arith.addf %385, %390 : vector<4x256xf32>
    %392 = vector.extract_strided_slice %313 {offsets = [0, 21], sizes = [4, 1], strides = [1, 1]} : vector<4x32xf32> to vector<4x1xf32>
    %393 = vector.extract_strided_slice %311 {offsets = [21, 0], sizes = [1, 256], strides = [1, 1]} : vector<32x256xf32> to vector<1x256xf32>
    %394 = vector.broadcast %392 : vector<4x1xf32> to vector<4x256xf32>
    %395 = vector.broadcast %393 : vector<1x256xf32> to vector<4x256xf32>
    %396 = arith.mulf %394, %395 : vector<4x256xf32>
    %397 = arith.addf %391, %396 : vector<4x256xf32>
    %398 = vector.extract_strided_slice %313 {offsets = [0, 25], sizes = [4, 1], strides = [1, 1]} : vector<4x32xf32> to vector<4x1xf32>
    %399 = vector.extract_strided_slice %311 {offsets = [25, 0], sizes = [1, 256], strides = [1, 1]} : vector<32x256xf32> to vector<1x256xf32>
    %400 = vector.broadcast %398 : vector<4x1xf32> to vector<4x256xf32>
    %401 = vector.broadcast %399 : vector<1x256xf32> to vector<4x256xf32>
    %402 = arith.mulf %400, %401 : vector<4x256xf32>
    %403 = arith.addf %397, %402 : vector<4x256xf32>
    %404 = vector.extract_strided_slice %313 {offsets = [0, 29], sizes = [4, 1], strides = [1, 1]} : vector<4x32xf32> to vector<4x1xf32>
    %405 = vector.extract_strided_slice %311 {offsets = [29, 0], sizes = [1, 256], strides = [1, 1]} : vector<32x256xf32> to vector<1x256xf32>
    %406 = vector.broadcast %404 : vector<4x1xf32> to vector<4x256xf32>
    %407 = vector.broadcast %405 : vector<1x256xf32> to vector<4x256xf32>
    %408 = arith.mulf %406, %407 : vector<4x256xf32>
    %409 = arith.addf %403, %408 : vector<4x256xf32>
    %410 = vector.extract_strided_slice %313 {offsets = [0, 2], sizes = [4, 1], strides = [1, 1]} : vector<4x32xf32> to vector<4x1xf32>
    %411 = vector.extract_strided_slice %311 {offsets = [2, 0], sizes = [1, 256], strides = [1, 1]} : vector<32x256xf32> to vector<1x256xf32>
    %412 = vector.broadcast %410 : vector<4x1xf32> to vector<4x256xf32>
    %413 = vector.broadcast %411 : vector<1x256xf32> to vector<4x256xf32>
    %414 = arith.mulf %412, %413 : vector<4x256xf32>
    %415 = vector.extract_strided_slice %313 {offsets = [0, 6], sizes = [4, 1], strides = [1, 1]} : vector<4x32xf32> to vector<4x1xf32>
    %416 = vector.extract_strided_slice %311 {offsets = [6, 0], sizes = [1, 256], strides = [1, 1]} : vector<32x256xf32> to vector<1x256xf32>
    %417 = vector.broadcast %415 : vector<4x1xf32> to vector<4x256xf32>
    %418 = vector.broadcast %416 : vector<1x256xf32> to vector<4x256xf32>
    %419 = arith.mulf %417, %418 : vector<4x256xf32>
    %420 = arith.addf %414, %419 : vector<4x256xf32>
    %421 = vector.extract_strided_slice %313 {offsets = [0, 10], sizes = [4, 1], strides = [1, 1]} : vector<4x32xf32> to vector<4x1xf32>
    %422 = vector.extract_strided_slice %311 {offsets = [10, 0], sizes = [1, 256], strides = [1, 1]} : vector<32x256xf32> to vector<1x256xf32>
    %423 = vector.broadcast %421 : vector<4x1xf32> to vector<4x256xf32>
    %424 = vector.broadcast %422 : vector<1x256xf32> to vector<4x256xf32>
    %425 = arith.mulf %423, %424 : vector<4x256xf32>
    %426 = arith.addf %420, %425 : vector<4x256xf32>
    %427 = vector.extract_strided_slice %313 {offsets = [0, 14], sizes = [4, 1], strides = [1, 1]} : vector<4x32xf32> to vector<4x1xf32>
    %428 = vector.extract_strided_slice %311 {offsets = [14, 0], sizes = [1, 256], strides = [1, 1]} : vector<32x256xf32> to vector<1x256xf32>
    %429 = vector.broadcast %427 : vector<4x1xf32> to vector<4x256xf32>
    %430 = vector.broadcast %428 : vector<1x256xf32> to vector<4x256xf32>
    %431 = arith.mulf %429, %430 : vector<4x256xf32>
    %432 = arith.addf %426, %431 : vector<4x256xf32>
    %433 = vector.extract_strided_slice %313 {offsets = [0, 18], sizes = [4, 1], strides = [1, 1]} : vector<4x32xf32> to vector<4x1xf32>
    %434 = vector.extract_strided_slice %311 {offsets = [18, 0], sizes = [1, 256], strides = [1, 1]} : vector<32x256xf32> to vector<1x256xf32>
    %435 = vector.broadcast %433 : vector<4x1xf32> to vector<4x256xf32>
    %436 = vector.broadcast %434 : vector<1x256xf32> to vector<4x256xf32>
    %437 = arith.mulf %435, %436 : vector<4x256xf32>
    %438 = arith.addf %432, %437 : vector<4x256xf32>
    %439 = vector.extract_strided_slice %313 {offsets = [0, 22], sizes = [4, 1], strides = [1, 1]} : vector<4x32xf32> to vector<4x1xf32>
    %440 = vector.extract_strided_slice %311 {offsets = [22, 0], sizes = [1, 256], strides = [1, 1]} : vector<32x256xf32> to vector<1x256xf32>
    %441 = vector.broadcast %439 : vector<4x1xf32> to vector<4x256xf32>
    %442 = vector.broadcast %440 : vector<1x256xf32> to vector<4x256xf32>
    %443 = arith.mulf %441, %442 : vector<4x256xf32>
    %444 = arith.addf %438, %443 : vector<4x256xf32>
    %445 = vector.extract_strided_slice %313 {offsets = [0, 26], sizes = [4, 1], strides = [1, 1]} : vector<4x32xf32> to vector<4x1xf32>
    %446 = vector.extract_strided_slice %311 {offsets = [26, 0], sizes = [1, 256], strides = [1, 1]} : vector<32x256xf32> to vector<1x256xf32>
    %447 = vector.broadcast %445 : vector<4x1xf32> to vector<4x256xf32>
    %448 = vector.broadcast %446 : vector<1x256xf32> to vector<4x256xf32>
    %449 = arith.mulf %447, %448 : vector<4x256xf32>
    %450 = arith.addf %444, %449 : vector<4x256xf32>
    %451 = vector.extract_strided_slice %313 {offsets = [0, 30], sizes = [4, 1], strides = [1, 1]} : vector<4x32xf32> to vector<4x1xf32>
    %452 = vector.extract_strided_slice %311 {offsets = [30, 0], sizes = [1, 256], strides = [1, 1]} : vector<32x256xf32> to vector<1x256xf32>
    %453 = vector.broadcast %451 : vector<4x1xf32> to vector<4x256xf32>
    %454 = vector.broadcast %452 : vector<1x256xf32> to vector<4x256xf32>
    %455 = arith.mulf %453, %454 : vector<4x256xf32>
    %456 = arith.addf %450, %455 : vector<4x256xf32>
    %457 = vector.extract_strided_slice %313 {offsets = [0, 3], sizes = [4, 1], strides = [1, 1]} : vector<4x32xf32> to vector<4x1xf32>
    %458 = vector.extract_strided_slice %311 {offsets = [3, 0], sizes = [1, 256], strides = [1, 1]} : vector<32x256xf32> to vector<1x256xf32>
    %459 = vector.broadcast %457 : vector<4x1xf32> to vector<4x256xf32>
    %460 = vector.broadcast %458 : vector<1x256xf32> to vector<4x256xf32>
    %461 = arith.mulf %459, %460 : vector<4x256xf32>
    %462 = vector.extract_strided_slice %313 {offsets = [0, 7], sizes = [4, 1], strides = [1, 1]} : vector<4x32xf32> to vector<4x1xf32>
    %463 = vector.extract_strided_slice %311 {offsets = [7, 0], sizes = [1, 256], strides = [1, 1]} : vector<32x256xf32> to vector<1x256xf32>
    %464 = vector.broadcast %462 : vector<4x1xf32> to vector<4x256xf32>
    %465 = vector.broadcast %463 : vector<1x256xf32> to vector<4x256xf32>
    %466 = arith.mulf %464, %465 : vector<4x256xf32>
    %467 = arith.addf %461, %466 : vector<4x256xf32>
    %468 = vector.extract_strided_slice %313 {offsets = [0, 11], sizes = [4, 1], strides = [1, 1]} : vector<4x32xf32> to vector<4x1xf32>
    %469 = vector.extract_strided_slice %311 {offsets = [11, 0], sizes = [1, 256], strides = [1, 1]} : vector<32x256xf32> to vector<1x256xf32>
    %470 = vector.broadcast %468 : vector<4x1xf32> to vector<4x256xf32>
    %471 = vector.broadcast %469 : vector<1x256xf32> to vector<4x256xf32>
    %472 = arith.mulf %470, %471 : vector<4x256xf32>
    %473 = arith.addf %467, %472 : vector<4x256xf32>
    %474 = vector.extract_strided_slice %313 {offsets = [0, 15], sizes = [4, 1], strides = [1, 1]} : vector<4x32xf32> to vector<4x1xf32>
    %475 = vector.extract_strided_slice %311 {offsets = [15, 0], sizes = [1, 256], strides = [1, 1]} : vector<32x256xf32> to vector<1x256xf32>
    %476 = vector.broadcast %474 : vector<4x1xf32> to vector<4x256xf32>
    %477 = vector.broadcast %475 : vector<1x256xf32> to vector<4x256xf32>
    %478 = arith.mulf %476, %477 : vector<4x256xf32>
    %479 = arith.addf %473, %478 : vector<4x256xf32>
    %480 = vector.extract_strided_slice %313 {offsets = [0, 19], sizes = [4, 1], strides = [1, 1]} : vector<4x32xf32> to vector<4x1xf32>
    %481 = vector.extract_strided_slice %311 {offsets = [19, 0], sizes = [1, 256], strides = [1, 1]} : vector<32x256xf32> to vector<1x256xf32>
    %482 = vector.broadcast %480 : vector<4x1xf32> to vector<4x256xf32>
    %483 = vector.broadcast %481 : vector<1x256xf32> to vector<4x256xf32>
    %484 = arith.mulf %482, %483 : vector<4x256xf32>
    %485 = arith.addf %479, %484 : vector<4x256xf32>
    %486 = vector.extract_strided_slice %313 {offsets = [0, 23], sizes = [4, 1], strides = [1, 1]} : vector<4x32xf32> to vector<4x1xf32>
    %487 = vector.extract_strided_slice %311 {offsets = [23, 0], sizes = [1, 256], strides = [1, 1]} : vector<32x256xf32> to vector<1x256xf32>
    %488 = vector.broadcast %486 : vector<4x1xf32> to vector<4x256xf32>
    %489 = vector.broadcast %487 : vector<1x256xf32> to vector<4x256xf32>
    %490 = arith.mulf %488, %489 : vector<4x256xf32>
    %491 = arith.addf %485, %490 : vector<4x256xf32>
    %492 = vector.extract_strided_slice %313 {offsets = [0, 27], sizes = [4, 1], strides = [1, 1]} : vector<4x32xf32> to vector<4x1xf32>
    %493 = vector.extract_strided_slice %311 {offsets = [27, 0], sizes = [1, 256], strides = [1, 1]} : vector<32x256xf32> to vector<1x256xf32>
    %494 = vector.broadcast %492 : vector<4x1xf32> to vector<4x256xf32>
    %495 = vector.broadcast %493 : vector<1x256xf32> to vector<4x256xf32>
    %496 = arith.mulf %494, %495 : vector<4x256xf32>
    %497 = arith.addf %491, %496 : vector<4x256xf32>
    %498 = vector.extract_strided_slice %313 {offsets = [0, 31], sizes = [4, 1], strides = [1, 1]} : vector<4x32xf32> to vector<4x1xf32>
    %499 = vector.extract_strided_slice %311 {offsets = [31, 0], sizes = [1, 256], strides = [1, 1]} : vector<32x256xf32> to vector<1x256xf32>
    %500 = vector.broadcast %498 : vector<4x1xf32> to vector<4x256xf32>
    %501 = vector.broadcast %499 : vector<1x256xf32> to vector<4x256xf32>
    %502 = arith.mulf %500, %501 : vector<4x256xf32>
    %503 = arith.addf %497, %502 : vector<4x256xf32>
    %504 = arith.addf %362, %409 : vector<4x256xf32>
    %505 = arith.addf %504, %456 : vector<4x256xf32>
    %506 = arith.addf %505, %503 : vector<4x256xf32>
    %507 = vector.broadcast %315 : vector<4x1xf32> to vector<4x256xf32>
    %508 = arith.addf %506, %507 : vector<4x256xf32>
    %c0_62 = arith.constant 0 : index
    %c0_63 = arith.constant 0 : index
    %c0_64 = arith.constant 0 : index
    %509 = vector.load %arg16[%c0_62, %c0_63, %c0_64] : memref<2x4x1xf32, #tpu.memory_space<vmem>>, vector<1x4x1xf32>
    %510 = vector.shape_cast %509 : vector<1x4x1xf32> to vector<4x1xf32>
    %c0_65 = arith.constant 0 : index
    %c0_66 = arith.constant 0 : index
    %c0_67 = arith.constant 0 : index
    %511 = vector.load %arg17[%c0_65, %c0_66, %c0_67] : memref<2x4x1xf32, #tpu.memory_space<vmem>>, vector<1x4x1xf32>
    %512 = vector.shape_cast %511 : vector<1x4x1xf32> to vector<4x1xf32>
    %513 = arith.addf %280, %508 : vector<4x256xf32>
    %cst_68 = arith.constant dense<0.000000e+00> : vector<256xf32>
    %514 = vector.multi_reduction <add>, %513, %cst_68 [0] : vector<4x256xf32> to vector<256xf32>
    %515 = vector.shape_cast %514 : vector<256xf32> to vector<1x256xf32>
    %cst_69 = arith.constant 4.000000e+00 : f32
    %516 = vector.broadcast %cst_69 : f32 to vector<1x256xf32>
    %517 = arith.divf %515, %516 : vector<1x256xf32>
    %518 = arith.mulf %513, %513 : vector<4x256xf32>
    %cst_70 = arith.constant dense<0.000000e+00> : vector<256xf32>
    %519 = vector.multi_reduction <add>, %518, %cst_70 [0] : vector<4x256xf32> to vector<256xf32>
    %520 = vector.shape_cast %519 : vector<256xf32> to vector<1x256xf32>
    %cst_71 = arith.constant 4.000000e+00 : f32
    %521 = vector.broadcast %cst_71 : f32 to vector<1x256xf32>
    %522 = arith.divf %520, %521 : vector<1x256xf32>
    %523 = arith.mulf %517, %517 : vector<1x256xf32>
    %524 = arith.subf %522, %523 : vector<1x256xf32>
    %525 = vector.broadcast %517 : vector<1x256xf32> to vector<4x256xf32>
    %526 = arith.subf %513, %525 : vector<4x256xf32>
    %cst_72 = arith.constant 9.99999974E-6 : f32
    %527 = vector.broadcast %cst_72 : f32 to vector<1x256xf32>
    %528 = arith.addf %524, %527 : vector<1x256xf32>
    %529 = math.rsqrt %528 : vector<1x256xf32>
    %530 = vector.broadcast %529 : vector<1x256xf32> to vector<4x256xf32>
    %531 = arith.mulf %526, %530 : vector<4x256xf32>
    %532 = vector.broadcast %510 : vector<4x1xf32> to vector<4x256xf32>
    %533 = arith.mulf %531, %532 : vector<4x256xf32>
    %534 = vector.broadcast %512 : vector<4x1xf32> to vector<4x256xf32>
    %535 = arith.addf %533, %534 : vector<4x256xf32>
    %c1 = arith.constant 1 : index
    %c0_73 = arith.constant 0 : index
    %c0_74 = arith.constant 0 : index
    %c0_75 = arith.constant 0 : index
    %536 = vector.load %arg2[%c1, %c0_73, %c0_74, %c0_75] : memref<2x2x2x4xf32, #tpu.memory_space<vmem>>, vector<1x2x2x4xf32>
    %537 = vector.shape_cast %536 : vector<1x2x2x4xf32> to vector<2x2x4xf32>
    %c1_76 = arith.constant 1 : index
    %c0_77 = arith.constant 0 : index
    %c0_78 = arith.constant 0 : index
    %c0_79 = arith.constant 0 : index
    %538 = vector.load %arg3[%c1_76, %c0_77, %c0_78, %c0_79] : memref<2x2x2x1xf32, #tpu.memory_space<vmem>>, vector<1x2x2x1xf32>
    %539 = vector.shape_cast %538 : vector<1x2x2x1xf32> to vector<2x2x1xf32>
    %c1_80 = arith.constant 1 : index
    %c0_81 = arith.constant 0 : index
    %c0_82 = arith.constant 0 : index
    %c0_83 = arith.constant 0 : index
    %540 = vector.load %arg4[%c1_80, %c0_81, %c0_82, %c0_83] : memref<2x2x2x4xf32, #tpu.memory_space<vmem>>, vector<1x2x2x4xf32>
    %541 = vector.shape_cast %540 : vector<1x2x2x4xf32> to vector<2x2x4xf32>
    %c1_84 = arith.constant 1 : index
    %c0_85 = arith.constant 0 : index
    %c0_86 = arith.constant 0 : index
    %c0_87 = arith.constant 0 : index
    %542 = vector.load %arg5[%c1_84, %c0_85, %c0_86, %c0_87] : memref<2x2x2x1xf32, #tpu.memory_space<vmem>>, vector<1x2x2x1xf32>
    %543 = vector.shape_cast %542 : vector<1x2x2x1xf32> to vector<2x2x1xf32>
    %c1_88 = arith.constant 1 : index
    %c0_89 = arith.constant 0 : index
    %c0_90 = arith.constant 0 : index
    %c0_91 = arith.constant 0 : index
    %544 = vector.load %arg6[%c1_88, %c0_89, %c0_90, %c0_91] : memref<2x2x3x4xf32, #tpu.memory_space<vmem>>, vector<1x2x3x4xf32>
    %545 = vector.shape_cast %544 : vector<1x2x3x4xf32> to vector<2x3x4xf32>
    %c1_92 = arith.constant 1 : index
    %c0_93 = arith.constant 0 : index
    %c0_94 = arith.constant 0 : index
    %c0_95 = arith.constant 0 : index
    %546 = vector.load %arg7[%c1_92, %c0_93, %c0_94, %c0_95] : memref<2x2x3x1xf32, #tpu.memory_space<vmem>>, vector<1x2x3x1xf32>
    %547 = vector.shape_cast %546 : vector<1x2x3x1xf32> to vector<2x3x1xf32>
    %c1_96 = arith.constant 1 : index
    %c0_97 = arith.constant 0 : index
    %c0_98 = arith.constant 0 : index
    %c0_99 = arith.constant 0 : index
    %548 = vector.load %arg8[%c1_96, %c0_97, %c0_98, %c0_99] : memref<2x2x4x2xf32, #tpu.memory_space<vmem>>, vector<1x2x4x2xf32>
    %549 = vector.shape_cast %548 : vector<1x2x4x2xf32> to vector<2x4x2xf32>
    %c1_100 = arith.constant 1 : index
    %c0_101 = arith.constant 0 : index
    %c0_102 = arith.constant 0 : index
    %550 = vector.load %arg9[%c1_100, %c0_101, %c0_102] : memref<2x4x1xf32, #tpu.memory_space<vmem>>, vector<1x4x1xf32>
    %551 = vector.shape_cast %550 : vector<1x4x1xf32> to vector<4x1xf32>
    %552 = vector.shape_cast %551 : vector<4x1xf32> to vector<4x1xf32>
    %553 = vector.broadcast %552 : vector<4x1xf32> to vector<4x256xf32>
    %554 = vector.extract_strided_slice %537 {offsets = [0, 0, 0], sizes = [1, 2, 4], strides = [1, 1, 1]} : vector<2x2x4xf32> to vector<1x2x4xf32>
    %555 = vector.shape_cast %554 : vector<1x2x4xf32> to vector<2x4xf32>
    %556 = vector.extract_strided_slice %539 {offsets = [0, 0, 0], sizes = [1, 2, 1], strides = [1, 1, 1]} : vector<2x2x1xf32> to vector<1x2x1xf32>
    %557 = vector.shape_cast %556 : vector<1x2x1xf32> to vector<2x1xf32>
    %558 = vector.extract_strided_slice %555 {offsets = [0, 0], sizes = [2, 1], strides = [1, 1]} : vector<2x4xf32> to vector<2x1xf32>
    %559 = vector.extract_strided_slice %535 {offsets = [0, 0], sizes = [1, 256], strides = [1, 1]} : vector<4x256xf32> to vector<1x256xf32>
    %560 = vector.broadcast %558 : vector<2x1xf32> to vector<2x256xf32>
    %561 = vector.broadcast %559 : vector<1x256xf32> to vector<2x256xf32>
    %562 = arith.mulf %560, %561 : vector<2x256xf32>
    %563 = vector.extract_strided_slice %555 {offsets = [0, 1], sizes = [2, 1], strides = [1, 1]} : vector<2x4xf32> to vector<2x1xf32>
    %564 = vector.extract_strided_slice %535 {offsets = [1, 0], sizes = [1, 256], strides = [1, 1]} : vector<4x256xf32> to vector<1x256xf32>
    %565 = vector.broadcast %563 : vector<2x1xf32> to vector<2x256xf32>
    %566 = vector.broadcast %564 : vector<1x256xf32> to vector<2x256xf32>
    %567 = arith.mulf %565, %566 : vector<2x256xf32>
    %568 = arith.addf %562, %567 : vector<2x256xf32>
    %569 = vector.extract_strided_slice %555 {offsets = [0, 2], sizes = [2, 1], strides = [1, 1]} : vector<2x4xf32> to vector<2x1xf32>
    %570 = vector.extract_strided_slice %535 {offsets = [2, 0], sizes = [1, 256], strides = [1, 1]} : vector<4x256xf32> to vector<1x256xf32>
    %571 = vector.broadcast %569 : vector<2x1xf32> to vector<2x256xf32>
    %572 = vector.broadcast %570 : vector<1x256xf32> to vector<2x256xf32>
    %573 = arith.mulf %571, %572 : vector<2x256xf32>
    %574 = arith.addf %568, %573 : vector<2x256xf32>
    %575 = vector.extract_strided_slice %555 {offsets = [0, 3], sizes = [2, 1], strides = [1, 1]} : vector<2x4xf32> to vector<2x1xf32>
    %576 = vector.extract_strided_slice %535 {offsets = [3, 0], sizes = [1, 256], strides = [1, 1]} : vector<4x256xf32> to vector<1x256xf32>
    %577 = vector.broadcast %575 : vector<2x1xf32> to vector<2x256xf32>
    %578 = vector.broadcast %576 : vector<1x256xf32> to vector<2x256xf32>
    %579 = arith.mulf %577, %578 : vector<2x256xf32>
    %580 = arith.addf %574, %579 : vector<2x256xf32>
    %581 = vector.broadcast %557 : vector<2x1xf32> to vector<2x256xf32>
    %582 = arith.addf %580, %581 : vector<2x256xf32>
    %583 = vector.extract_strided_slice %541 {offsets = [0, 0, 0], sizes = [1, 2, 4], strides = [1, 1, 1]} : vector<2x2x4xf32> to vector<1x2x4xf32>
    %584 = vector.shape_cast %583 : vector<1x2x4xf32> to vector<2x4xf32>
    %585 = vector.extract_strided_slice %543 {offsets = [0, 0, 0], sizes = [1, 2, 1], strides = [1, 1, 1]} : vector<2x2x1xf32> to vector<1x2x1xf32>
    %586 = vector.shape_cast %585 : vector<1x2x1xf32> to vector<2x1xf32>
    %587 = vector.extract_strided_slice %584 {offsets = [0, 0], sizes = [2, 1], strides = [1, 1]} : vector<2x4xf32> to vector<2x1xf32>
    %588 = vector.extract_strided_slice %535 {offsets = [0, 0], sizes = [1, 256], strides = [1, 1]} : vector<4x256xf32> to vector<1x256xf32>
    %589 = vector.broadcast %587 : vector<2x1xf32> to vector<2x256xf32>
    %590 = vector.broadcast %588 : vector<1x256xf32> to vector<2x256xf32>
    %591 = arith.mulf %589, %590 : vector<2x256xf32>
    %592 = vector.extract_strided_slice %584 {offsets = [0, 1], sizes = [2, 1], strides = [1, 1]} : vector<2x4xf32> to vector<2x1xf32>
    %593 = vector.extract_strided_slice %535 {offsets = [1, 0], sizes = [1, 256], strides = [1, 1]} : vector<4x256xf32> to vector<1x256xf32>
    %594 = vector.broadcast %592 : vector<2x1xf32> to vector<2x256xf32>
    %595 = vector.broadcast %593 : vector<1x256xf32> to vector<2x256xf32>
    %596 = arith.mulf %594, %595 : vector<2x256xf32>
    %597 = arith.addf %591, %596 : vector<2x256xf32>
    %598 = vector.extract_strided_slice %584 {offsets = [0, 2], sizes = [2, 1], strides = [1, 1]} : vector<2x4xf32> to vector<2x1xf32>
    %599 = vector.extract_strided_slice %535 {offsets = [2, 0], sizes = [1, 256], strides = [1, 1]} : vector<4x256xf32> to vector<1x256xf32>
    %600 = vector.broadcast %598 : vector<2x1xf32> to vector<2x256xf32>
    %601 = vector.broadcast %599 : vector<1x256xf32> to vector<2x256xf32>
    %602 = arith.mulf %600, %601 : vector<2x256xf32>
    %603 = arith.addf %597, %602 : vector<2x256xf32>
    %604 = vector.extract_strided_slice %584 {offsets = [0, 3], sizes = [2, 1], strides = [1, 1]} : vector<2x4xf32> to vector<2x1xf32>
    %605 = vector.extract_strided_slice %535 {offsets = [3, 0], sizes = [1, 256], strides = [1, 1]} : vector<4x256xf32> to vector<1x256xf32>
    %606 = vector.broadcast %604 : vector<2x1xf32> to vector<2x256xf32>
    %607 = vector.broadcast %605 : vector<1x256xf32> to vector<2x256xf32>
    %608 = arith.mulf %606, %607 : vector<2x256xf32>
    %609 = arith.addf %603, %608 : vector<2x256xf32>
    %610 = vector.broadcast %586 : vector<2x1xf32> to vector<2x256xf32>
    %611 = arith.addf %609, %610 : vector<2x256xf32>
    %612 = vector.extract_strided_slice %545 {offsets = [0, 0, 0], sizes = [1, 3, 4], strides = [1, 1, 1]} : vector<2x3x4xf32> to vector<1x3x4xf32>
    %613 = vector.shape_cast %612 : vector<1x3x4xf32> to vector<3x4xf32>
    %614 = vector.extract_strided_slice %547 {offsets = [0, 0, 0], sizes = [1, 3, 1], strides = [1, 1, 1]} : vector<2x3x1xf32> to vector<1x3x1xf32>
    %615 = vector.shape_cast %614 : vector<1x3x1xf32> to vector<3x1xf32>
    %616 = vector.extract_strided_slice %613 {offsets = [0, 0], sizes = [3, 1], strides = [1, 1]} : vector<3x4xf32> to vector<3x1xf32>
    %617 = vector.extract_strided_slice %535 {offsets = [0, 0], sizes = [1, 256], strides = [1, 1]} : vector<4x256xf32> to vector<1x256xf32>
    %618 = vector.broadcast %616 : vector<3x1xf32> to vector<3x256xf32>
    %619 = vector.broadcast %617 : vector<1x256xf32> to vector<3x256xf32>
    %620 = arith.mulf %618, %619 : vector<3x256xf32>
    %621 = vector.extract_strided_slice %613 {offsets = [0, 1], sizes = [3, 1], strides = [1, 1]} : vector<3x4xf32> to vector<3x1xf32>
    %622 = vector.extract_strided_slice %535 {offsets = [1, 0], sizes = [1, 256], strides = [1, 1]} : vector<4x256xf32> to vector<1x256xf32>
    %623 = vector.broadcast %621 : vector<3x1xf32> to vector<3x256xf32>
    %624 = vector.broadcast %622 : vector<1x256xf32> to vector<3x256xf32>
    %625 = arith.mulf %623, %624 : vector<3x256xf32>
    %626 = arith.addf %620, %625 : vector<3x256xf32>
    %627 = vector.extract_strided_slice %613 {offsets = [0, 2], sizes = [3, 1], strides = [1, 1]} : vector<3x4xf32> to vector<3x1xf32>
    %628 = vector.extract_strided_slice %535 {offsets = [2, 0], sizes = [1, 256], strides = [1, 1]} : vector<4x256xf32> to vector<1x256xf32>
    %629 = vector.broadcast %627 : vector<3x1xf32> to vector<3x256xf32>
    %630 = vector.broadcast %628 : vector<1x256xf32> to vector<3x256xf32>
    %631 = arith.mulf %629, %630 : vector<3x256xf32>
    %632 = arith.addf %626, %631 : vector<3x256xf32>
    %633 = vector.extract_strided_slice %613 {offsets = [0, 3], sizes = [3, 1], strides = [1, 1]} : vector<3x4xf32> to vector<3x1xf32>
    %634 = vector.extract_strided_slice %535 {offsets = [3, 0], sizes = [1, 256], strides = [1, 1]} : vector<4x256xf32> to vector<1x256xf32>
    %635 = vector.broadcast %633 : vector<3x1xf32> to vector<3x256xf32>
    %636 = vector.broadcast %634 : vector<1x256xf32> to vector<3x256xf32>
    %637 = arith.mulf %635, %636 : vector<3x256xf32>
    %638 = arith.addf %632, %637 : vector<3x256xf32>
    %639 = vector.broadcast %615 : vector<3x1xf32> to vector<3x256xf32>
    %640 = arith.addf %638, %639 : vector<3x256xf32>
    %641 = arith.truncf %582 : vector<2x256xf32> to vector<2x256xbf16>
    %642 = arith.truncf %611 : vector<2x256xf32> to vector<2x256xbf16>
    %cst_103 = arith.constant dense<0.000000e+00> : vector<256x256xf32>
    %643 = tpu.matmul %641, %642, %cst_103 {dimension_numbers = #tpu.dot_dimension_numbers<[0], [0], [1], [1], [0, 1, 1, 1], [], []>} : vector<2x256xbf16>, vector<2x256xbf16>, vector<256x256xf32> -> vector<256x256xf32>
    %cst_104 = arith.constant dense<0xFF800000> : vector<256xf32>
    %644 = vector.multi_reduction <maximumf>, %643, %cst_104 [1] : vector<256x256xf32> to vector<256xf32>
    %645 = vector.shape_cast %644 : vector<256xf32> to vector<256x1xf32>
    %646 = vector.broadcast %645 : vector<256x1xf32> to vector<256x256xf32>
    %647 = arith.subf %643, %646 : vector<256x256xf32>
    %648 = arith.truncf %647 : vector<256x256xf32> to vector<256x256xbf16>
    %649 = math.exp %648 : vector<256x256xbf16>
    %650 = arith.truncf %640 : vector<3x256xf32> to vector<3x256xbf16>
    %cst_105 = arith.constant dense<0.000000e+00> : vector<3x256xf32>
    %651 = tpu.matmul %650, %649, %cst_105 {dimension_numbers = #tpu.dot_dimension_numbers<[1], [1], [0], [0], [0, 0, 1, 0], [], []>} : vector<3x256xbf16>, vector<256x256xbf16>, vector<3x256xf32> -> vector<3x256xf32>
    %652 = vector.extract_strided_slice %651 {offsets = [2, 0], sizes = [1, 256], strides = [1, 1]} : vector<3x256xf32> to vector<1x256xf32>
    %653 = tpu.reciprocal %652 {approx = true} : vector<1x256xf32> -> vector<1x256xf32>
    %654 = vector.extract_strided_slice %651 {offsets = [0, 0], sizes = [2, 256], strides = [1, 1]} : vector<3x256xf32> to vector<2x256xf32>
    %655 = vector.broadcast %653 : vector<1x256xf32> to vector<2x256xf32>
    %656 = arith.mulf %654, %655 : vector<2x256xf32>
    %657 = vector.extract_strided_slice %549 {offsets = [0, 0, 0], sizes = [1, 4, 2], strides = [1, 1, 1]} : vector<2x4x2xf32> to vector<1x4x2xf32>
    %658 = vector.shape_cast %657 : vector<1x4x2xf32> to vector<4x2xf32>
    %659 = vector.extract_strided_slice %658 {offsets = [0, 0], sizes = [4, 1], strides = [1, 1]} : vector<4x2xf32> to vector<4x1xf32>
    %660 = vector.extract_strided_slice %656 {offsets = [0, 0], sizes = [1, 256], strides = [1, 1]} : vector<2x256xf32> to vector<1x256xf32>
    %661 = vector.broadcast %659 : vector<4x1xf32> to vector<4x256xf32>
    %662 = vector.broadcast %660 : vector<1x256xf32> to vector<4x256xf32>
    %663 = arith.mulf %661, %662 : vector<4x256xf32>
    %664 = vector.extract_strided_slice %658 {offsets = [0, 1], sizes = [4, 1], strides = [1, 1]} : vector<4x2xf32> to vector<4x1xf32>
    %665 = vector.extract_strided_slice %656 {offsets = [1, 0], sizes = [1, 256], strides = [1, 1]} : vector<2x256xf32> to vector<1x256xf32>
    %666 = vector.broadcast %664 : vector<4x1xf32> to vector<4x256xf32>
    %667 = vector.broadcast %665 : vector<1x256xf32> to vector<4x256xf32>
    %668 = arith.mulf %666, %667 : vector<4x256xf32>
    %669 = arith.addf %663, %668 : vector<4x256xf32>
    %670 = arith.addf %553, %669 : vector<4x256xf32>
    %671 = vector.extract_strided_slice %537 {offsets = [1, 0, 0], sizes = [1, 2, 4], strides = [1, 1, 1]} : vector<2x2x4xf32> to vector<1x2x4xf32>
    %672 = vector.shape_cast %671 : vector<1x2x4xf32> to vector<2x4xf32>
    %673 = vector.extract_strided_slice %539 {offsets = [1, 0, 0], sizes = [1, 2, 1], strides = [1, 1, 1]} : vector<2x2x1xf32> to vector<1x2x1xf32>
    %674 = vector.shape_cast %673 : vector<1x2x1xf32> to vector<2x1xf32>
    %675 = vector.extract_strided_slice %672 {offsets = [0, 0], sizes = [2, 1], strides = [1, 1]} : vector<2x4xf32> to vector<2x1xf32>
    %676 = vector.extract_strided_slice %535 {offsets = [0, 0], sizes = [1, 256], strides = [1, 1]} : vector<4x256xf32> to vector<1x256xf32>
    %677 = vector.broadcast %675 : vector<2x1xf32> to vector<2x256xf32>
    %678 = vector.broadcast %676 : vector<1x256xf32> to vector<2x256xf32>
    %679 = arith.mulf %677, %678 : vector<2x256xf32>
    %680 = vector.extract_strided_slice %672 {offsets = [0, 1], sizes = [2, 1], strides = [1, 1]} : vector<2x4xf32> to vector<2x1xf32>
    %681 = vector.extract_strided_slice %535 {offsets = [1, 0], sizes = [1, 256], strides = [1, 1]} : vector<4x256xf32> to vector<1x256xf32>
    %682 = vector.broadcast %680 : vector<2x1xf32> to vector<2x256xf32>
    %683 = vector.broadcast %681 : vector<1x256xf32> to vector<2x256xf32>
    %684 = arith.mulf %682, %683 : vector<2x256xf32>
    %685 = arith.addf %679, %684 : vector<2x256xf32>
    %686 = vector.extract_strided_slice %672 {offsets = [0, 2], sizes = [2, 1], strides = [1, 1]} : vector<2x4xf32> to vector<2x1xf32>
    %687 = vector.extract_strided_slice %535 {offsets = [2, 0], sizes = [1, 256], strides = [1, 1]} : vector<4x256xf32> to vector<1x256xf32>
    %688 = vector.broadcast %686 : vector<2x1xf32> to vector<2x256xf32>
    %689 = vector.broadcast %687 : vector<1x256xf32> to vector<2x256xf32>
    %690 = arith.mulf %688, %689 : vector<2x256xf32>
    %691 = arith.addf %685, %690 : vector<2x256xf32>
    %692 = vector.extract_strided_slice %672 {offsets = [0, 3], sizes = [2, 1], strides = [1, 1]} : vector<2x4xf32> to vector<2x1xf32>
    %693 = vector.extract_strided_slice %535 {offsets = [3, 0], sizes = [1, 256], strides = [1, 1]} : vector<4x256xf32> to vector<1x256xf32>
    %694 = vector.broadcast %692 : vector<2x1xf32> to vector<2x256xf32>
    %695 = vector.broadcast %693 : vector<1x256xf32> to vector<2x256xf32>
    %696 = arith.mulf %694, %695 : vector<2x256xf32>
    %697 = arith.addf %691, %696 : vector<2x256xf32>
    %698 = vector.broadcast %674 : vector<2x1xf32> to vector<2x256xf32>
    %699 = arith.addf %697, %698 : vector<2x256xf32>
    %700 = vector.extract_strided_slice %541 {offsets = [1, 0, 0], sizes = [1, 2, 4], strides = [1, 1, 1]} : vector<2x2x4xf32> to vector<1x2x4xf32>
    %701 = vector.shape_cast %700 : vector<1x2x4xf32> to vector<2x4xf32>
    %702 = vector.extract_strided_slice %543 {offsets = [1, 0, 0], sizes = [1, 2, 1], strides = [1, 1, 1]} : vector<2x2x1xf32> to vector<1x2x1xf32>
    %703 = vector.shape_cast %702 : vector<1x2x1xf32> to vector<2x1xf32>
    %704 = vector.extract_strided_slice %701 {offsets = [0, 0], sizes = [2, 1], strides = [1, 1]} : vector<2x4xf32> to vector<2x1xf32>
    %705 = vector.extract_strided_slice %535 {offsets = [0, 0], sizes = [1, 256], strides = [1, 1]} : vector<4x256xf32> to vector<1x256xf32>
    %706 = vector.broadcast %704 : vector<2x1xf32> to vector<2x256xf32>
    %707 = vector.broadcast %705 : vector<1x256xf32> to vector<2x256xf32>
    %708 = arith.mulf %706, %707 : vector<2x256xf32>
    %709 = vector.extract_strided_slice %701 {offsets = [0, 1], sizes = [2, 1], strides = [1, 1]} : vector<2x4xf32> to vector<2x1xf32>
    %710 = vector.extract_strided_slice %535 {offsets = [1, 0], sizes = [1, 256], strides = [1, 1]} : vector<4x256xf32> to vector<1x256xf32>
    %711 = vector.broadcast %709 : vector<2x1xf32> to vector<2x256xf32>
    %712 = vector.broadcast %710 : vector<1x256xf32> to vector<2x256xf32>
    %713 = arith.mulf %711, %712 : vector<2x256xf32>
    %714 = arith.addf %708, %713 : vector<2x256xf32>
    %715 = vector.extract_strided_slice %701 {offsets = [0, 2], sizes = [2, 1], strides = [1, 1]} : vector<2x4xf32> to vector<2x1xf32>
    %716 = vector.extract_strided_slice %535 {offsets = [2, 0], sizes = [1, 256], strides = [1, 1]} : vector<4x256xf32> to vector<1x256xf32>
    %717 = vector.broadcast %715 : vector<2x1xf32> to vector<2x256xf32>
    %718 = vector.broadcast %716 : vector<1x256xf32> to vector<2x256xf32>
    %719 = arith.mulf %717, %718 : vector<2x256xf32>
    %720 = arith.addf %714, %719 : vector<2x256xf32>
    %721 = vector.extract_strided_slice %701 {offsets = [0, 3], sizes = [2, 1], strides = [1, 1]} : vector<2x4xf32> to vector<2x1xf32>
    %722 = vector.extract_strided_slice %535 {offsets = [3, 0], sizes = [1, 256], strides = [1, 1]} : vector<4x256xf32> to vector<1x256xf32>
    %723 = vector.broadcast %721 : vector<2x1xf32> to vector<2x256xf32>
    %724 = vector.broadcast %722 : vector<1x256xf32> to vector<2x256xf32>
    %725 = arith.mulf %723, %724 : vector<2x256xf32>
    %726 = arith.addf %720, %725 : vector<2x256xf32>
    %727 = vector.broadcast %703 : vector<2x1xf32> to vector<2x256xf32>
    %728 = arith.addf %726, %727 : vector<2x256xf32>
    %729 = vector.extract_strided_slice %545 {offsets = [1, 0, 0], sizes = [1, 3, 4], strides = [1, 1, 1]} : vector<2x3x4xf32> to vector<1x3x4xf32>
    %730 = vector.shape_cast %729 : vector<1x3x4xf32> to vector<3x4xf32>
    %731 = vector.extract_strided_slice %547 {offsets = [1, 0, 0], sizes = [1, 3, 1], strides = [1, 1, 1]} : vector<2x3x1xf32> to vector<1x3x1xf32>
    %732 = vector.shape_cast %731 : vector<1x3x1xf32> to vector<3x1xf32>
    %733 = vector.extract_strided_slice %730 {offsets = [0, 0], sizes = [3, 1], strides = [1, 1]} : vector<3x4xf32> to vector<3x1xf32>
    %734 = vector.extract_strided_slice %535 {offsets = [0, 0], sizes = [1, 256], strides = [1, 1]} : vector<4x256xf32> to vector<1x256xf32>
    %735 = vector.broadcast %733 : vector<3x1xf32> to vector<3x256xf32>
    %736 = vector.broadcast %734 : vector<1x256xf32> to vector<3x256xf32>
    %737 = arith.mulf %735, %736 : vector<3x256xf32>
    %738 = vector.extract_strided_slice %730 {offsets = [0, 1], sizes = [3, 1], strides = [1, 1]} : vector<3x4xf32> to vector<3x1xf32>
    %739 = vector.extract_strided_slice %535 {offsets = [1, 0], sizes = [1, 256], strides = [1, 1]} : vector<4x256xf32> to vector<1x256xf32>
    %740 = vector.broadcast %738 : vector<3x1xf32> to vector<3x256xf32>
    %741 = vector.broadcast %739 : vector<1x256xf32> to vector<3x256xf32>
    %742 = arith.mulf %740, %741 : vector<3x256xf32>
    %743 = arith.addf %737, %742 : vector<3x256xf32>
    %744 = vector.extract_strided_slice %730 {offsets = [0, 2], sizes = [3, 1], strides = [1, 1]} : vector<3x4xf32> to vector<3x1xf32>
    %745 = vector.extract_strided_slice %535 {offsets = [2, 0], sizes = [1, 256], strides = [1, 1]} : vector<4x256xf32> to vector<1x256xf32>
    %746 = vector.broadcast %744 : vector<3x1xf32> to vector<3x256xf32>
    %747 = vector.broadcast %745 : vector<1x256xf32> to vector<3x256xf32>
    %748 = arith.mulf %746, %747 : vector<3x256xf32>
    %749 = arith.addf %743, %748 : vector<3x256xf32>
    %750 = vector.extract_strided_slice %730 {offsets = [0, 3], sizes = [3, 1], strides = [1, 1]} : vector<3x4xf32> to vector<3x1xf32>
    %751 = vector.extract_strided_slice %535 {offsets = [3, 0], sizes = [1, 256], strides = [1, 1]} : vector<4x256xf32> to vector<1x256xf32>
    %752 = vector.broadcast %750 : vector<3x1xf32> to vector<3x256xf32>
    %753 = vector.broadcast %751 : vector<1x256xf32> to vector<3x256xf32>
    %754 = arith.mulf %752, %753 : vector<3x256xf32>
    %755 = arith.addf %749, %754 : vector<3x256xf32>
    %756 = vector.broadcast %732 : vector<3x1xf32> to vector<3x256xf32>
    %757 = arith.addf %755, %756 : vector<3x256xf32>
    %758 = arith.truncf %699 : vector<2x256xf32> to vector<2x256xbf16>
    %759 = arith.truncf %728 : vector<2x256xf32> to vector<2x256xbf16>
    %cst_106 = arith.constant dense<0.000000e+00> : vector<256x256xf32>
    %760 = tpu.matmul %758, %759, %cst_106 {dimension_numbers = #tpu.dot_dimension_numbers<[0], [0], [1], [1], [0, 1, 1, 1], [], []>} : vector<2x256xbf16>, vector<2x256xbf16>, vector<256x256xf32> -> vector<256x256xf32>
    %cst_107 = arith.constant dense<0xFF800000> : vector<256xf32>
    %761 = vector.multi_reduction <maximumf>, %760, %cst_107 [1] : vector<256x256xf32> to vector<256xf32>
    %762 = vector.shape_cast %761 : vector<256xf32> to vector<256x1xf32>
    %763 = vector.broadcast %762 : vector<256x1xf32> to vector<256x256xf32>
    %764 = arith.subf %760, %763 : vector<256x256xf32>
    %765 = arith.truncf %764 : vector<256x256xf32> to vector<256x256xbf16>
    %766 = math.exp %765 : vector<256x256xbf16>
    %767 = arith.truncf %757 : vector<3x256xf32> to vector<3x256xbf16>
    %cst_108 = arith.constant dense<0.000000e+00> : vector<3x256xf32>
    %768 = tpu.matmul %767, %766, %cst_108 {dimension_numbers = #tpu.dot_dimension_numbers<[1], [1], [0], [0], [0, 0, 1, 0], [], []>} : vector<3x256xbf16>, vector<256x256xbf16>, vector<3x256xf32> -> vector<3x256xf32>
    %769 = vector.extract_strided_slice %768 {offsets = [2, 0], sizes = [1, 256], strides = [1, 1]} : vector<3x256xf32> to vector<1x256xf32>
    %770 = tpu.reciprocal %769 {approx = true} : vector<1x256xf32> -> vector<1x256xf32>
    %771 = vector.extract_strided_slice %768 {offsets = [0, 0], sizes = [2, 256], strides = [1, 1]} : vector<3x256xf32> to vector<2x256xf32>
    %772 = vector.broadcast %770 : vector<1x256xf32> to vector<2x256xf32>
    %773 = arith.mulf %771, %772 : vector<2x256xf32>
    %774 = vector.extract_strided_slice %549 {offsets = [1, 0, 0], sizes = [1, 4, 2], strides = [1, 1, 1]} : vector<2x4x2xf32> to vector<1x4x2xf32>
    %775 = vector.shape_cast %774 : vector<1x4x2xf32> to vector<4x2xf32>
    %776 = vector.extract_strided_slice %775 {offsets = [0, 0], sizes = [4, 1], strides = [1, 1]} : vector<4x2xf32> to vector<4x1xf32>
    %777 = vector.extract_strided_slice %773 {offsets = [0, 0], sizes = [1, 256], strides = [1, 1]} : vector<2x256xf32> to vector<1x256xf32>
    %778 = vector.broadcast %776 : vector<4x1xf32> to vector<4x256xf32>
    %779 = vector.broadcast %777 : vector<1x256xf32> to vector<4x256xf32>
    %780 = arith.mulf %778, %779 : vector<4x256xf32>
    %781 = vector.extract_strided_slice %775 {offsets = [0, 1], sizes = [4, 1], strides = [1, 1]} : vector<4x2xf32> to vector<4x1xf32>
    %782 = vector.extract_strided_slice %773 {offsets = [1, 0], sizes = [1, 256], strides = [1, 1]} : vector<2x256xf32> to vector<1x256xf32>
    %783 = vector.broadcast %781 : vector<4x1xf32> to vector<4x256xf32>
    %784 = vector.broadcast %782 : vector<1x256xf32> to vector<4x256xf32>
    %785 = arith.mulf %783, %784 : vector<4x256xf32>
    %786 = arith.addf %780, %785 : vector<4x256xf32>
    %787 = arith.addf %670, %786 : vector<4x256xf32>
    %c1_109 = arith.constant 1 : index
    %c0_110 = arith.constant 0 : index
    %c0_111 = arith.constant 0 : index
    %788 = vector.load %arg14[%c1_109, %c0_110, %c0_111] : memref<2x4x1xf32, #tpu.memory_space<vmem>>, vector<1x4x1xf32>
    %789 = vector.shape_cast %788 : vector<1x4x1xf32> to vector<4x1xf32>
    %c1_112 = arith.constant 1 : index
    %c0_113 = arith.constant 0 : index
    %c0_114 = arith.constant 0 : index
    %790 = vector.load %arg15[%c1_112, %c0_113, %c0_114] : memref<2x4x1xf32, #tpu.memory_space<vmem>>, vector<1x4x1xf32>
    %791 = vector.shape_cast %790 : vector<1x4x1xf32> to vector<4x1xf32>
    %792 = arith.addf %535, %787 : vector<4x256xf32>
    %cst_115 = arith.constant dense<0.000000e+00> : vector<256xf32>
    %793 = vector.multi_reduction <add>, %792, %cst_115 [0] : vector<4x256xf32> to vector<256xf32>
    %794 = vector.shape_cast %793 : vector<256xf32> to vector<1x256xf32>
    %cst_116 = arith.constant 4.000000e+00 : f32
    %795 = vector.broadcast %cst_116 : f32 to vector<1x256xf32>
    %796 = arith.divf %794, %795 : vector<1x256xf32>
    %797 = arith.mulf %792, %792 : vector<4x256xf32>
    %cst_117 = arith.constant dense<0.000000e+00> : vector<256xf32>
    %798 = vector.multi_reduction <add>, %797, %cst_117 [0] : vector<4x256xf32> to vector<256xf32>
    %799 = vector.shape_cast %798 : vector<256xf32> to vector<1x256xf32>
    %cst_118 = arith.constant 4.000000e+00 : f32
    %800 = vector.broadcast %cst_118 : f32 to vector<1x256xf32>
    %801 = arith.divf %799, %800 : vector<1x256xf32>
    %802 = arith.mulf %796, %796 : vector<1x256xf32>
    %803 = arith.subf %801, %802 : vector<1x256xf32>
    %804 = vector.broadcast %796 : vector<1x256xf32> to vector<4x256xf32>
    %805 = arith.subf %792, %804 : vector<4x256xf32>
    %cst_119 = arith.constant 9.99999974E-6 : f32
    %806 = vector.broadcast %cst_119 : f32 to vector<1x256xf32>
    %807 = arith.addf %803, %806 : vector<1x256xf32>
    %808 = math.rsqrt %807 : vector<1x256xf32>
    %809 = vector.broadcast %808 : vector<1x256xf32> to vector<4x256xf32>
    %810 = arith.mulf %805, %809 : vector<4x256xf32>
    %811 = vector.broadcast %789 : vector<4x1xf32> to vector<4x256xf32>
    %812 = arith.mulf %810, %811 : vector<4x256xf32>
    %813 = vector.broadcast %791 : vector<4x1xf32> to vector<4x256xf32>
    %814 = arith.addf %812, %813 : vector<4x256xf32>
    %c1_120 = arith.constant 1 : index
    %c0_121 = arith.constant 0 : index
    %c0_122 = arith.constant 0 : index
    %815 = vector.load %arg10[%c1_120, %c0_121, %c0_122] : memref<2x32x4xf32, #tpu.memory_space<vmem>>, vector<1x32x4xf32>
    %816 = vector.shape_cast %815 : vector<1x32x4xf32> to vector<32x4xf32>
    %c1_123 = arith.constant 1 : index
    %c0_124 = arith.constant 0 : index
    %c0_125 = arith.constant 0 : index
    %817 = vector.load %arg11[%c1_123, %c0_124, %c0_125] : memref<2x32x1xf32, #tpu.memory_space<vmem>>, vector<1x32x1xf32>
    %818 = vector.shape_cast %817 : vector<1x32x1xf32> to vector<32x1xf32>
    %819 = vector.extract_strided_slice %816 {offsets = [0, 0], sizes = [32, 1], strides = [1, 1]} : vector<32x4xf32> to vector<32x1xf32>
    %820 = vector.extract_strided_slice %814 {offsets = [0, 0], sizes = [1, 256], strides = [1, 1]} : vector<4x256xf32> to vector<1x256xf32>
    %821 = vector.broadcast %819 : vector<32x1xf32> to vector<32x256xf32>
    %822 = vector.broadcast %820 : vector<1x256xf32> to vector<32x256xf32>
    %823 = arith.mulf %821, %822 : vector<32x256xf32>
    %824 = vector.extract_strided_slice %816 {offsets = [0, 1], sizes = [32, 1], strides = [1, 1]} : vector<32x4xf32> to vector<32x1xf32>
    %825 = vector.extract_strided_slice %814 {offsets = [1, 0], sizes = [1, 256], strides = [1, 1]} : vector<4x256xf32> to vector<1x256xf32>
    %826 = vector.broadcast %824 : vector<32x1xf32> to vector<32x256xf32>
    %827 = vector.broadcast %825 : vector<1x256xf32> to vector<32x256xf32>
    %828 = arith.mulf %826, %827 : vector<32x256xf32>
    %829 = arith.addf %823, %828 : vector<32x256xf32>
    %830 = vector.extract_strided_slice %816 {offsets = [0, 2], sizes = [32, 1], strides = [1, 1]} : vector<32x4xf32> to vector<32x1xf32>
    %831 = vector.extract_strided_slice %814 {offsets = [2, 0], sizes = [1, 256], strides = [1, 1]} : vector<4x256xf32> to vector<1x256xf32>
    %832 = vector.broadcast %830 : vector<32x1xf32> to vector<32x256xf32>
    %833 = vector.broadcast %831 : vector<1x256xf32> to vector<32x256xf32>
    %834 = arith.mulf %832, %833 : vector<32x256xf32>
    %835 = arith.addf %829, %834 : vector<32x256xf32>
    %836 = vector.extract_strided_slice %816 {offsets = [0, 3], sizes = [32, 1], strides = [1, 1]} : vector<32x4xf32> to vector<32x1xf32>
    %837 = vector.extract_strided_slice %814 {offsets = [3, 0], sizes = [1, 256], strides = [1, 1]} : vector<4x256xf32> to vector<1x256xf32>
    %838 = vector.broadcast %836 : vector<32x1xf32> to vector<32x256xf32>
    %839 = vector.broadcast %837 : vector<1x256xf32> to vector<32x256xf32>
    %840 = arith.mulf %838, %839 : vector<32x256xf32>
    %841 = arith.addf %835, %840 : vector<32x256xf32>
    %842 = vector.broadcast %818 : vector<32x1xf32> to vector<32x256xf32>
    %843 = arith.addf %841, %842 : vector<32x256xf32>
    %cst_126 = arith.constant 0.000000e+00 : f32
    %844 = vector.broadcast %cst_126 : f32 to vector<32x256xf32>
    %845 = arith.maximumf %843, %844 : vector<32x256xf32>
    %c1_127 = arith.constant 1 : index
    %c0_128 = arith.constant 0 : index
    %c0_129 = arith.constant 0 : index
    %846 = vector.load %arg12[%c1_127, %c0_128, %c0_129] : memref<2x4x32xf32, #tpu.memory_space<vmem>>, vector<1x4x32xf32>
    %847 = vector.shape_cast %846 : vector<1x4x32xf32> to vector<4x32xf32>
    %c1_130 = arith.constant 1 : index
    %c0_131 = arith.constant 0 : index
    %c0_132 = arith.constant 0 : index
    %848 = vector.load %arg13[%c1_130, %c0_131, %c0_132] : memref<2x4x1xf32, #tpu.memory_space<vmem>>, vector<1x4x1xf32>
    %849 = vector.shape_cast %848 : vector<1x4x1xf32> to vector<4x1xf32>
    %850 = vector.extract_strided_slice %847 {offsets = [0, 0], sizes = [4, 1], strides = [1, 1]} : vector<4x32xf32> to vector<4x1xf32>
    %851 = vector.extract_strided_slice %845 {offsets = [0, 0], sizes = [1, 256], strides = [1, 1]} : vector<32x256xf32> to vector<1x256xf32>
    %852 = vector.broadcast %850 : vector<4x1xf32> to vector<4x256xf32>
    %853 = vector.broadcast %851 : vector<1x256xf32> to vector<4x256xf32>
    %854 = arith.mulf %852, %853 : vector<4x256xf32>
    %855 = vector.extract_strided_slice %847 {offsets = [0, 4], sizes = [4, 1], strides = [1, 1]} : vector<4x32xf32> to vector<4x1xf32>
    %856 = vector.extract_strided_slice %845 {offsets = [4, 0], sizes = [1, 256], strides = [1, 1]} : vector<32x256xf32> to vector<1x256xf32>
    %857 = vector.broadcast %855 : vector<4x1xf32> to vector<4x256xf32>
    %858 = vector.broadcast %856 : vector<1x256xf32> to vector<4x256xf32>
    %859 = arith.mulf %857, %858 : vector<4x256xf32>
    %860 = arith.addf %854, %859 : vector<4x256xf32>
    %861 = vector.extract_strided_slice %847 {offsets = [0, 8], sizes = [4, 1], strides = [1, 1]} : vector<4x32xf32> to vector<4x1xf32>
    %862 = vector.extract_strided_slice %845 {offsets = [8, 0], sizes = [1, 256], strides = [1, 1]} : vector<32x256xf32> to vector<1x256xf32>
    %863 = vector.broadcast %861 : vector<4x1xf32> to vector<4x256xf32>
    %864 = vector.broadcast %862 : vector<1x256xf32> to vector<4x256xf32>
    %865 = arith.mulf %863, %864 : vector<4x256xf32>
    %866 = arith.addf %860, %865 : vector<4x256xf32>
    %867 = vector.extract_strided_slice %847 {offsets = [0, 12], sizes = [4, 1], strides = [1, 1]} : vector<4x32xf32> to vector<4x1xf32>
    %868 = vector.extract_strided_slice %845 {offsets = [12, 0], sizes = [1, 256], strides = [1, 1]} : vector<32x256xf32> to vector<1x256xf32>
    %869 = vector.broadcast %867 : vector<4x1xf32> to vector<4x256xf32>
    %870 = vector.broadcast %868 : vector<1x256xf32> to vector<4x256xf32>
    %871 = arith.mulf %869, %870 : vector<4x256xf32>
    %872 = arith.addf %866, %871 : vector<4x256xf32>
    %873 = vector.extract_strided_slice %847 {offsets = [0, 16], sizes = [4, 1], strides = [1, 1]} : vector<4x32xf32> to vector<4x1xf32>
    %874 = vector.extract_strided_slice %845 {offsets = [16, 0], sizes = [1, 256], strides = [1, 1]} : vector<32x256xf32> to vector<1x256xf32>
    %875 = vector.broadcast %873 : vector<4x1xf32> to vector<4x256xf32>
    %876 = vector.broadcast %874 : vector<1x256xf32> to vector<4x256xf32>
    %877 = arith.mulf %875, %876 : vector<4x256xf32>
    %878 = arith.addf %872, %877 : vector<4x256xf32>
    %879 = vector.extract_strided_slice %847 {offsets = [0, 20], sizes = [4, 1], strides = [1, 1]} : vector<4x32xf32> to vector<4x1xf32>
    %880 = vector.extract_strided_slice %845 {offsets = [20, 0], sizes = [1, 256], strides = [1, 1]} : vector<32x256xf32> to vector<1x256xf32>
    %881 = vector.broadcast %879 : vector<4x1xf32> to vector<4x256xf32>
    %882 = vector.broadcast %880 : vector<1x256xf32> to vector<4x256xf32>
    %883 = arith.mulf %881, %882 : vector<4x256xf32>
    %884 = arith.addf %878, %883 : vector<4x256xf32>
    %885 = vector.extract_strided_slice %847 {offsets = [0, 24], sizes = [4, 1], strides = [1, 1]} : vector<4x32xf32> to vector<4x1xf32>
    %886 = vector.extract_strided_slice %845 {offsets = [24, 0], sizes = [1, 256], strides = [1, 1]} : vector<32x256xf32> to vector<1x256xf32>
    %887 = vector.broadcast %885 : vector<4x1xf32> to vector<4x256xf32>
    %888 = vector.broadcast %886 : vector<1x256xf32> to vector<4x256xf32>
    %889 = arith.mulf %887, %888 : vector<4x256xf32>
    %890 = arith.addf %884, %889 : vector<4x256xf32>
    %891 = vector.extract_strided_slice %847 {offsets = [0, 28], sizes = [4, 1], strides = [1, 1]} : vector<4x32xf32> to vector<4x1xf32>
    %892 = vector.extract_strided_slice %845 {offsets = [28, 0], sizes = [1, 256], strides = [1, 1]} : vector<32x256xf32> to vector<1x256xf32>
    %893 = vector.broadcast %891 : vector<4x1xf32> to vector<4x256xf32>
    %894 = vector.broadcast %892 : vector<1x256xf32> to vector<4x256xf32>
    %895 = arith.mulf %893, %894 : vector<4x256xf32>
    %896 = arith.addf %890, %895 : vector<4x256xf32>
    %897 = vector.extract_strided_slice %847 {offsets = [0, 1], sizes = [4, 1], strides = [1, 1]} : vector<4x32xf32> to vector<4x1xf32>
    %898 = vector.extract_strided_slice %845 {offsets = [1, 0], sizes = [1, 256], strides = [1, 1]} : vector<32x256xf32> to vector<1x256xf32>
    %899 = vector.broadcast %897 : vector<4x1xf32> to vector<4x256xf32>
    %900 = vector.broadcast %898 : vector<1x256xf32> to vector<4x256xf32>
    %901 = arith.mulf %899, %900 : vector<4x256xf32>
    %902 = vector.extract_strided_slice %847 {offsets = [0, 5], sizes = [4, 1], strides = [1, 1]} : vector<4x32xf32> to vector<4x1xf32>
    %903 = vector.extract_strided_slice %845 {offsets = [5, 0], sizes = [1, 256], strides = [1, 1]} : vector<32x256xf32> to vector<1x256xf32>
    %904 = vector.broadcast %902 : vector<4x1xf32> to vector<4x256xf32>
    %905 = vector.broadcast %903 : vector<1x256xf32> to vector<4x256xf32>
    %906 = arith.mulf %904, %905 : vector<4x256xf32>
    %907 = arith.addf %901, %906 : vector<4x256xf32>
    %908 = vector.extract_strided_slice %847 {offsets = [0, 9], sizes = [4, 1], strides = [1, 1]} : vector<4x32xf32> to vector<4x1xf32>
    %909 = vector.extract_strided_slice %845 {offsets = [9, 0], sizes = [1, 256], strides = [1, 1]} : vector<32x256xf32> to vector<1x256xf32>
    %910 = vector.broadcast %908 : vector<4x1xf32> to vector<4x256xf32>
    %911 = vector.broadcast %909 : vector<1x256xf32> to vector<4x256xf32>
    %912 = arith.mulf %910, %911 : vector<4x256xf32>
    %913 = arith.addf %907, %912 : vector<4x256xf32>
    %914 = vector.extract_strided_slice %847 {offsets = [0, 13], sizes = [4, 1], strides = [1, 1]} : vector<4x32xf32> to vector<4x1xf32>
    %915 = vector.extract_strided_slice %845 {offsets = [13, 0], sizes = [1, 256], strides = [1, 1]} : vector<32x256xf32> to vector<1x256xf32>
    %916 = vector.broadcast %914 : vector<4x1xf32> to vector<4x256xf32>
    %917 = vector.broadcast %915 : vector<1x256xf32> to vector<4x256xf32>
    %918 = arith.mulf %916, %917 : vector<4x256xf32>
    %919 = arith.addf %913, %918 : vector<4x256xf32>
    %920 = vector.extract_strided_slice %847 {offsets = [0, 17], sizes = [4, 1], strides = [1, 1]} : vector<4x32xf32> to vector<4x1xf32>
    %921 = vector.extract_strided_slice %845 {offsets = [17, 0], sizes = [1, 256], strides = [1, 1]} : vector<32x256xf32> to vector<1x256xf32>
    %922 = vector.broadcast %920 : vector<4x1xf32> to vector<4x256xf32>
    %923 = vector.broadcast %921 : vector<1x256xf32> to vector<4x256xf32>
    %924 = arith.mulf %922, %923 : vector<4x256xf32>
    %925 = arith.addf %919, %924 : vector<4x256xf32>
    %926 = vector.extract_strided_slice %847 {offsets = [0, 21], sizes = [4, 1], strides = [1, 1]} : vector<4x32xf32> to vector<4x1xf32>
    %927 = vector.extract_strided_slice %845 {offsets = [21, 0], sizes = [1, 256], strides = [1, 1]} : vector<32x256xf32> to vector<1x256xf32>
    %928 = vector.broadcast %926 : vector<4x1xf32> to vector<4x256xf32>
    %929 = vector.broadcast %927 : vector<1x256xf32> to vector<4x256xf32>
    %930 = arith.mulf %928, %929 : vector<4x256xf32>
    %931 = arith.addf %925, %930 : vector<4x256xf32>
    %932 = vector.extract_strided_slice %847 {offsets = [0, 25], sizes = [4, 1], strides = [1, 1]} : vector<4x32xf32> to vector<4x1xf32>
    %933 = vector.extract_strided_slice %845 {offsets = [25, 0], sizes = [1, 256], strides = [1, 1]} : vector<32x256xf32> to vector<1x256xf32>
    %934 = vector.broadcast %932 : vector<4x1xf32> to vector<4x256xf32>
    %935 = vector.broadcast %933 : vector<1x256xf32> to vector<4x256xf32>
    %936 = arith.mulf %934, %935 : vector<4x256xf32>
    %937 = arith.addf %931, %936 : vector<4x256xf32>
    %938 = vector.extract_strided_slice %847 {offsets = [0, 29], sizes = [4, 1], strides = [1, 1]} : vector<4x32xf32> to vector<4x1xf32>
    %939 = vector.extract_strided_slice %845 {offsets = [29, 0], sizes = [1, 256], strides = [1, 1]} : vector<32x256xf32> to vector<1x256xf32>
    %940 = vector.broadcast %938 : vector<4x1xf32> to vector<4x256xf32>
    %941 = vector.broadcast %939 : vector<1x256xf32> to vector<4x256xf32>
    %942 = arith.mulf %940, %941 : vector<4x256xf32>
    %943 = arith.addf %937, %942 : vector<4x256xf32>
    %944 = vector.extract_strided_slice %847 {offsets = [0, 2], sizes = [4, 1], strides = [1, 1]} : vector<4x32xf32> to vector<4x1xf32>
    %945 = vector.extract_strided_slice %845 {offsets = [2, 0], sizes = [1, 256], strides = [1, 1]} : vector<32x256xf32> to vector<1x256xf32>
    %946 = vector.broadcast %944 : vector<4x1xf32> to vector<4x256xf32>
    %947 = vector.broadcast %945 : vector<1x256xf32> to vector<4x256xf32>
    %948 = arith.mulf %946, %947 : vector<4x256xf32>
    %949 = vector.extract_strided_slice %847 {offsets = [0, 6], sizes = [4, 1], strides = [1, 1]} : vector<4x32xf32> to vector<4x1xf32>
    %950 = vector.extract_strided_slice %845 {offsets = [6, 0], sizes = [1, 256], strides = [1, 1]} : vector<32x256xf32> to vector<1x256xf32>
    %951 = vector.broadcast %949 : vector<4x1xf32> to vector<4x256xf32>
    %952 = vector.broadcast %950 : vector<1x256xf32> to vector<4x256xf32>
    %953 = arith.mulf %951, %952 : vector<4x256xf32>
    %954 = arith.addf %948, %953 : vector<4x256xf32>
    %955 = vector.extract_strided_slice %847 {offsets = [0, 10], sizes = [4, 1], strides = [1, 1]} : vector<4x32xf32> to vector<4x1xf32>
    %956 = vector.extract_strided_slice %845 {offsets = [10, 0], sizes = [1, 256], strides = [1, 1]} : vector<32x256xf32> to vector<1x256xf32>
    %957 = vector.broadcast %955 : vector<4x1xf32> to vector<4x256xf32>
    %958 = vector.broadcast %956 : vector<1x256xf32> to vector<4x256xf32>
    %959 = arith.mulf %957, %958 : vector<4x256xf32>
    %960 = arith.addf %954, %959 : vector<4x256xf32>
    %961 = vector.extract_strided_slice %847 {offsets = [0, 14], sizes = [4, 1], strides = [1, 1]} : vector<4x32xf32> to vector<4x1xf32>
    %962 = vector.extract_strided_slice %845 {offsets = [14, 0], sizes = [1, 256], strides = [1, 1]} : vector<32x256xf32> to vector<1x256xf32>
    %963 = vector.broadcast %961 : vector<4x1xf32> to vector<4x256xf32>
    %964 = vector.broadcast %962 : vector<1x256xf32> to vector<4x256xf32>
    %965 = arith.mulf %963, %964 : vector<4x256xf32>
    %966 = arith.addf %960, %965 : vector<4x256xf32>
    %967 = vector.extract_strided_slice %847 {offsets = [0, 18], sizes = [4, 1], strides = [1, 1]} : vector<4x32xf32> to vector<4x1xf32>
    %968 = vector.extract_strided_slice %845 {offsets = [18, 0], sizes = [1, 256], strides = [1, 1]} : vector<32x256xf32> to vector<1x256xf32>
    %969 = vector.broadcast %967 : vector<4x1xf32> to vector<4x256xf32>
    %970 = vector.broadcast %968 : vector<1x256xf32> to vector<4x256xf32>
    %971 = arith.mulf %969, %970 : vector<4x256xf32>
    %972 = arith.addf %966, %971 : vector<4x256xf32>
    %973 = vector.extract_strided_slice %847 {offsets = [0, 22], sizes = [4, 1], strides = [1, 1]} : vector<4x32xf32> to vector<4x1xf32>
    %974 = vector.extract_strided_slice %845 {offsets = [22, 0], sizes = [1, 256], strides = [1, 1]} : vector<32x256xf32> to vector<1x256xf32>
    %975 = vector.broadcast %973 : vector<4x1xf32> to vector<4x256xf32>
    %976 = vector.broadcast %974 : vector<1x256xf32> to vector<4x256xf32>
    %977 = arith.mulf %975, %976 : vector<4x256xf32>
    %978 = arith.addf %972, %977 : vector<4x256xf32>
    %979 = vector.extract_strided_slice %847 {offsets = [0, 26], sizes = [4, 1], strides = [1, 1]} : vector<4x32xf32> to vector<4x1xf32>
    %980 = vector.extract_strided_slice %845 {offsets = [26, 0], sizes = [1, 256], strides = [1, 1]} : vector<32x256xf32> to vector<1x256xf32>
    %981 = vector.broadcast %979 : vector<4x1xf32> to vector<4x256xf32>
    %982 = vector.broadcast %980 : vector<1x256xf32> to vector<4x256xf32>
    %983 = arith.mulf %981, %982 : vector<4x256xf32>
    %984 = arith.addf %978, %983 : vector<4x256xf32>
    %985 = vector.extract_strided_slice %847 {offsets = [0, 30], sizes = [4, 1], strides = [1, 1]} : vector<4x32xf32> to vector<4x1xf32>
    %986 = vector.extract_strided_slice %845 {offsets = [30, 0], sizes = [1, 256], strides = [1, 1]} : vector<32x256xf32> to vector<1x256xf32>
    %987 = vector.broadcast %985 : vector<4x1xf32> to vector<4x256xf32>
    %988 = vector.broadcast %986 : vector<1x256xf32> to vector<4x256xf32>
    %989 = arith.mulf %987, %988 : vector<4x256xf32>
    %990 = arith.addf %984, %989 : vector<4x256xf32>
    %991 = vector.extract_strided_slice %847 {offsets = [0, 3], sizes = [4, 1], strides = [1, 1]} : vector<4x32xf32> to vector<4x1xf32>
    %992 = vector.extract_strided_slice %845 {offsets = [3, 0], sizes = [1, 256], strides = [1, 1]} : vector<32x256xf32> to vector<1x256xf32>
    %993 = vector.broadcast %991 : vector<4x1xf32> to vector<4x256xf32>
    %994 = vector.broadcast %992 : vector<1x256xf32> to vector<4x256xf32>
    %995 = arith.mulf %993, %994 : vector<4x256xf32>
    %996 = vector.extract_strided_slice %847 {offsets = [0, 7], sizes = [4, 1], strides = [1, 1]} : vector<4x32xf32> to vector<4x1xf32>
    %997 = vector.extract_strided_slice %845 {offsets = [7, 0], sizes = [1, 256], strides = [1, 1]} : vector<32x256xf32> to vector<1x256xf32>
    %998 = vector.broadcast %996 : vector<4x1xf32> to vector<4x256xf32>
    %999 = vector.broadcast %997 : vector<1x256xf32> to vector<4x256xf32>
    %1000 = arith.mulf %998, %999 : vector<4x256xf32>
    %1001 = arith.addf %995, %1000 : vector<4x256xf32>
    %1002 = vector.extract_strided_slice %847 {offsets = [0, 11], sizes = [4, 1], strides = [1, 1]} : vector<4x32xf32> to vector<4x1xf32>
    %1003 = vector.extract_strided_slice %845 {offsets = [11, 0], sizes = [1, 256], strides = [1, 1]} : vector<32x256xf32> to vector<1x256xf32>
    %1004 = vector.broadcast %1002 : vector<4x1xf32> to vector<4x256xf32>
    %1005 = vector.broadcast %1003 : vector<1x256xf32> to vector<4x256xf32>
    %1006 = arith.mulf %1004, %1005 : vector<4x256xf32>
    %1007 = arith.addf %1001, %1006 : vector<4x256xf32>
    %1008 = vector.extract_strided_slice %847 {offsets = [0, 15], sizes = [4, 1], strides = [1, 1]} : vector<4x32xf32> to vector<4x1xf32>
    %1009 = vector.extract_strided_slice %845 {offsets = [15, 0], sizes = [1, 256], strides = [1, 1]} : vector<32x256xf32> to vector<1x256xf32>
    %1010 = vector.broadcast %1008 : vector<4x1xf32> to vector<4x256xf32>
    %1011 = vector.broadcast %1009 : vector<1x256xf32> to vector<4x256xf32>
    %1012 = arith.mulf %1010, %1011 : vector<4x256xf32>
    %1013 = arith.addf %1007, %1012 : vector<4x256xf32>
    %1014 = vector.extract_strided_slice %847 {offsets = [0, 19], sizes = [4, 1], strides = [1, 1]} : vector<4x32xf32> to vector<4x1xf32>
    %1015 = vector.extract_strided_slice %845 {offsets = [19, 0], sizes = [1, 256], strides = [1, 1]} : vector<32x256xf32> to vector<1x256xf32>
    %1016 = vector.broadcast %1014 : vector<4x1xf32> to vector<4x256xf32>
    %1017 = vector.broadcast %1015 : vector<1x256xf32> to vector<4x256xf32>
    %1018 = arith.mulf %1016, %1017 : vector<4x256xf32>
    %1019 = arith.addf %1013, %1018 : vector<4x256xf32>
    %1020 = vector.extract_strided_slice %847 {offsets = [0, 23], sizes = [4, 1], strides = [1, 1]} : vector<4x32xf32> to vector<4x1xf32>
    %1021 = vector.extract_strided_slice %845 {offsets = [23, 0], sizes = [1, 256], strides = [1, 1]} : vector<32x256xf32> to vector<1x256xf32>
    %1022 = vector.broadcast %1020 : vector<4x1xf32> to vector<4x256xf32>
    %1023 = vector.broadcast %1021 : vector<1x256xf32> to vector<4x256xf32>
    %1024 = arith.mulf %1022, %1023 : vector<4x256xf32>
    %1025 = arith.addf %1019, %1024 : vector<4x256xf32>
    %1026 = vector.extract_strided_slice %847 {offsets = [0, 27], sizes = [4, 1], strides = [1, 1]} : vector<4x32xf32> to vector<4x1xf32>
    %1027 = vector.extract_strided_slice %845 {offsets = [27, 0], sizes = [1, 256], strides = [1, 1]} : vector<32x256xf32> to vector<1x256xf32>
    %1028 = vector.broadcast %1026 : vector<4x1xf32> to vector<4x256xf32>
    %1029 = vector.broadcast %1027 : vector<1x256xf32> to vector<4x256xf32>
    %1030 = arith.mulf %1028, %1029 : vector<4x256xf32>
    %1031 = arith.addf %1025, %1030 : vector<4x256xf32>
    %1032 = vector.extract_strided_slice %847 {offsets = [0, 31], sizes = [4, 1], strides = [1, 1]} : vector<4x32xf32> to vector<4x1xf32>
    %1033 = vector.extract_strided_slice %845 {offsets = [31, 0], sizes = [1, 256], strides = [1, 1]} : vector<32x256xf32> to vector<1x256xf32>
    %1034 = vector.broadcast %1032 : vector<4x1xf32> to vector<4x256xf32>
    %1035 = vector.broadcast %1033 : vector<1x256xf32> to vector<4x256xf32>
    %1036 = arith.mulf %1034, %1035 : vector<4x256xf32>
    %1037 = arith.addf %1031, %1036 : vector<4x256xf32>
    %1038 = arith.addf %896, %943 : vector<4x256xf32>
    %1039 = arith.addf %1038, %990 : vector<4x256xf32>
    %1040 = arith.addf %1039, %1037 : vector<4x256xf32>
    %1041 = vector.broadcast %849 : vector<4x1xf32> to vector<4x256xf32>
    %1042 = arith.addf %1040, %1041 : vector<4x256xf32>
    %c1_133 = arith.constant 1 : index
    %c0_134 = arith.constant 0 : index
    %c0_135 = arith.constant 0 : index
    %1043 = vector.load %arg16[%c1_133, %c0_134, %c0_135] : memref<2x4x1xf32, #tpu.memory_space<vmem>>, vector<1x4x1xf32>
    %1044 = vector.shape_cast %1043 : vector<1x4x1xf32> to vector<4x1xf32>
    %c1_136 = arith.constant 1 : index
    %c0_137 = arith.constant 0 : index
    %c0_138 = arith.constant 0 : index
    %1045 = vector.load %arg17[%c1_136, %c0_137, %c0_138] : memref<2x4x1xf32, #tpu.memory_space<vmem>>, vector<1x4x1xf32>
    %1046 = vector.shape_cast %1045 : vector<1x4x1xf32> to vector<4x1xf32>
    %1047 = arith.addf %814, %1042 : vector<4x256xf32>
    %cst_139 = arith.constant dense<0.000000e+00> : vector<256xf32>
    %1048 = vector.multi_reduction <add>, %1047, %cst_139 [0] : vector<4x256xf32> to vector<256xf32>
    %1049 = vector.shape_cast %1048 : vector<256xf32> to vector<1x256xf32>
    %cst_140 = arith.constant 4.000000e+00 : f32
    %1050 = vector.broadcast %cst_140 : f32 to vector<1x256xf32>
    %1051 = arith.divf %1049, %1050 : vector<1x256xf32>
    %1052 = arith.mulf %1047, %1047 : vector<4x256xf32>
    %cst_141 = arith.constant dense<0.000000e+00> : vector<256xf32>
    %1053 = vector.multi_reduction <add>, %1052, %cst_141 [0] : vector<4x256xf32> to vector<256xf32>
    %1054 = vector.shape_cast %1053 : vector<256xf32> to vector<1x256xf32>
    %cst_142 = arith.constant 4.000000e+00 : f32
    %1055 = vector.broadcast %cst_142 : f32 to vector<1x256xf32>
    %1056 = arith.divf %1054, %1055 : vector<1x256xf32>
    %1057 = arith.mulf %1051, %1051 : vector<1x256xf32>
    %1058 = arith.subf %1056, %1057 : vector<1x256xf32>
    %1059 = vector.broadcast %1051 : vector<1x256xf32> to vector<4x256xf32>
    %1060 = arith.subf %1047, %1059 : vector<4x256xf32>
    %cst_143 = arith.constant 9.99999974E-6 : f32
    %1061 = vector.broadcast %cst_143 : f32 to vector<1x256xf32>
    %1062 = arith.addf %1058, %1061 : vector<1x256xf32>
    %1063 = math.rsqrt %1062 : vector<1x256xf32>
    %1064 = vector.broadcast %1063 : vector<1x256xf32> to vector<4x256xf32>
    %1065 = arith.mulf %1060, %1064 : vector<4x256xf32>
    %1066 = vector.broadcast %1044 : vector<4x1xf32> to vector<4x256xf32>
    %1067 = arith.mulf %1065, %1066 : vector<4x256xf32>
    %1068 = vector.broadcast %1046 : vector<4x1xf32> to vector<4x256xf32>
    %1069 = arith.addf %1067, %1068 : vector<4x256xf32>
    %c0_144 = arith.constant 0 : index
    %c0_145 = arith.constant 0 : index
    %c0_146 = arith.constant 0 : index
    %1070 = vector.load %arg18[%c0_144, %c0_145, %c0_146] : memref<1x4x256xf32, #tpu.memory_space<vmem>>, vector<1x4x256xf32>
    %1071 = vector.shape_cast %1070 : vector<1x4x256xf32> to vector<4x256xf32>
    %1072 = vector.shape_cast %1069 : vector<4x256xf32> to vector<1x4x256xf32>
    tpu.vector_store %arg18[%c0_144, %c0_145, %c0_146], %1072 {strides = array<i32>} : memref<1x4x256xf32, #tpu.memory_space<vmem>>, vector<1x4x256xf32>,
    return
  }
  func.func @transform_0(%arg0: i32) -> (i32, i32, i32) {
    %c0_i32 = arith.constant 0 : i32
    %c0_i32_0 = arith.constant 0 : i32
    %c0_i32_1 = arith.constant 0 : i32
    return %arg0, %c0_i32, %c0_i32_0 : i32, i32, i32
  }
  func.func @transform_1(%arg0: i32) -> (i32, i32, i32, i32) {
    %c0_i32 = arith.constant 0 : i32
    %c0_i32_0 = arith.constant 0 : i32
    %c0_i32_1 = arith.constant 0 : i32
    %c0_i32_2 = arith.constant 0 : i32
    %c0_i32_3 = arith.constant 0 : i32
    return %c0_i32, %c0_i32_0, %c0_i32_1, %c0_i32_2 : i32, i32, i32, i32
  }
  func.func @transform_2(%arg0: i32) -> (i32, i32, i32, i32) {
    %c0_i32 = arith.constant 0 : i32
    %c0_i32_0 = arith.constant 0 : i32
    %c0_i32_1 = arith.constant 0 : i32
    %c0_i32_2 = arith.constant 0 : i32
    %c0_i32_3 = arith.constant 0 : i32
    return %c0_i32, %c0_i32_0, %c0_i32_1, %c0_i32_2 : i32, i32, i32, i32
  }
  func.func @transform_3(%arg0: i32) -> (i32, i32, i32, i32) {
    %c0_i32 = arith.constant 0 : i32
    %c0_i32_0 = arith.constant 0 : i32
    %c0_i32_1 = arith.constant 0 : i32
    %c0_i32_2 = arith.constant 0 : i32
    %c0_i32_3 = arith.constant 0 : i32
    return %c0_i32, %c0_i32_0, %c0_i32_1, %c0_i32_2 : i32, i32, i32, i32
  }
  func.func @transform_4(%arg0: i32) -> (i32, i32, i32, i32) {
    %c0_i32 = arith.constant 0 : i32
    %c0_i32_0 = arith.constant 0 : i32
    %c0_i32_1 = arith.constant 0 : i32
    %c0_i32_2 = arith.constant 0 : i32
    %c0_i32_3 = arith.constant 0 : i32
    return %c0_i32, %c0_i32_0, %c0_i32_1, %c0_i32_2 : i32, i32, i32, i32
  }
  func.func @transform_5(%arg0: i32) -> (i32, i32, i32, i32) {
    %c0_i32 = arith.constant 0 : i32
    %c0_i32_0 = arith.constant 0 : i32
    %c0_i32_1 = arith.constant 0 : i32
    %c0_i32_2 = arith.constant 0 : i32
    %c0_i32_3 = arith.constant 0 : i32
    return %c0_i32, %c0_i32_0, %c0_i32_1, %c0_i32_2 : i32, i32, i32, i32
  }
  func.func @transform_6(%arg0: i32) -> (i32, i32, i32, i32) {
    %c0_i32 = arith.constant 0 : i32
    %c0_i32_0 = arith.constant 0 : i32
    %c0_i32_1 = arith.constant 0 : i32
    %c0_i32_2 = arith.constant 0 : i32
    %c0_i32_3 = arith.constant 0 : i32
    return %c0_i32, %c0_i32_0, %c0_i32_1, %c0_i32_2 : i32, i32, i32, i32
  }
  func.func @transform_7(%arg0: i32) -> (i32, i32, i32, i32) {
    %c0_i32 = arith.constant 0 : i32
    %c0_i32_0 = arith.constant 0 : i32
    %c0_i32_1 = arith.constant 0 : i32
    %c0_i32_2 = arith.constant 0 : i32
    %c0_i32_3 = arith.constant 0 : i32
    return %c0_i32, %c0_i32_0, %c0_i32_1, %c0_i32_2 : i32, i32, i32, i32
  }
  func.func @transform_8(%arg0: i32) -> (i32, i32, i32) {
    %c0_i32 = arith.constant 0 : i32
    %c0_i32_0 = arith.constant 0 : i32
    %c0_i32_1 = arith.constant 0 : i32
    %c0_i32_2 = arith.constant 0 : i32
    return %c0_i32, %c0_i32_0, %c0_i32_1 : i32, i32, i32
  }
  func.func @transform_9(%arg0: i32) -> (i32, i32, i32) {
    %c0_i32 = arith.constant 0 : i32
    %c0_i32_0 = arith.constant 0 : i32
    %c0_i32_1 = arith.constant 0 : i32
    %c0_i32_2 = arith.constant 0 : i32
    return %c0_i32, %c0_i32_0, %c0_i32_1 : i32, i32, i32
  }
  func.func @transform_10(%arg0: i32) -> (i32, i32, i32) {
    %c0_i32 = arith.constant 0 : i32
    %c0_i32_0 = arith.constant 0 : i32
    %c0_i32_1 = arith.constant 0 : i32
    %c0_i32_2 = arith.constant 0 : i32
    return %c0_i32, %c0_i32_0, %c0_i32_1 : i32, i32, i32
  }
  func.func @transform_11(%arg0: i32) -> (i32, i32, i32) {
    %c0_i32 = arith.constant 0 : i32
    %c0_i32_0 = arith.constant 0 : i32
    %c0_i32_1 = arith.constant 0 : i32
    %c0_i32_2 = arith.constant 0 : i32
    return %c0_i32, %c0_i32_0, %c0_i32_1 : i32, i32, i32
  }
  func.func @transform_12(%arg0: i32) -> (i32, i32, i32) {
    %c0_i32 = arith.constant 0 : i32
    %c0_i32_0 = arith.constant 0 : i32
    %c0_i32_1 = arith.constant 0 : i32
    %c0_i32_2 = arith.constant 0 : i32
    return %c0_i32, %c0_i32_0, %c0_i32_1 : i32, i32, i32
  }
  func.func @transform_13(%arg0: i32) -> (i32, i32, i32) {
    %c0_i32 = arith.constant 0 : i32
    %c0_i32_0 = arith.constant 0 : i32
    %c0_i32_1 = arith.constant 0 : i32
    %c0_i32_2 = arith.constant 0 : i32
    return %c0_i32, %c0_i32_0, %c0_i32_1 : i32, i32, i32
  }
  func.func @transform_14(%arg0: i32) -> (i32, i32, i32) {
    %c0_i32 = arith.constant 0 : i32
    %c0_i32_0 = arith.constant 0 : i32
    %c0_i32_1 = arith.constant 0 : i32
    %c0_i32_2 = arith.constant 0 : i32
    return %c0_i32, %c0_i32_0, %c0_i32_1 : i32, i32, i32
  }
  func.func @transform_15(%arg0: i32) -> (i32, i32, i32) {
    %c0_i32 = arith.constant 0 : i32
    %c0_i32_0 = arith.constant 0 : i32
    %c0_i32_1 = arith.constant 0 : i32
    %c0_i32_2 = arith.constant 0 : i32
    return %c0_i32, %c0_i32_0, %c0_i32_1 : i32, i32, i32
  }
  func.func @transform_16(%arg0: i32) -> (i32, i32, i32) {
    %c0_i32 = arith.constant 0 : i32
    %c0_i32_0 = arith.constant 0 : i32
    %c0_i32_1 = arith.constant 0 : i32
    %c0_i32_2 = arith.constant 0 : i32
    return %c0_i32, %c0_i32_0, %c0_i32_1 : i32, i32, i32
  }
  func.func @transform_17(%arg0: i32) -> (i32, i32, i32) {
    %c0_i32 = arith.constant 0 : i32
    %c0_i32_0 = arith.constant 0 : i32
    %c0_i32_1 = arith.constant 0 : i32
    return %arg0, %c0_i32, %c0_i32_0 : i32, i32, i32
  }
}

</mosaic_0001>

<bundles_post_ra>
// kernel: mhsa_forward.1
= control target key start
LH: loop header
LB: loop body
LE: loop exit
PB: predicated region body
PF: predicated region fallthrough
CT: control target
= control target key end

     0   :  { %s6509_s24 = smov 0   ;;  %s9485_s0 = inlined_call_operand.vmem [shape: f32[2,4,256], index: 0, kind: input, shape index: {}]   ;;  %s9486_s1 = inlined_call_operand.vmem [shape: f32[2,2,2,4], index: 1, kind: input, shape index: {}]   ;;  %s9487_s2 = inlined_call_operand.vmem [shape: f32[2,2,2,1], index: 2, kind: input, shape index: {}]   ;;  %s9488_s3 = inlined_call_operand.vmem [shape: f32[2,2,2,4], index: 3, kind: input, shape index: {}]   ;;  %s9489_s4 = inlined_call_operand.vmem [shape: f32[2,2,2,1], index: 4, kind: input, shape index: {}]   ;;  %s9490_s5 = inlined_call_operand.vmem [shape: f32[2,2,3,4], index: 5, kind: input, shape index: {}]   ;;  %s9491_s6 = inlined_call_operand.vmem [shape: f32[2,2,3,1], index: 6, kind: input, shape index: {}]   ;;  %s9492_s7 = inlined_call_operand.vmem [shape: f32[2,2,4,2], index: 7, kind: input, shape index: {}]   ;;  %s9493_s8 = inlined_call_operand.vmem [shape: f32[2,4,1], index: 8, kind: input, shape index: {}]   ;;  %s9494_s9 = inlined_call_operand.vmem [shape: f32[2,32,4], index: 9, kind: input, shape index: {}]   ;;  %s9495_s10 = inlined_call_operand.vmem [shape: f32[2,32,1], index: 10, kind: input, shape index: {}]   ;;  %s9496_s11 = inlined_call_operand.vmem [shape: f32[2,4,32], index: 11, kind: input, shape index: {}]   ;;  %s9497_s12 = inlined_call_operand.vmem [shape: f32[2,4,1], index: 12, kind: input, shape index: {}]   ;;  %s9498_s13 = inlined_call_operand.vmem [shape: f32[2,4,1], index: 13, kind: input, shape index: {}]   ;;  %s9499_s14 = inlined_call_operand.vmem [shape: f32[2,4,1], index: 14, kind: input, shape index: {}]   ;;  %s9500_s15 = inlined_call_operand.vmem [shape: f32[2,4,1], index: 15, kind: input, shape index: {}]   ;;  %s9501_s16 = inlined_call_operand.vmem [shape: f32[2,4,1], index: 16, kind: input, shape index: {}]   ;;  %s9502_s17 = inlined_call_operand.vmem [shape: f32[2,4,256], index: 17, kind: output, shape index: {}]  }
   0x1   :  { %9776 = sst [smem:[#allocation98_spill]] %s9485_s0 }
   0x2   :  { %9777 = sst [smem:[#allocation99_spill]] %s9486_s1 }
   0x3 LB: > { %s5787_s25 = sadd.s32 4294967295, %s6384_s24   ;;  %p5791_p0 = scmp.ge.s32.totalorder %s6384_s24, 1  ;;  %s6384_s24 = sphi %s6509_s24, %s27_s24  }
   0x4   : > { %p487_p1 = scmp.lt.s32.totalorder %s6384_s24, 3 }
   0x6   : > { %p488_p2 = pnand %p5791_p0, %p487_p1 }
   0x8   : > { %491 = sbr.rel (%p488_p2) target bundleno = 2725 (0xaa5), region = 88 }
   0xd   : > { %s9778_s28 = sld [smem:[#allocation99_spill]]  ;;  %v9523_v1 = vmov 0   ;;  %v9506_v2 = vmov 2   ;;  %v9504_v3 = vmov 1   ;;  %v9508_v4 = vmov 3   ;;  %p539_p3 = scmp.lt.s32.totalorder %s5787_s25, 1 }
   0xe   : > { %5938 = vset.pattern.permute.xlu0 %v9523_v1  ;;  %5940 = vset.pattern.permute.xlu1 %v9506_v2  ;;  %v553_v5 = vld [vmem:[%s9487_s2] sm:$0x3]  ;;  %v577_v9 = vlaneseq  ;;  %s9780_s27 = sld [smem:[#allocation98_spill]]  ;;  %vm843_vm0 = vcmask 1040384   ;;  %vm794_vm1 = vcmask 15360   ;;  %vm2202_vm2 = vcmask 1043456  }
   0xf   : > { %882 = vmatprep.mubr.bf16.mxu0 %v9523_v1  ;;  %v555_v6 = vld [vmem:[%s9488_s3] sm:$0x3]  ;;  %s10236_s25 = smov (!%p539_p3, %s5787_s25), 1 }
  0x10   : > { %v557_v8 = vld [vmem:[%s9489_s4] sm:$0x3]  ;;  %s5895_s22 = sshll.u32 %s10236_s25, 3  ;;  %v6554_v10 = vshrl.u32 %v577_v9, 7 }
  0x11   : > { %s548_s19 = scalar_lea.vmem %s9502_s17, %s5895_s22 }
  0x12   : > { %9779 = vst [vmem:[#allocation2_spill] sm:$0xff] %v6554_v10  ;;  %v6564_v11 = vsub.s32 0, %v6554_v10  ;;  %v6567_v12 = vsub.s32 4, %v6554_v10  ;;  %v6570_v13 = vsub.s32 1, %v6554_v10  ;;  %v6573_v14 = vsub.s32 5, %v6554_v10 }
  0x13   : > { %v551_v0 = vld [vmem:[%s9778_s28] sm:$0x3]  ;;  %v552_v7 = vld [vmem:[%s9778_s28 + $0x2] sm:$0x3]  ;;  %v6577_v16 = vsub.s32 2, %v6554_v10  ;;  %v6580_v17 = vsub.s32 6, %v6554_v10 }
  0x14   : > { %573 = vperm.xlu0 %5938, %v551_v0   ;;  %624 = vperm.xlu1 %5940, %v551_v0   ;;  %s6561_s29 = scalar_lea.vmem %s9780_s27, %s5895_s22  ;;  %9781 = vst [vmem:[#allocation3_spill] sm:$0xff] %v6564_v11  ;;  %9782 = vst [vmem:[#allocation4_spill] sm:$0xff] %v6567_v12  ;;  %v6583_v18 = vsub.s32 3, %v6554_v10  ;;  %v6586_v19 = vsub.s32 7, %v6554_v10 }
  0x15   : > { %9783 = vst [vmem:[#allocation5_spill] sm:$0xff] %v6570_v13  ;;  %9784 = vst [vmem:[#allocation6_spill] sm:$0xff] %v6573_v14  ;;  %v550_v15 = vld [vmem:[%s6561_s29] sm:$0xff] }
  0x16   : > { %9785 = vst [vmem:[#allocation7_spill] sm:$0xff] %v6577_v16  ;;  %9786 = vst [vmem:[#allocation8_spill] sm:$0xff] %v6580_v17  ;;  %v580_v20 = vrot.slane %v550_v15, %v6564_v11  ;;  %v584_v21 = vrot.slane %v550_v15, %v6567_v12  ;;  %v604_v22 = vrot.slane %v550_v15, %v6570_v13 }
  0x17   : > { %9787 = vst [vmem:[#allocation9_spill] sm:$0xff] %v6583_v18  ;;  %9788 = vst [vmem:[#allocation10_spill] sm:$0xff] %v6586_v19  ;;  %v608_v23 = vrot.slane %v550_v15, %v6573_v14  ;;  %v630_v24 = vrot.slane %v550_v15, %v6577_v16  ;;  %v634_v25 = vrot.slane %v550_v15, %v6580_v17 }
  0x18   : > { %5939 = vset.pattern.permute.xlu0 %v9504_v3  ;;  %5941 = vset.pattern.permute.xlu1 %v9508_v4  ;;  %v656_v28 = vrot.slane %v550_v15, %v6583_v18  ;;  %v660_v29 = vrot.slane %v550_v15, %v6586_v19  ;;  %v6597_v30 = vrot.slane %v580_v20, %v6564_v11 }
  0x19   : > { %598 = vperm.xlu0 %5939, %v551_v0   ;;  %650 = vperm.xlu1 %5941, %v551_v0   ;;  %v6600_v31 = vrot.slane %v584_v21, %v6564_v11  ;;  %v6603_v32 = vrot.slane %v604_v22, %v6570_v13  ;;  %v6606_v33 = vrot.slane %v608_v23, %v6570_v13 }
  0x1a   : > { %9789 = vst [vmem:[#allocation11_spill] sm:$0xff] %v6597_v30  ;;  %v6609_v34 = vrot.slane %v630_v24, %v6577_v16  ;;  %v6612_v35 = vrot.slane %v634_v25, %v6577_v16  ;;  %v6615_v36 = vrot.slane %v656_v28, %v6583_v18  ;;  %v6618_v37 = vrot.slane %v660_v29, %v6583_v18 }
  0x1b   : > { %9790 = vst [vmem:[#allocation12_spill] sm:$0xff] %v6600_v31  ;;  %9791 = vst [vmem:[#allocation13_spill] sm:$0xff] %v6603_v32 }
  0x1c   : > { %9792 = vst [vmem:[#allocation14_spill] sm:$0xff] %v6606_v33  ;;  %9793 = vst [vmem:[#allocation15_spill] sm:$0xff] %v6609_v34 }
  0x1d   : > { %5942 = vset.pattern.permute.xlu1 %v9523_v1  ;;  %5943 = vset.pattern.permute.xlu0 %v9523_v1  ;;  %9794 = vst [vmem:[#allocation16_spill] sm:$0xff] %v6612_v35  ;;  %9795 = vst [vmem:[#allocation17_spill] sm:$0xff] %v6615_v36 }
  0x1e   : > { %677 = vperm.xlu1 %5942, %v553_v5   ;;  %684 = vperm.xlu0 %5943, %v555_v6   ;;  %9796 = vst [vmem:[#allocation18_spill] sm:$0xff] %v6618_v37 }
  0x22   : > { %5946 = vset.pattern.permute.xlu0 %v9508_v4  ;;  %5944 = vset.pattern.permute.xlu1 %v9504_v3 }
  0x23   : > { %706 = vperm.xlu0 %5946, %v555_v6   ;;  %690 = vperm.xlu1 %5944, %v555_v6  }
  0x27   : > { %5948 = vset.pattern.permute.xlu0 %v9523_v1  ;;  %5945 = vset.pattern.permute.xlu1 %v9506_v2 }
  0x28   : > { %1421 = vperm.xlu0 %5948, %v552_v7   ;;  %698 = vperm.xlu1 %5945, %v555_v6  }
  0x2c   : > { %5949 = vset.pattern.permute.xlu0 %v9504_v3  ;;  %5947 = vset.pattern.permute.xlu1 %v9523_v1 }
  0x2d   : > { %1427 = vperm.xlu0 %5949, %v552_v7   ;;  %715 = vperm.xlu1 %5947, %v557_v8  }
  0x31   : > { %5950 = vset.pattern.permute.xlu0 %v9506_v2 }
  0x32   : > { %1435 = vperm.xlu0 %5950, %v552_v7  }
  0x36   : > { %5951 = vset.pattern.permute.xlu0 %v9508_v4 }
  0x37   : > { %1443 = vperm.xlu0 %5951, %v552_v7  }
  0x8f   : > { %v574_v26 = vpop.permute.xlu0 %573  ;;  %v625_v27 = vpop.permute.xlu1 %624 }
  0x90   : > { %v595_v40 = vmul.f32 %v6597_v30, %v574_v26  ;;  %v596_v41 = vmul.f32 %v6600_v31, %v574_v26  ;;  %v645_v44 = vmul.f32 %v6609_v34, %v625_v27  ;;  %v646_v45 = vmul.f32 %v6612_v35, %v625_v27 }
  0x94   : > { %v599_v38 = vpop.permute.xlu0 %598  ;;  %v651_v39 = vpop.permute.xlu1 %650 }
  0x95   : > { %v619_v42 = vmul.f32 %v6603_v32, %v599_v38  ;;  %v620_v43 = vmul.f32 %v6606_v33, %v599_v38  ;;  %v671_v48 = vmul.f32 %v6615_v36, %v651_v39  ;;  %v672_v49 = vmul.f32 %v6618_v37, %v651_v39 }
  0x97   : > { %v621_v46 = vadd.f32 %v619_v42, %v595_v40  ;;  %v622_v47 = vadd.f32 %v620_v43, %v596_v41  ;;  %v554_v40 = vld [vmem:[%s9487_s2 + $0x2] sm:$0x3] }
  0x98   : > { %v556_v41 = vld [vmem:[%s9488_s3 + $0x2] sm:$0x3] }
  0x99   : > { %v647_v50 = vadd.f32 %v645_v44, %v621_v46  ;;  %v648_v51 = vadd.f32 %v646_v45, %v622_v47  ;;  %v678_v52 = vpop.permute.xlu1 %677  ;;  %v685_v55 = vpop.permute.xlu0 %684  ;;  %v558_v42 = vld [vmem:[%s9489_s4 + $0x2] sm:$0x3] }
  0x9a   : > { %v687_v58 = vmul.f32 %v685_v55, %v6597_v30  ;;  %v688_v59 = vmul.f32 %v685_v55, %v6600_v31 }
  0x9b   : > { %v673_v53 = vadd.f32 %v671_v48, %v647_v50  ;;  %v674_v54 = vadd.f32 %v672_v49, %v648_v51 }
  0x9d   : > { %v680_v56 = vadd.f32 %v678_v52, %v673_v53  ;;  %v681_v57 = vadd.f32 %v678_v52, %v674_v54 }
  0x9e   : > { %v691_v60 = vpop.permute.xlu1 %690  ;;  %v707_v5 = vpop.permute.xlu0 %706 }
  0x9f   : > { %v759_v61 = vpack.c.bf16 %v681_v57, %v681_v57  ;;  %v758_v62 = vpack.c.bf16 %v680_v56, %v680_v56  ;;  %v693_v63 = vmul.f32 %v691_v60, %v6603_v32  ;;  %v694_v0 = vmul.f32 %v691_v60, %v6606_v33 }
  0xa0   : > { %v709_v9 = vmul.f32 %v707_v5, %v6615_v36  ;;  %v710_v15 = vmul.f32 %v707_v5, %v6618_v37 }
  0xa1   : > { %778 = vxpose.xlu0.c.b16.start.end [1/1] (short) %v759_v61, 128  ;;  %762 = vxpose.xlu1.c.b16.start.end [1/1] (short) %v758_v62, 128  ;;  %v695_v6 = vadd.f32 %v693_v63, %v687_v58  ;;  %v696_v7 = vadd.f32 %v694_v0, %v688_v59 }
  0xa3   : > { %v699_v8 = vpop.permute.xlu1 %698  ;;  %v1422_v45 = vpop.permute.xlu0 %1421 }
  0xa4   : > { %v701_v20 = vmul.f32 %v699_v8, %v6609_v34  ;;  %v702_v21 = vmul.f32 %v699_v8, %v6612_v35  ;;  %v1424_v57 = vmul.f32 %v1422_v45, %v6597_v30  ;;  %v1425_v58 = vmul.f32 %v1422_v45, %v6600_v31 }
  0xa6   : > { %v703_v22 = vadd.f32 %v701_v20, %v695_v6  ;;  %v704_v23 = vadd.f32 %v702_v21, %v696_v7 }
  0xa8   : > { %v716_v24 = vpop.permute.xlu1 %715  ;;  %v712_v25 = vadd.f32 %v710_v15, %v704_v23  ;;  %v711_v26 = vadd.f32 %v709_v9, %v703_v22  ;;  %v1428_v46 = vpop.permute.xlu0 %1427 }
  0xa9   : > { %v1430_v59 = vmul.f32 %v1428_v46, %v6603_v32  ;;  %v1431_v60 = vmul.f32 %v1428_v46, %v6606_v33 }
  0xaa   : > { %5952 = vset.pattern.permute.xlu0 %v9523_v1  ;;  %v719_v27 = vadd.f32 %v716_v24, %v712_v25  ;;  %v718_v28 = vadd.f32 %v716_v24, %v711_v26 }
  0xab   : > { %v1432_v63 = vadd.f32 %v1430_v59, %v1424_v57  ;;  %v1433_v0 = vadd.f32 %v1431_v60, %v1425_v58 }
  0xac   : > { %v761_v29 = vpack.c.bf16 %v719_v27, %v719_v27  ;;  %v760_v38 = vpack.c.bf16 %v718_v28, %v718_v28 }
  0xad   : > { %v1436_v48 = vpop.permute.xlu0 %1435 }
  0xae   : > { %5796 = vmatprep.subr.msk.bf16.mxu0 %vm843_vm0, %v761_v29  ;;  %v845_v39 = vsel %vm843_vm0, %v760_v38, 0  ;;  %v1438_v5 = vmul.f32 %v1436_v48, %v6609_v34  ;;  %v1439_v6 = vmul.f32 %v1436_v48, %v6612_v35 }
  0xaf   : > { %865 = vmatpush1.bf16.msra.mxu0 %v845_v39 }
  0xb0   : > { %v1440_v9 = vadd.f32 %v1438_v5, %v1432_v63  ;;  %v1441_v15 = vadd.f32 %v1439_v6, %v1433_v0 }
  0xb2   : > { %v1444_v50 = vpop.permute.xlu0 %1443 }
  0xb3   : > { %v1446_v20 = vmul.f32 %v1444_v50, %v6615_v36  ;;  %v1447_v21 = vmul.f32 %v1444_v50, %v6618_v37 }
  0xb5   : > { %v1448_v23 = vadd.f32 %v1446_v20, %v1440_v9  ;;  %v1449_v24 = vadd.f32 %v1447_v21, %v1441_v15 }
  0xc1   : > { %1452 = vperm.xlu1 %5947, %v554_v40  }
  0xc5   : > { %5953 = vset.pattern.permute.xlu1 %v9504_v3 }
  0xc6   : > { %1459 = vperm.xlu0 %5952, %v556_v41   ;;  %1465 = vperm.xlu1 %5953, %v556_v41  }
  0xca   : > { %5954 = vset.pattern.permute.xlu1 %v9506_v2 }
  0xcb   : > { %1473 = vperm.xlu1 %5954, %v556_v41  }
  0xcf   : > { %5955 = vset.pattern.permute.xlu1 %v9508_v4 }
  0xd0   : > { %1481 = vperm.xlu1 %5955, %v556_v41  }
  0xd4   : > { %5956 = vset.pattern.permute.xlu1 %v9523_v1 }
  0xd5   : > { %1490 = vperm.xlu1 %5956, %v558_v42  }
 0x103   : > { %v770_v43 = vpop.trf.xlu1  ;;  %v786_v51 = vpop.trf.xlu0 }
 0x104   : > { %5797 = vmatmul.mubr.msk.bf16.vlgmr.msra.gmra.mxu0 %vm794_vm1, %v770_v43 }
 0x105   : > { %892 = vmatprep.mubr.bf16.mxu0 %v9523_v1 }
 0x107   : > { %v771_v44 = vpop.trf.xlu1  ;;  %v787_v53 = vpop.trf.xlu0 }
 0x10b   : > { %v772_v47 = vpop.trf.xlu1  ;;  %v6662_v54 = vpop.trf.xlu0 }
 0x10c   : > { %5798 = vmatmul.mubr.msk.bf16.gmra.mxu0 %vm794_vm1, %v771_v44 }
 0x10d   : > { %902 = vmatprep.mubr.bf16.mxu0 %v9523_v1 }
 0x10f   : > { %v773_v49 = vpop.trf.xlu1  ;;  %v6665_v56 = vpop.trf.xlu0 }
 0x113   : > { %v774_v52 = vpop.trf.xlu1  ;;  %v790_v62 = vpop.trf.xlu0 }
 0x114   : > { %5799 = vmatmul.mubr.msk.bf16.gmra.mxu0 %vm794_vm1, %v772_v47 }
 0x115   : > { %912 = vmatprep.mubr.bf16.mxu0 %v9523_v1 }
 0x117   : > { %v775_v55 = vpop.trf.xlu1  ;;  %v791_v7 = vpop.trf.xlu0 }
 0x11b   : > { %v776_v61 = vpop.trf.xlu1  ;;  %v792_v22 = vpop.trf.xlu0 }
 0x11c   : > { %5800 = vmatmul.mubr.msk.bf16.gmra.mxu0 %vm794_vm1, %v773_v49 }
 0x11d   : > { %922 = vmatprep.mubr.bf16.mxu0 %v9523_v1 }
 0x11f   : > { %v777_v8 = vpop.trf.xlu1  ;;  %v793_v28 = vpop.trf.xlu0 }
 0x124   : > { %5801 = vmatmul.mubr.msk.bf16.gmra.mxu0 %vm794_vm1, %v774_v52 }
 0x125   : > { %932 = vmatprep.mubr.bf16.mxu0 %v9523_v1 }
 0x12c   : > { %5802 = vmatmul.mubr.msk.bf16.gmra.mxu0 %vm794_vm1, %v775_v55 }
 0x12d   : > { %942 = vmatprep.mubr.bf16.mxu0 %v9523_v1 }
 0x134   : > { %5803 = vmatmul.mubr.msk.bf16.gmra.mxu0 %vm794_vm1, %v776_v61 }
 0x135   : > { %952 = vmatprep.mubr.bf16.mxu0 %v9523_v1 }
 0x13c   : > { %5804 = vmatmul.mubr.msk.bf16.gmra.mxu0 %vm794_vm1, %v777_v8  ;;  %v1453_v25 = vpop.permute.xlu1 %1452 }
 0x13d   : > { %v1455_v26 = vadd.f32 %v1453_v25, %v1448_v23  ;;  %v1456_v27 = vadd.f32 %v1453_v25, %v1449_v24  ;;  %962 = vmatprep.mubr.bf16.mxu0 %v9523_v1 }
 0x13f   : > { %v1533_v29 = vpack.c.bf16 %v1455_v26, %v1455_v26  ;;  %v1534_v38 = vpack.c.bf16 %v1456_v27, %v1456_v27 }
 0x141   : > { %v1460_v39 = vpop.permute.xlu0 %1459  ;;  %1553 = vxpose.xlu0.c.b16.start.end [1/1] (short) %v1534_v38, 128  ;;  %1537 = vxpose.xlu1.c.b16.start.end [1/1] (short) %v1533_v29, 128  ;;  %v1466_v40 = vpop.permute.xlu1 %1465 }
 0x142   : > { %v1462_v41 = vmul.f32 %v1460_v39, %v6597_v30  ;;  %v1463_v42 = vmul.f32 %v1460_v39, %v6600_v31  ;;  %v1468_v43 = vmul.f32 %v1466_v40, %v6603_v32  ;;  %v1469_v44 = vmul.f32 %v1466_v40, %v6606_v33 }
 0x144   : > { %5805 = vmatmul.mubr.msk.bf16.gmra.mxu0 %vm794_vm1, %v786_v51  ;;  %v1470_v45 = vadd.f32 %v1468_v43, %v1462_v41  ;;  %v1471_v46 = vadd.f32 %v1469_v44, %v1463_v42 }
 0x145   : > { %972 = vmatprep.mubr.bf16.mxu0 %v9523_v1  ;;  %5957 = vset.pattern.permute.xlu1 %v9504_v3 }
 0x146   : > { %v1474_v47 = vpop.permute.xlu1 %1473 }
 0x147   : > { %v1476_v48 = vmul.f32 %v1474_v47, %v6609_v34  ;;  %v1477_v49 = vmul.f32 %v1474_v47, %v6612_v35 }
 0x149   : > { %v1478_v50 = vadd.f32 %v1476_v48, %v1470_v45  ;;  %v1479_v52 = vadd.f32 %v1477_v49, %v1471_v46 }
 0x14b   : > { %v1482_v55 = vpop.permute.xlu1 %1481 }
 0x14c   : > { %v1484_v57 = vmul.f32 %v1482_v55, %v6615_v36  ;;  %v1485_v58 = vmul.f32 %v1482_v55, %v6618_v37  ;;  %5806 = vmatmul.mubr.msk.bf16.gmra.mxu0 %vm794_vm1, %v787_v53 }
 0x14d   : > { %982 = vmatprep.mubr.bf16.mxu0 %v9523_v1 }
 0x14e   : > { %v1486_v51 = vadd.f32 %v1484_v57, %v1478_v50  ;;  %v1487_v59 = vadd.f32 %v1485_v58, %v1479_v52 }
 0x150   : > { %v1491_v60 = vpop.permute.xlu1 %1490 }
 0x151   : > { %v1493_v61 = vadd.f32 %v1491_v60, %v1486_v51  ;;  %v1494_v63 = vadd.f32 %v1491_v60, %v1487_v59 }
 0x153   : > { %v1535_v0 = vpack.c.bf16 %v1493_v61, %v1493_v61  ;;  %v1536_v5 = vpack.c.bf16 %v1494_v63, %v1494_v63 }
 0x154   : > { %5807 = vmatmul.mubr.msk.bf16.gmra.mxu0 %vm794_vm1, %v6662_v54 }
 0x155   : > { %5813 = vmatprep.subr.msk.bf16.mxu0 %vm843_vm0, %v1536_v5  ;;  %v1618_v6 = vsel %vm843_vm0, %v1535_v0, 0  ;;  %992 = vmatprep.mubr.bf16.mxu0 %v9523_v1 }
 0x156   : > { %1638 = vmatpush1.bf16.msra.mxu0 %v1618_v6 }
 0x15c   : > { %5808 = vmatmul.mubr.msk.bf16.gmra.mxu0 %vm794_vm1, %v6665_v56 }
 0x15d   : > { %1002 = vmatprep.mubr.bf16.mxu0 %v9523_v1 }
 0x164   : > { %5809 = vmatmul.mubr.msk.bf16.gmra.mxu0 %vm794_vm1, %v790_v62 }
 0x165   : > { %1012 = vmatprep.mubr.bf16.mxu0 %v9523_v1 }
 0x16c   : > { %5810 = vmatmul.mubr.msk.bf16.gmra.mxu0 %vm794_vm1, %v791_v7 }
 0x16d   : > { %1022 = vmatprep.mubr.bf16.mxu0 %v9523_v1 }
 0x174   : > { %5811 = vmatmul.mubr.msk.bf16.gmra.mxu0 %vm794_vm1, %v792_v22 }
 0x175   : > { %1032 = vmatprep.mubr.bf16.mxu0 %v9523_v1 }
 0x17c   : > { %5812 = vmatmul.mubr.msk.bf16.gmra.mxu0 %vm794_vm1, %v793_v28 }
 0x17d   : > { %1655 = vmatprep.mubr.bf16.mxu0 %v9523_v1 }
 0x1a3   : > { %v1545_v53 = vpop.trf.xlu1  ;;  %v1561_v50 = vpop.trf.xlu0 }
 0x1a4   : > { %5814 = vmatmul.mubr.msk.bf16.vlgmr.msra.gmra.mxu0 %vm794_vm1, %v1545_v53 }
 0x1a5   : > { %1665 = vmatprep.mubr.bf16.mxu0 %v9523_v1 }
 0x1a7   : > { %v1546_v54 = vpop.trf.xlu1  ;;  %v1562_v60 = vpop.trf.xlu0 }
 0x1ab   : > { %v1547_v56 = vpop.trf.xlu1 }
 0x1ac   : > { %5815 = vmatmul.mubr.msk.bf16.gmra.mxu0 %vm794_vm1, %v1546_v54  ;;  %v1563_v54 = vpop.trf.xlu0 }
 0x1ad   : > { %1675 = vmatprep.mubr.bf16.mxu0 %v9523_v1 }
 0x1af   : > { %v1548_v62 = vpop.trf.xlu1 }
 0x1b3   : > { %v1549_v7 = vpop.trf.xlu1 }
 0x1b4   : > { %5816 = vmatmul.mubr.msk.bf16.gmra.mxu0 %vm794_vm1, %v1547_v56 }
 0x1b5   : > { %1685 = vmatprep.mubr.bf16.mxu0 %v9523_v1 }
 0x1b7   : > { %v1550_v21 = vpop.trf.xlu1 }
 0x1bb   : > { %v1551_v28 = vpop.trf.xlu1 }
 0x1bc   : > { %5817 = vmatmul.mubr.msk.bf16.gmra.mxu0 %vm794_vm1, %v1548_v62 }
 0x1bd   : > { %1695 = vmatprep.mubr.bf16.mxu0 %v9523_v1 }
 0x1bf   : > { %v1552_v43 = vpop.trf.xlu1 }
 0x1c4   : > { %v6717_v8 = vpop.f32.mrf.mxu0  ;;  %5818 = vmatmul.mubr.msk.bf16.gmra.mxu0 %vm794_vm1, %v1549_v7 }
 0x1c5   : > { %1705 = vmatprep.mubr.bf16.mxu0 %v9523_v1 }
 0x1c6   : > { %v6721_v9 = vpop.f32.mrf.mxu0 }
 0x1c7   : > { %v1043_v15 = vmax.f32 %v6717_v8, %v6721_v9 }
 0x1c8   : > { %v6725_v20 = vpop.f32.mrf.mxu0 }
 0x1c9   : > { %1044 = vmax.xlane.f32.xlu0 %v1043_v15 }
 0x1ca   : > { %v6727_v22 = vpop.f32.mrf.mxu0 }
 0x1cb   : > { %v1046_v23 = vmax.f32 %v6725_v20, %v6727_v22 }
 0x1cc   : > { %v6731_v24 = vpop.f32.mrf.mxu0  ;;  %5819 = vmatmul.mubr.msk.bf16.gmra.mxu0 %vm794_vm1, %v1550_v21 }
 0x1cd   : > { %1047 = vmax.xlane.f32.xlu1 %v1046_v23  ;;  %1715 = vmatprep.mubr.bf16.mxu0 %v9523_v1 }
 0x1ce   : > { %v6735_v25 = vpop.f32.mrf.mxu0 }
 0x1cf   : > { %v1049_v26 = vmax.f32 %v6731_v24, %v6735_v25 }
 0x1d0   : > { %v6739_v27 = vpop.f32.mrf.mxu0 }
 0x1d1   : > { %1050 = vmax.xlane.f32.xlu0 %v1049_v26  ;;  %v1564_v26 = vpop.trf.xlu0 }
 0x1d2   : > { %v6741_v29 = vpop.f32.mrf.mxu0 }
 0x1d3   : > { %v1052_v38 = vmax.f32 %v6739_v27, %v6741_v29 }
 0x1d4   : > { %v6745_v39 = vpop.f32.mrf.mxu0  ;;  %5820 = vmatmul.mubr.msk.bf16.gmra.mxu0 %vm794_vm1, %v1551_v28 }
 0x1d5   : > { %1053 = vmax.xlane.f32.xlu1 %v1052_v38  ;;  %1725 = vmatprep.mubr.bf16.mxu0 %v9523_v1 }
 0x1d6   : > { %v6749_v40 = vpop.f32.mrf.mxu0 }
 0x1d7   : > { %v1055_v41 = vmax.f32 %v6745_v39, %v6749_v40 }
 0x1d8   : > { %v6753_v42 = vpop.f32.mrf.mxu0 }
 0x1d9   : > { %1056 = vmax.xlane.f32.xlu0 %v1055_v41 }
 0x1da   : > { %v6755_v44 = vpop.f32.mrf.mxu0 }
 0x1db   : > { %v1058_v45 = vmax.f32 %v6753_v42, %v6755_v44 }
 0x1dc   : > { %v6759_v46 = vpop.f32.mrf.mxu0  ;;  %5821 = vmatmul.mubr.msk.bf16.gmra.mxu0 %vm794_vm1, %v1552_v43 }
 0x1dd   : > { %1059 = vmax.xlane.f32.xlu1 %v1058_v45  ;;  %1735 = vmatprep.mubr.bf16.mxu0 %v9523_v1 }
 0x1de   : > { %v6763_v47 = vpop.f32.mrf.mxu0 }
 0x1df   : > { %v1061_v48 = vmax.f32 %v6759_v46, %v6763_v47 }
 0x1e0   : > { %v6767_v49 = vpop.f32.mrf.mxu0 }
 0x1e1   : > { %1062 = vmax.xlane.f32.xlu0 %v1061_v48 }
 0x1e2   : > { %v6769_v52 = vpop.f32.mrf.mxu0 }
 0x1e3   : > { %v1064_v55 = vmax.f32 %v6767_v49, %v6769_v52 }
 0x1e4   : > { %v6773_v57 = vpop.f32.mrf.mxu0  ;;  %5822 = vmatmul.mubr.msk.bf16.gmra.mxu0 %vm794_vm1, %v1561_v50  ;;  %v1565_v50 = vpop.trf.xlu0 }
 0x1e5   : > { %1065 = vmax.xlane.f32.xlu1 %v1064_v55  ;;  %1745 = vmatprep.mubr.bf16.mxu0 %v9523_v1 }
 0x1e6   : > { %v6777_v58 = vpop.f32.mrf.mxu0 }
 0x1e7   : > { %v1067_v51 = vmax.f32 %v6773_v57, %v6777_v58 }
 0x1e8   : > { %v6781_v59 = vpop.f32.mrf.mxu0 }
 0x1e9   : > { %1068 = vmax.xlane.f32.xlu0 %v1067_v51 }
 0x1ea   : > { %v6783_v61 = vpop.f32.mrf.mxu0 }
 0x1eb   : > { %v1070_v63 = vmax.f32 %v6781_v59, %v6783_v61 }
 0x1ec   : > { %v6787_v0 = vpop.f32.mrf.mxu0  ;;  %5823 = vmatmul.mubr.msk.bf16.gmra.mxu0 %vm794_vm1, %v1562_v60 }
 0x1ed   : > { %1071 = vmax.xlane.f32.xlu1 %v1070_v63  ;;  %1755 = vmatprep.mubr.bf16.mxu0 %v9523_v1 }
 0x1ee   : > { %v6791_v5 = vpop.f32.mrf.mxu0 }
 0x1ef   : > { %v1073_v6 = vmax.f32 %v6787_v0, %v6791_v5 }
 0x1f0   : > { %v6795_v53 = vpop.f32.mrf.mxu0 }
 0x1f1   : > { %1074 = vmax.xlane.f32.xlu1 %v1073_v6 }
 0x1f2   : > { %v6797_v56 = vpop.f32.mrf.mxu0 }
 0x1f3   : > { %v1076_v62 = vmax.f32 %v6795_v53, %v6797_v56 }
 0x1f4   : > { %v6801_v7 = vpop.f32.mrf.mxu0  ;;  %5824 = vmatmul.mubr.msk.bf16.gmra.mxu0 %vm794_vm1, %v1563_v54 }
 0x1f5   : > { %1077 = vmax.xlane.f32.xlu1 %v1076_v62  ;;  %1765 = vmatprep.mubr.bf16.mxu0 %v9523_v1  ;;  %v1566_v62 = vpop.trf.xlu0 }
 0x1f6   : > { %v6805_v15 = vpop.f32.mrf.mxu0 }
 0x1f7   : > { %v1079_v21 = vmax.f32 %v6801_v7, %v6805_v15 }
 0x1f8   : > { %v6809_v23 = vpop.f32.mrf.mxu0 }
 0x1f9   : > { %1080 = vmax.xlane.f32.xlu1 %v1079_v21 }
 0x1fa   : > { %v6811_v28 = vpop.f32.mrf.mxu0 }
 0x1fb   : > { %v1082_v38 = vmax.f32 %v6809_v23, %v6811_v28 }
 0x1fc   : > { %v6815_v41 = vpop.f32.mrf.mxu0  ;;  %5825 = vmatmul.mubr.msk.bf16.gmra.mxu0 %vm794_vm1, %v1564_v26 }
 0x1fd   : > { %1083 = vmax.xlane.f32.xlu1 %v1082_v38  ;;  %1775 = vmatprep.mubr.bf16.mxu0 %v9523_v1 }
 0x1fe   : > { %v6819_v43 = vpop.f32.mrf.mxu0 }
 0x1ff   : > { %v1085_v45 = vmax.f32 %v6815_v41, %v6819_v43 }
 0x200   : > { %v6823_v48 = vpop.f32.mrf.mxu0 }
 0x201   : > { %1086 = vmax.xlane.f32.xlu1 %v1085_v45 }
 0x202   : > { %v6825_v55 = vpop.f32.mrf.mxu0 }
 0x203   : > { %v1088_v51 = vmax.f32 %v6823_v48, %v6825_v55 }
 0x204   : > { %v6829_v60 = vpop.f32.mrf.mxu0  ;;  %5826 = vmatmul.mubr.msk.bf16.gmra.mxu0 %vm794_vm1, %v1565_v50 }
 0x205   : > { %9797 = vst [vmem:[#allocation19_spill] sm:$0xff] %v6829_v60  ;;  %1089 = vmax.xlane.f32.xlu0 %v1088_v51  ;;  %1785 = vmatprep.mubr.bf16.mxu0 %v9523_v1 }
 0x206   : > { %v6833_v63 = vpop.f32.mrf.mxu0 }
 0x207   : > { %9798 = vst [vmem:[#allocation20_spill] sm:$0xff] %v6833_v63  ;;  %v1091_v6 = vmax.f32 %v6829_v60, %v6833_v63  ;;  %v9828_v63 = vmov 2  }
 0x208   : > { %v6837_v54 = vpop.f32.mrf.mxu0 }
 0x209   : > { %9799 = vst [vmem:[#allocation21_spill] sm:$0xff] %v6837_v54  ;;  %1092 = vmax.xlane.f32.xlu0 %v1091_v6  ;;  %v1567_v6 = vpop.trf.xlu0 }
 0x20a   : > { %v6839_v21 = vpop.f32.mrf.mxu0 }
 0x20b   : > { %9800 = vst [vmem:[#allocation22_spill] sm:$0xff] %v6839_v21  ;;  %v1094_v26 = vmax.f32 %v6837_v54, %v6839_v21  ;;  %v6930_v54 = vld [vmem:[%s9490_s5] sm:$0x7] }
 0x20c   : > { %v6843_v38 = vpop.f32.mrf.mxu0  ;;  %5827 = vmatmul.mubr.msk.bf16.gmra.mxu0 %vm794_vm1, %v1566_v62 }
 0x20d   : > { %9801 = vst [vmem:[#allocation23_spill] sm:$0xff] %v6843_v38  ;;  %1095 = vmax.xlane.f32.xlu1 %v1094_v26  ;;  %1795 = vmatprep.mubr.bf16.mxu0 %v9523_v1 }
 0x20e   : > { %v6847_v45 = vpop.f32.mrf.mxu0 }
 0x20f   : > { %9802 = vst [vmem:[#allocation24_spill] sm:$0xff] %v6847_v45  ;;  %v1097_v50 = vmax.f32 %v6843_v38, %v6847_v45 }
 0x210   : > { %v6851_v51 = vpop.f32.mrf.mxu0 }
 0x211   : > { %9803 = vst [vmem:[#allocation25_spill] sm:$0xff] %v6851_v51  ;;  %1098 = vmax.xlane.f32.xlu0 %v1097_v50  ;;  %v1568_v50 = vpop.trf.xlu0 }
 0x212   : > { %v6853_v3 = vpop.f32.mrf.mxu0 }
 0x213   : > { %9804 = vst [vmem:[#allocation26_spill] sm:$0xff] %v6853_v3  ;;  %v1100_v2 = vmax.f32 %v6851_v51, %v6853_v3 }
 0x214   : > { %v6857_v4 = vpop.f32.mrf.mxu0  ;;  %5828 = vmatmul.mubr.msk.bf16.gmra.mxu0 %vm794_vm1, %v1567_v6 }
 0x215   : > { %9805 = vst [vmem:[#allocation27_spill] sm:$0xff] %v6857_v4  ;;  %1101 = vmax.xlane.f32.xlu1 %v1100_v2  ;;  %1805 = vmatprep.mubr.bf16.mxu0 %v9523_v1 }
 0x216   : > { %v6861_v62 = vpop.f32.mrf.mxu0 }
 0x217   : > { %9806 = vst [vmem:[#allocation28_spill] sm:$0xff] %v6861_v62  ;;  %v1103_v26 = vmax.f32 %v6857_v4, %v6861_v62 }
 0x218   : > { %v6865_v19 = vpop.f32.mrf.mxu0 }
 0x219   : > { %9807 = vst [vmem:[#allocation29_spill] sm:$0xff] %v6865_v19  ;;  %1104 = vmax.xlane.f32.xlu0 %v1103_v26 }
 0x21a   : > { %v6867_v18 = vpop.f32.mrf.mxu0 }
 0x21b   : > { %9808 = vst [vmem:[#allocation30_spill] sm:$0xff] %v6867_v18  ;;  %v1106_v17 = vmax.f32 %v6865_v19, %v6867_v18 }
 0x21c   : > { %v6871_v14 = vpop.f32.mrf.mxu0  ;;  %5829 = vmatmul.mubr.msk.bf16.gmra.mxu0 %vm794_vm1, %v1568_v50 }
 0x21d   : > { %9809 = vst [vmem:[#allocation31_spill] sm:$0xff] %v6871_v14  ;;  %1107 = vmax.xlane.f32.xlu1 %v1106_v17  ;;  %3472 = vmatprep.mubr.bf16.mxu0 %v9523_v1 }
 0x21e   : > { %v6875_v2 = vpop.f32.mrf.mxu0 }
 0x21f   : > { %9810 = vst [vmem:[#allocation32_spill] sm:$0xff] %v6875_v2  ;;  %v1109_v6 = vmax.f32 %v6871_v14, %v6875_v2 }
 0x220   : > { %v6879_v12 = vpop.f32.mrf.mxu0 }
 0x221   : > { %9811 = vst [vmem:[#allocation33_spill] sm:$0xff] %v6879_v12  ;;  %1110 = vmax.xlane.f32.xlu0 %v1109_v6 }
 0x222   : > { %v6881_v26 = vpop.f32.mrf.mxu0 }
 0x223   : > { %9812 = vst [vmem:[#allocation34_spill] sm:$0xff] %v6881_v26  ;;  %v1112_v10 = vmax.f32 %v6879_v12, %v6881_v26 }
 0x224   : > { %v6885_v13 = vpop.f32.mrf.mxu0 }
 0x225   : > { %9813 = vst [vmem:[#allocation35_spill] sm:$0xff] %v6885_v13  ;;  %1113 = vmax.xlane.f32.xlu1 %v1112_v10 }
 0x226   : > { %v6887_v50 = vpop.f32.mrf.mxu0 }
 0x227   : > { %9814 = vst [vmem:[#allocation36_spill] sm:$0xff] %v6887_v50  ;;  %v1115_v17 = vmax.f32 %v6885_v13, %v6887_v50 }
 0x228   : > { %v6891_v1 = vpop.f32.mrf.mxu0 }
 0x229   : > { %9815 = vst [vmem:[#allocation37_spill] sm:$0xff] %v6891_v1  ;;  %1116 = vmax.xlane.f32.xlu0 %v1115_v17 }
 0x22a   : > { %v6893_v11 = vpop.f32.mrf.mxu0 }
 0x22b   : > { %9816 = vst [vmem:[#allocation38_spill] sm:$0xff] %v6893_v11  ;;  %v1118_v6 = vmax.f32 %v6891_v1, %v6893_v11 }
 0x22c   : > { %v6897_v16 = vpop.f32.mrf.mxu0 }
 0x22d   : > { %9817 = vst [vmem:[#allocation39_spill] sm:$0xff] %v6897_v16  ;;  %1119 = vmax.xlane.f32.xlu1 %v1118_v6 }
 0x22e   : > { %v6899_v37 = vpop.f32.mrf.mxu0 }
 0x22f   : > { %9818 = vst [vmem:[#allocation40_spill] sm:$0xff] %v6899_v37  ;;  %v1121_v10 = vmax.f32 %v6897_v16, %v6899_v37 }
 0x230   : > { %v6903_v36 = vpop.f32.mrf.mxu0 }
 0x231   : > { %9819 = vst [vmem:[#allocation41_spill] sm:$0xff] %v6903_v36  ;;  %1122 = vmax.xlane.f32.xlu0 %v1121_v10 }
 0x232   : > { %v6905_v35 = vpop.f32.mrf.mxu0 }
 0x233   : > { %9820 = vst [vmem:[#allocation42_spill] sm:$0xff] %v6905_v35  ;;  %v1124_v17 = vmax.f32 %v6903_v36, %v6905_v35 }
 0x234   : > { %v6909_v34 = vpop.f32.mrf.mxu0 }
 0x235   : > { %9821 = vst [vmem:[#allocation43_spill] sm:$0xff] %v6909_v34  ;;  %1125 = vmax.xlane.f32.xlu1 %v1124_v17 }
 0x236   : > { %v6911_v33 = vpop.f32.mrf.mxu0 }
 0x237   : > { %9822 = vst [vmem:[#allocation44_spill] sm:$0xff] %v6911_v33  ;;  %v1127_v6 = vmax.f32 %v6909_v34, %v6911_v33 }
 0x238   : > { %v6915_v32 = vpop.f32.mrf.mxu0 }
 0x239   : > { %9823 = vst [vmem:[#allocation45_spill] sm:$0xff] %v6915_v32  ;;  %1128 = vmax.xlane.f32.xlu0 %v1127_v6  ;;  %v9827_v6 = vmov 3  }
 0x23a   : > { %v6917_v31 = vpop.f32.mrf.mxu0 }
 0x23b   : > { %9824 = vst [vmem:[#allocation46_spill] sm:$0xff] %v6917_v31  ;;  %v1130_v10 = vmax.f32 %v6915_v32, %v6917_v31 }
 0x23c   : > { %v6921_v30 = vpop.f32.mrf.mxu0 }
 0x23d   : > { %9825 = vst [vmem:[#allocation47_spill] sm:$0xff] %v6921_v30  ;;  %1131 = vmax.xlane.f32.xlu1 %v1130_v10 }
 0x23e   : > { %v6923_v60 = vpop.f32.mrf.mxu0 }
 0x23f   : > { %9826 = vst [vmem:[#allocation48_spill] sm:$0xff] %v6923_v60  ;;  %v1133_v17 = vmax.f32 %v6921_v30, %v6923_v60 }
 0x240   : > { %v6936_v10 = vpop.f32.mrf.mxu0 }
 0x241   : > { %1134 = vmax.xlane.f32.xlu0 %v1133_v17  ;;  %9829 = vst [vmem:[#allocation49_spill] sm:$0xff] %v6936_v10 }
 0x242   : > { %v6938_v38 = vpop.f32.mrf.mxu0 }
 0x243   : > { %9830 = vst [vmem:[#allocation50_spill] sm:$0xff] %v6938_v38 }
 0x24e   : > { %728 = vperm.xlu1 %5957, %v6930_v54  }
 0x252   : > { %5959 = vset.pattern.permute.xlu1 %v9827_v6  ;;  %v6974_v13 = vpop.xlane.xlu0 %1044 }
 0x256   : > { %v6942_v17 = vpop.xlane.xlu1 %1047 }
 0x257   : > { %722 = vperm.xlu0 %5952, %v6930_v54  }
 0x25a   : > { %v6982_v50 = vpop.xlane.xlu0 %1050 }
 0x25b   : > { %5958 = vset.pattern.permute.xlu0 %v9828_v63 }
 0x25e   : > { %v6948_v4 = vpop.xlane.xlu1 %1053 }
 0x264   : > { %v6940_v21 = vpop.f32.mrf.mxu0 }
 0x265   : > { %9831 = vst [vmem:[#allocation51_spill] sm:$0xff] %v6940_v21  ;;  %v1136_v21 = vmax.f32 %v6936_v10, %v6938_v38 }
 0x266   : > { %v6944_v51 = vpop.f32.mrf.mxu0  ;;  %v6954_v19 = vpop.xlane.xlu1 %1059 }
 0x267   : > { %9832 = vst [vmem:[#allocation52_spill] sm:$0xff] %v6944_v51 }
 0x268   : > { %v6946_v45 = vpop.f32.mrf.mxu0 }
 0x269   : > { %9833 = vst [vmem:[#allocation53_spill] sm:$0xff] %v6946_v45 }
 0x26a   : > { %v6950_v3 = vpop.f32.mrf.mxu0 }
 0x26b   : > { %9834 = vst [vmem:[#allocation54_spill] sm:$0xff] %v6950_v3 }
 0x26c   : > { %v6952_v6 = vpop.f32.mrf.mxu0 }
 0x26d   : > { %9835 = vst [vmem:[#allocation55_spill] sm:$0xff] %v6952_v6 }
 0x26e   : > { %v6956_v63 = vpop.f32.mrf.mxu0  ;;  %v6962_v14 = vpop.xlane.xlu1 %1065 }
 0x26f   : > { %9836 = vst [vmem:[#allocation56_spill] sm:$0xff] %v6956_v63 }
 0x270   : > { %v6958_v62 = vpop.f32.mrf.mxu0 }
 0x271   : > { %9837 = vst [vmem:[#allocation57_spill] sm:$0xff] %v6958_v62 }
 0x272   : > { %1137 = vmax.xlane.f32.xlu1 %v1136_v21  ;;  %v6964_v51 = vpop.f32.mrf.mxu0 }
 0x273   : > { %9838 = vst [vmem:[#allocation58_spill] sm:$0xff] %v6964_v51 }
 0x274   : > { %v6966_v18 = vpop.f32.mrf.mxu0 }
 0x275   : > { %9839 = vst [vmem:[#allocation59_spill] sm:$0xff] %v6966_v18 }
 0x276   : > { %v6968_v12 = vpop.f32.mrf.mxu0  ;;  %v6970_v2 = vpop.xlane.xlu1 %1071 }
 0x277   : > { %9840 = vst [vmem:[#allocation60_spill] sm:$0xff] %v6968_v12  ;;  %v6988_v12 = vpop.xlane.xlu0 %1056 }
 0x278   : > { %v6972_v6 = vpop.f32.mrf.mxu0 }
 0x279   : > { %9841 = vst [vmem:[#allocation61_spill] sm:$0xff] %v6972_v6 }
 0x27a   : > { %v6976_v63 = vpop.f32.mrf.mxu0  ;;  %v6978_v26 = vpop.xlane.xlu1 %1074 }
 0x27b   : > { %9842 = vst [vmem:[#allocation62_spill] sm:$0xff] %v6976_v63  ;;  %v6994_v37 = vpop.xlane.xlu0 %1062 }
 0x27c   : > { %v6980_v1 = vpop.f32.mrf.mxu0 }
 0x27d   : > { %9843 = vst [vmem:[#allocation63_spill] sm:$0xff] %v6980_v1 }
 0x27e   : > { %v6984_v21 = vpop.f32.mrf.mxu0  ;;  %v1078_v16 = vpop.xlane.xlu1 %1077 }
 0x27f   : > { %9844 = vst [vmem:[#allocation64_spill] sm:$0xff] %v6984_v21  ;;  %v7000_v35 = vpop.xlane.xlu0 %1068 }
 0x280   : > { %v6986_v18 = vpop.f32.mrf.mxu0 }
 0x281   : > { %9845 = vst [vmem:[#allocation65_spill] sm:$0xff] %v6986_v18 }
 0x282   : > { %v6990_v11 = vpop.f32.mrf.mxu0  ;;  %v1081_v6 = vpop.xlane.xlu1 %1080 }
 0x283   : > { %9846 = vst [vmem:[#allocation66_spill] sm:$0xff] %v6990_v11  ;;  %v1164_v11 = vsub.f32 %v6805_v15, %v1081_v6 }
 0x284   : > { %v6992_v36 = vpop.f32.mrf.mxu0 }
 0x285   : > { %9847 = vst [vmem:[#allocation67_spill] sm:$0xff] %v6992_v36 }
 0x286   : > { %v6996_v63 = vpop.f32.mrf.mxu0  ;;  %v1084_v34 = vpop.xlane.xlu1 %1083 }
 0x287   : > { %9848 = vst [vmem:[#allocation68_spill] sm:$0xff] %v6996_v63  ;;  %v1166_v18 = vsub.f32 %v6811_v28, %v1084_v34 }
 0x288   : > { %v6998_v1 = vpop.f32.mrf.mxu0 }
 0x289   : > { %9849 = vst [vmem:[#allocation69_spill] sm:$0xff] %v6998_v1  ;;  %v1216_v45 = vpack.c.bf16 %v1166_v18, %v1164_v11  ;;  %v1163_v11 = vsub.f32 %v6801_v7, %v1081_v6  ;;  %v1160_v18 = vsub.f32 %v6791_v5, %v6978_v26  ;;  %v1158_v5 = vsub.f32 %v6783_v61, %v6970_v2 }
 0x28a   : > { %v7002_v21 = vpop.f32.mrf.mxu0  ;;  %v1087_v32 = vpop.xlane.xlu1 %1086  ;;  %v1156_v6 = vsub.f32 %v6777_v58, %v7000_v35 }
 0x28b   : > { %9850 = vst [vmem:[#allocation70_spill] sm:$0xff] %v7002_v21  ;;  %v1167_v36 = vsub.f32 %v6815_v41, %v1087_v32  ;;  %v1168_v63 = vsub.f32 %v6819_v43, %v1087_v32  ;;  %v1165_v41 = vsub.f32 %v6809_v23, %v1084_v34  ;;  %v1162_v43 = vsub.f32 %v6797_v56, %v1078_v16 }
 0x28c   : > { %v7005_v38 = vpop.f32.mrf.mxu0  ;;  %v1161_v56 = vsub.f32 %v6795_v53, %v1078_v16  ;;  %v1212_v53 = vpack.c.bf16 %v1158_v5, %v1156_v6  ;;  %v1148_v6 = vsub.f32 %v6749_v40, %v6988_v12  ;;  %v1146_v40 = vsub.f32 %v6741_v29, %v6948_v4 }
 0x28d   : > { %9851 = vst [vmem:[#allocation71_spill] sm:$0xff] %v7005_v38 }
 0x28e   : > { %v1090_v10 = vpop.xlane.xlu0 %1089  ;;  %v7009_v60 = vpop.f32.mrf.mxu0 }
 0x28f   : > { %9852 = vst [vmem:[#allocation72_spill] sm:$0xff] %v7009_v60  ;;  %v1169_v30 = vsub.f32 %v6823_v48, %v1090_v10  ;;  %v1170_v33 = vsub.f32 %v6825_v55, %v1090_v10  ;;  %v1846_v31 = vmax.f32 %v7005_v38, %v7009_v60  ;;  %v1275_v48 = vmul.bf16 1069105081, %v1216_v45  ;;  %v9887_v38 = vld [vmem:[#allocation49_spill] sm:$0xff] }
 0x290   : > { %v7016_v28 = vpop.f32.mrf.mxu0  ;;  %v9889_v60 = vld [vmem:[#allocation45_spill] sm:$0xff] }
 0x291   : > { %9853 = vst [vmem:[#allocation73_spill] sm:$0xff] %v7016_v28  ;;  %v1217_v3 = vpack.c.bf16 %v1169_v30, %v1167_v36  ;;  %1847 = vmax.xlane.f32.xlu1 %v1846_v31  ;;  %v1218_v15 = vpack.c.bf16 %v1170_v33, %v1168_v63  ;;  %v1214_v33 = vpack.c.bf16 %v1162_v43, %v1160_v18 }
 0x292   : > { %v7018_v62 = vpop.f32.mrf.mxu0  ;;  %v1155_v18 = vsub.f32 %v6773_v57, %v7000_v35  ;;  %v1153_v35 = vsub.f32 %v6767_v49, %v6962_v14 }
 0x293   : > { %9854 = vst [vmem:[#allocation74_spill] sm:$0xff] %v7018_v62  ;;  %v1278_v51 = vmul.bf16 1069105081, %v1217_v3  ;;  %v1849_v32 = vmax.f32 %v7016_v28, %v7018_v62  ;;  %v1281_v10 = vmul.bf16 1069105081, %v1218_v15  ;;  %v1215_v3 = vpack.c.bf16 %v1165_v41, %v1163_v11 }
 0x294   : > { %v7024_v55 = vpop.f32.mrf.mxu0  ;;  %v1269_v23 = vmul.bf16 1069105081, %v1214_v33 }
 0x295   : > { %9855 = vst [vmem:[#allocation75_spill] sm:$0xff] %v7024_v55  ;;  %6089 = vpow.bf16 %v1278_v51  ;;  %1850 = vmax.xlane.f32.xlu0 %v1849_v32  ;;  %v1272_v7 = vmul.bf16 1069105081, %v1215_v3  ;;  %v1159_v51 = vsub.f32 %v6787_v0, %v6978_v26  ;;  %v1157_v0 = vsub.f32 %v6781_v59, %v6970_v2 }
 0x296   : > { %v7029_v30 = vpop.f32.mrf.mxu0  ;;  %6091 = vpow.bf16 %v1281_v10  ;;  %v1263_v10 = vmul.bf16 1069105081, %v1212_v53  ;;  %v9864_v53 = vmov 0  }
 0x297   : > { %v1852_v31 = vmax.f32 %v7024_v55, %v7029_v30  ;;  %6093 = vpow.bf16 %v1275_v48  ;;  %v1213_v16 = vpack.c.bf16 %v1161_v56, %v1159_v51  ;;  %v1154_v48 = vsub.f32 %v6769_v52, %v6962_v14  ;;  %v9890_v55 = vld [vmem:[#allocation42_spill] sm:$0xff] }
 0x298   : > { %v7033_v34 = vpop.f32.mrf.mxu0  ;;  %6095 = vpow.bf16 %v1272_v7  ;;  %v1211_v59 = vpack.c.bf16 %v1157_v0, %v1155_v18  ;;  %v1150_v7 = vsub.f32 %v6755_v44, %v6954_v19 }
 0x299   : > { %1853 = vmax.xlane.f32.xlu0 %v1852_v31  ;;  %6097 = vpow.bf16 %v1269_v23  ;;  %v1266_v58 = vmul.bf16 1069105081, %v1213_v16  ;;  %v1152_v31 = vsub.f32 %v6763_v47, %v6994_v37 }
 0x29a   : > { %v7035_v36 = vpop.f32.mrf.mxu0  ;;  %v1260_v57 = vmul.bf16 1069105081, %v1211_v59  ;;  %v1208_v14 = vpack.c.bf16 %v1150_v7, %v1148_v6  ;;  %v1140_v7 = vsub.f32 %v6721_v9, %v6974_v13  ;;  %v1139_v6 = vsub.f32 %v6717_v8, %v6974_v13 }
 0x29b   : > { %v1855_v45 = vmax.f32 %v7033_v34, %v7035_v36  ;;  %6099 = vpow.bf16 %v1266_v58  ;;  %v1210_v2 = vpack.c.bf16 %v1154_v48, %v1152_v31  ;;  %v9868_v31 = vmov 1  }
 0x29c   : > { %v7040_v63 = vpop.f32.mrf.mxu0  ;;  %6101 = vpow.bf16 %v1263_v10  ;;  %v1144_v10 = vsub.f32 %v6735_v25, %v6982_v50  ;;  %v1142_v25 = vsub.f32 %v6727_v22, %v6942_v17 }
 0x29d   : > { %1856 = vmax.xlane.f32.xlu1 %v1855_v45  ;;  %v1257_v47 = vmul.bf16 1069105081, %v1210_v2  ;;  %v1151_v45 = vsub.f32 %v6759_v46, %v6994_v37  ;;  %6103 = vpow.bf16 %v1260_v57  ;;  %v1149_v37 = vsub.f32 %v6753_v42, %v6954_v19 }
 0x29e   : > { %v7048_v15 = vpop.f32.mrf.mxu0  ;;  %v1206_v29 = vpack.c.bf16 %v1146_v40, %v1144_v10 }
 0x29f   : > { %v1858_v61 = vmax.f32 %v7040_v63, %v7048_v15  ;;  %6105 = vpow.bf16 %v1257_v47 }
 0x2a0   : > { %v7052_v41 = vpop.f32.mrf.mxu0  ;;  %v1245_v59 = vmul.bf16 1069105081, %v1206_v29 }
 0x2a1   : > { %1859 = vmax.xlane.f32.xlu0 %v1858_v61  ;;  %v1209_v61 = vpack.c.bf16 %v1153_v35, %v1151_v45  ;;  %v1141_v45 = vsub.f32 %v6725_v20, %v6942_v17 }
 0x2a2   : > { %v7054_v32 = vpop.f32.mrf.mxu0 }
 0x2a3   : > { %v6090_v43 = vpop.eup %6089  ;;  %v1254_v46 = vmul.bf16 1069105081, %v1209_v61  ;;  %v1861_v8 = vmax.f32 %v7052_v41, %v7054_v32 }
 0x2a4   : > { %v6092_v26 = vpop.eup %6091  ;;  %v7060_v11 = vpop.f32.mrf.mxu0 }
 0x2a5   : > { %9856 = vst [vmem:[#allocation76_spill] sm:$0xff] %v7060_v11  ;;  %1333 = vmatprep.subr.bf16.mxu1 %v6092_v26  ;;  %v6094_v3 = vpop.eup %6093  ;;  %v1147_v26 = vsub.f32 %v6745_v39, %v6988_v12  ;;  %6107 = vpow.bf16 %v1254_v46  ;;  %v1145_v12 = vsub.f32 %v6739_v27, %v6948_v4  ;;  %v1204_v27 = vpack.c.bf16 %v1142_v25, %v1140_v7  ;;  %v7158_v7 = vpop.xlane.xlu1 %1095 }
 0x2a6   : > { %1334 = vmatpush1.bf16.xpose.msra.mxu1 %v6090_v43  ;;  %v7066_v33 = vpop.f32.mrf.mxu0  ;;  %v6096_v23 = vpop.eup %6095  ;;  %v1251_v43 = vmul.bf16 1069105081, %v1208_v14 }
 0x2a7   : > { %9857 = vst [vmem:[#allocation77_spill] sm:$0xff] %v7066_v33  ;;  %1335 = vmatprep.subr.bf16.mxu1 %v6094_v3  ;;  %v6098_v51 = vpop.eup %6097  ;;  %v1207_v19 = vpack.c.bf16 %v1149_v37, %v1147_v26  ;;  %v1203_v37 = vpack.c.bf16 %v1141_v45, %v1139_v6  ;;  %v9880_v45 = vld [vmem:[#allocation53_spill] sm:$0xff] }
 0x2a8   : > { %v7068_v52 = vpop.f32.mrf.mxu0  ;;  %6109 = vpow.bf16 %v1251_v43 }
 0x2a9   : > { %9858 = vst [vmem:[#allocation78_spill] sm:$0xff] %v7068_v52  ;;  %v6100_v58 = vpop.eup %6099  ;;  %v1248_v39 = vmul.bf16 1069105081, %v1207_v19  ;;  %v1236_v20 = vmul.bf16 1069105081, %v1203_v37  ;;  %v1843_v19 = vmax.f32 %v6998_v1, %v7002_v21 }
 0x2aa   : > { %v7070_v56 = vpop.f32.mrf.mxu0  ;;  %v6102_v48 = vpop.eup %6101 }
 0x2ab   : > { %9859 = vst [vmem:[#allocation79_spill] sm:$0xff] %v7070_v56  ;;  %v6104_v35 = vpop.eup %6103  ;;  %6111 = vpow.bf16 %v1248_v39 }
 0x2ac   : > { %v7076_v5 = vpop.f32.mrf.mxu0  ;;  %6113 = vpow.bf16 %v1245_v59  ;;  %v9876_v59 = vld [vmem:[#allocation58_spill] sm:$0xff] }
 0x2ad   : > { %9860 = vst [vmem:[#allocation80_spill] sm:$0xff] %v7076_v5  ;;  %v6106_v57 = vpop.eup %6105 }
 0x2ae   : > { %1336 = vmatpush1.bf16.xpose.msra.mxu1 %v6096_v23  ;;  %v7082_v16 = vpop.f32.mrf.mxu0  ;;  %744 = vperm.xlu1 %5959, %v6930_v54  }
 0x2af   : > { %9861 = vst [vmem:[#allocation81_spill] sm:$0xff] %v7082_v16  ;;  %1337 = vmatprep.subr.bf16.mxu1 %v6098_v51 }
 0x2b0   : > { %v7085_v44 = vpop.f32.mrf.mxu0 }
 0x2b1   : > { %9862 = vst [vmem:[#allocation82_spill] sm:$0xff] %v7085_v44 }
 0x2b2   : > { %v7087_v49 = vpop.f32.mrf.mxu0  ;;  %5960 = vset.pattern.permute.xlu1 %v9864_v53 }
 0x2b3   : > { %9863 = vst [vmem:[#allocation83_spill] sm:$0xff] %v7087_v49  ;;  %v6108_v9 = vpop.eup %6107 }
 0x2b4   : > { %v7094_v0 = vpop.f32.mrf.mxu0 }
 0x2b5   : > { %9865 = vst [vmem:[#allocation84_spill] sm:$0xff] %v7094_v0 }
 0x2b6   : > { %1338 = vmatpush1.bf16.xpose.msra.mxu1 %v6100_v58  ;;  %v7100_v18 = vpop.f32.mrf.mxu0  ;;  %v6110_v61 = vpop.eup %6109 }
 0x2b7   : > { %1339 = vmatprep.subr.bf16.mxu1 %v6102_v48  ;;  %736 = vperm.xlu0 %5958, %v6930_v54   ;;  %v1143_v54 = vsub.f32 %v6731_v24, %v6982_v50  ;;  %v1239_v50 = vmul.bf16 1069105081, %v1204_v27  ;;  %v9879_v27 = vld [vmem:[#allocation54_spill] sm:$0xff] }
 0x2b8   : > { %v7103_v42 = vpop.f32.mrf.mxu0 }
 0x2b9   : > { %9866 = vst [vmem:[#allocation85_spill] sm:$0xff] %v7103_v42  ;;  %v1205_v4 = vpack.c.bf16 %v1145_v12, %v1143_v54  ;;  %v6112_v43 = vpop.eup %6111 }
 0x2ba   : > { %v7105_v3 = vpop.f32.mrf.mxu0  ;;  %v6114_v58 = vpop.eup %6113 }
 0x2bb   : > { %9867 = vst [vmem:[#allocation86_spill] sm:$0xff] %v7105_v3  ;;  %5961 = vset.pattern.permute.xlu0 %v9868_v31  ;;  %v1242_v24 = vmul.bf16 1069105081, %v1205_v4 }
 0x2bc   : > { %v7112_v2 = vpop.f32.mrf.mxu0 }
 0x2bd   : > { %6115 = vpow.bf16 %v1242_v24  ;;  %v1819_v24 = vmax.f32 %v9880_v45, %v9879_v27 }
 0x2be   : > { %1340 = vmatpush1.bf16.xpose.msra.mxu1 %v6104_v35  ;;  %v7118_v47 = vpop.f32.mrf.mxu0  ;;  %6117 = vpow.bf16 %v1239_v50  ;;  %v9877_v35 = vld [vmem:[#allocation57_spill] sm:$0xff] }
 0x2bf   : > { %1341 = vmatprep.subr.bf16.mxu1 %v6106_v57  ;;  %6119 = vpow.bf16 %v1236_v20  ;;  %v1825_v54 = vmax.f32 %v9877_v35, %v9876_v59 }
 0x2c0   : > { %v7120_v22 = vpop.f32.mrf.mxu0 }
 0x2c1   : > { %9869 = vst [vmem:[#allocation87_spill] sm:$0xff] %v7120_v22 }
 0x2c2   : > { %v7122_v23 = vpop.f32.mrf.mxu0 }
 0x2c3   : > { %9870 = vst [vmem:[#allocation88_spill] sm:$0xff] %v7122_v23 }
 0x2c4   : > { %v7126_v51 = vpop.f32.mrf.mxu0 }
 0x2c6   : > { %1342 = vmatpush1.bf16.xpose.msra.mxu1 %v6108_v9  ;;  %v7130_v14 = vpop.f32.mrf.mxu0  ;;  %v7164_v9 = vpop.xlane.xlu0 %1092 }
 0x2c7   : > { %1343 = vmatprep.subr.bf16.mxu1 %v6110_v61  ;;  %v7168_v61 = vpop.xlane.xlu1 %1101 }
 0x2c8   : > { %v7132_v46 = vpop.f32.mrf.mxu0 }
 0x2c9   : > { %9871 = vst [vmem:[#allocation89_spill] sm:$0xff] %v7132_v46 }
 0x2ca   : > { %v7134_v40 = vpop.f32.mrf.mxu0  ;;  %v7172_v20 = vpop.xlane.xlu0 %1098 }
 0x2cb   : > { %9872 = vst [vmem:[#allocation90_spill] sm:$0xff] %v7134_v40  ;;  %v6116_v29 = vpop.eup %6115 }
 0x2cc   : > { %v7136_v17 = vpop.f32.mrf.mxu0  ;;  %v6118_v12 = vpop.eup %6117 }
 0x2cd   : > { %v6120_v50 = vpop.eup %6119 }
 0x2ce   : > { %1344 = vmatpush1.bf16.xpose.msra.mxu1 %v6112_v43  ;;  %v7138_v26 = vpop.f32.mrf.mxu0  ;;  %v561_v43 = vld [vmem:[%s9491_s6] sm:$0x7] }
 0x2cf   : > { %1345 = vmatprep.subr.bf16.mxu1 %v6114_v58 }
 0x2d0   : > { %v7140_v13 = vpop.f32.mrf.mxu0 }
 0x2d1   : > { %9873 = vst [vmem:[#allocation91_spill] sm:$0xff] %v7140_v13 }
 0x2d2   : > { %v7144_v48 = vpop.f32.mrf.mxu0  ;;  %1862 = vmax.xlane.f32.xlu1 %v1861_v8  ;;  %v7179_v8 = vpop.xlane.xlu1 %1107 }
 0x2d3   : > { %9874 = vst [vmem:[#allocation92_spill] sm:$0xff] %v7144_v48 }
 0x2d4   : > { %v7146_v10 = vpop.f32.mrf.mxu0 }
 0x2d6   : > { %1346 = vmatpush1.bf16.xpose.msra.mxu1 %v6116_v29  ;;  %1844 = vmax.xlane.f32.xlu0 %v1843_v19  ;;  %v7150_v39 = vpop.f32.mrf.mxu0  ;;  %v7183_v29 = vpop.xlane.xlu0 %1104 }
 0x2d7   : > { %1347 = vmatprep.subr.bf16.mxu1 %v6118_v12 }
 0x2d8   : > { %v7152_v25 = vpop.f32.mrf.mxu0 }
 0x2d9   : > { %9875 = vst [vmem:[#allocation93_spill] sm:$0xff] %v7152_v25 }
 0x2da   : > { %1826 = vmax.xlane.f32.xlu0 %v1825_v54  ;;  %v7156_v57 = vpop.f32.mrf.mxu0  ;;  %v7187_v54 = vpop.xlane.xlu1 %1113 }
 0x2db   : > { %9878 = vst [vmem:[#allocation94_spill] sm:$0xff] %v7156_v57  ;;  %v1903_v12 = vmax.f32 %v7152_v25, %v7156_v57  ;;  %v1885_v25 = vmax.f32 %v7120_v22, %v7122_v23  ;;  %v9885_v22 = vld [vmem:[#allocation47_spill] sm:$0xff]  ;;  %v9886_v23 = vld [vmem:[#allocation48_spill] sm:$0xff] }
 0x2dc   : > { %v7160_v4 = vpop.f32.mrf.mxu0 }
 0x2de   : > { %1348 = vmatpush1.bf16.xpose.msra.mxu1 %v6120_v50  ;;  %1820 = vmax.xlane.f32.xlu0 %v1819_v24  ;;  %v7166_v6 = vpop.f32.mrf.mxu0  ;;  %v7189_v24 = vpop.xlane.xlu0 %1110  ;;  %v1897_v50 = vmax.f32 %v7140_v13, %v7144_v48  ;;  %v9883_v48 = vld [vmem:[#allocation46_spill] sm:$0xff] }
 0x2df   : > { %v7193_v45 = vpop.xlane.xlu1 %1119 }
 0x2e0   : > { %v7170_v37 = vpop.f32.mrf.mxu0 }
 0x2e1   : > { %9881 = vst [vmem:[#allocation95_spill] sm:$0xff] %v7170_v37 }
 0x2e2   : > { %v7177_v58 = vpop.f32.mrf.mxu0  ;;  %v7195_v27 = vpop.xlane.xlu0 %1116 }
 0x2e3   : > { %9882 = vst [vmem:[#allocation96_spill] sm:$0xff] %v7177_v58  ;;  %v1909_v19 = vmax.f32 %v7170_v37, %v7177_v58  ;;  %753 = vperm.xlu1 %5960, %v561_v43   ;;  %v1891_v43 = vmax.f32 %v7132_v46, %v7134_v40  ;;  %v1879_v58 = vmax.f32 %v7103_v42, %v7105_v3  ;;  %v9884_v46 = vld [vmem:[#allocation44_spill] sm:$0xff]  ;;  %v9888_v3 = vld [vmem:[#allocation50_spill] sm:$0xff] }
 0x2e5   : > { %1910 = vmax.xlane.f32.xlu0 %v1909_v19  ;;  %v1126_v19 = vpop.xlane.xlu1 %1125 }
 0x2e6   : > { %v1123_v37 = vpop.xlane.xlu0 %1122  ;;  %v1194_v62 = vsub.f32 %v9890_v55, %v1126_v19  ;;  %v9896_v55 = vld [vmem:[#allocation38_spill] sm:$0xff] }
 0x2e9   : > { %1904 = vmax.xlane.f32.xlu0 %v1903_v12  ;;  %v1132_v57 = vpop.xlane.xlu1 %1131 }
 0x2ea   : > { %v1129_v13 = vpop.xlane.xlu0 %1128  ;;  %v1198_v35 = vsub.f32 %v9883_v48, %v1132_v57 }
 0x2eb   : > { %v1196_v40 = vsub.f32 %v9884_v46, %v1129_v13 }
 0x2ed   : > { %1898 = vmax.xlane.f32.xlu0 %v1897_v50  ;;  %v7203_v12 = vpop.permute.xlu1 %728  ;;  %v1873_v50 = vmax.f32 %v7085_v44, %v7087_v49  ;;  %v1232_v28 = vpack.c.bf16 %v1198_v35, %v1196_v40  ;;  %v1197_v44 = vsub.f32 %v9889_v60, %v1132_v57  ;;  %v9894_v40 = vld [vmem:[#allocation67_spill] sm:$0xff] }
 0x2ee   : > { %v1135_v59 = vpop.xlane.xlu0 %1134 }
 0x2ef   : > { %v1200_v1 = vsub.f32 %v9886_v23, %v1135_v59  ;;  %v9891_v23 = vld [vmem:[#allocation43_spill] sm:$0xff] }
 0x2f1   : > { %1892 = vmax.xlane.f32.xlu0 %v1891_v43  ;;  %v1199_v43 = vsub.f32 %v9885_v22, %v1135_v59  ;;  %v1323_v22 = vmul.bf16 1069105081, %v1232_v28  ;;  %v1195_v59 = vsub.f32 %v9891_v23, %v1129_v13  ;;  %v1190_v28 = vsub.f32 %v9896_v55, %v7193_v45  ;;  %v9898_v13 = vld [vmem:[#allocation63_spill] sm:$0xff]  ;;  %v9905_v55 = vld [vmem:[#allocation60_spill] sm:$0xff] }
 0x2f5   : > { %1886 = vmax.xlane.f32.xlu0 %v1885_v25 }
 0x2f9   : > { %1880 = vmax.xlane.f32.xlu0 %v1879_v58  ;;  %v1867_v58 = vmax.f32 %v7068_v52, %v7070_v56 }
 0x2fb   : > { %v1138_v21 = vpop.xlane.xlu1 %1137 }
 0x2fc   : > { %v1201_v42 = vsub.f32 %v9887_v38, %v1138_v21  ;;  %v1202_v25 = vsub.f32 %v9888_v3, %v1138_v21  ;;  %v9892_v38 = vld [vmem:[#allocation40_spill] sm:$0xff]  ;;  %v1231_v3 = vpack.c.bf16 %v1197_v44, %v1195_v59 }
 0x2fd   : > { %1874 = vmax.xlane.f32.xlu0 %v1873_v50  ;;  %v1192_v21 = vsub.f32 %v9892_v38, %v1123_v37  ;;  %v9895_v50 = vld [vmem:[#allocation41_spill] sm:$0xff]  ;;  %v9900_v44 = vld [vmem:[#allocation36_spill] sm:$0xff] }
 0x2fe   : > { %v1233_v31 = vpack.c.bf16 %v1201_v42, %v1199_v43  ;;  %v1234_v48 = vpack.c.bf16 %v1202_v25, %v1200_v1  ;;  %v9893_v1 = vld [vmem:[#allocation68_spill] sm:$0xff]  ;;  %v1193_v60 = vsub.f32 %v9895_v50, %v1126_v19  ;;  %v9899_v25 = vld [vmem:[#allocation39_spill] sm:$0xff]  ;;  %v9901_v19 = vld [vmem:[#allocation66_spill] sm:$0xff] }
 0x2ff   : > { %v1230_v42 = vpack.c.bf16 %v1194_v62, %v1192_v21  ;;  %v1840_v35 = vmax.f32 %v9894_v40, %v9893_v1  ;;  %v9897_v43 = vld [vmem:[#allocation64_spill] sm:$0xff]  ;;  %v1188_v62 = vsub.f32 %v9900_v44, %v7195_v27  ;;  %v9903_v38 = vld [vmem:[#allocation37_spill] sm:$0xff]  ;;  %v7244_v44 = vld [vmem:[%s9490_s5 + $0x4] sm:$0x7] }
 0x300   : > { %v1326_v49 = vmul.bf16 1069105081, %v1233_v31  ;;  %v1329_v46 = vmul.bf16 1069105081, %v1234_v48  ;;  %v1320_v31 = vmul.bf16 1069105081, %v1231_v3  ;;  %v1191_v48 = vsub.f32 %v9899_v25, %v1123_v37 }
 0x301   : > { %1868 = vmax.xlane.f32.xlu0 %v1867_v58  ;;  %v1317_v57 = vmul.bf16 1069105081, %v1230_v42  ;;  %v1189_v21 = vsub.f32 %v9903_v38, %v7193_v45  ;;  %v9904_v37 = vld [vmem:[#allocation34_spill] sm:$0xff]  ;;  %v9908_v25 = vld [vmem:[#allocation32_spill] sm:$0xff] }
 0x302   : > { %6121 = vpow.bf16 %v1326_v49  ;;  %v1834_v49 = vmax.f32 %v9898_v13, %v9897_v43  ;;  %v1229_v58 = vpack.c.bf16 %v1193_v60, %v1191_v48  ;;  %v9906_v60 = vld [vmem:[#allocation59_spill] sm:$0xff]  ;;  %v1184_v48 = vsub.f32 %v9908_v25, %v7189_v24 }
 0x303   : > { %6123 = vpow.bf16 %v1329_v46  ;;  %v1228_v46 = vpack.c.bf16 %v1190_v28, %v1188_v62  ;;  %v9907_v28 = vld [vmem:[#allocation35_spill] sm:$0xff] }
 0x304   : > { %6125 = vpow.bf16 %v1323_v22  ;;  %v9902_v22 = vld [vmem:[#allocation65_spill] sm:$0xff]  ;;  %v1314_v3 = vmul.bf16 1069105081, %v1229_v58  ;;  %v9909_v58 = vld [vmem:[#allocation62_spill] sm:$0xff] }
 0x305   : > { %6127 = vpow.bf16 %v1320_v31  ;;  %v1837_v23 = vmax.f32 %v9902_v22, %v9901_v19  ;;  %v1311_v50 = vmul.bf16 1069105081, %v1228_v46  ;;  %v1828_v31 = vmax.f32 %v9906_v60, %v9905_v55  ;;  %v9910_v46 = vld [vmem:[#allocation61_spill] sm:$0xff] }
 0x306   : > { %6129 = vpow.bf16 %v1317_v57  ;;  %v1187_v57 = vsub.f32 %v9907_v28, %v7195_v27  ;;  %v1831_v27 = vmax.f32 %v9910_v46, %v9909_v58 }
 0x307   : > { %1841 = vmax.xlane.f32.xlu1 %v1840_v35  ;;  %v1186_v35 = vsub.f32 %v9904_v37, %v7187_v54  ;;  %6131 = vpow.bf16 %v1314_v3  ;;  %v9912_v3 = vld [vmem:[#allocation30_spill] sm:$0xff] }
 0x308   : > { %v1227_v45 = vpack.c.bf16 %v1189_v21, %v1187_v57  ;;  %6133 = vpow.bf16 %v1311_v50  ;;  %v7254_v21 = vld [vmem:[%s9494_s9 + $0x18] sm:$0xff]  ;;  %v9913_v50 = vld [vmem:[#allocation56_spill] sm:$0xff]  ;;  %v9915_v57 = vld [vmem:[#allocation31_spill] sm:$0xff] }
 0x309   : > { %v1226_v62 = vpack.c.bf16 %v1186_v35, %v1184_v48 }
 0x30b   : > { %1835 = vmax.xlane.f32.xlu1 %v1834_v49  ;;  %v1305_v37 = vmul.bf16 1069105081, %v1226_v62  ;;  %v9917_v62 = vld [vmem:[#allocation52_spill] sm:$0xff] }
 0x30f   : > { %1838 = vmax.xlane.f32.xlu1 %v1837_v23  ;;  %v9911_v23 = vld [vmem:[#allocation33_spill] sm:$0xff] }
 0x310   : > { %v6122_v59 = vpop.eup %6121  ;;  %v1185_v38 = vsub.f32 %v9911_v23, %v7187_v54  ;;  %v9916_v54 = vld [vmem:[#allocation28_spill] sm:$0xff]  ;;  %v9918_v23 = vld [vmem:[#allocation51_spill] sm:$0xff] }
 0x311   : > { %v6124_v42 = vpop.eup %6123  ;;  %v1180_v48 = vsub.f32 %v9916_v54, %v7183_v29  ;;  %v9922_v54 = vld [vmem:[#allocation24_spill] sm:$0xff] }
 0x312   : > { %1349 = vmatprep.subr.bf16.mxu1 %v6124_v42  ;;  %v6126_v49 = vpop.eup %6125  ;;  %v1182_v42 = vsub.f32 %v9912_v3, %v7179_v8  ;;  %v1816_v3 = vmax.f32 %v9918_v23, %v9917_v62 }
 0x313   : > { %1350 = vmatpush2.bf16.xpose.msra.mxu1 %v6122_v59  ;;  %1829 = vmax.xlane.f32.xlu1 %v1828_v31  ;;  %v1308_v59 = vmul.bf16 1069105081, %v1227_v45  ;;  %v6128_v35 = vpop.eup %6127  ;;  %v9914_v31 = vld [vmem:[#allocation55_spill] sm:$0xff] }
 0x314   : > { %1351 = vmatprep.subr.bf16.mxu1 %v6126_v49  ;;  %v1822_v28 = vmax.f32 %v9914_v31, %v9913_v50  ;;  %v1183_v49 = vsub.f32 %v9915_v57, %v7189_v24  ;;  %v6130_v25 = vpop.eup %6129  ;;  %v9919_v24 = vld [vmem:[#allocation29_spill] sm:$0xff] }
 0x315   : > { %6135 = vpow.bf16 %v1308_v59  ;;  %v1181_v57 = vsub.f32 %v9919_v24, %v7179_v8 }
 0x316   : > { %v1225_v45 = vpack.c.bf16 %v1185_v38, %v1183_v49  ;;  %6137 = vpow.bf16 %v1305_v37  ;;  %v9920_v38 = vld [vmem:[#allocation26_spill] sm:$0xff]  ;;  %v6132_v49 = vpop.eup %6131 }
 0x317   : > { %1503 = vperm.xlu0 %5961, %v7244_v44   ;;  %1832 = vmax.xlane.f32.xlu1 %v1831_v27  ;;  %v1224_v27 = vpack.c.bf16 %v1182_v42, %v1180_v48  ;;  %v1178_v59 = vsub.f32 %v9920_v38, %v7168_v61  ;;  %v9921_v42 = vld [vmem:[#allocation27_spill] sm:$0xff]  ;;  %v1176_v48 = vsub.f32 %v9922_v54, %v7172_v20 }
 0x318   : > { %v1302_v52 = vmul.bf16 1069105081, %v1225_v45  ;;  %v1179_v37 = vsub.f32 %v9921_v42, %v7183_v29  ;;  %v1900_v45 = vmax.f32 %v7146_v10, %v7150_v39  ;;  %v9924_v29 = vld [vmem:[#allocation22_spill] sm:$0xff] }
 0x319   : > { %v1222_v8 = vpack.c.bf16 %v1178_v59, %v1176_v48  ;;  %v1174_v38 = vsub.f32 %v9924_v29, %v7158_v7 }
 0x31a   : > { %v1223_v56 = vpack.c.bf16 %v1181_v57, %v1179_v37  ;;  %6139 = vpow.bf16 %v1302_v52  ;;  %v9925_v57 = vld [vmem:[#allocation23_spill] sm:$0xff] }
 0x31b   : > { %1352 = vmatpush2.bf16.xpose.msra.mxu1 %v6128_v35  ;;  %2352 = vperm.xlu0 %5961, %v7254_v21   ;;  %v1906_v35 = vmax.f32 %v7160_v4, %v7166_v6  ;;  %v1293_v42 = vmul.bf16 1069105081, %v1222_v8  ;;  %v1175_v52 = vsub.f32 %v9925_v57, %v7172_v20  ;;  %v1870_v57 = vmax.f32 %v7076_v5, %v7082_v16  ;;  %v9937_v16 = vld [vmem:[#allocation17_spill] sm:$0xff] }
 0x31c   : > { %1823 = vmax.xlane.f32.xlu1 %v1822_v28  ;;  %1353 = vmatprep.subr.bf16.mxu1 %v6130_v25  ;;  %v1299_v28 = vmul.bf16 1069105081, %v1224_v27  ;;  %v6134_v25 = vpop.eup %6133  ;;  %v9923_v27 = vld [vmem:[#allocation25_spill] sm:$0xff]  ;;  %v1296_v24 = vmul.bf16 1069105081, %v1223_v56 }
 0x31e   : > { %6141 = vpow.bf16 %v1299_v28  ;;  %v9926_v28 = vld [vmem:[#allocation20_spill] sm:$0xff] }
 0x31f   : > { %5975 = vset.pattern.permute.xlu0 %v9864_v53  ;;  %6143 = vpow.bf16 %v1296_v24 }
 0x320   : > { %1817 = vmax.xlane.f32.xlu1 %v1816_v3  ;;  %v1177_v3 = vsub.f32 %v9923_v27, %v7168_v61  ;;  %6145 = vpow.bf16 %v1293_v42  ;;  %v1888_v61 = vmax.f32 %v7126_v51, %v7130_v14  ;;  %v9928_v27 = vld [vmem:[#allocation19_spill] sm:$0xff] }
 0x321   : > { %v1171_v29 = vsub.f32 %v9928_v27, %v7164_v9 }
 0x322   : > { %v1221_v37 = vpack.c.bf16 %v1177_v3, %v1175_v52  ;;  %v1882_v3 = vmax.f32 %v7112_v2, %v7118_v47  ;;  %v1864_v52 = vmax.f32 %v7060_v11, %v7066_v33 }
 0x323   : > { %1354 = vmatpush2.bf16.xpose.msra.mxu1 %v6132_v49  ;;  %v6136_v54 = vpop.eup %6135  ;;  %v1172_v49 = vsub.f32 %v9926_v28, %v7164_v9 }
 0x324   : > { %1907 = vmax.xlane.f32.xlu1 %v1906_v35  ;;  %1355 = vmatprep.subr.bf16.mxu1 %v6134_v25  ;;  %v1894_v35 = vmax.f32 %v7136_v17, %v7138_v26  ;;  %v6138_v59 = vpop.eup %6137  ;;  %v9927_v25 = vld [vmem:[#allocation21_spill] sm:$0xff]  ;;  %v1290_v48 = vmul.bf16 1069105081, %v1221_v37 }
 0x325   : > { %v1220_v56 = vpack.c.bf16 %v1174_v38, %v1172_v49  ;;  %v1173_v20 = vsub.f32 %v9927_v25, %v7158_v7  ;;  %v1876_v7 = vmax.f32 %v7094_v0, %v7100_v18  ;;  %v565_v49 = vld [vmem:[%s9493_s8] sm:$0xf]  ;;  %v7309_v25 = vpop.xlane.xlu1 %1847 }
 0x326   : > { %6147 = vpow.bf16 %v1290_v48  ;;  %568 = vperm.xlu0 %5975, %v565_v49   ;;  %v9938_v0 = vld [vmem:[#allocation18_spill] sm:$0xff] }
 0x327   : > { %v1287_v8 = vmul.bf16 1069105081, %v1220_v56  ;;  %v1219_v38 = vpack.c.bf16 %v1173_v20, %v1171_v29  ;;  %v9930_v29 = vld [vmem:[#allocation12_spill] sm:$0xff] }
 0x328   : > { %1901 = vmax.xlane.f32.xlu1 %v1900_v45  ;;  %v6140_v45 = vpop.eup %6139 }
 0x329   : > { %6149 = vpow.bf16 %v1287_v8  ;;  %v1284_v42 = vmul.bf16 1069105081, %v1219_v38  ;;  %v1857_v48 = vpop.xlane.xlu1 %1856 }
 0x32b   : > { %1356 = vmatpush2.bf16.xpose.msra.mxu1 %v6136_v54  ;;  %6151 = vpow.bf16 %v1284_v42 }
 0x32c   : > { %1895 = vmax.xlane.f32.xlu1 %v1894_v35  ;;  %1357 = vmatprep.subr.bf16.mxu1 %v6138_v59  ;;  %v6142_v24 = vpop.eup %6141  ;;  %v723_v59 = vpop.permute.xlu0 %722 }
 0x32d   : > { %v6144_v54 = vpop.eup %6143 }
 0x32e   : > { %v6146_v9 = vpop.eup %6145 }
 0x330   : > { %1889 = vmax.xlane.f32.xlu1 %v1888_v61  ;;  %v7307_v37 = vpop.xlane.xlu0 %1850 }
 0x333   : > { %1358 = vmatpush2.bf16.xpose.msra.mxu1 %v6140_v45  ;;  %v9929_v45 = vld [vmem:[#allocation11_spill] sm:$0xff] }
 0x334   : > { %1883 = vmax.xlane.f32.xlu1 %v1882_v3  ;;  %1359 = vmatprep.subr.bf16.mxu1 %v6142_v24  ;;  %v6148_v35 = vpop.eup %6147  ;;  %v1854_v61 = vpop.xlane.xlu0 %1853  ;;  %v725_v27 = vmul.f32 %v723_v59, %v9929_v45  ;;  %v726_v3 = vmul.f32 %v723_v59, %v9930_v29  ;;  %v9931_v24 = vld [vmem:[#allocation13_spill] sm:$0xff]  ;;  %v1939_v45 = vsub.f32 %v7035_v36, %v1857_v48  ;;  %v9936_v59 = vmov 3  }
 0x335   : > { %v731_v38 = vmul.f32 %v7203_v12, %v9931_v24 }
 0x337   : > { %v6150_v28 = vpop.eup %6149  ;;  %v733_v49 = vadd.f32 %v731_v38, %v725_v27 }
 0x338   : > { %1877 = vmax.xlane.f32.xlu1 %v1876_v7  ;;  %v1860_v20 = vpop.xlane.xlu0 %1859  ;;  %v9932_v7 = vld [vmem:[#allocation14_spill] sm:$0xff] }
 0x339   : > { %v6152_v56 = vpop.eup %6151  ;;  %v732_v42 = vmul.f32 %v7203_v12, %v9932_v7  ;;  %v1937_v12 = vsub.f32 %v7029_v30, %v1854_v61  ;;  %v1940_v33 = vsub.f32 %v7040_v63, %v1860_v20  ;;  %v1941_v5 = vsub.f32 %v7048_v15, %v1860_v20 }
 0x33a   : > { %v1938_v20 = vsub.f32 %v7033_v34, %v1857_v48  ;;  %v9941_v34 = vld [vmem:[#allocation72_spill] sm:$0xff] }
 0x33b   : > { %1360 = vmatpush2.bf16.xpose.msra.mxu1 %v6144_v54  ;;  %v9933_v54 = vmov 2   ;;  %v1989_v38 = vpack.c.bf16 %v1939_v45, %v1937_v12  ;;  %v9939_v45 = vld [vmem:[#allocation74_spill] sm:$0xff]  ;;  %v1933_v48 = vsub.f32 %v9941_v34, %v7309_v25 }
 0x33c   : > { %1871 = vmax.xlane.f32.xlu1 %v1870_v57  ;;  %1361 = vmatprep.subr.bf16.mxu1 %v6146_v9  ;;  %v737_v8 = vpop.permute.xlu0 %736  ;;  %v9934_v57 = vld [vmem:[#allocation15_spill] sm:$0xff] }
 0x33d   : > { %v739_v9 = vmul.f32 %v737_v8, %v9934_v57 }
 0x33f   : > { %v741_v11 = vadd.f32 %v739_v9, %v733_v49 }
 0x340   : > { %1865 = vmax.xlane.f32.xlu1 %v1864_v52  ;;  %v9935_v52 = vld [vmem:[#allocation16_spill] sm:$0xff] }
 0x343   : > { %1362 = vmatpush2.bf16.xpose.msra.mxu1 %v6148_v35  ;;  %v740_v35 = vmul.f32 %v737_v8, %v9935_v52 }
 0x344   : > { %1363 = vmatprep.subr.bf16.mxu1 %v6150_v28  ;;  %v745_v28 = vpop.permute.xlu1 %744 }
 0x345   : > { %v747_v8 = vmul.f32 %v745_v28, %v9937_v16  ;;  %v748_v27 = vmul.f32 %v745_v28, %v9938_v0 }
 0x347   : > { %v749_v63 = vadd.f32 %v747_v8, %v741_v11 }
 0x34b   : > { %1364 = vmatpush2.bf16.xpose.msra.mxu1 %v6152_v56  ;;  %v734_v56 = vadd.f32 %v732_v42, %v726_v3 }
 0x34d   : > { %v742_v24 = vadd.f32 %v740_v35, %v734_v56 }
 0x34f   : > { %v750_v15 = vadd.f32 %v748_v27, %v742_v24  ;;  %v9942_v27 = vmov 1  }
 0x351   : > { %1497 = vperm.xlu1 %5960, %v7244_v44  }
 0x355   : > { %5962 = vset.pattern.permute.xlu1 %v9933_v54 }
 0x356   : > { %1511 = vperm.xlu1 %5962, %v7244_v44  }
 0x35a   : > { %5963 = vset.pattern.permute.xlu1 %v9936_v59 }
 0x35b   : > { %1519 = vperm.xlu1 %5963, %v7244_v44   ;;  %v1863_v57 = vpop.xlane.xlu1 %1862  ;;  %v562_v44 = vld [vmem:[%s9491_s6 + $0x4] sm:$0x7] }
 0x35c   : > { %v1942_v3 = vsub.f32 %v7052_v41, %v1863_v57  ;;  %v1943_v36 = vsub.f32 %v7054_v32, %v1863_v57  ;;  %v563_v32 = vld [vmem:[%s9492_s7] sm:$0xf]  ;;  %v9940_v57 = vld [vmem:[#allocation75_spill] sm:$0xff] }
 0x35d   : > { %v1936_v56 = vsub.f32 %v9940_v57, %v1854_v61 }
 0x35e   : > { %v1990_v42 = vpack.c.bf16 %v1942_v3, %v1940_v33  ;;  %v1991_v30 = vpack.c.bf16 %v1943_v36, %v1941_v5  ;;  %v1935_v33 = vsub.f32 %v9939_v45, %v7307_v37  ;;  %v2048_v5 = vmul.bf16 1069105081, %v1989_v38  ;;  %v9943_v3 = vld [vmem:[#allocation73_spill] sm:$0xff]  ;;  %v9944_v38 = vld [vmem:[#allocation71_spill] sm:$0xff]  ;;  %v7366_v45 = vld [vmem:[%s9494_s9] sm:$0xff] }
 0x35f   : > { %5964 = vset.pattern.permute.xlu1 %v9864_v53  ;;  %v754_v9 = vpop.permute.xlu1 %753  ;;  %v1988_v12 = vpack.c.bf16 %v1938_v20, %v1936_v56  ;;  %v1934_v36 = vsub.f32 %v9943_v3, %v7307_v37  ;;  %v564_v37 = vld [vmem:[%s9492_s7 + $0x4] sm:$0xf]  ;;  %2294 = vperm.xlu0 %5975, %v7366_v45  }
 0x360   : > { %1528 = vperm.xlu1 %5964, %v562_v44   ;;  %v2051_v35 = vmul.bf16 1069105081, %v1990_v42  ;;  %v2054_v28 = vmul.bf16 1069105081, %v1991_v30  ;;  %v756_v41 = vadd.f32 %v754_v9, %v749_v63  ;;  %v757_v49 = vadd.f32 %v754_v9, %v750_v15  ;;  %v9946_v56 = vld [vmem:[#allocation70_spill] sm:$0xff] }
 0x361   : > { %v1987_v8 = vpack.c.bf16 %v1935_v33, %v1933_v48  ;;  %v2045_v44 = vmul.bf16 1069105081, %v1988_v12  ;;  %v1932_v42 = vsub.f32 %v9944_v38, %v7309_v25  ;;  %v2285_v48 = vld [vmem:[%s9494_s9 + $0x8] sm:$0xff]  ;;  %v7380_v38 = vld [vmem:[%s9494_s9 + $0x10] sm:$0xff] }
 0x362   : > { %6153 = vpow.bf16 %v2051_v35  ;;  %v1332_v11 = vpack.c.bf16 %v757_v49, %v757_v49  ;;  %v1331_v24 = vpack.c.bf16 %v756_v41, %v756_v41  ;;  %v2193_v49 = vld [vmem:[%s9499_s14] sm:$0xf] }
 0x363   : > { %6155 = vpow.bf16 %v2054_v28  ;;  %v2042_v61 = vmul.bf16 1069105081, %v1987_v8  ;;  %v1986_v30 = vpack.c.bf16 %v1934_v36, %v1932_v42  ;;  %v2192_v28 = vld [vmem:[%s9498_s13] sm:$0xf]  ;;  %2299 = vperm.xlu0 %5975, %v2285_v48  }
 0x364   : > { %1388 = vperm.xlu1 %5964, %v563_v32   ;;  %1365 = vmatprep.mubr.bf16.mxu1 %v1332_v11  ;;  %6157 = vpow.bf16 %v2048_v5  ;;  %v9945_v5 = vld [vmem:[#allocation69_spill] sm:$0xff] }
 0x365   : > { %1366 = vmatmul.mubr.bf16.vlgmr.msra.gmra.mxu1 %v1331_v24  ;;  %6159 = vpow.bf16 %v2045_v44  ;;  %v2039_v15 = vmul.bf16 1069105081, %v1986_v30 }
 0x366   : > { %6161 = vpow.bf16 %v2042_v61 }
 0x367   : > { %6163 = vpow.bf16 %v2039_v15  ;;  %2304 = vperm.xlu0 %5975, %v7380_v38  }
 0x368   : > { %5965 = vset.pattern.permute.xlu1 %v9942_v27 }
 0x369   : > { %1402 = vperm.xlu1 %5965, %v563_v32   ;;  %v1845_v32 = vpop.xlane.xlu0 %1844 }
 0x36a   : > { %v1930_v57 = vsub.f32 %v9945_v5, %v1845_v32  ;;  %v1931_v11 = vsub.f32 %v9946_v56, %v1845_v32 }
 0x36d   : > { %5966 = vset.pattern.permute.xlu1 %v9864_v53  ;;  %v1827_v36 = vpop.xlane.xlu0 %1826 }
 0x36e   : > { %2161 = vperm.xlu1 %5966, %v564_v37  }
 0x370   : > { %v6154_v63 = vpop.eup %6153 }
 0x371   : > { %v6156_v20 = vpop.eup %6155  ;;  %v7388_v15 = vpop.xlane.xlu0 %1820 }
 0x372   : > { %2106 = vmatprep.subr.bf16.mxu1 %v6156_v20  ;;  %v6158_v9 = vpop.eup %6157  ;;  %5967 = vset.pattern.permute.xlu1 %v9942_v27 }
 0x373   : > { %2107 = vmatpush1.bf16.xpose.msra.mxu1 %v6154_v63  ;;  %v6160_v35 = vpop.eup %6159  ;;  %2175 = vperm.xlu1 %5967, %v564_v37  }
 0x374   : > { %2108 = vmatprep.subr.bf16.mxu1 %v6158_v9  ;;  %v6162_v25 = vpop.eup %6161 }
 0x375   : > { %v6164_v41 = vpop.eup %6163 }
 0x377   : > { %5968 = vset.pattern.permute.xlu1 %v9864_v53 }
 0x378   : > { %2260 = vperm.xlu1 %5968, %v2192_v28   ;;  %v7392_v28 = vpop.xlane.xlu0 %1910 }
 0x37b   : > { %2109 = vmatpush1.bf16.xpose.msra.mxu1 %v6160_v35 }
 0x37c   : > { %2110 = vmatprep.subr.bf16.mxu1 %v6162_v25  ;;  %2273 = vperm.xlu1 %5968, %v2193_v49  }
 0x380   : > { %5969 = vset.pattern.permute.xlu1 %v9942_v27 }
 0x381   : > { %2340 = vperm.xlu1 %5969, %v7366_v45  }
 0x383   : > { %2111 = vmatpush1.bf16.xpose.msra.mxu1 %v6164_v41 }
 0x385   : > { %2344 = vperm.xlu1 %5969, %v2285_v48  }
 0x389   : > { %5970 = vset.pattern.permute.xlu1 %v9933_v54 }
 0x38a   : > { %2394 = vperm.xlu1 %5970, %v2285_v48  }
 0x38e   : > { %5971 = vset.pattern.permute.xlu1 %v9936_v59 }
 0x38f   : > { %2440 = vperm.xlu1 %5971, %v7366_v45  }
 0x390   : > { %v1842_v33 = vpop.xlane.xlu1 %1841 }
 0x391   : > { %v1928_v24 = vsub.f32 %v9894_v40, %v1842_v33  ;;  %v1929_v34 = vsub.f32 %v9893_v1, %v1842_v33  ;;  %v9947_v33 = vld [vmem:[#allocation58_spill] sm:$0xff] }
 0x392   : > { %v1919_v5 = vsub.f32 %v9947_v33, %v1827_v36 }
 0x393   : > { %v1984_v12 = vpack.c.bf16 %v1930_v57, %v1928_v24  ;;  %v1985_v8 = vpack.c.bf16 %v1931_v11, %v1929_v34  ;;  %5972 = vset.pattern.permute.xlu1 %v9942_v27  ;;  %v7401_v11 = vpop.xlane.xlu0 %1904 }
 0x394   : > { %v1836_v3 = vpop.xlane.xlu1 %1835  ;;  %2348 = vperm.xlu1 %5972, %v7380_v38  }
 0x395   : > { %v2033_v44 = vmul.bf16 1069105081, %v1984_v12  ;;  %v2036_v61 = vmul.bf16 1069105081, %v1985_v8  ;;  %v1924_v40 = vsub.f32 %v9898_v13, %v1836_v3  ;;  %v1925_v42 = vsub.f32 %v9897_v43, %v1836_v3 }
 0x397   : > { %6165 = vpow.bf16 %v2033_v44  ;;  %v9949_v44 = vld [vmem:[#allocation54_spill] sm:$0xff] }
 0x398   : > { %6167 = vpow.bf16 %v2036_v61  ;;  %v1839_v1 = vpop.xlane.xlu1 %1838  ;;  %5973 = vset.pattern.permute.xlu1 %v9936_v59  ;;  %v1915_v61 = vsub.f32 %v9949_v44, %v7388_v15 }
 0x399   : > { %v1926_v30 = vsub.f32 %v9902_v22, %v1839_v1  ;;  %v1927_v63 = vsub.f32 %v9901_v19, %v1839_v1  ;;  %2444 = vperm.xlu1 %5973, %v2285_v48  }
 0x39b   : > { %v1982_v20 = vpack.c.bf16 %v1926_v30, %v1924_v40  ;;  %v1983_v9 = vpack.c.bf16 %v1927_v63, %v1925_v42  ;;  %v2288_v30 = vld [vmem:[%s9495_s10] sm:$0xff] }
 0x39c   : > { %v1830_v37 = vpop.xlane.xlu1 %1829 }
 0x39d   : > { %v2027_v35 = vmul.bf16 1069105081, %v1982_v20  ;;  %v2030_v25 = vmul.bf16 1069105081, %v1983_v9  ;;  %v1920_v13 = vsub.f32 %v9906_v60, %v1830_v37  ;;  %v1921_v19 = vsub.f32 %v9905_v55, %v1830_v37  ;;  %5974 = vset.pattern.permute.xlu1 %v9864_v53 }
 0x39e   : > { %2491 = vperm.xlu1 %5974, %v2288_v30   ;;  %v9955_v30 = vld [vmem:[#allocation92_spill] sm:$0xff] }
 0x39f   : > { %6169 = vpow.bf16 %v2027_v35  ;;  %v9950_v35 = vld [vmem:[#allocation53_spill] sm:$0xff] }
 0x3a0   : > { %6171 = vpow.bf16 %v2030_v25  ;;  %v1833_v43 = vpop.xlane.xlu1 %1832  ;;  %v1914_v25 = vsub.f32 %v9950_v35, %v7388_v15 }
 0x3a1   : > { %v1922_v22 = vsub.f32 %v9910_v46, %v1833_v43  ;;  %v1923_v41 = vsub.f32 %v9909_v58, %v1833_v43  ;;  %v9948_v58 = vld [vmem:[#allocation57_spill] sm:$0xff]  ;;  %v9951_v43 = vld [vmem:[#allocation96_spill] sm:$0xff] }
 0x3a2   : > { %v1918_v12 = vsub.f32 %v9948_v58, %v1827_v36  ;;  %2309 = vperm.xlu1 %5974, %v7254_v21  }
 0x3a3   : > { %v1980_v49 = vpack.c.bf16 %v1922_v22, %v1920_v13  ;;  %v1981_v32 = vpack.c.bf16 %v1923_v41, %v1921_v19  ;;  %v1975_v13 = vsub.f32 %v9951_v43, %v7392_v28 }
 0x3a5   : > { %v1824_v57 = vpop.xlane.xlu1 %1823  ;;  %v6166_v56 = vpop.eup %6165  ;;  %v2021_v24 = vmul.bf16 1069105081, %v1980_v49  ;;  %v2024_v60 = vmul.bf16 1069105081, %v1981_v32 }
 0x3a6   : > { %v1916_v55 = vsub.f32 %v9914_v31, %v1824_v57  ;;  %v1917_v46 = vsub.f32 %v9913_v50, %v1824_v57  ;;  %v6168_v34 = vpop.eup %6167  ;;  %v7410_v50 = vpop.xlane.xlu0 %1898  ;;  %5976 = vset.pattern.permute.xlu1 %v9936_v59 }
 0x3a7   : > { %6173 = vpow.bf16 %v2021_v24  ;;  %2112 = vmatprep.subr.bf16.mxu1 %v6168_v34  ;;  %2448 = vperm.xlu1 %5976, %v7380_v38  }
 0x3a8   : > { %v1979_v8 = vpack.c.bf16 %v1919_v5, %v1917_v46  ;;  %6175 = vpow.bf16 %v2024_v60  ;;  %2113 = vmatpush1.bf16.xpose.msra.mxu1 %v6166_v56  ;;  %v1978_v1 = vpack.c.bf16 %v1918_v12, %v1916_v55  ;;  %v9952_v56 = vld [vmem:[#allocation95_spill] sm:$0xff]  ;;  %v9953_v55 = vld [vmem:[#allocation94_spill] sm:$0xff] }
 0x3a9   : > { %v1818_v3 = vpop.xlane.xlu1 %1817  ;;  %v1974_v24 = vsub.f32 %v9952_v56, %v7392_v28  ;;  %v1971_v46 = vsub.f32 %v9953_v55, %v7401_v11 }
 0x3aa   : > { %v2018_v40 = vmul.bf16 1069105081, %v1979_v8  ;;  %v1913_v31 = vsub.f32 %v9917_v62, %v1818_v3  ;;  %v2015_v48 = vmul.bf16 1069105081, %v1978_v1  ;;  %v1912_v20 = vsub.f32 %v9918_v23, %v1818_v3  ;;  %v7422_v22 = vpop.xlane.xlu0 %1892 }
 0x3ab   : > { %5977 = vset.pattern.permute.xlu1 %v9864_v53 }
 0x3ac   : > { %v1977_v42 = vpack.c.bf16 %v1915_v61, %v1913_v31  ;;  %6177 = vpow.bf16 %v2018_v40  ;;  %v1976_v41 = vpack.c.bf16 %v1914_v25, %v1912_v20  ;;  %v9954_v31 = vld [vmem:[#allocation93_spill] sm:$0xff]  ;;  %v2290_v20 = vld [vmem:[%s9495_s10 + $0x10] sm:$0xff]  ;;  %v9650_v25 = vmov 5  }
 0x3ad   : > { %v1908_v36 = vpop.xlane.xlu1 %1907  ;;  %v6170_v63 = vpop.eup %6169  ;;  %6179 = vpow.bf16 %v2015_v48 }
 0x3ae   : > { %v6172_v9 = vpop.eup %6171  ;;  %v2012_v37 = vmul.bf16 1069105081, %v1977_v42  ;;  %v1973_v62 = vsub.f32 %v7166_v6, %v1908_v36  ;;  %v2009_v32 = vmul.bf16 1069105081, %v1976_v41  ;;  %v1972_v15 = vsub.f32 %v7160_v4, %v1908_v36  ;;  %v7433_v60 = vpop.xlane.xlu0 %1886  ;;  %v9956_v41 = vld [vmem:[#allocation91_spill] sm:$0xff] }
 0x3af   : > { %2114 = vmatprep.subr.bf16.mxu1 %v6172_v9  ;;  %v1970_v42 = vsub.f32 %v9954_v31, %v7401_v11 }
 0x3b0   : > { %2115 = vmatpush1.bf16.xpose.msra.mxu1 %v6170_v63  ;;  %6181 = vpow.bf16 %v2012_v37  ;;  %v2007_v23 = vpack.c.bf16 %v1975_v13, %v1973_v62  ;;  %v2006_v4 = vpack.c.bf16 %v1974_v24, %v1972_v15  ;;  %v1967_v63 = vsub.f32 %v9955_v30, %v7410_v50 }
 0x3b1   : > { %v1902_v19 = vpop.xlane.xlu1 %1901  ;;  %6183 = vpow.bf16 %v2009_v32  ;;  %v9957_v32 = vld [vmem:[#allocation90_spill] sm:$0xff] }
 0x3b2   : > { %v2102_v5 = vmul.bf16 1069105081, %v2007_v23  ;;  %v1969_v57 = vsub.f32 %v7150_v39, %v1902_v19  ;;  %v2289_v39 = vld [vmem:[%s9495_s10 + $0x8] sm:$0xff]  ;;  %v7445_v8 = vpop.xlane.xlu0 %1880  ;;  %v2099_v3 = vmul.bf16 1069105081, %v2006_v4  ;;  %v1968_v44 = vsub.f32 %v7146_v10, %v1902_v19 }
 0x3b3   : > { %2496 = vperm.xlu1 %5977, %v2289_v39   ;;  %v7461_v10 = vld [vmem:[%s9496_s11] sm:$0xf]  ;;  %v1966_v23 = vsub.f32 %v9956_v41, %v7410_v50  ;;  %v1963_v15 = vsub.f32 %v9957_v32, %v7422_v22  ;;  %v9959_v39 = vld [vmem:[#allocation88_spill] sm:$0xff]  ;;  %v9963_v32 = vld [vmem:[#allocation81_spill] sm:$0xff] }
 0x3b4   : > { %6185 = vpow.bf16 %v2102_v5  ;;  %v2005_v12 = vpack.c.bf16 %v1971_v46, %v1969_v57  ;;  %2529 = vperm.xlu0 %5975, %v7461_v10   ;;  %v9649_v5 = vmov 4  }
 0x3b5   : > { %v7425_v49 = vpop.xlane.xlu1 %1895  ;;  %v6174_v6 = vpop.eup %6173  ;;  %6187 = vpow.bf16 %v2099_v3 }
 0x3b6   : > { %v6176_v33 = vpop.eup %6175  ;;  %v2096_v61 = vmul.bf16 1069105081, %v2005_v12  ;;  %v1965_v1 = vsub.f32 %v7138_v26, %v7425_v49  ;;  %v2004_v26 = vpack.c.bf16 %v1970_v42, %v1968_v44  ;;  %v7467_v9 = vpop.xlane.xlu0 %1874  ;;  %v1964_v35 = vsub.f32 %v7136_v17, %v7425_v49 }
 0x3b7   : > { %2116 = vmatprep.subr.bf16.mxu1 %v6176_v33  ;;  %5978 = vset.pattern.permute.xlu1 %v9936_v59 }
 0x3b8   : > { %2117 = vmatpush1.bf16.xpose.msra.mxu1 %v6174_v6  ;;  %2452 = vperm.xlu1 %5978, %v7254_v21   ;;  %6189 = vpow.bf16 %v2096_v61  ;;  %v2003_v11 = vpack.c.bf16 %v1967_v63, %v1965_v1  ;;  %v2093_v62 = vmul.bf16 1069105081, %v2004_v26  ;;  %v2002_v33 = vpack.c.bf16 %v1966_v23, %v1964_v35 }
 0x3b9   : > { %v7437_v34 = vpop.xlane.xlu1 %1889  ;;  %5982 = vset.pattern.permute.xlu0 %v9650_v25  ;;  %v9647_v61 = vmov 8   ;;  %v9648_v35 = vmov 12   ;;  %v9645_v23 = vmov 6  }
 0x3ba   : > { %v6178_v58 = vpop.eup %6177  ;;  %v2090_v43 = vmul.bf16 1069105081, %v2003_v11  ;;  %v1961_v13 = vsub.f32 %v7130_v14, %v7437_v34  ;;  %2669 = vperm.xlu0 %5982, %v7461_v10   ;;  %v7484_v49 = vpop.xlane.xlu0 %1868  ;;  %6191 = vpow.bf16 %v2093_v62  ;;  %v2087_v57 = vmul.bf16 1069105081, %v2002_v33  ;;  %v9961_v11 = vld [vmem:[#allocation86_spill] sm:$0xff] }
 0x3bb   : > { %2118 = vmatprep.subr.bf16.mxu1 %v6178_v58  ;;  %v6180_v40 = vpop.eup %6179  ;;  %v1960_v56 = vsub.f32 %v7126_v51, %v7437_v34  ;;  %v9958_v58 = vld [vmem:[#allocation89_spill] sm:$0xff]  ;;  %v1959_v51 = vsub.f32 %v9959_v39, %v7433_v60  ;;  %v9644_v39 = vmov 17  }
 0x3bc   : > { %5979 = vset.pattern.permute.xlu1 %v9864_v53  ;;  %6193 = vpow.bf16 %v2090_v43  ;;  %v2001_v14 = vpack.c.bf16 %v1963_v15, %v1961_v13  ;;  %v1962_v12 = vsub.f32 %v9958_v58, %v7422_v22  ;;  %v9962_v13 = vld [vmem:[#allocation84_spill] sm:$0xff] }
 0x3bd   : > { %v7443_v28 = vpop.xlane.xlu1 %1883  ;;  %2501 = vperm.xlu1 %5979, %v2290_v20   ;;  %6195 = vpow.bf16 %v2087_v57  ;;  %v9646_v20 = vmov 9  }
 0x3be   : > { %v6182_v36 = vpop.eup %6181  ;;  %5983 = vset.pattern.permute.xlu0 %v9933_v54  ;;  %v7494_v24 = vpop.permute.xlu0 %1503  ;;  %v2084_v55 = vmul.bf16 1069105081, %v2001_v14  ;;  %v1957_v46 = vsub.f32 %v7118_v47, %v7443_v28  ;;  %v2000_v44 = vpack.c.bf16 %v1962_v12, %v1960_v56  ;;  %v1956_v1 = vsub.f32 %v7112_v2, %v7443_v28  ;;  %v9964_v14 = vld [vmem:[#allocation85_spill] sm:$0xff]  ;;  %v9966_v12 = vld [vmem:[#allocation80_spill] sm:$0xff] }
 0x3bf   : > { %v6184_v19 = vpop.eup %6183  ;;  %2390 = vperm.xlu0 %5983, %v7366_v45   ;;  %v1507_v34 = vmul.f32 %v7494_v24, %v9932_v7  ;;  %v1955_v2 = vsub.f32 %v9961_v11, %v7445_v8  ;;  %v1954_v57 = vsub.f32 %v9964_v14, %v7445_v8  ;;  %v9971_v11 = vld [vmem:[#allocation78_spill] sm:$0xff] }
 0x3c0   : > { %2119 = vmatpush1.bf16.xpose.msra.mxu1 %v6180_v40  ;;  %6197 = vpow.bf16 %v2084_v55  ;;  %v1999_v22 = vpack.c.bf16 %v1959_v51, %v1957_v46  ;;  %v9965_v55 = vld [vmem:[#allocation83_spill] sm:$0xff] }
 0x3c1   : > { %v7455_v48 = vpop.xlane.xlu1 %1877  ;;  %2120 = vmatprep.subr.bf16.mxu1 %v6182_v36  ;;  %5980 = vset.pattern.permute.xlu1 %v9649_v5  ;;  %v1951_v46 = vsub.f32 %v9965_v55, %v7467_v9  ;;  %v9974_v55 = vld [vmem:[#allocation15_spill] sm:$0xff] }
 0x3c2   : > { %v6186_v6 = vpop.eup %6185  ;;  %2543 = vperm.xlu1 %5980, %v7461_v10   ;;  %v2078_v31 = vmul.bf16 1069105081, %v1999_v22  ;;  %v1953_v42 = vsub.f32 %v7100_v18, %v7455_v48  ;;  %v9968_v22 = vld [vmem:[#allocation82_spill] sm:$0xff] }
 0x3c3   : > { %v6188_v4 = vpop.eup %6187  ;;  %2398 = vperm.xlu0 %5983, %v7380_v38  }
 0x3c5   : > { %v7469_v37 = vpop.xlane.xlu1 %1871 }
 0x3c6   : > { %5981 = vset.pattern.permute.xlu1 %v9942_v27  ;;  %v6190_v45 = vpop.eup %6189  ;;  %v1949_v15 = vsub.f32 %v9963_v32, %v7469_v37  ;;  %v9972_v32 = vld [vmem:[#allocation13_spill] sm:$0xff] }
 0x3c7   : > { %2655 = vperm.xlu1 %5981, %v7461_v10   ;;  %2402 = vperm.xlu0 %5983, %v7254_v21   ;;  %v9960_v21 = vld [vmem:[#allocation87_spill] sm:$0xff] }
 0x3c8   : > { %2121 = vmatpush1.bf16.xpose.msra.mxu1 %v6184_v19  ;;  %v6192_v30 = vpop.eup %6191  ;;  %v1958_v63 = vsub.f32 %v9960_v21, %v7433_v60  ;;  %v1952_v19 = vsub.f32 %v9962_v13, %v7455_v48  ;;  %v2291_v48 = vld [vmem:[%s9495_s10 + $0x18] sm:$0xff]  ;;  %v1995_v58 = vpack.c.bf16 %v1951_v46, %v1949_v15  ;;  %v1506_v15 = vmul.f32 %v7494_v24, %v9972_v32 }
 0x3c9   : > { %v7482_v17 = vpop.xlane.xlu1 %1865  ;;  %2122 = vmatprep.subr.bf16.mxu1 %v6186_v6 }
 0x3ca   : > { %v6194_v26 = vpop.eup %6193  ;;  %v1998_v18 = vpack.c.bf16 %v1958_v63, %v1956_v1  ;;  %v2066_v51 = vmul.bf16 1069105081, %v1995_v58  ;;  %v9969_v1 = vld [vmem:[#allocation79_spill] sm:$0xff] }
 0x3cb   : > { %5984 = vset.pattern.permute.xlu1 %v9647_v61  ;;  %2781 = vperm.xlu0 %5983, %v7461_v10   ;;  %v6196_v33 = vpop.eup %6195 }
 0x3cc   : > { %2559 = vperm.xlu1 %5984, %v7461_v10   ;;  %v2075_v43 = vmul.bf16 1069105081, %v1998_v18 }
 0x3cd   : > { %v7490_v50 = vpop.permute.xlu1 %1497 }
 0x3ce   : > { %v1501_v47 = vmul.f32 %v7490_v50, %v9930_v29  ;;  %v2081_v29 = vmul.bf16 1069105081, %v2000_v44  ;;  %v6198_v56 = vpop.eup %6197 }
 0x3cf   : > { %5988 = vset.pattern.permute.xlu0 %v9648_v35 }
 0x3d0   : > { %2123 = vmatpush2.bf16.xpose.msra.mxu1 %v6188_v4  ;;  %v1509_v7 = vadd.f32 %v1507_v34, %v1501_v47  ;;  %5985 = vset.pattern.permute.xlu1 %v9646_v20  ;;  %6199 = vpow.bf16 %v2081_v29  ;;  %v1996_v4 = vpack.c.bf16 %v1954_v57, %v1952_v19  ;;  %v9967_v34 = vld [vmem:[#allocation77_spill] sm:$0xff]  ;;  %v9635_v57 = vmov 30  }
 0x3d1   : > { %v7509_v3 = vpop.permute.xlu1 %1511  ;;  %2124 = vmatprep.subr.bf16.mxu1 %v6190_v45  ;;  %2685 = vperm.xlu1 %5985, %v7461_v10   ;;  %6201 = vpow.bf16 %v2078_v31  ;;  %v1948_v45 = vsub.f32 %v9966_v12, %v7469_v37  ;;  %v1945_v47 = vsub.f32 %v9967_v34, %v7482_v17  ;;  %v1947_v37 = vsub.f32 %v9969_v1, %v7484_v49 }
 0x3d2   : > { %v1515_v38 = vmul.f32 %v7509_v3, %v9935_v52  ;;  %2575 = vperm.xlu0 %5988, %v7461_v10   ;;  %6203 = vpow.bf16 %v2075_v43  ;;  %v2069_v8 = vmul.bf16 1069105081, %v1996_v4  ;;  %v9636_v43 = vmov 16  }
 0x3d3   : > { %v1514_v46 = vmul.f32 %v7509_v3, %v9974_v55  ;;  %v9633_v4 = vmov 11   ;;  %v9632_v12 = vmov 21  }
 0x3d4   : > { %v1517_v36 = vadd.f32 %v1515_v38, %v1509_v7  ;;  %v1950_v38 = vsub.f32 %v9968_v22, %v7467_v9  ;;  %v9642_v7 = vmov 13   ;;  %v9640_v9 = vmov 10  }
 0x3d5   : > { %5986 = vset.pattern.permute.xlu1 %v9645_v23  ;;  %v9627_v22 = vmov 28  }
 0x3d6   : > { %v7518_v40 = vpop.permute.xlu1 %1519  ;;  %2795 = vperm.xlu1 %5986, %v7461_v10   ;;  %5991 = vset.pattern.permute.xlu0 %v9936_v59  ;;  %v1994_v31 = vpack.c.bf16 %v1950_v38, %v1948_v45  ;;  %v7604_v45 = vld [vmem:[%s9778_s28 + $0x4] sm:$0x3]  ;;  %v9626_v38 = vmov 26  }
 0x3d7   : > { %v1523_v52 = vmul.f32 %v7518_v40, %v9938_v0  ;;  %v1997_v0 = vpack.c.bf16 %v1955_v2, %v1953_v42  ;;  %2907 = vperm.xlu0 %5991, %v7461_v10   ;;  %v1993_v42 = vpack.c.bf16 %v1947_v37, %v1945_v47  ;;  %v1946_v2 = vsub.f32 %v9971_v11, %v7484_v49 }
 0x3d8   : > { %2125 = vmatpush2.bf16.xpose.msra.mxu1 %v6192_v30  ;;  %v9970_v30 = vld [vmem:[#allocation76_spill] sm:$0xff]  ;;  %v1522_v24 = vmul.f32 %v7518_v40, %v9937_v16  ;;  %v9630_v47 = vmov 24   ;;  %v9625_v37 = vmov 23  }
 0x3d9   : > { %v1525_v28 = vadd.f32 %v1523_v52, %v1517_v36  ;;  %2126 = vmatprep.subr.bf16.mxu1 %v6194_v26  ;;  %v2072_v6 = vmul.bf16 1069105081, %v1997_v0  ;;  %v9643_v36 = vmov 20   ;;  %v2063_v52 = vmul.bf16 1069105081, %v1994_v31 }
 0x3da   : > { %5987 = vset.pattern.permute.xlu1 %v9864_v53  ;;  %v1944_v21 = vsub.f32 %v9970_v30, %v7482_v17  ;;  %v2060_v63 = vmul.bf16 1069105081, %v1993_v42  ;;  %v9639_v17 = vmov 22   ;;  %v9623_v30 = vmov 31  }
 0x3db   : > { %v7531_v62 = vpop.permute.xlu1 %1528  ;;  %6205 = vpow.bf16 %v2072_v6  ;;  %2506 = vperm.xlu1 %5987, %v2291_v48   ;;  %5994 = vset.pattern.permute.xlu0 %v9644_v39  ;;  %v9634_v6 = vmov 14  }
 0x3dc   : > { %v1532_v60 = vadd.f32 %v7531_v62, %v1525_v28  ;;  %2717 = vperm.xlu0 %5994, %v7461_v10   ;;  %6207 = vpow.bf16 %v2069_v8  ;;  %v9641_v28 = vmov 15   ;;  %v1992_v0 = vpack.c.bf16 %v1946_v2, %v1944_v21 }
 0x3dd   : > { %6209 = vpow.bf16 %v2066_v51  ;;  %v9631_v51 = vmov 18  }
 0x3de   : > { %v2105_v41 = vpack.c.bf16 %v1532_v60, %v1532_v60  ;;  %v6200_v44 = vpop.eup %6199  ;;  %6211 = vpow.bf16 %v2063_v52  ;;  %v9638_v60 = vmov 7   ;;  %v2057_v49 = vmul.bf16 1069105081, %v1992_v0 }
 0x3df   : > { %5989 = vset.pattern.permute.xlu1 %v9642_v7  ;;  %v6202_v29 = vpop.eup %6201  ;;  %6213 = vpow.bf16 %v2060_v63  ;;  %v9624_v52 = vmov 27   ;;  %v1389_v63 = vpop.permute.xlu1 %1388 }
 0x3e0   : > { %2138 = vmatprep.mubr.bf16.mxu1 %v2105_v41  ;;  %2127 = vmatpush2.bf16.xpose.msra.mxu1 %v6196_v33  ;;  %v6204_v26 = vpop.eup %6203  ;;  %6215 = vpow.bf16 %v2057_v49  ;;  %v9637_v41 = vmov 29   ;;  %v9973_v33 = vld [vmem:[#allocation11_spill] sm:$0xff] }
 0x3e1   : > { %2128 = vmatprep.subr.bf16.mxu1 %v6198_v56  ;;  %2701 = vperm.xlu1 %5989, %v7461_v10   ;;  %v1500_v14 = vmul.f32 %v7490_v50, %v9973_v33  ;;  %v2526_v50 = vld [vmem:[%s9497_s12] sm:$0xf] }
 0x3e2   : > { %5997 = vset.pattern.permute.xlu0 %v9643_v36 }
 0x3e3   : > { %2607 = vperm.xlu0 %5997, %v7461_v10   ;;  %v1508_v58 = vadd.f32 %v1506_v15, %v1500_v14  ;;  %v9977_v15 = vld [vmem:[#allocation5_spill] sm:$0xff] }
 0x3e4   : > { %v1403_v49 = vpop.permute.xlu1 %1402 }
 0x3e5   : > { %5990 = vset.pattern.permute.xlu1 %v9640_v9  ;;  %v1516_v8 = vadd.f32 %v1514_v46, %v1508_v58 }
 0x3e6   : > { %2811 = vperm.xlu1 %5990, %v7461_v10  }
 0x3e7   : > { %6000 = vset.pattern.permute.xlu0 %v9641_v28  ;;  %v1524_v3 = vadd.f32 %v1522_v24, %v1516_v8  ;;  %v5834_v8 = vld [vmem:[%s9488_s3 + $0x4] sm:$0x3] }
 0x3e8   : > { %2129 = vmatpush2.bf16.xpose.msra.mxu1 %v6200_v44  ;;  %2953 = vperm.xlu0 %6000, %v7461_v10   ;;  %v9629_v44 = vmov 25  }
 0x3e9   : > { %2130 = vmatprep.subr.bf16.mxu1 %v6202_v29  ;;  %v6206_v18 = vpop.eup %6205  ;;  %v1531_v40 = vadd.f32 %v7531_v62, %v1524_v3  ;;  %v9628_v62 = vmov 19   ;;  %v3046_v3 = vld [vmem:[%s9501_s16] sm:$0xf] }
 0x3ea   : > { %5992 = vset.pattern.permute.xlu1 %v9638_v60  ;;  %v6208_v13 = vpop.eup %6207 }
 0x3eb   : > { %2921 = vperm.xlu1 %5992, %v7461_v10   ;;  %v6210_v19 = vpop.eup %6209  ;;  %v2104_v34 = vpack.c.bf16 %v1531_v40, %v1531_v40  ;;  %v5832_v40 = vld [vmem:[%s9487_s2 + $0x4] sm:$0x3] }
 0x3ec   : > { %6003 = vset.pattern.permute.xlu0 %v9639_v17  ;;  %v6212_v56 = vpop.eup %6211 }
 0x3ed   : > { %2859 = vperm.xlu0 %6003, %v7461_v10   ;;  %v6214_v48 = vpop.eup %6213 }
 0x3ee   : > { %v6216_v16 = vpop.eup %6215 }
 0x3ef   : > { %5993 = vset.pattern.permute.xlu1 %v9636_v43 }
 0x3f0   : > { %2131 = vmatpush2.bf16.xpose.msra.mxu1 %v6204_v26  ;;  %2591 = vperm.xlu1 %5993, %v7461_v10   ;;  %v9975_v26 = vld [vmem:[#allocation7_spill] sm:$0xff] }
 0x3f1   : > { %2132 = vmatprep.subr.bf16.mxu1 %v6206_v18  ;;  %6006 = vset.pattern.permute.xlu0 %v9637_v41 }
 0x3f2   : > { %2765 = vperm.xlu0 %6006, %v7461_v10  }
 0x3f4   : > { %5995 = vset.pattern.permute.xlu1 %v9634_v6 }
 0x3f5   : > { %2827 = vperm.xlu1 %5995, %v7461_v10  }
 0x3f6   : > { %6009 = vset.pattern.permute.xlu0 %v9635_v57 }
 0x3f7   : > { %2891 = vperm.xlu0 %6009, %v7461_v10  }
 0x3f8   : > { %2133 = vmatpush2.bf16.xpose.msra.mxu1 %v6208_v13  ;;  %v9976_v13 = vld [vmem:[#allocation3_spill] sm:$0xff] }
 0x3f9   : > { %2134 = vmatprep.subr.bf16.mxu1 %v6210_v19  ;;  %5996 = vset.pattern.permute.xlu1 %v9633_v4 }
 0x3fa   : > { %2937 = vperm.xlu1 %5996, %v7461_v10  }
 0x3fb   : > { %6012 = vset.pattern.permute.xlu0 %v9864_v53 }
 0x3fc   : > { %3040 = vperm.xlu0 %6012, %v2526_v50   ;;  %v3045_v50 = vld [vmem:[%s9500_s15] sm:$0xf] }
 0x3fe   : > { %5998 = vset.pattern.permute.xlu1 %v9632_v12 }
 0x3ff   : > { %2733 = vperm.xlu1 %5998, %v7461_v10  }
 0x400   : > { %2135 = vmatpush2.bf16.xpose.msra.mxu1 %v6212_v56  ;;  %3165 = vperm.xlu0 %6012, %v7604_v45  }
 0x401   : > { %2136 = vmatprep.subr.bf16.mxu1 %v6214_v48 }
 0x403   : > { %5999 = vset.pattern.permute.xlu1 %v9631_v51 }
 0x404   : > { %2843 = vperm.xlu1 %5999, %v7461_v10   ;;  %6015 = vset.pattern.permute.xlu0 %v9933_v54 }
 0x405   : > { %3216 = vperm.xlu0 %6015, %v7604_v45  }
 0x408   : > { %2137 = vmatpush2.bf16.xpose.msra.mxu1 %v6216_v16  ;;  %6001 = vset.pattern.permute.xlu1 %v9630_v47  ;;  %v5831_v16 = vld [vmem:[%s9778_s28 + $0x6] sm:$0x3] }
 0x409   : > { %2623 = vperm.xlu1 %6001, %v7461_v10   ;;  %6018 = vset.pattern.permute.xlu0 %v9864_v53 }
 0x40a   : > { %3276 = vperm.xlu0 %6018, %v5834_v8  }
 0x40d   : > { %6002 = vset.pattern.permute.xlu1 %v9629_v44 }
 0x40e   : > { %2749 = vperm.xlu1 %6002, %v7461_v10   ;;  %6021 = vset.pattern.permute.xlu0 %v9936_v59 }
 0x40f   : > { %2139 = vmatmul.mubr.bf16.vlgmr.msra.gmra.mxu1 %v2104_v34  ;;  %3298 = vperm.xlu0 %6021, %v5834_v8  }
 0x412   : > { %6004 = vset.pattern.permute.xlu1 %v9628_v62 }
 0x413   : > { %2969 = vperm.xlu1 %6004, %v7461_v10   ;;  %6023 = vset.pattern.permute.xlu0 %v9864_v53 }
 0x414   : > { %4011 = vperm.xlu0 %6023, %v5831_v16  }
 0x417   : > { %6005 = vset.pattern.permute.xlu1 %v9627_v22 }
 0x418   : > { %2639 = vperm.xlu1 %6005, %v7461_v10   ;;  %6024 = vset.pattern.permute.xlu0 %v9942_v27 }
 0x419   : > { %4017 = vperm.xlu0 %6024, %v5831_v16  }
 0x41c   : > { %6007 = vset.pattern.permute.xlu1 %v9626_v38 }
 0x41d   : > { %2875 = vperm.xlu1 %6007, %v7461_v10   ;;  %6025 = vset.pattern.permute.xlu0 %v9933_v54 }
 0x41e   : > { %4025 = vperm.xlu0 %6025, %v5831_v16  }
 0x421   : > { %6008 = vset.pattern.permute.xlu1 %v9625_v37 }
 0x422   : > { %2985 = vperm.xlu1 %6008, %v7461_v10   ;;  %6026 = vset.pattern.permute.xlu0 %v9936_v59 }
 0x423   : > { %4033 = vperm.xlu0 %6026, %v5831_v16  }
 0x425   : > { %v1367_v29 = vpop.f32.mrf.mxu1 }
 0x426   : > { %6217 = vrcp.f32 %v1367_v29  ;;  %6010 = vset.pattern.permute.xlu1 %v9624_v52 }
 0x427   : > { %v1369_v1 = vpop.f32.mrf.mxu1  ;;  %3001 = vperm.xlu1 %6010, %v7461_v10  }
 0x428   : > { %6219 = vrcp.f32 %v1369_v1 }
 0x429   : > { %v1371_v31 = vpop.f32.mrf.mxu1 }
 0x42a   : > { %v5836_v31 = vld [vmem:[%s9489_s4 + $0x4] sm:$0x3] }
 0x42b   : > { %v1372_v42 = vpop.f32.mrf.mxu1  ;;  %6011 = vset.pattern.permute.xlu1 %v9623_v30 }
 0x42c   : > { %3017 = vperm.xlu1 %6011, %v7461_v10  }
 0x430   : > { %6013 = vset.pattern.permute.xlu1 %v9864_v53 }
 0x431   : > { %3111 = vperm.xlu1 %6013, %v3045_v50  }
 0x433   : > { %v6218_v21 = vpop.eup %6217 }
 0x434   : > { %v1379_v11 = vrot.slane %v6218_v21, %v9975_v26 }
 0x435   : > { %v6220_v2 = vpop.eup %6219  ;;  %3124 = vperm.xlu1 %6013, %v3046_v3  }
 0x436   : > { %v1384_v18 = vmul.f32 %v1379_v11, %v1367_v29  ;;  %v1383_v0 = vrot.slane %v6220_v2, %v9975_v26 }
 0x438   : > { %v1394_v19 = vrot.slane %v1384_v18, %v9976_v13  ;;  %v1385_v32 = vmul.f32 %v1383_v0, %v1369_v1  ;;  %v1408_v33 = vrot.slane %v1384_v18, %v9977_v15 }
 0x439   : > { %6014 = vset.pattern.permute.xlu1 %v9942_v27 }
 0x43a   : > { %v1398_v14 = vrot.slane %v1385_v32, %v9976_v13  ;;  %v1399_v56 = vmul.f32 %v1394_v19, %v1389_v63  ;;  %v1412_v55 = vrot.slane %v1385_v32, %v9977_v15  ;;  %v1413_v10 = vmul.f32 %v1408_v33, %v1403_v49  ;;  %3190 = vperm.xlu1 %6014, %v7604_v45  }
 0x43c   : > { %v1400_v46 = vmul.f32 %v1398_v14, %v1389_v63  ;;  %v1414_v48 = vmul.f32 %v1412_v55, %v1403_v49  ;;  %v7637_v58 = vadd.f32 %v1413_v10, %v1399_v56 }
 0x43e   : > { %v7639_v24 = vadd.f32 %v1414_v48, %v1400_v46  ;;  %6016 = vset.pattern.permute.xlu1 %v9936_v59 }
 0x43f   : > { %3242 = vperm.xlu1 %6016, %v7604_v45   ;;  %v2162_v45 = vpop.permute.xlu1 %2161 }
 0x443   : > { %6017 = vset.pattern.permute.xlu1 %v9864_v53  ;;  %v2176_v34 = vpop.permute.xlu1 %2175 }
 0x444   : > { %3269 = vperm.xlu1 %6017, %v5832_v40  }
 0x447   : > { %v7669_v29 = vpop.permute.xlu1 %2260 }
 0x448   : > { %6019 = vset.pattern.permute.xlu1 %v9942_v27 }
 0x449   : > { %3282 = vperm.xlu1 %6019, %v5834_v8  }
 0x44b   : > { %v7671_v1 = vpop.permute.xlu1 %2273 }
 0x44d   : > { %6020 = vset.pattern.permute.xlu1 %v9933_v54 }
 0x44e   : > { %3290 = vperm.xlu1 %6020, %v5834_v8  }
 0x44f   : > { %v7676_v42 = vpop.permute.xlu1 %2340 }
 0x452   : > { %6022 = vset.pattern.permute.xlu1 %v9864_v53 }
 0x453   : > { %3307 = vperm.xlu1 %6022, %v5836_v31   ;;  %v7678_v21 = vpop.permute.xlu1 %2344  ;;  %v7704_v31 = vpop.permute.xlu0 %2352 }
 0x457   : > { %v7680_v63 = vpop.permute.xlu1 %2394  ;;  %v569_v22 = vpop.permute.xlu0 %568 }
 0x458   : > { %v1417_v44 = vadd.f32 %v7637_v58, %v569_v22  ;;  %v1418_v47 = vadd.f32 %v7639_v24, %v569_v22 }
 0x45b   : > { %v7682_v11 = vpop.permute.xlu1 %2440 }
 0x45f   : > { %v7684_v2 = vpop.permute.xlu1 %2348 }
 0x463   : > { %v7686_v18 = vpop.permute.xlu1 %2444 }
 0x467   : > { %v7688_v0 = vpop.permute.xlu1 %2491 }
 0x46b   : > { %v7690_v49 = vpop.permute.xlu1 %2309 }
 0x46f   : > { %v7692_v19 = vpop.permute.xlu1 %2448 }
 0x473   : > { %v7694_v32 = vpop.permute.xlu1 %2496 }
 0x477   : > { %v7696_v55 = vpop.permute.xlu1 %2452 }
 0x47b   : > { %v7698_v46 = vpop.permute.xlu1 %2501 }
 0x47f   : > { %v7702_v40 = vpop.permute.xlu1 %2543 }
 0x483   : > { %v7710_v62 = vpop.permute.xlu1 %2655 }
 0x4cf   : > { %v2140_v33 = vpop.f32.mrf.mxu1 }
 0x4d0   : > { %6221 = vrcp.f32 %v2140_v33 }
 0x4d1   : > { %v2142_v14 = vpop.f32.mrf.mxu1 }
 0x4d2   : > { %6223 = vrcp.f32 %v2142_v14 }
 0x4d3   : > { %v2144_v56 = vpop.f32.mrf.mxu1 }
 0x4d5   : > { %v2145_v10 = vpop.f32.mrf.mxu1 }
 0x4dd   : > { %v6222_v48 = vpop.eup %6221 }
 0x4de   : > { %v2152_v50 = vrot.slane %v6222_v48, %v9975_v26 }
 0x4df   : > { %v6224_v8 = vpop.eup %6223 }
 0x4e0   : > { %v2157_v3 = vmul.f32 %v2152_v50, %v2140_v33  ;;  %v2156_v16 = vrot.slane %v6224_v8, %v9975_v26 }
 0x4e2   : > { %v2167_v30 = vrot.slane %v2157_v3, %v9976_v13  ;;  %v2181_v56 = vrot.slane %v2157_v3, %v9977_v15  ;;  %v2158_v52 = vmul.f32 %v2156_v16, %v2142_v14  ;;  %v7714_v16 = vpop.permute.xlu1 %2559 }
 0x4e4   : > { %v2172_v37 = vmul.f32 %v2167_v30, %v2162_v45  ;;  %v2186_v10 = vmul.f32 %v2181_v56, %v2176_v34  ;;  %v2171_v38 = vrot.slane %v2158_v52, %v9976_v13  ;;  %v2185_v48 = vrot.slane %v2158_v52, %v9977_v15  ;;  %v6377_v56 = vld [vmem:[%s6561_s29] sm:$0xff] }
 0x4e6   : > { %v2188_v33 = vadd.f32 %v2186_v10, %v2172_v37  ;;  %v2173_v50 = vmul.f32 %v2171_v38, %v2162_v45  ;;  %v2187_v8 = vmul.f32 %v2185_v48, %v2176_v34  ;;  %v7720_v22 = vpop.permute.xlu1 %2685 }
 0x4e8   : > { %v2189_v51 = vadd.f32 %v2187_v8, %v2173_v50  ;;  %v2190_v3 = vadd.f32 %v2188_v33, %v1417_v44 }
 0x4ea   : > { %v2191_v14 = vadd.f32 %v2189_v51, %v1418_v47  ;;  %v7723_v4 = vpop.permute.xlu1 %2795 }
 0x4ec   : > { %v2196_v30 = vcombine.low %v2190_v3, %v2191_v14 }
 0x4ee   : > { %v2198_v12 = vadd.f32 %v6377_v56, %v2196_v30 }
 0x4f0   : > { %v2200_v52 = vcombine.high %v2198_v12, %v2198_v12  ;;  %v2203_v37 = vsel %vm2202_vm2, %v2198_v12, 0.0  ;;  %v2220_v38 = vmul.f32 %v2198_v12, %v2198_v12 }
 0x4f1   : > { %v2204_v45 = vrot.slane %v2203_v37, 4 }
 0x4f2   : > { %v2210_v34 = vsel %vm2202_vm2, %v2200_v52, 0.0  ;;  %v2222_v10 = vcombine.high %v2220_v38, %v2220_v38  ;;  %v2224_v58 = vsel %vm2202_vm2, %v2220_v38, 0.0 }
 0x4f3   : > { %v2205_v44 = vadd.f32 %v2204_v45, %v2203_v37  ;;  %v2211_v51 = vrot.slane %v2210_v34, 4  ;;  %v2225_v47 = vrot.slane %v2224_v58, 4 }
 0x4f4   : > { %v2231_v24 = vsel %vm2202_vm2, %v2222_v10, 0.0 }
 0x4f5   : > { %v2206_v48 = vrot.slane %v2205_v44, 2  ;;  %v2212_v33 = vadd.f32 %v2211_v51, %v2210_v34  ;;  %v2226_v50 = vadd.f32 %v2225_v47, %v2224_v58  ;;  %v2232_v8 = vrot.slane %v2231_v24, 4  ;;  %v7725_v58 = vpop.permute.xlu1 %2506 }
 0x4f7   : > { %v2207_v3 = vadd.f32 %v2206_v48, %v2205_v44  ;;  %v2213_v14 = vrot.slane %v2212_v33, 2  ;;  %v2227_v30 = vrot.slane %v2226_v50, 2  ;;  %v2233_v56 = vadd.f32 %v2232_v8, %v2231_v24  ;;  %v2295_v48 = vpop.permute.xlu0 %2294 }
 0x4f9   : > { %v2208_v52 = vrot.slane %v2207_v3, 1  ;;  %v2214_v6 = vadd.f32 %v2213_v14, %v2212_v33  ;;  %v2228_v38 = vadd.f32 %v2227_v30, %v2226_v50  ;;  %v2234_v57 = vrot.slane %v2233_v56, 2 }
 0x4fb   : > { %v2209_v43 = vadd.f32 %v2208_v52, %v2207_v3  ;;  %v2215_v37 = vrot.slane %v2214_v6, 1  ;;  %v2229_v45 = vrot.slane %v2228_v38, 1  ;;  %v2235_v41 = vadd.f32 %v2234_v57, %v2233_v56  ;;  %v7727_v3 = vpop.permute.xlu1 %2701 }
 0x4fc   : > { %v6418_v57 = vmov 839922192  }
 0x4fd   : > { %v2216_v60 = vadd.f32 %v2215_v37, %v2214_v6  ;;  %v2218_v10 = vmul.f32 0.25, %v2209_v43  ;;  %v2230_v17 = vadd.f32 %v2229_v45, %v2228_v38  ;;  %v2236_v34 = vrot.slane %v2235_v41, 1  ;;  %v2300_v6 = vpop.permute.xlu0 %2299 }
 0x4fe   : > { %v2263_v56 = vunpack.c.l.s4 %v6418_v57 }
 0x4ff   : > { %v2219_v44 = vmul.f32 0.25, %v2216_v60  ;;  %v2237_v51 = vadd.f32 %v2236_v34, %v2235_v41  ;;  %v2238_v47 = vmul.f32 0.25, %v2230_v17  ;;  %v2240_v24 = vmul.f32 %v2218_v10, %v2218_v10  ;;  %v7729_v43 = vpop.permute.xlu1 %2811 }
 0x500   : > { %v2264_v41 = vunpack.c.0.s8 %v2263_v56  ;;  %v9983_v56 = vld [vmem:[#allocation4_spill] sm:$0xff] }
 0x501   : > { %v2239_v8 = vmul.f32 0.25, %v2237_v51  ;;  %v2241_v9 = vmul.f32 %v2219_v44, %v2219_v44  ;;  %v2242_v33 = vsub.f32 %v2238_v47, %v2240_v24  ;;  %v2305_v60 = vpop.permute.xlu0 %2304  ;;  %v2246_v52 = vcombine.low %v2218_v10, %v2219_v44 }
 0x503   : > { %v2243_v50 = vsub.f32 %v2239_v8, %v2241_v9  ;;  %v2249_v14 = vadd.f32 1e-05, %v2242_v33  ;;  %v7731_v17 = vpop.permute.xlu1 %2921  ;;  %v9978_v9 = vld [vmem:[#allocation2_spill] sm:$0xff]  ;;  %v2248_v51 = vsub.f32 %v2198_v12, %v2246_v52 }
 0x504   : > { %v7736_v45 = vsub.s32 %v2264_v41, %v9978_v9  ;;  %v9985_v9 = vld [vmem:[#allocation8_spill] sm:$0xff] }
 0x505   : > { %v2250_v30 = vadd.f32 1e-05, %v2243_v50  ;;  %6225 = vrsqrt.f32 %v2249_v14  ;;  %v7733_v38 = vpop.permute.xlu0 %2529 }
 0x506   : > { %9979 = vst [vmem:[#allocation46_spill] sm:$0xff] %v7736_v45  ;;  %v2268_v33 = vrot.slane %v7669_v29, %v7736_v45  ;;  %v2281_v10 = vrot.slane %v7671_v1, %v7736_v45  ;;  %v9984_v29 = vld [vmem:[#allocation6_spill] sm:$0xff] }
 0x507   : > { %6227 = vrsqrt.f32 %v2250_v30  ;;  %v7740_v8 = vpop.permute.xlu1 %2591 }
 0x508   : > { %9981 = vst [vmem:[#allocation47_spill] sm:$0xff] %v7740_v8 }
 0x509   : > { %v7738_v24 = vpop.permute.xlu0 %2669 }
 0x50a   : > { %9980 = vst [vmem:[#allocation44_spill] sm:$0xff] %v7738_v24 }
 0x50b   : > { %v7748_v57 = vpop.permute.xlu1 %2827 }
 0x50d   : > { %v2391_v30 = vpop.permute.xlu0 %2390 }
 0x50f   : > { %v7786_v25 = vpop.permute.xlu1 %2937 }
 0x512   : > { %v6226_v37 = vpop.eup %6225 }
 0x514   : > { %v6228_v34 = vpop.eup %6227 }
 0x515   : > { %v2255_v47 = vcombine.low %v6226_v37, %v6228_v34 }
 0x517   : > { %v2257_v50 = vmul.f32 %v2255_v47, %v2248_v51  ;;  %v9986_v51 = vld [vmem:[#allocation9_spill] sm:$0xff] }
 0x519   : > { %v2270_v44 = vmul.f32 %v2268_v33, %v2257_v50  ;;  %v9987_v33 = vld [vmem:[#allocation10_spill] sm:$0xff] }
 0x51b   : > { %v7746_v14 = vadd.f32 %v2281_v10, %v2270_v44 }
 0x51d   : > { %9982 = vst [vmem:[#allocation48_spill] sm:$0xff] %v7746_v14  ;;  %v2316_v12 = vrot.slane %v7746_v14, %v9976_v13  ;;  %v2320_v41 = vrot.slane %v7746_v14, %v9983_v56  ;;  %v2358_v52 = vrot.slane %v7746_v14, %v9977_v15  ;;  %v2362_v37 = vrot.slane %v7746_v14, %v9984_v29 }
 0x51e   : > { %v2408_v1 = vrot.slane %v7746_v14, %v9975_v26  ;;  %v2412_v34 = vrot.slane %v7746_v14, %v9985_v9  ;;  %v2458_v47 = vrot.slane %v7746_v14, %v9986_v51  ;;  %v2462_v50 = vrot.slane %v7746_v14, %v9987_v33 }
 0x51f   : > { %v2326_v10 = vrot.slane %v2316_v12, %v9976_v13  ;;  %v2330_v44 = vrot.slane %v2320_v41, %v9976_v13  ;;  %v2368_v28 = vrot.slane %v2358_v52, %v9977_v15  ;;  %v2372_v7 = vrot.slane %v2362_v37, %v9977_v15 }
 0x520   : > { %v7771_v36 = vrot.slane %v2408_v1, %v9975_v26  ;;  %v7774_v39 = vrot.slane %v2412_v34, %v9975_v26  ;;  %v7777_v23 = vrot.slane %v2458_v47, %v9986_v51  ;;  %v7780_v20 = vrot.slane %v2462_v50, %v9986_v51  ;;  %v2399_v34 = vpop.permute.xlu0 %2398 }
 0x521   : > { %v2331_v61 = vmul.f32 %v2326_v10, %v2295_v48  ;;  %v2332_v12 = vmul.f32 %v2330_v44, %v2295_v48  ;;  %v2373_v41 = vmul.f32 %v2368_v28, %v7676_v42  ;;  %v2374_v52 = vmul.f32 %v2372_v7, %v7676_v42 }
 0x522   : > { %v2333_v35 = vmul.f32 %v2326_v10, %v2300_v6  ;;  %v2334_v37 = vmul.f32 %v2330_v44, %v2300_v6  ;;  %v2375_v1 = vmul.f32 %v2368_v28, %v7678_v21  ;;  %v2376_v5 = vmul.f32 %v2372_v7, %v7678_v21 }
 0x523   : > { %v2381_v47 = vadd.f32 %v2373_v41, %v2331_v61  ;;  %v2382_v59 = vadd.f32 %v2374_v52, %v2332_v12  ;;  %v2425_v50 = vmul.f32 %v7771_v36, %v7680_v63  ;;  %v2426_v48 = vmul.f32 %v7774_v39, %v7680_v63 }
 0x524   : > { %v2383_v54 = vadd.f32 %v2375_v1, %v2333_v35  ;;  %v2384_v27 = vadd.f32 %v2376_v5, %v2334_v37  ;;  %v2475_v42 = vmul.f32 %v7777_v23, %v7686_v18  ;;  %v2476_v6 = vmul.f32 %v7780_v20, %v7686_v18  ;;  %v2403_v24 = vpop.permute.xlu0 %2402 }
 0x525   : > { %v2335_v21 = vmul.f32 %v2326_v10, %v2305_v60  ;;  %v2336_v53 = vmul.f32 %v2330_v44, %v2305_v60  ;;  %v2377_v45 = vmul.f32 %v2368_v28, %v7684_v2  ;;  %v2378_v61 = vmul.f32 %v2372_v7, %v7684_v2  ;;  %v7804_v2 = vpop.permute.xlu1 %2733 }
 0x526   : > { %v2433_v12 = vadd.f32 %v2425_v50, %v2383_v54  ;;  %v2434_v41 = vadd.f32 %v2426_v48, %v2384_v27  ;;  %v2423_v52 = vmul.f32 %v7771_v36, %v2391_v30  ;;  %v2424_v63 = vmul.f32 %v7774_v39, %v2391_v30 }
 0x527   : > { %v2385_v35 = vadd.f32 %v2377_v45, %v2335_v21  ;;  %v2386_v5 = vadd.f32 %v2378_v61, %v2336_v53  ;;  %v2473_v37 = vmul.f32 %v7777_v23, %v7682_v11  ;;  %v2474_v18 = vmul.f32 %v7780_v20, %v7682_v11 }
 0x528   : > { %v2483_v1 = vadd.f32 %v2475_v42, %v2433_v12  ;;  %v2484_v60 = vadd.f32 %v2476_v6, %v2434_v41  ;;  %v2431_v14 = vadd.f32 %v2423_v52, %v2381_v47  ;;  %v2432_v8 = vadd.f32 %v2424_v63, %v2382_v59  ;;  %v2782_v52 = vpop.permute.xlu0 %2781 }
 0x529   : > { %v2427_v54 = vmul.f32 %v7771_v36, %v2399_v34  ;;  %v2428_v27 = vmul.f32 %v7774_v39, %v2399_v34  ;;  %v2477_v53 = vmul.f32 %v7777_v23, %v7692_v19  ;;  %v2478_v45 = vmul.f32 %v7780_v20, %v7692_v19 }
 0x52a   : > { %v2511_v30 = vadd.f32 %v7694_v32, %v2483_v1  ;;  %v2512_v11 = vadd.f32 %v7694_v32, %v2484_v60  ;;  %v2481_v50 = vadd.f32 %v2473_v37, %v2431_v14  ;;  %v2482_v47 = vadd.f32 %v2474_v18, %v2432_v8 }
 0x52b   : > { %v2435_v59 = vadd.f32 %v2427_v54, %v2385_v35  ;;  %v2436_v48 = vadd.f32 %v2428_v27, %v2386_v5  ;;  %v2337_v42 = vmul.f32 %v2326_v10, %v7690_v49  ;;  %v2338_v6 = vmul.f32 %v2330_v44, %v7690_v49 }
 0x52c   : > { %v7816_v21 = vmax.f32 %v2511_v30, 0.0  ;;  %v7818_v34 = vmax.f32 %v2512_v11, 0.0  ;;  %v2509_v61 = vadd.f32 %v7688_v0, %v2481_v50  ;;  %v2510_v19 = vadd.f32 %v7688_v0, %v2482_v47  ;;  %v7832_v0 = vpop.permute.xlu1 %2843 }
 0x52d   : > { %v2485_v12 = vadd.f32 %v2477_v53, %v2435_v59  ;;  %v2486_v41 = vadd.f32 %v2478_v45, %v2436_v48  ;;  %v2379_v32 = vmul.f32 %v2368_v28, %v7704_v31  ;;  %v2380_v8 = vmul.f32 %v2372_v7, %v7704_v31 }
 0x52e   : > { %v2565_v14 = vrot.slane %v7816_v21, %v9976_v13  ;;  %v2569_v49 = vrot.slane %v7818_v34, %v9976_v13  ;;  %v2691_v10 = vrot.slane %v7816_v21, %v9977_v15  ;;  %v2695_v44 = vrot.slane %v7818_v34, %v9977_v15 }
 0x52f   : > { %v2707_v28 = vrot.slane %v7816_v21, %v9984_v29  ;;  %v2711_v7 = vrot.slane %v7818_v34, %v9984_v29  ;;  %v2817_v31 = vrot.slane %v7816_v21, %v9975_v26  ;;  %v2821_v63 = vrot.slane %v7818_v34, %v9975_v26 }
 0x530   : > { %v7843_v35 = vmul.f32 %v2565_v14, %v7714_v16  ;;  %v7846_v5 = vmul.f32 %v2569_v49, %v7714_v16  ;;  %v7849_v37 = vmul.f32 %v2691_v10, %v7720_v22  ;;  %v7852_v18 = vmul.f32 %v2695_v44, %v7720_v22  ;;  %v7868_v22 = vpop.permute.xlu0 %2575 }
 0x531   : > { %v7855_v1 = vmul.f32 %v2707_v28, %v7727_v3  ;;  %v7858_v60 = vmul.f32 %v2711_v7, %v7727_v3  ;;  %v2822_v54 = vmul.f32 %v2817_v31, %v7729_v43  ;;  %v2823_v27 = vmul.f32 %v2821_v63, %v7729_v43 }
 0x532   : > { %v7862_v53 = vmax.f32 %v2509_v61, 0.0  ;;  %v7864_v16 = vmax.f32 %v2510_v19, 0.0  ;;  %v2513_v45 = vadd.f32 %v7698_v46, %v2485_v12  ;;  %v2514_v30 = vadd.f32 %v7698_v46, %v2486_v41  ;;  %v7880_v19 = vpop.permute.xlu1 %2623 }
 0x533   : > { %v2833_v11 = vrot.slane %v7816_v21, %v9985_v9  ;;  %v2837_v3 = vrot.slane %v7818_v34, %v9985_v9  ;;  %v2387_v50 = vadd.f32 %v2379_v32, %v2337_v42  ;;  %v2388_v47 = vadd.f32 %v2380_v8, %v2338_v6 }
 0x534   : > { %v7874_v59 = vmax.f32 %v2513_v45, 0.0  ;;  %v7876_v43 = vmax.f32 %v2514_v30, 0.0  ;;  %v2429_v48 = vmul.f32 %v7771_v36, %v2403_v24  ;;  %v2430_v61 = vmul.f32 %v7774_v39, %v2403_v24  ;;  %v2908_v10 = vpop.permute.xlu0 %2907 }
 0x535   : > { %v2838_v46 = vmul.f32 %v2833_v11, %v7748_v57  ;;  %v2839_v12 = vmul.f32 %v2837_v3, %v7748_v57  ;;  %v2479_v41 = vmul.f32 %v7777_v23, %v7696_v55  ;;  %v2480_v42 = vmul.f32 %v7780_v20, %v7696_v55 }
 0x536   : > { %v2437_v6 = vadd.f32 %v2429_v48, %v2387_v50  ;;  %v2438_v32 = vadd.f32 %v2430_v61, %v2388_v47  ;;  %v2943_v8 = vrot.slane %v7816_v21, %v9986_v51  ;;  %v2947_v39 = vrot.slane %v7818_v34, %v9986_v51  ;;  %v2750_v3 = vpop.permute.xlu1 %2749 }
 0x537   : > { %v2787_v36 = vrot.slane %v7862_v53, %v9975_v26  ;;  %v2791_v24 = vrot.slane %v7864_v16, %v9975_v26  ;;  %v2801_v23 = vrot.slane %v7862_v53, %v9985_v9  ;;  %v2805_v20 = vrot.slane %v7864_v16, %v9985_v9 }
 0x538   : > { %v2487_v55 = vadd.f32 %v2479_v41, %v2437_v6  ;;  %v2488_v57 = vadd.f32 %v2480_v42, %v2438_v32  ;;  %v7901_v14 = vmul.f32 %v2943_v8, %v7786_v25  ;;  %v7904_v49 = vmul.f32 %v2947_v39, %v7786_v25 }
 0x539   : > { %v2792_v44 = vmul.f32 %v2787_v36, %v2782_v52  ;;  %v2793_v28 = vmul.f32 %v2791_v24, %v2782_v52  ;;  %v2806_v7 = vmul.f32 %v2801_v23, %v7723_v4  ;;  %v2807_v31 = vmul.f32 %v2805_v20, %v7723_v4 }
 0x53a   : > { %v2515_v63 = vadd.f32 %v7725_v58, %v2487_v55  ;;  %v2516_v45 = vadd.f32 %v7725_v58, %v2488_v57  ;;  %v2739_v30 = vrot.slane %v7874_v59, %v9984_v29  ;;  %v2743_v11 = vrot.slane %v7876_v43, %v9984_v29 }
 0x53b   : > { %v2808_v25 = vadd.f32 %v2806_v7, %v2792_v44  ;;  %v2809_v50 = vadd.f32 %v2807_v31, %v2793_v28  ;;  %v2849_v52 = vrot.slane %v7874_v59, %v9975_v26  ;;  %v2853_v47 = vrot.slane %v7876_v43, %v9975_v26  ;;  %v2970_v28 = vpop.permute.xlu1 %2969 }
 0x53c   : > { %v7918_v4 = vmax.f32 %v2515_v63, 0.0  ;;  %v7920_v48 = vmax.f32 %v2516_v45, 0.0  ;;  %v7923_v58 = vmul.f32 %v2739_v30, %v7804_v2  ;;  %v7926_v61 = vmul.f32 %v2743_v11, %v7804_v2  ;;  %v2718_v2 = vpop.permute.xlu0 %2717 }
 0x53d   : > { %v2824_v41 = vadd.f32 %v2822_v54, %v2808_v25  ;;  %v2825_v42 = vadd.f32 %v2823_v27, %v2809_v50  ;;  %v2854_v6 = vmul.f32 %v2849_v52, %v7832_v0  ;;  %v2855_v32 = vmul.f32 %v2853_v47, %v7832_v0 }
 0x53e   : > { %v2535_v8 = vrot.slane %v7862_v53, %v9976_v13  ;;  %v2539_v39 = vrot.slane %v7864_v16, %v9976_v13  ;;  %v2549_v36 = vrot.slane %v7862_v53, %v9983_v56  ;;  %v2553_v24 = vrot.slane %v7864_v16, %v9983_v56 }
 0x53f   : > { %v2840_v23 = vadd.f32 %v2838_v46, %v2824_v41  ;;  %v2841_v54 = vadd.f32 %v2839_v12, %v2825_v42  ;;  %v2581_v27 = vrot.slane %v7816_v21, %v9983_v56  ;;  %v2585_v0 = vrot.slane %v7818_v34, %v9983_v56 }
 0x540   : > { %v2540_v20 = vmul.f32 %v2535_v8, %v7733_v38  ;;  %v2541_v55 = vmul.f32 %v2539_v39, %v7733_v38  ;;  %v2554_v57 = vmul.f32 %v2549_v36, %v7702_v40  ;;  %v2555_v44 = vmul.f32 %v2553_v24, %v7702_v40  ;;  %v2608_v42 = vpop.permute.xlu0 %2607 }
 0x541   : > { %v7946_v7 = vadd.f32 %v2854_v6, %v2840_v23  ;;  %v7948_v31 = vadd.f32 %v2855_v32, %v2841_v54  ;;  %v2586_v46 = vmul.f32 %v2581_v27, %v7868_v22  ;;  %v2587_v12 = vmul.f32 %v2585_v0, %v7868_v22  ;;  %v2640_v23 = vpop.permute.xlu1 %2639 }
 0x542   : > { %v2556_v63 = vadd.f32 %v2554_v57, %v2540_v20  ;;  %v2557_v45 = vadd.f32 %v2555_v44, %v2541_v55  ;;  %v2629_v30 = vrot.slane %v7918_v4, %v9976_v13  ;;  %v2633_v38 = vrot.slane %v7920_v48, %v9976_v13 }
 0x543   : > { %v2913_v40 = vrot.slane %v7862_v53, %v9986_v51  ;;  %v2917_v11 = vrot.slane %v7864_v16, %v9986_v51  ;;  %v2927_v25 = vrot.slane %v7862_v53, %v9987_v33  ;;  %v2931_v22 = vrot.slane %v7864_v16, %v9987_v33 }
 0x544   : > { %v2572_v50 = vadd.f32 %v7843_v35, %v2556_v63  ;;  %v2573_v52 = vadd.f32 %v7846_v5, %v2557_v45  ;;  %v7967_v47 = vmul.f32 %v2629_v30, %v7880_v19  ;;  %v7970_v41 = vmul.f32 %v2633_v38, %v7880_v19  ;;  %v9988_v63 = vld [vmem:[#allocation44_spill] sm:$0xff]  ;;  %v2954_v30 = vpop.permute.xlu0 %2953 }
 0x545   : > { %v2918_v6 = vmul.f32 %v2913_v40, %v2908_v10  ;;  %v2919_v32 = vmul.f32 %v2917_v11, %v2908_v10  ;;  %v2932_v8 = vmul.f32 %v2927_v25, %v7731_v17  ;;  %v2933_v39 = vmul.f32 %v2931_v22, %v7731_v17 }
 0x546   : > { %v2588_v36 = vadd.f32 %v2586_v46, %v2572_v50  ;;  %v2589_v24 = vadd.f32 %v2587_v12, %v2573_v52  ;;  %v2755_v35 = vrot.slane %v7918_v4, %v9977_v15  ;;  %v2759_v5 = vrot.slane %v7920_v48, %v9977_v15 }
 0x547   : > { %v2934_v54 = vadd.f32 %v2932_v8, %v2918_v6  ;;  %v2935_v27 = vadd.f32 %v2933_v39, %v2919_v32  ;;  %v2661_v19 = vrot.slane %v7862_v53, %v9977_v15  ;;  %v2665_v10 = vrot.slane %v7864_v16, %v9977_v15  ;;  %v2876_v6 = vpop.permute.xlu1 %2875  ;;  %v9989_v32 = vld [vmem:[#allocation47_spill] sm:$0xff] }
 0x548   : > { %v7982_v0 = vmul.f32 %v2755_v35, %v2750_v3  ;;  %v7984_v17 = vmul.f32 %v2759_v5, %v2750_v3  ;;  %v2675_v20 = vrot.slane %v7862_v53, %v9984_v29  ;;  %v2679_v55 = vrot.slane %v7864_v16, %v9984_v29 }
 0x549   : > { %v2666_v57 = vmul.f32 %v2661_v19, %v7710_v62  ;;  %v2667_v44 = vmul.f32 %v2665_v10, %v7710_v62  ;;  %v2723_v46 = vrot.slane %v7874_v59, %v9977_v15  ;;  %v2727_v12 = vrot.slane %v7876_v43, %v9977_v15 }
 0x54a   : > { %v2680_v45 = vmul.f32 %v2675_v20, %v9988_v63  ;;  %v2681_v3 = vmul.f32 %v2679_v55, %v9988_v63  ;;  %v2975_v53 = vrot.slane %v7874_v59, %v9986_v51  ;;  %v2979_v16 = vrot.slane %v7876_v43, %v9986_v51 }
 0x54b   : > { %v2728_v38 = vmul.f32 %v2723_v46, %v2718_v2  ;;  %v2729_v40 = vmul.f32 %v2727_v12, %v2718_v2  ;;  %v2597_v62 = vrot.slane %v7874_v59, %v9976_v13  ;;  %v2601_v11 = vrot.slane %v7876_v43, %v9976_v13 }
 0x54c   : > { %v2682_v25 = vadd.f32 %v2680_v45, %v2666_v57  ;;  %v2683_v22 = vadd.f32 %v2681_v3, %v2667_v44  ;;  %v2980_v50 = vmul.f32 %v2975_v53, %v2970_v28  ;;  %v2981_v52 = vmul.f32 %v2979_v16, %v2970_v28  ;;  %v2860_v3 = vpop.permute.xlu0 %2859 }
 0x54d   : > { %v2602_v8 = vmul.f32 %v2597_v62, %v9989_v32  ;;  %v2603_v39 = vmul.f32 %v2601_v11, %v9989_v32  ;;  %v2613_v35 = vrot.slane %v7874_v59, %v9983_v56  ;;  %v2617_v2 = vrot.slane %v7876_v43, %v9983_v56 }
 0x54e   : > { %v2698_v5 = vadd.f32 %v7849_v37, %v2682_v25  ;;  %v2699_v19 = vadd.f32 %v7852_v18, %v2683_v22  ;;  %v2645_v10 = vrot.slane %v7918_v4, %v9983_v56  ;;  %v2649_v28 = vrot.slane %v7920_v48, %v9983_v56 }
 0x54f   : > { %v2604_v20 = vadd.f32 %v2602_v8, %v2588_v36  ;;  %v2605_v55 = vadd.f32 %v2603_v39, %v2589_v24  ;;  %v2618_v57 = vmul.f32 %v2613_v35, %v2608_v42  ;;  %v2619_v44 = vmul.f32 %v2617_v2, %v2608_v42 }
 0x550   : > { %v2714_v46 = vadd.f32 %v7855_v1, %v2698_v5  ;;  %v2715_v12 = vadd.f32 %v7858_v60, %v2699_v19  ;;  %v2650_v63 = vmul.f32 %v2645_v10, %v2640_v23  ;;  %v2651_v45 = vmul.f32 %v2649_v28, %v2640_v23  ;;  %v2986_v1 = vpop.permute.xlu1 %2985  ;;  %v2766_v8 = vpop.permute.xlu0 %2765 }
 0x551   : > { %v2620_v37 = vadd.f32 %v2618_v57, %v2604_v20  ;;  %v2621_v53 = vadd.f32 %v2619_v44, %v2605_v55  ;;  %v2950_v18 = vadd.f32 %v7901_v14, %v2934_v54  ;;  %v2951_v16 = vadd.f32 %v7904_v49, %v2935_v27 }
 0x552   : > { %v2730_v62 = vadd.f32 %v2728_v38, %v2714_v46  ;;  %v2731_v11 = vadd.f32 %v2729_v40, %v2715_v12  ;;  %v2959_v36 = vrot.slane %v7816_v21, %v9987_v33  ;;  %v2963_v42 = vrot.slane %v7818_v34, %v9987_v33 }
 0x553   : > { %v2636_v60 = vadd.f32 %v7967_v47, %v2620_v37  ;;  %v2637_v24 = vadd.f32 %v7970_v41, %v2621_v53  ;;  %v2881_v23 = vrot.slane %v7918_v4, %v9975_v26  ;;  %v2885_v14 = vrot.slane %v7920_v48, %v9975_v26 }
 0x554   : > { %v2746_v49 = vadd.f32 %v7923_v58, %v2730_v62  ;;  %v2747_v54 = vadd.f32 %v7926_v61, %v2731_v11  ;;  %v2964_v27 = vmul.f32 %v2959_v36, %v2954_v30  ;;  %v2965_v21 = vmul.f32 %v2963_v42, %v2954_v30  ;;  %v3002_v19 = vpop.permute.xlu1 %3001 }
 0x555   : > { %v2652_v38 = vadd.f32 %v2650_v63, %v2636_v60  ;;  %v2653_v40 = vadd.f32 %v2651_v45, %v2637_v24  ;;  %v2886_v34 = vmul.f32 %v2881_v23, %v2876_v6  ;;  %v2887_v25 = vmul.f32 %v2885_v14, %v2876_v6  ;;  %v2892_v63 = vpop.permute.xlu0 %2891 }
 0x556   : > { %v2966_v22 = vadd.f32 %v2964_v27, %v2950_v18  ;;  %v2967_v47 = vadd.f32 %v2965_v21, %v2951_v16  ;;  %v2865_v41 = vrot.slane %v7874_v59, %v9985_v9  ;;  %v2869_v32 = vrot.slane %v7876_v43, %v9985_v9 }
 0x557   : > { %v2991_v58 = vrot.slane %v7874_v59, %v9987_v33  ;;  %v2995_v61 = vrot.slane %v7876_v43, %v9987_v33  ;;  %v2762_v30 = vadd.f32 %v7982_v0, %v2746_v49  ;;  %v2763_v39 = vadd.f32 %v7984_v17, %v2747_v54 }
 0x558   : > { %v2870_v6 = vmul.f32 %v2865_v41, %v2860_v3  ;;  %v2871_v35 = vmul.f32 %v2869_v32, %v2860_v3  ;;  %v2982_v2 = vadd.f32 %v2980_v50, %v2966_v22  ;;  %v2983_v5 = vadd.f32 %v2981_v52, %v2967_v47  ;;  %v3018_v36 = vpop.permute.xlu1 %3017 }
 0x559   : > { %v2996_v10 = vmul.f32 %v2991_v58, %v2986_v1  ;;  %v2997_v28 = vmul.f32 %v2995_v61, %v2986_v1  ;;  %v2771_v20 = vrot.slane %v7918_v4, %v9984_v29  ;;  %v2775_v59 = vrot.slane %v7920_v48, %v9984_v29  ;;  %v3041_v41 = vpop.permute.xlu0 %3040 }
 0x55a   : > { %v2872_v55 = vadd.f32 %v2870_v6, %v7946_v7  ;;  %v2873_v43 = vadd.f32 %v2871_v35, %v7948_v31  ;;  %v3007_v0 = vrot.slane %v7918_v4, %v9986_v51  ;;  %v3011_v17 = vrot.slane %v7920_v48, %v9986_v51 }
 0x55b   : > { %v2998_v50 = vadd.f32 %v2996_v10, %v2982_v2  ;;  %v2999_v52 = vadd.f32 %v2997_v28, %v2983_v5  ;;  %v2776_v57 = vmul.f32 %v2771_v20, %v2766_v8  ;;  %v2777_v44 = vmul.f32 %v2775_v59, %v2766_v8 }
 0x55c   : > { %v3012_v46 = vmul.f32 %v3007_v0, %v3002_v19  ;;  %v3013_v12 = vmul.f32 %v3011_v17, %v3002_v19  ;;  %v2888_v45 = vadd.f32 %v2886_v34, %v2872_v55  ;;  %v2889_v3 = vadd.f32 %v2887_v25, %v2873_v43 }
 0x55d   : > { %v2778_v37 = vadd.f32 %v2776_v57, %v2762_v30  ;;  %v2779_v53 = vadd.f32 %v2777_v44, %v2763_v39  ;;  %v2897_v7 = vrot.slane %v7918_v4, %v9985_v9  ;;  %v2901_v31 = vrot.slane %v7920_v48, %v9985_v9 }
 0x55e   : > { %v3014_v18 = vadd.f32 %v3012_v46, %v2998_v50  ;;  %v3015_v16 = vadd.f32 %v3013_v12, %v2999_v52  ;;  %v3023_v62 = vrot.slane %v7918_v4, %v9987_v33  ;;  %v3027_v11 = vrot.slane %v7920_v48, %v9987_v33  ;;  %v9990_v48 = vld [vmem:[#allocation48_spill] sm:$0xff] }
 0x55f   : > { %v3032_v42 = vadd.f32 %v2778_v37, %v2652_v38  ;;  %v3033_v1 = vadd.f32 %v2779_v53, %v2653_v40  ;;  %v2902_v60 = vmul.f32 %v2897_v7, %v2892_v63  ;;  %v2903_v24 = vmul.f32 %v2901_v31, %v2892_v63 }
 0x560   : > { %v3028_v49 = vmul.f32 %v3023_v62, %v3018_v36  ;;  %v3029_v54 = vmul.f32 %v3027_v11, %v3018_v36 }
 0x561   : > { %v2904_v23 = vadd.f32 %v2902_v60, %v2888_v45  ;;  %v2905_v14 = vadd.f32 %v2903_v24, %v2889_v3  ;;  %v3112_v60 = vpop.permute.xlu1 %3111 }
 0x562   : > { %v3030_v27 = vadd.f32 %v3028_v49, %v3014_v18  ;;  %v3031_v21 = vadd.f32 %v3029_v54, %v3015_v16 }
 0x563   : > { %v3034_v34 = vadd.f32 %v3032_v42, %v2904_v23  ;;  %v3035_v25 = vadd.f32 %v3033_v1, %v2905_v14 }
 0x565   : > { %v3036_v22 = vadd.f32 %v3034_v34, %v3030_v27  ;;  %v3037_v47 = vadd.f32 %v3035_v25, %v3031_v21  ;;  %v3125_v49 = vpop.permute.xlu1 %3124 }
 0x567   : > { %v3043_v4 = vadd.f32 %v3041_v41, %v3036_v22  ;;  %v3044_v32 = vadd.f32 %v3041_v41, %v3037_v47 }
 0x569   : > { %v3049_v8 = vcombine.low %v3043_v4, %v3044_v32  ;;  %v3191_v54 = vpop.permute.xlu1 %3190  ;;  %v9991_v4 = vld [vmem:[#allocation46_spill] sm:$0xff] }
 0x56a   : > { %v3119_v32 = vrot.slane %v3112_v60, %v9991_v4 }
 0x56b   : > { %v3051_v58 = vadd.f32 %v3049_v8, %v9990_v48  ;;  %v3132_v48 = vrot.slane %v3125_v49, %v9991_v4 }
 0x56d   : > { %v3053_v38 = vcombine.high %v3051_v58, %v3051_v58  ;;  %v3055_v40 = vsel %vm2202_vm2, %v3051_v58, 0.0  ;;  %v3071_v61 = vmul.f32 %v3051_v58, %v3051_v58  ;;  %v3243_v25 = vpop.permute.xlu1 %3242 }
 0x56e   : > { %v3056_v30 = vrot.slane %v3055_v40, 4 }
 0x56f   : > { %v3073_v39 = vcombine.high %v3071_v61, %v3071_v61  ;;  %v3075_v6 = vsel %vm2202_vm2, %v3071_v61, 0.0  ;;  %v3062_v35 = vsel %vm2202_vm2, %v3053_v38, 0.0  ;;  %v3166_v38 = vpop.permute.xlu0 %3165 }
 0x570   : > { %v3076_v2 = vrot.slane %v3075_v6, 4  ;;  %v3057_v5 = vadd.f32 %v3056_v30, %v3055_v40  ;;  %v3063_v19 = vrot.slane %v3062_v35, 4 }
 0x571   : > { %v3082_v10 = vsel %vm2202_vm2, %v3073_v39, 0.0  ;;  %v3270_v40 = vpop.permute.xlu1 %3269 }
 0x572   : > { %v3077_v28 = vadd.f32 %v3076_v2, %v3075_v6  ;;  %v3083_v20 = vrot.slane %v3082_v10, 4  ;;  %v3058_v59 = vrot.slane %v3057_v5, 2  ;;  %v3064_v55 = vadd.f32 %v3063_v19, %v3062_v35 }
 0x573   : > { %v3217_v35 = vpop.permute.xlu0 %3216 }
 0x574   : > { %v3078_v43 = vrot.slane %v3077_v28, 2  ;;  %v3084_v0 = vadd.f32 %v3083_v20, %v3082_v10  ;;  %v3059_v17 = vadd.f32 %v3058_v59, %v3057_v5  ;;  %v3065_v50 = vrot.slane %v3064_v55, 2 }
 0x576   : > { %v3060_v52 = vrot.slane %v3059_v17, 1  ;;  %v3066_v57 = vadd.f32 %v3065_v50, %v3064_v55  ;;  %v3079_v44 = vadd.f32 %v3078_v43, %v3077_v28  ;;  %v3085_v46 = vrot.slane %v3084_v0, 2 }
 0x578   : > { %v3061_v12 = vadd.f32 %v3060_v52, %v3059_v17  ;;  %v3067_v63 = vrot.slane %v3066_v57, 1  ;;  %v3080_v45 = vrot.slane %v3079_v44, 1  ;;  %v3086_v3 = vadd.f32 %v3085_v46, %v3084_v0  ;;  %v3283_v17 = vpop.permute.xlu1 %3282 }
 0x57a   : > { %v3068_v37 = vadd.f32 %v3067_v63, %v3066_v57  ;;  %v3069_v53 = vmul.f32 0.25, %v3061_v12  ;;  %v3081_v7 = vadd.f32 %v3080_v45, %v3079_v44  ;;  %v3087_v31 = vrot.slane %v3086_v3, 1  ;;  %v3277_v63 = vpop.permute.xlu0 %3276 }
 0x57c   : > { %v3070_v18 = vmul.f32 0.25, %v3068_v37  ;;  %v3088_v16 = vadd.f32 %v3087_v31, %v3086_v3  ;;  %v3089_v62 = vmul.f32 0.25, %v3081_v7  ;;  %v3091_v11 = vmul.f32 %v3069_v53, %v3069_v53 }
 0x57e   : > { %v3090_v36 = vmul.f32 0.25, %v3088_v16  ;;  %v3092_v42 = vmul.f32 %v3070_v18, %v3070_v18  ;;  %v3093_v1 = vsub.f32 %v3089_v62, %v3091_v11  ;;  %v3097_v27 = vcombine.low %v3069_v53, %v3070_v18 }
 0x580   : > { %v3094_v24 = vsub.f32 %v3090_v36, %v3092_v42  ;;  %v3100_v23 = vadd.f32 1e-05, %v3093_v1  ;;  %v3099_v22 = vsub.f32 %v3051_v58, %v3097_v27  ;;  %v3291_v36 = vpop.permute.xlu1 %3290  ;;  %v3299_v27 = vpop.permute.xlu0 %3298 }
 0x582   : > { %v3101_v14 = vadd.f32 1e-05, %v3094_v24  ;;  %6229 = vrsqrt.f32 %v3100_v23 }
 0x584   : > { %6231 = vrsqrt.f32 %v3101_v14 }
 0x58f   : > { %v6230_v21 = vpop.eup %6229 }
 0x591   : > { %v6232_v34 = vpop.eup %6231 }
 0x592   : > { %v3106_v47 = vcombine.low %v6230_v21, %v6232_v34 }
 0x594   : > { %v3108_v41 = vmul.f32 %v3106_v47, %v3099_v22 }
 0x596   : > { %v3121_v8 = vmul.f32 %v3119_v32, %v3108_v41 }
 0x598   : > { %v8069_v61 = vadd.f32 %v3132_v48, %v3121_v8  ;;  %v3308_v48 = vpop.permute.xlu1 %3307 }
 0x59a   : > { %9992 = vst [vmem:[#allocation49_spill] sm:$0xff] %v8069_v61  ;;  %v3248_v30 = vrot.slane %v8069_v61, %v9986_v51  ;;  %v3252_v39 = vrot.slane %v8069_v61, %v9987_v33  ;;  %v3172_v58 = vrot.slane %v8069_v61, %v9976_v13  ;;  %v3176_v6 = vrot.slane %v8069_v61, %v9983_v56 }
 0x59b   : > { %v3196_v2 = vrot.slane %v8069_v61, %v9977_v15  ;;  %v3200_v5 = vrot.slane %v8069_v61, %v9984_v29  ;;  %v3222_v19 = vrot.slane %v8069_v61, %v9975_v26  ;;  %v3226_v10 = vrot.slane %v8069_v61, %v9985_v9 }
 0x59c   : > { %v8088_v28 = vrot.slane %v3172_v58, %v9976_v13  ;;  %v8091_v20 = vrot.slane %v3176_v6, %v9976_v13  ;;  %v8106_v50 = vrot.slane %v3248_v30, %v9986_v51  ;;  %v8109_v52 = vrot.slane %v3252_v39, %v9986_v51 }
 0x59d   : > { %v8094_v59 = vrot.slane %v3196_v2, %v9977_v15  ;;  %v8097_v55 = vrot.slane %v3200_v5, %v9977_v15  ;;  %v8100_v43 = vrot.slane %v3222_v19, %v9975_v26  ;;  %v8103_v0 = vrot.slane %v3226_v10, %v9975_v26  ;;  %v5833_v5 = vld [vmem:[%s9487_s2 + $0x6] sm:$0x3] }
 0x59e   : > { %9993 = vst [vmem:[#allocation50_spill] sm:$0xff] %v8088_v28  ;;  %9994 = vst [vmem:[#allocation45_spill] sm:$0xff] %v8091_v20  ;;  %v3187_v57 = vmul.f32 %v8088_v28, %v3166_v38  ;;  %v3188_v44 = vmul.f32 %v8091_v20, %v3166_v38  ;;  %v3263_v7 = vmul.f32 %v8106_v50, %v3243_v25  ;;  %v10001_v2 = vmov 0   ;;  %v5835_v19 = vld [vmem:[%s9488_s3 + $0x6] sm:$0x3] }
 0x59f   : > { %9995 = vst [vmem:[#allocation42_spill] sm:$0xff] %v8094_v59  ;;  %9996 = vst [vmem:[#allocation43_spill] sm:$0xff] %v8097_v55  ;;  %v3211_v46 = vmul.f32 %v8094_v59, %v3191_v54  ;;  %v3212_v12 = vmul.f32 %v8097_v55, %v3191_v54  ;;  %v3237_v37 = vmul.f32 %v8100_v43, %v3217_v35  ;;  %v10002_v10 = vmov 1  }
 0x5a0   : > { %9997 = vst [vmem:[#allocation40_spill] sm:$0xff] %v8100_v43  ;;  %9998 = vst [vmem:[#allocation68_spill] sm:$0xff] %v8103_v0  ;;  %v3238_v53 = vmul.f32 %v8103_v0, %v3217_v35  ;;  %v3264_v31 = vmul.f32 %v8109_v52, %v3243_v25  ;;  %v3279_v62 = vmul.f32 %v3277_v63, %v8088_v28 }
 0x5a1   : > { %9999 = vst [vmem:[#allocation67_spill] sm:$0xff] %v8106_v50  ;;  %10000 = vst [vmem:[#allocation41_spill] sm:$0xff] %v8109_v52  ;;  %v3213_v45 = vadd.f32 %v3211_v46, %v3187_v57  ;;  %v3214_v3 = vadd.f32 %v3212_v12, %v3188_v44  ;;  %v3280_v11 = vmul.f32 %v3277_v63, %v8091_v20  ;;  %v10004_v57 = vmov 3   ;;  %v5837_v44 = vld [vmem:[%s9489_s4 + $0x6] sm:$0x3]  ;;  %v4012_v46 = vpop.permute.xlu0 %4011 }
 0x5a2   : > { %v3285_v42 = vmul.f32 %v3283_v17, %v8094_v59  ;;  %v3286_v1 = vmul.f32 %v3283_v17, %v8097_v55  ;;  %v3293_v49 = vmul.f32 %v3291_v36, %v8100_v43  ;;  %v3294_v54 = vmul.f32 %v3291_v36, %v8103_v0 }
 0x5a3   : > { %v3239_v18 = vadd.f32 %v3237_v37, %v3213_v45  ;;  %v3240_v16 = vadd.f32 %v3238_v53, %v3214_v3  ;;  %v3301_v25 = vmul.f32 %v3299_v27, %v8106_v50  ;;  %v3302_v22 = vmul.f32 %v3299_v27, %v8109_v52 }
 0x5a4   : > { %v3287_v23 = vadd.f32 %v3285_v42, %v3279_v62  ;;  %v3288_v14 = vadd.f32 %v3286_v1, %v3280_v11  ;;  %v10003_v17 = vmov 2   ;;  %v4014_v1 = vmul.f32 %v4012_v46, %v8088_v28 }
 0x5a5   : > { %v3265_v60 = vadd.f32 %v3263_v7, %v3239_v18  ;;  %v3266_v24 = vadd.f32 %v3264_v31, %v3240_v16  ;;  %v4018_v12 = vpop.permute.xlu0 %4017 }
 0x5a6   : > { %v3295_v47 = vadd.f32 %v3293_v49, %v3287_v23  ;;  %v3296_v41 = vadd.f32 %v3294_v54, %v3288_v14  ;;  %v4021_v23 = vmul.f32 %v4018_v12, %v8097_v55 }
 0x5a7   : > { %v3272_v21 = vadd.f32 %v3270_v40, %v3265_v60  ;;  %v3273_v34 = vadd.f32 %v3270_v40, %v3266_v24  ;;  %v4015_v60 = vmul.f32 %v4012_v46, %v8091_v20  ;;  %v4020_v24 = vmul.f32 %v4018_v12, %v8094_v59 }
 0x5a8   : > { %v3303_v38 = vadd.f32 %v3301_v25, %v3295_v47  ;;  %v3304_v30 = vadd.f32 %v3302_v22, %v3296_v41 }
 0x5a9   : > { %v3350_v32 = vpack.c.bf16 %v3272_v21, %v3272_v21  ;;  %v3351_v8 = vpack.c.bf16 %v3273_v34, %v3273_v34  ;;  %v4026_v45 = vpop.permute.xlu0 %4025  ;;  %v4022_v54 = vadd.f32 %v4020_v24, %v4014_v1  ;;  %v4023_v27 = vadd.f32 %v4021_v23, %v4015_v60 }
 0x5aa   : > { %v3310_v39 = vadd.f32 %v3308_v48, %v3303_v38  ;;  %v3311_v58 = vadd.f32 %v3308_v48, %v3304_v30  ;;  %v4028_v21 = vmul.f32 %v4026_v45, %v8100_v43  ;;  %v4029_v34 = vmul.f32 %v4026_v45, %v8103_v0 }
 0x5ab   : > { %3370 = vxpose.xlu0.c.b16.start.end [1/1] (short) %v3351_v8, 128  ;;  %3354 = vxpose.xlu1.c.b16.start.end [1/1] (short) %v3350_v32, 128 }
 0x5ac   : > { %v3352_v6 = vpack.c.bf16 %v3310_v39, %v3310_v39  ;;  %v3353_v35 = vpack.c.bf16 %v3311_v58, %v3311_v58  ;;  %v4030_v22 = vadd.f32 %v4028_v21, %v4022_v54  ;;  %v4031_v47 = vadd.f32 %v4029_v34, %v4023_v27 }
 0x5ad   : > { %v4034_v37 = vpop.permute.xlu0 %4033 }
 0x5ae   : > { %5845 = vmatprep.subr.msk.bf16.mxu0 %vm843_vm0, %v3353_v35  ;;  %v3435_v40 = vsel %vm843_vm0, %v3352_v6, 0  ;;  %v4036_v32 = vmul.f32 %v4034_v37, %v8106_v50  ;;  %v4037_v8 = vmul.f32 %v4034_v37, %v8109_v52 }
 0x5af   : > { %3455 = vmatpush1.bf16.msra.mxu0 %v3435_v40 }
 0x5b0   : > { %v4038_v48 = vadd.f32 %v4036_v32, %v4030_v22  ;;  %v4039_v38 = vadd.f32 %v4037_v8, %v4031_v47 }
 0x5b4   : > { %6027 = vset.pattern.permute.xlu0 %v10001_v2 }
 0x5cb   : > { %4042 = vperm.xlu1 %6022, %v5833_v5  }
 0x5cf   : > { %6028 = vset.pattern.permute.xlu1 %v10002_v10 }
 0x5d0   : > { %4049 = vperm.xlu0 %6027, %v5835_v19   ;;  %4055 = vperm.xlu1 %6028, %v5835_v19  }
 0x5d4   : > { %6029 = vset.pattern.permute.xlu1 %v10003_v17 }
 0x5d5   : > { %4063 = vperm.xlu1 %6029, %v5835_v19  }
 0x5d9   : > { %6030 = vset.pattern.permute.xlu1 %v10004_v57 }
 0x5da   : > { %4071 = vperm.xlu1 %6030, %v5835_v19  }
 0x5de   : > { %6031 = vset.pattern.permute.xlu1 %v10001_v2 }
 0x5df   : > { %4080 = vperm.xlu1 %6031, %v5837_v44  }
 0x60d   : > { %v3362_v63 = vpop.trf.xlu1  ;;  %v3378_v7 = vpop.trf.xlu0 }
 0x60e   : > { %5846 = vmatmul.mubr.msk.bf16.vlgmr.msra.gmra.mxu0 %vm794_vm1, %v3362_v63 }
 0x60f   : > { %3482 = vmatprep.mubr.bf16.mxu0 %v10001_v2 }
 0x611   : > { %v3363_v3 = vpop.trf.xlu1  ;;  %v3379_v18 = vpop.trf.xlu0 }
 0x615   : > { %v3364_v53 = vpop.trf.xlu1  ;;  %v8151_v16 = vpop.trf.xlu0 }
 0x616   : > { %5847 = vmatmul.mubr.msk.bf16.gmra.mxu0 %vm794_vm1, %v3363_v3 }
 0x617   : > { %3492 = vmatprep.mubr.bf16.mxu0 %v10001_v2 }
 0x619   : > { %v3365_v31 = vpop.trf.xlu1  ;;  %v8155_v11 = vpop.trf.xlu0 }
 0x61d   : > { %v3366_v62 = vpop.trf.xlu1  ;;  %v8157_v42 = vpop.trf.xlu0 }
 0x61e   : > { %5848 = vmatmul.mubr.msk.bf16.gmra.mxu0 %vm794_vm1, %v3364_v53 }
 0x61f   : > { %3502 = vmatprep.mubr.bf16.mxu0 %v10001_v2 }
 0x621   : > { %v3367_v36 = vpop.trf.xlu1  ;;  %v3383_v49 = vpop.trf.xlu0 }
 0x625   : > { %v3368_v14 = vpop.trf.xlu1  ;;  %v3384_v41 = vpop.trf.xlu0 }
 0x626   : > { %5849 = vmatmul.mubr.msk.bf16.gmra.mxu0 %vm794_vm1, %v3365_v31 }
 0x627   : > { %3512 = vmatprep.mubr.bf16.mxu0 %v10001_v2 }
 0x629   : > { %v3369_v25 = vpop.trf.xlu1  ;;  %v3385_v6 = vpop.trf.xlu0 }
 0x62e   : > { %5850 = vmatmul.mubr.msk.bf16.gmra.mxu0 %vm794_vm1, %v3366_v62 }
 0x62f   : > { %3522 = vmatprep.mubr.bf16.mxu0 %v10001_v2 }
 0x636   : > { %5851 = vmatmul.mubr.msk.bf16.gmra.mxu0 %vm794_vm1, %v3367_v36 }
 0x637   : > { %3532 = vmatprep.mubr.bf16.mxu0 %v10001_v2 }
 0x63e   : > { %5852 = vmatmul.mubr.msk.bf16.gmra.mxu0 %vm794_vm1, %v3368_v14 }
 0x63f   : > { %3542 = vmatprep.mubr.bf16.mxu0 %v10001_v2 }
 0x646   : > { %5853 = vmatmul.mubr.msk.bf16.gmra.mxu0 %vm794_vm1, %v3369_v25  ;;  %v4043_v30 = vpop.permute.xlu1 %4042 }
 0x647   : > { %v4045_v39 = vadd.f32 %v4043_v30, %v4038_v48  ;;  %v4046_v58 = vadd.f32 %v4043_v30, %v4039_v38  ;;  %3552 = vmatprep.mubr.bf16.mxu0 %v10001_v2 }
 0x649   : > { %v4123_v35 = vpack.c.bf16 %v4045_v39, %v4045_v39  ;;  %v4124_v40 = vpack.c.bf16 %v4046_v58, %v4046_v58 }
 0x64b   : > { %4143 = vxpose.xlu0.c.b16.start.end [1/1] (short) %v4124_v40, 128  ;;  %4127 = vxpose.xlu1.c.b16.start.end [1/1] (short) %v4123_v35, 128  ;;  %v4056_v5 = vpop.permute.xlu1 %4055  ;;  %v4050_v19 = vpop.permute.xlu0 %4049 }
 0x64c   : > { %v4052_v44 = vmul.f32 %v4050_v19, %v8088_v28  ;;  %v4053_v46 = vmul.f32 %v4050_v19, %v8091_v20  ;;  %v4058_v12 = vmul.f32 %v4056_v5, %v8094_v59  ;;  %v4059_v63 = vmul.f32 %v4056_v5, %v8097_v55 }
 0x64e   : > { %5854 = vmatmul.mubr.msk.bf16.gmra.mxu0 %vm794_vm1, %v3378_v7  ;;  %v4060_v53 = vadd.f32 %v4058_v12, %v4052_v44  ;;  %v4061_v31 = vadd.f32 %v4059_v63, %v4053_v46 }
 0x64f   : > { %3562 = vmatprep.mubr.bf16.mxu0 %v10001_v2  ;;  %6032 = vset.pattern.permute.xlu1 %v10002_v10 }
 0x650   : > { %v4064_v45 = vpop.permute.xlu1 %4063 }
 0x651   : > { %v4066_v3 = vmul.f32 %v4064_v45, %v8100_v43  ;;  %v4067_v37 = vmul.f32 %v4064_v45, %v8103_v0 }
 0x653   : > { %v4068_v62 = vadd.f32 %v4066_v3, %v4060_v53  ;;  %v4069_v36 = vadd.f32 %v4067_v37, %v4061_v31 }
 0x655   : > { %v4072_v7 = vpop.permute.xlu1 %4071 }
 0x656   : > { %v4074_v1 = vmul.f32 %v4072_v7, %v8106_v50  ;;  %v4075_v60 = vmul.f32 %v4072_v7, %v8109_v52  ;;  %5855 = vmatmul.mubr.msk.bf16.gmra.mxu0 %vm794_vm1, %v3379_v18 }
 0x657   : > { %3572 = vmatprep.mubr.bf16.mxu0 %v10001_v2 }
 0x658   : > { %v4076_v24 = vadd.f32 %v4074_v1, %v4068_v62  ;;  %v4077_v23 = vadd.f32 %v4075_v60, %v4069_v36 }
 0x65a   : > { %v4081_v14 = vpop.permute.xlu1 %4080 }
 0x65b   : > { %v4083_v54 = vadd.f32 %v4081_v14, %v4076_v24  ;;  %v4084_v27 = vadd.f32 %v4081_v14, %v4077_v23 }
 0x65d   : > { %v4125_v21 = vpack.c.bf16 %v4083_v54, %v4083_v54  ;;  %v4126_v34 = vpack.c.bf16 %v4084_v27, %v4084_v27 }
 0x65e   : > { %5856 = vmatmul.mubr.msk.bf16.gmra.mxu0 %vm794_vm1, %v8151_v16 }
 0x65f   : > { %5862 = vmatprep.subr.msk.bf16.mxu0 %vm843_vm0, %v4126_v34  ;;  %v4208_v25 = vsel %vm843_vm0, %v4125_v21, 0  ;;  %3582 = vmatprep.mubr.bf16.mxu0 %v10001_v2 }
 0x660   : > { %4228 = vmatpush1.bf16.msra.mxu0 %v4208_v25 }
 0x666   : > { %5857 = vmatmul.mubr.msk.bf16.gmra.mxu0 %vm794_vm1, %v8155_v11 }
 0x667   : > { %3592 = vmatprep.mubr.bf16.mxu0 %v10001_v2 }
 0x66e   : > { %5858 = vmatmul.mubr.msk.bf16.gmra.mxu0 %vm794_vm1, %v8157_v42 }
 0x66f   : > { %3602 = vmatprep.mubr.bf16.mxu0 %v10001_v2 }
 0x676   : > { %5859 = vmatmul.mubr.msk.bf16.gmra.mxu0 %vm794_vm1, %v3383_v49 }
 0x677   : > { %3612 = vmatprep.mubr.bf16.mxu0 %v10001_v2 }
 0x67e   : > { %5860 = vmatmul.mubr.msk.bf16.gmra.mxu0 %vm794_vm1, %v3384_v41 }
 0x67f   : > { %3622 = vmatprep.mubr.bf16.mxu0 %v10001_v2 }
 0x686   : > { %5861 = vmatmul.mubr.msk.bf16.gmra.mxu0 %vm794_vm1, %v3385_v6 }
 0x687   : > { %4245 = vmatprep.mubr.bf16.mxu0 %v10001_v2 }
 0x6ad   : > { %v4135_v18 = vpop.trf.xlu1  ;;  %v4151_v62 = vpop.trf.xlu0 }
 0x6ae   : > { %5863 = vmatmul.mubr.msk.bf16.vlgmr.msra.gmra.mxu0 %vm794_vm1, %v4135_v18 }
 0x6af   : > { %4255 = vmatprep.mubr.bf16.mxu0 %v10001_v2 }
 0x6b1   : > { %v4136_v16 = vpop.trf.xlu1  ;;  %v4152_v54 = vpop.trf.xlu0 }
 0x6b5   : > { %v4137_v11 = vpop.trf.xlu1 }
 0x6b6   : > { %5864 = vmatmul.mubr.msk.bf16.gmra.mxu0 %vm794_vm1, %v4136_v16 }
 0x6b7   : > { %4265 = vmatprep.mubr.bf16.mxu0 %v10001_v2 }
 0x6b9   : > { %v4138_v42 = vpop.trf.xlu1 }
 0x6bd   : > { %v4139_v49 = vpop.trf.xlu1 }
 0x6be   : > { %5865 = vmatmul.mubr.msk.bf16.gmra.mxu0 %vm794_vm1, %v4137_v11  ;;  %v4153_v11 = vpop.trf.xlu0 }
 0x6bf   : > { %4275 = vmatprep.mubr.bf16.mxu0 %v10001_v2 }
 0x6c1   : > { %v4140_v8 = vpop.trf.xlu1 }
 0x6c5   : > { %v4141_v35 = vpop.trf.xlu1 }
 0x6c6   : > { %5866 = vmatmul.mubr.msk.bf16.gmra.mxu0 %vm794_vm1, %v4138_v42 }
 0x6c7   : > { %4285 = vmatprep.mubr.bf16.mxu0 %v10001_v2 }
 0x6c9   : > { %v4142_v63 = vpop.trf.xlu1 }
 0x6ce   : > { %v8211_v22 = vpop.f32.mrf.mxu0  ;;  %5867 = vmatmul.mubr.msk.bf16.gmra.mxu0 %vm794_vm1, %v4139_v49 }
 0x6cf   : > { %10005 = vst [vmem:[#allocation38_spill] sm:$0xff] %v8211_v22  ;;  %4295 = vmatprep.mubr.bf16.mxu0 %v10001_v2 }
 0x6d0   : > { %v8215_v47 = vpop.f32.mrf.mxu0 }
 0x6d1   : > { %v3633_v41 = vmax.f32 %v8211_v22, %v8215_v47 }
 0x6d2   : > { %v8219_v32 = vpop.f32.mrf.mxu0 }
 0x6d3   : > { %3634 = vmax.xlane.f32.xlu0 %v3633_v41 }
 0x6d4   : > { %v8221_v48 = vpop.f32.mrf.mxu0 }
 0x6d5   : > { %v3636_v38 = vmax.f32 %v8219_v32, %v8221_v48 }
 0x6d6   : > { %v8225_v30 = vpop.f32.mrf.mxu0  ;;  %5868 = vmatmul.mubr.msk.bf16.gmra.mxu0 %vm794_vm1, %v4140_v8 }
 0x6d7   : > { %3637 = vmax.xlane.f32.xlu1 %v3636_v38  ;;  %4305 = vmatprep.mubr.bf16.mxu0 %v10001_v2 }
 0x6d8   : > { %v8229_v39 = vpop.f32.mrf.mxu0 }
 0x6d9   : > { %v3639_v58 = vmax.f32 %v8225_v30, %v8229_v39 }
 0x6da   : > { %v8233_v6 = vpop.f32.mrf.mxu0 }
 0x6db   : > { %3640 = vmax.xlane.f32.xlu0 %v3639_v58 }
 0x6dc   : > { %v8235_v40 = vpop.f32.mrf.mxu0 }
 0x6dd   : > { %v3642_v5 = vmax.f32 %v8233_v6, %v8235_v40 }
 0x6de   : > { %v8239_v19 = vpop.f32.mrf.mxu0  ;;  %5869 = vmatmul.mubr.msk.bf16.gmra.mxu0 %vm794_vm1, %v4141_v35  ;;  %v4154_v35 = vpop.trf.xlu0 }
 0x6df   : > { %3643 = vmax.xlane.f32.xlu1 %v3642_v5  ;;  %4315 = vmatprep.mubr.bf16.mxu0 %v10001_v2 }
 0x6e0   : > { %v8243_v44 = vpop.f32.mrf.mxu0 }
 0x6e1   : > { %v3645_v46 = vmax.f32 %v8239_v19, %v8243_v44 }
 0x6e2   : > { %v8247_v12 = vpop.f32.mrf.mxu0 }
 0x6e3   : > { %3646 = vmax.xlane.f32.xlu0 %v3645_v46 }
 0x6e4   : > { %v8249_v45 = vpop.f32.mrf.mxu0 }
 0x6e5   : > { %v3648_v3 = vmax.f32 %v8247_v12, %v8249_v45 }
 0x6e6   : > { %v8253_v37 = vpop.f32.mrf.mxu0  ;;  %5870 = vmatmul.mubr.msk.bf16.gmra.mxu0 %vm794_vm1, %v4142_v63 }
 0x6e7   : > { %3649 = vmax.xlane.f32.xlu1 %v3648_v3  ;;  %4325 = vmatprep.mubr.bf16.mxu0 %v10001_v2 }
 0x6e8   : > { %v8257_v53 = vpop.f32.mrf.mxu0 }
 0x6e9   : > { %v3651_v31 = vmax.f32 %v8253_v37, %v8257_v53 }
 0x6ea   : > { %v8261_v7 = vpop.f32.mrf.mxu0 }
 0x6eb   : > { %3652 = vmax.xlane.f32.xlu0 %v3651_v31 }
 0x6ec   : > { %v8263_v36 = vpop.f32.mrf.mxu0 }
 0x6ed   : > { %v3654_v1 = vmax.f32 %v8261_v7, %v8263_v36 }
 0x6ee   : > { %v8267_v60 = vpop.f32.mrf.mxu0  ;;  %5871 = vmatmul.mubr.msk.bf16.gmra.mxu0 %vm794_vm1, %v4151_v62 }
 0x6ef   : > { %3655 = vmax.xlane.f32.xlu1 %v3654_v1  ;;  %4335 = vmatprep.mubr.bf16.mxu0 %v10001_v2  ;;  %v4155_v1 = vpop.trf.xlu0 }
 0x6f0   : > { %v8271_v24 = vpop.f32.mrf.mxu0 }
 0x6f1   : > { %v3657_v23 = vmax.f32 %v8267_v60, %v8271_v24 }
 0x6f2   : > { %v8275_v14 = vpop.f32.mrf.mxu0 }
 0x6f3   : > { %3658 = vmax.xlane.f32.xlu0 %v3657_v23 }
 0x6f4   : > { %v8277_v27 = vpop.f32.mrf.mxu0 }
 0x6f5   : > { %v3660_v21 = vmax.f32 %v8275_v14, %v8277_v27 }
 0x6f6   : > { %v8281_v34 = vpop.f32.mrf.mxu0  ;;  %5872 = vmatmul.mubr.msk.bf16.gmra.mxu0 %vm794_vm1, %v4152_v54 }
 0x6f7   : > { %3661 = vmax.xlane.f32.xlu1 %v3660_v21  ;;  %4345 = vmatprep.mubr.bf16.mxu0 %v10001_v2 }
 0x6f8   : > { %v8285_v25 = vpop.f32.mrf.mxu0 }
 0x6f9   : > { %v3663_v18 = vmax.f32 %v8281_v34, %v8285_v25 }
 0x6fa   : > { %v8289_v16 = vpop.f32.mrf.mxu0 }
 0x6fb   : > { %3664 = vmax.xlane.f32.xlu1 %v3663_v18 }
 0x6fc   : > { %v8291_v42 = vpop.f32.mrf.mxu0 }
 0x6fd   : > { %v3666_v49 = vmax.f32 %v8289_v16, %v8291_v42 }
 0x6fe   : > { %v8295_v41 = vpop.f32.mrf.mxu0  ;;  %5873 = vmatmul.mubr.msk.bf16.gmra.mxu0 %vm794_vm1, %v4153_v11 }
 0x6ff   : > { %3667 = vmax.xlane.f32.xlu1 %v3666_v49  ;;  %4355 = vmatprep.mubr.bf16.mxu0 %v10001_v2 }
 0x700   : > { %v8299_v8 = vpop.f32.mrf.mxu0 }
 0x701   : > { %v3669_v38 = vmax.f32 %v8295_v41, %v8299_v8 }
 0x702   : > { %v8303_v58 = vpop.f32.mrf.mxu0 }
 0x703   : > { %3670 = vmax.xlane.f32.xlu1 %v3669_v38  ;;  %v4156_v38 = vpop.trf.xlu0 }
 0x704   : > { %v8305_v5 = vpop.f32.mrf.mxu0 }
 0x705   : > { %v3672_v46 = vmax.f32 %v8303_v58, %v8305_v5 }
 0x706   : > { %v8309_v63 = vpop.f32.mrf.mxu0  ;;  %5874 = vmatmul.mubr.msk.bf16.gmra.mxu0 %vm794_vm1, %v4154_v35 }
 0x707   : > { %3673 = vmax.xlane.f32.xlu1 %v3672_v46  ;;  %4365 = vmatprep.mubr.bf16.mxu0 %v10001_v2 }
 0x708   : > { %v8313_v3 = vpop.f32.mrf.mxu0 }
 0x709   : > { %v3675_v31 = vmax.f32 %v8309_v63, %v8313_v3 }
 0x70a   : > { %v8317_v62 = vpop.f32.mrf.mxu0 }
 0x70b   : > { %3676 = vmax.xlane.f32.xlu1 %v3675_v31 }
 0x70c   : > { %v8319_v23 = vpop.f32.mrf.mxu0 }
 0x70d   : > { %v3678_v54 = vmax.f32 %v8317_v62, %v8319_v23 }
 0x70e   : > { %v8323_v21 = vpop.f32.mrf.mxu0  ;;  %5875 = vmatmul.mubr.msk.bf16.gmra.mxu0 %vm794_vm1, %v4155_v1 }
 0x70f   : > { %10006 = vst [vmem:[#allocation64_spill] sm:$0xff] %v8323_v21  ;;  %3679 = vmax.xlane.f32.xlu0 %v3678_v54  ;;  %4375 = vmatprep.mubr.bf16.mxu0 %v10001_v2 }
 0x710   : > { %v8327_v18 = vpop.f32.mrf.mxu0 }
 0x711   : > { %10007 = vst [vmem:[#allocation63_spill] sm:$0xff] %v8327_v18  ;;  %v3681_v11 = vmax.f32 %v8323_v21, %v8327_v18 }
 0x712   : > { %v8331_v49 = vpop.f32.mrf.mxu0 }
 0x713   : > { %10008 = vst [vmem:[#allocation39_spill] sm:$0xff] %v8331_v49  ;;  %3682 = vmax.xlane.f32.xlu0 %v3681_v11  ;;  %v4157_v11 = vpop.trf.xlu0 }
 0x714   : > { %v8333_v35 = vpop.f32.mrf.mxu0 }
 0x715   : > { %10009 = vst [vmem:[#allocation36_spill] sm:$0xff] %v8333_v35  ;;  %v3684_v46 = vmax.f32 %v8331_v49, %v8333_v35 }
 0x716   : > { %v8337_v31 = vpop.f32.mrf.mxu0  ;;  %5876 = vmatmul.mubr.msk.bf16.gmra.mxu0 %vm794_vm1, %v4156_v38 }
 0x717   : > { %10010 = vst [vmem:[#allocation66_spill] sm:$0xff] %v8337_v31  ;;  %3685 = vmax.xlane.f32.xlu1 %v3684_v46  ;;  %4385 = vmatprep.mubr.bf16.mxu0 %v10001_v2 }
 0x718   : > { %v8341_v1 = vpop.f32.mrf.mxu0 }
 0x719   : > { %10011 = vst [vmem:[#allocation65_spill] sm:$0xff] %v8341_v1  ;;  %v3687_v54 = vmax.f32 %v8337_v31, %v8341_v1 }
 0x71a   : > { %v8345_v9 = vpop.f32.mrf.mxu0 }
 0x71b   : > { %10012 = vst [vmem:[#allocation37_spill] sm:$0xff] %v8345_v9  ;;  %3688 = vmax.xlane.f32.xlu0 %v3687_v54  ;;  %v4158_v54 = vpop.trf.xlu0 }
 0x71c   : > { %v8347_v29 = vpop.f32.mrf.mxu0 }
 0x71d   : > { %10013 = vst [vmem:[#allocation34_spill] sm:$0xff] %v8347_v29  ;;  %v3690_v56 = vmax.f32 %v8345_v9, %v8347_v29  ;;  %v8423_v9 = vld [vmem:[%s9490_s5 + $0x8] sm:$0x7] }
 0x71e   : > { %v8351_v33 = vpop.f32.mrf.mxu0  ;;  %5877 = vmatmul.mubr.msk.bf16.gmra.mxu0 %vm794_vm1, %v4157_v11 }
 0x71f   : > { %10014 = vst [vmem:[#allocation60_spill] sm:$0xff] %v8351_v33  ;;  %3691 = vmax.xlane.f32.xlu1 %v3690_v56  ;;  %4395 = vmatprep.mubr.bf16.mxu0 %v10001_v2 }
 0x720   : > { %v8355_v38 = vpop.f32.mrf.mxu0 }
 0x721   : > { %10015 = vst [vmem:[#allocation59_spill] sm:$0xff] %v8355_v38  ;;  %v3693_v46 = vmax.f32 %v8351_v33, %v8355_v38 }
 0x722   : > { %v8359_v51 = vpop.f32.mrf.mxu0 }
 0x723   : > { %10016 = vst [vmem:[#allocation35_spill] sm:$0xff] %v8359_v51  ;;  %3694 = vmax.xlane.f32.xlu0 %v3693_v46 }
 0x724   : > { %v8361_v4 = vpop.f32.mrf.mxu0 }
 0x725   : > { %10017 = vst [vmem:[#allocation32_spill] sm:$0xff] %v8361_v4  ;;  %v3696_v61 = vmax.f32 %v8359_v51, %v8361_v4 }
 0x726   : > { %v8365_v15 = vpop.f32.mrf.mxu0  ;;  %5878 = vmatmul.mubr.msk.bf16.gmra.mxu0 %vm794_vm1, %v4158_v54 }
 0x727   : > { %10018 = vst [vmem:[#allocation62_spill] sm:$0xff] %v8365_v15  ;;  %3697 = vmax.xlane.f32.xlu1 %v3696_v61 }
 0x728   : > { %v8368_v56 = vpop.f32.mrf.mxu0 }
 0x729   : > { %10019 = vst [vmem:[#allocation61_spill] sm:$0xff] %v8368_v56  ;;  %v3699_v11 = vmax.f32 %v8365_v15, %v8368_v56 }
 0x72a   : > { %v8372_v13 = vpop.f32.mrf.mxu0 }
 0x72b   : > { %10020 = vst [vmem:[#allocation33_spill] sm:$0xff] %v8372_v13  ;;  %3700 = vmax.xlane.f32.xlu0 %v3699_v11 }
 0x72c   : > { %v8374_v46 = vpop.f32.mrf.mxu0 }
 0x72d   : > { %10021 = vst [vmem:[#allocation30_spill] sm:$0xff] %v8374_v46  ;;  %v3702_v26 = vmax.f32 %v8372_v13, %v8374_v46 }
 0x72e   : > { %v8378_v52 = vpop.f32.mrf.mxu0 }
 0x72f   : > { %10022 = vst [vmem:[#allocation56_spill] sm:$0xff] %v8378_v52  ;;  %3703 = vmax.xlane.f32.xlu1 %v3702_v26 }
 0x730   : > { %v8380_v50 = vpop.f32.mrf.mxu0 }
 0x731   : > { %10023 = vst [vmem:[#allocation55_spill] sm:$0xff] %v8380_v50  ;;  %v3705_v61 = vmax.f32 %v8378_v52, %v8380_v50 }
 0x732   : > { %v8384_v54 = vpop.f32.mrf.mxu0 }
 0x733   : > { %10024 = vst [vmem:[#allocation31_spill] sm:$0xff] %v8384_v54  ;;  %3706 = vmax.xlane.f32.xlu0 %v3705_v61 }
 0x734   : > { %v8386_v0 = vpop.f32.mrf.mxu0 }
 0x735   : > { %10025 = vst [vmem:[#allocation28_spill] sm:$0xff] %v8386_v0  ;;  %v3708_v11 = vmax.f32 %v8384_v54, %v8386_v0 }
 0x736   : > { %v8390_v43 = vpop.f32.mrf.mxu0 }
 0x737   : > { %10026 = vst [vmem:[#allocation52_spill] sm:$0xff] %v8390_v43  ;;  %3709 = vmax.xlane.f32.xlu1 %v3708_v11 }
 0x738   : > { %v8392_v55 = vpop.f32.mrf.mxu0 }
 0x739   : > { %10027 = vst [vmem:[#allocation51_spill] sm:$0xff] %v8392_v55  ;;  %v3711_v26 = vmax.f32 %v8390_v43, %v8392_v55 }
 0x73a   : > { %v8396_v59 = vpop.f32.mrf.mxu0 }
 0x73b   : > { %10028 = vst [vmem:[#allocation29_spill] sm:$0xff] %v8396_v59  ;;  %3712 = vmax.xlane.f32.xlu0 %v3711_v26 }
 0x73c   : > { %v8398_v20 = vpop.f32.mrf.mxu0 }
 0x73d   : > { %10029 = vst [vmem:[#allocation26_spill] sm:$0xff] %v8398_v20  ;;  %v3714_v61 = vmax.f32 %v8396_v59, %v8398_v20 }
 0x73e   : > { %v8402_v28 = vpop.f32.mrf.mxu0 }
 0x73f   : > { %10030 = vst [vmem:[#allocation27_spill] sm:$0xff] %v8402_v28  ;;  %3715 = vmax.xlane.f32.xlu1 %v3714_v61 }
 0x740   : > { %v8404_v21 = vpop.f32.mrf.mxu0 }
 0x741   : > { %10031 = vst [vmem:[#allocation24_spill] sm:$0xff] %v8404_v21  ;;  %v3717_v11 = vmax.f32 %v8402_v28, %v8404_v21 }
 0x742   : > { %v8408_v49 = vpop.f32.mrf.mxu0 }
 0x743   : > { %10032 = vst [vmem:[#allocation25_spill] sm:$0xff] %v8408_v49  ;;  %3718 = vmax.xlane.f32.xlu0 %v3717_v11 }
 0x744   : > { %v8410_v18 = vpop.f32.mrf.mxu0 }
 0x745   : > { %10033 = vst [vmem:[#allocation22_spill] sm:$0xff] %v8410_v18  ;;  %v3720_v26 = vmax.f32 %v8408_v49, %v8410_v18 }
 0x746   : > { %v8414_v31 = vpop.f32.mrf.mxu0 }
 0x747   : > { %10034 = vst [vmem:[#allocation23_spill] sm:$0xff] %v8414_v31  ;;  %3721 = vmax.xlane.f32.xlu1 %v3720_v26 }
 0x748   : > { %v8416_v35 = vpop.f32.mrf.mxu0 }
 0x749   : > { %10035 = vst [vmem:[#allocation20_spill] sm:$0xff] %v8416_v35  ;;  %v3723_v61 = vmax.f32 %v8414_v31, %v8416_v35 }
 0x74a   : > { %v8429_v11 = vpop.f32.mrf.mxu0 }
 0x74b   : > { %3724 = vmax.xlane.f32.xlu0 %v3723_v61  ;;  %10036 = vst [vmem:[#allocation21_spill] sm:$0xff] %v8429_v11 }
 0x74c   : > { %v8431_v26 = vpop.f32.mrf.mxu0 }
 0x74d   : > { %10037 = vst [vmem:[#allocation19_spill] sm:$0xff] %v8431_v26  ;;  %v3726_v4 = vmax.f32 %v8429_v11, %v8431_v26 }
 0x758   : > { %3320 = vperm.xlu1 %6032, %v8423_v9  }
 0x75c   : > { %6034 = vset.pattern.permute.xlu1 %v10004_v57  ;;  %v8467_v54 = vpop.xlane.xlu0 %3634 }
 0x760   : > { %v8435_v61 = vpop.xlane.xlu1 %3637 }
 0x761   : > { %3314 = vperm.xlu0 %6027, %v8423_v9  }
 0x764   : > { %v8475_v0 = vpop.xlane.xlu0 %3640 }
 0x765   : > { %6033 = vset.pattern.permute.xlu0 %v10003_v17 }
 0x768   : > { %v8441_v51 = vpop.xlane.xlu1 %3643 }
 0x76e   : > { %v8433_v1 = vpop.f32.mrf.mxu0 }
 0x76f   : > { %10038 = vst [vmem:[#allocation12_spill] sm:$0xff] %v8433_v1 }
 0x770   : > { %v8437_v33 = vpop.f32.mrf.mxu0  ;;  %v8447_v15 = vpop.xlane.xlu1 %3649 }
 0x771   : > { %10039 = vst [vmem:[#allocation14_spill] sm:$0xff] %v8437_v33 }
 0x772   : > { %v8439_v29 = vpop.f32.mrf.mxu0 }
 0x773   : > { %10040 = vst [vmem:[#allocation16_spill] sm:$0xff] %v8439_v29 }
 0x774   : > { %v8443_v38 = vpop.f32.mrf.mxu0 }
 0x775   : > { %10041 = vst [vmem:[#allocation17_spill] sm:$0xff] %v8443_v38 }
 0x776   : > { %v8445_v57 = vpop.f32.mrf.mxu0 }
 0x777   : > { %10042 = vst [vmem:[#allocation18_spill] sm:$0xff] %v8445_v57 }
 0x778   : > { %v8449_v17 = vpop.f32.mrf.mxu0  ;;  %v8455_v13 = vpop.xlane.xlu1 %3655 }
 0x779   : > { %10043 = vst [vmem:[#allocation74_spill] sm:$0xff] %v8449_v17 }
 0x77a   : > { %v8453_v1 = vpop.f32.mrf.mxu0 }
 0x77b   : > { %10044 = vst [vmem:[#allocation75_spill] sm:$0xff] %v8453_v1 }
 0x77c   : > { %3727 = vmax.xlane.f32.xlu1 %v3726_v4  ;;  %v8457_v33 = vpop.f32.mrf.mxu0 }
 0x77d   : > { %10045 = vst [vmem:[#allocation72_spill] sm:$0xff] %v8457_v33 }
 0x77e   : > { %v8459_v56 = vpop.f32.mrf.mxu0 }
 0x77f   : > { %10046 = vst [vmem:[#allocation73_spill] sm:$0xff] %v8459_v56 }
 0x780   : > { %v8461_v52 = vpop.f32.mrf.mxu0  ;;  %v8463_v46 = vpop.xlane.xlu1 %3661 }
 0x781   : > { %10047 = vst [vmem:[#allocation71_spill] sm:$0xff] %v8461_v52  ;;  %v8481_v52 = vpop.xlane.xlu0 %3646 }
 0x782   : > { %v8465_v57 = vpop.f32.mrf.mxu0 }
 0x783   : > { %10048 = vst [vmem:[#allocation69_spill] sm:$0xff] %v8465_v57 }
 0x784   : > { %v8469_v17 = vpop.f32.mrf.mxu0  ;;  %v8471_v50 = vpop.xlane.xlu1 %3664 }
 0x785   : > { %10049 = vst [vmem:[#allocation70_spill] sm:$0xff] %v8469_v17  ;;  %v8487_v20 = vpop.xlane.xlu0 %3652 }
 0x786   : > { %v8473_v43 = vpop.f32.mrf.mxu0 }
 0x787   : > { %10050 = vst [vmem:[#allocation58_spill] sm:$0xff] %v8473_v43 }
 0x788   : > { %v8477_v4 = vpop.f32.mrf.mxu0  ;;  %v3668_v59 = vpop.xlane.xlu1 %3667 }
 0x789   : > { %10051 = vst [vmem:[#allocation57_spill] sm:$0xff] %v8477_v4  ;;  %v8493_v26 = vpop.xlane.xlu0 %3658 }
 0x78a   : > { %v8479_v56 = vpop.f32.mrf.mxu0 }
 0x78b   : > { %10052 = vst [vmem:[#allocation54_spill] sm:$0xff] %v8479_v56 }
 0x78c   : > { %v8483_v55 = vpop.f32.mrf.mxu0  ;;  %v3671_v57 = vpop.xlane.xlu1 %3670 }
 0x78d   : > { %10053 = vst [vmem:[#allocation53_spill] sm:$0xff] %v8483_v55  ;;  %v3754_v55 = vsub.f32 %v8299_v8, %v3671_v57 }
 0x78e   : > { %v8485_v28 = vpop.f32.mrf.mxu0 }
 0x78f   : > { %10054 = vst [vmem:[#allocation96_spill] sm:$0xff] %v8485_v28 }
 0x790   : > { %v8489_v17 = vpop.f32.mrf.mxu0  ;;  %v3674_v49 = vpop.xlane.xlu1 %3673 }
 0x791   : > { %10055 = vst [vmem:[#allocation95_spill] sm:$0xff] %v8489_v17  ;;  %v3756_v56 = vsub.f32 %v8305_v5, %v3674_v49 }
 0x792   : > { %v8491_v43 = vpop.f32.mrf.mxu0 }
 0x793   : > { %10056 = vst [vmem:[#allocation94_spill] sm:$0xff] %v8491_v43  ;;  %v3806_v1 = vpack.c.bf16 %v3756_v56, %v3754_v55  ;;  %v3753_v55 = vsub.f32 %v8295_v41, %v3671_v57  ;;  %v3751_v57 = vsub.f32 %v8289_v16, %v3668_v59 }
 0x794   : > { %v8495_v4 = vpop.f32.mrf.mxu0  ;;  %v3677_v11 = vpop.xlane.xlu1 %3676 }
 0x795   : > { %10057 = vst [vmem:[#allocation93_spill] sm:$0xff] %v8495_v4  ;;  %v3757_v28 = vsub.f32 %v8309_v63, %v3677_v11  ;;  %v3758_v17 = vsub.f32 %v8313_v3, %v3677_v11  ;;  %v3755_v63 = vsub.f32 %v8303_v58, %v3674_v49  ;;  %v3752_v3 = vsub.f32 %v8291_v42, %v3668_v59 }
 0x796   : > { %v8498_v35 = vpop.f32.mrf.mxu0 }
 0x797   : > { %10058 = vst [vmem:[#allocation92_spill] sm:$0xff] %v8498_v35 }
 0x798   : > { %v3680_v31 = vpop.xlane.xlu0 %3679  ;;  %v8502_v21 = vpop.f32.mrf.mxu0 }
 0x799   : > { %10059 = vst [vmem:[#allocation91_spill] sm:$0xff] %v8502_v21  ;;  %v3759_v18 = vsub.f32 %v8317_v62, %v3680_v31  ;;  %v3760_v29 = vsub.f32 %v8319_v23, %v3680_v31  ;;  %v4436_v38 = vmax.f32 %v8498_v35, %v8502_v21  ;;  %v3865_v62 = vmul.bf16 1069105081, %v3806_v1  ;;  %v10095_v35 = vld [vmem:[#allocation21_spill] sm:$0xff] }
 0x79a   : > { %v8509_v5 = vpop.f32.mrf.mxu0  ;;  %v3749_v1 = vsub.f32 %v8281_v34, %v8471_v50  ;;  %v10097_v21 = vld [vmem:[#allocation25_spill] sm:$0xff] }
 0x79b   : > { %10060 = vst [vmem:[#allocation90_spill] sm:$0xff] %v8509_v5  ;;  %v3807_v33 = vpack.c.bf16 %v3759_v18, %v3757_v28  ;;  %v3808_v43 = vpack.c.bf16 %v3760_v29, %v3758_v17  ;;  %4437 = vmax.xlane.f32.xlu1 %v4436_v38  ;;  %v3750_v29 = vsub.f32 %v8285_v25, %v8471_v50 }
 0x79c   : > { %v8511_v8 = vpop.f32.mrf.mxu0  ;;  %v3746_v38 = vsub.f32 %v8271_v24, %v8493_v26  ;;  %v3803_v59 = vpack.c.bf16 %v3751_v57, %v3749_v1  ;;  %v3747_v50 = vsub.f32 %v8275_v14, %v8463_v46  ;;  %v3740_v57 = vsub.f32 %v8249_v45, %v8447_v15 }
 0x79d   : > { %10061 = vst [vmem:[#allocation89_spill] sm:$0xff] %v8511_v8  ;;  %v3868_v4 = vmul.bf16 1069105081, %v3807_v33  ;;  %v3871_v22 = vmul.bf16 1069105081, %v3808_v43  ;;  %v4439_v23 = vmax.f32 %v8509_v5, %v8511_v8  ;;  %v3805_v33 = vpack.c.bf16 %v3755_v63, %v3753_v55 }
 0x79e   : > { %v8517_v31 = vpop.f32.mrf.mxu0  ;;  %v3804_v17 = vpack.c.bf16 %v3752_v3, %v3750_v29  ;;  %v3856_v24 = vmul.bf16 1069105081, %v3803_v59  ;;  %v3744_v3 = vsub.f32 %v8263_v36, %v8455_v13  ;;  %v3745_v55 = vsub.f32 %v8267_v60, %v8493_v26 }
 0x79f   : > { %10062 = vst [vmem:[#allocation88_spill] sm:$0xff] %v8517_v31  ;;  %6233 = vpow.bf16 %v3868_v4  ;;  %4440 = vmax.xlane.f32.xlu0 %v4439_v23  ;;  %v3862_v41 = vmul.bf16 1069105081, %v3805_v33  ;;  %v3742_v33 = vsub.f32 %v8257_v53, %v8487_v20  ;;  %v3743_v60 = vsub.f32 %v8261_v7, %v8455_v13 }
 0x7a0   : > { %6235 = vpow.bf16 %v3871_v22  ;;  %v8522_v28 = vpop.f32.mrf.mxu0  ;;  %v3748_v22 = vsub.f32 %v8277_v27, %v8463_v46  ;;  %v3859_v25 = vmul.bf16 1069105081, %v3804_v17  ;;  %v3801_v14 = vpack.c.bf16 %v3747_v50, %v3745_v55 }
 0x7a1   : > { %v4442_v43 = vmax.f32 %v8517_v31, %v8522_v28  ;;  %6237 = vpow.bf16 %v3865_v62  ;;  %v3800_v46 = vpack.c.bf16 %v3744_v3, %v3742_v33  ;;  %v3738_v1 = vsub.f32 %v8243_v44, %v8481_v52  ;;  %v10098_v31 = vld [vmem:[#allocation26_spill] sm:$0xff] }
 0x7a2   : > { %v8526_v42 = vpop.f32.mrf.mxu0  ;;  %6239 = vpow.bf16 %v3862_v41  ;;  %v3802_v16 = vpack.c.bf16 %v3748_v22, %v3746_v38  ;;  %v3850_v26 = vmul.bf16 1069105081, %v3801_v14  ;;  %v3736_v44 = vsub.f32 %v8235_v40, %v8441_v51 }
 0x7a3   : > { %4443 = vmax.xlane.f32.xlu0 %v4442_v43  ;;  %6241 = vpow.bf16 %v3859_v25  ;;  %v3847_v53 = vmul.bf16 1069105081, %v3800_v46  ;;  %v3741_v25 = vsub.f32 %v8253_v37, %v8487_v20  ;;  %v3798_v13 = vpack.c.bf16 %v3740_v57, %v3738_v1 }
 0x7a4   : > { %v8528_v58 = vpop.f32.mrf.mxu0  ;;  %v3853_v62 = vmul.bf16 1069105081, %v3802_v16  ;;  %6243 = vpow.bf16 %v3856_v24  ;;  %v3739_v20 = vsub.f32 %v8247_v12, %v8447_v15  ;;  %v3737_v50 = vsub.f32 %v8239_v19, %v8481_v52 }
 0x7a5   : > { %v4445_v18 = vmax.f32 %v8526_v42, %v8528_v58  ;;  %v3799_v59 = vpack.c.bf16 %v3743_v60, %v3741_v25  ;;  %v3735_v52 = vsub.f32 %v8233_v6, %v8441_v51  ;;  %v3730_v46 = vsub.f32 %v8215_v47, %v8467_v54 }
 0x7a6   : > { %v8535_v49 = vpop.f32.mrf.mxu0  ;;  %6245 = vpow.bf16 %v3853_v62  ;;  %v3797_v15 = vpack.c.bf16 %v3739_v20, %v3737_v50  ;;  %v3731_v57 = vsub.f32 %v8219_v32, %v8435_v61 }
 0x7a7   : > { %4446 = vmax.xlane.f32.xlu1 %v4445_v18  ;;  %6247 = vpow.bf16 %v3850_v26  ;;  %v3844_v37 = vmul.bf16 1069105081, %v3799_v59 }
 0x7a8   : > { %v8541_v56 = vpop.f32.mrf.mxu0  ;;  %6249 = vpow.bf16 %v3847_v53  ;;  %v3838_v19 = vmul.bf16 1069105081, %v3797_v15 }
 0x7a9   : > { %v4448_v27 = vmax.f32 %v8535_v49, %v8541_v56  ;;  %6251 = vpow.bf16 %v3844_v37 }
 0x7aa   : > { %v8545_v11 = vpop.f32.mrf.mxu0 }
 0x7ab   : > { %4449 = vmax.xlane.f32.xlu0 %v4448_v27  ;;  %v3841_v27 = vmul.bf16 1069105081, %v3798_v13 }
 0x7ac   : > { %v8547_v4 = vpop.f32.mrf.mxu0 }
 0x7ad   : > { %v6234_v63 = vpop.eup %6233  ;;  %6253 = vpow.bf16 %v3841_v27 }
 0x7ae   : > { %v6236_v34 = vpop.eup %6235  ;;  %v8553_v23 = vpop.f32.mrf.mxu0  ;;  %6255 = vpow.bf16 %v3838_v19 }
 0x7af   : > { %10063 = vst [vmem:[#allocation87_spill] sm:$0xff] %v8553_v23  ;;  %3923 = vmatprep.subr.bf16.mxu1 %v6236_v34  ;;  %v6238_v29 = vpop.eup %6237  ;;  %v3734_v34 = vsub.f32 %v8229_v39, %v8475_v0  ;;  %v3732_v39 = vsub.f32 %v8221_v48, %v8435_v61 }
 0x7b0   : > { %3924 = vmatpush1.bf16.xpose.msra.mxu1 %v6234_v63  ;;  %v8559_v43 = vpop.f32.mrf.mxu0  ;;  %v6240_v22 = vpop.eup %6239 }
 0x7b1   : > { %10064 = vst [vmem:[#allocation86_spill] sm:$0xff] %v8559_v43  ;;  %3925 = vmatprep.subr.bf16.mxu1 %v6238_v29  ;;  %v6242_v18 = vpop.eup %6241  ;;  %v3796_v40 = vpack.c.bf16 %v3736_v44, %v3734_v34  ;;  %v3794_v6 = vpack.c.bf16 %v3732_v39, %v3730_v46  ;;  %v10082_v34 = vld [vmem:[#allocation94_spill] sm:$0xff]  ;;  %v8649_v46 = vpop.xlane.xlu1 %3685 }
 0x7b2   : > { %v8561_v36 = vpop.f32.mrf.mxu0  ;;  %v6244_v63 = vpop.eup %6243 }
 0x7b3   : > { %10065 = vst [vmem:[#allocation84_spill] sm:$0xff] %v8561_v36  ;;  %v3835_v55 = vmul.bf16 1069105081, %v3796_v40 }
 0x7b4   : > { %v8563_v17 = vpop.f32.mrf.mxu0  ;;  %v6246_v24 = vpop.eup %6245 }
 0x7b5   : > { %10066 = vst [vmem:[#allocation81_spill] sm:$0xff] %v8563_v17  ;;  %v6248_v33 = vpop.eup %6247  ;;  %6257 = vpow.bf16 %v3835_v55  ;;  %v10083_v55 = vld [vmem:[#allocation72_spill] sm:$0xff] }
 0x7b6   : > { %v8569_v41 = vpop.f32.mrf.mxu0  ;;  %v6250_v14 = vpop.eup %6249 }
 0x7b7   : > { %10067 = vst [vmem:[#allocation85_spill] sm:$0xff] %v8569_v41  ;;  %v6252_v47 = vpop.eup %6251 }
 0x7b8   : > { %3926 = vmatpush1.bf16.xpose.msra.mxu1 %v6240_v22  ;;  %v8575_v38 = vpop.f32.mrf.mxu0  ;;  %3336 = vperm.xlu1 %6034, %v8423_v9   ;;  %v10076_v22 = vld [vmem:[#allocation38_spill] sm:$0xff] }
 0x7b9   : > { %10068 = vst [vmem:[#allocation83_spill] sm:$0xff] %v8575_v38  ;;  %3927 = vmatprep.subr.bf16.mxu1 %v6242_v18  ;;  %v3729_v25 = vsub.f32 %v10076_v22, %v8467_v54  ;;  %v8657_v22 = vpop.xlane.xlu0 %3682 }
 0x7ba   : > { %v8578_v45 = vpop.f32.mrf.mxu0 }
 0x7bb   : > { %10069 = vst [vmem:[#allocation80_spill] sm:$0xff] %v8578_v45  ;;  %v6254_v18 = vpop.eup %6253  ;;  %v3793_v59 = vpack.c.bf16 %v3731_v57, %v3729_v25  ;;  %v10088_v57 = vld [vmem:[#allocation16_spill] sm:$0xff]  ;;  %v8659_v25 = vpop.xlane.xlu1 %3691 }
 0x7bc   : > { %v8580_v7 = vpop.f32.mrf.mxu0  ;;  %6035 = vset.pattern.permute.xlu1 %v10001_v2  ;;  %v6256_v37 = vpop.eup %6255 }
 0x7bd   : > { %10070 = vst [vmem:[#allocation77_spill] sm:$0xff] %v8580_v7  ;;  %v3826_v32 = vmul.bf16 1069105081, %v3793_v59 }
 0x7be   : > { %v8587_v16 = vpop.f32.mrf.mxu0 }
 0x7bf   : > { %10071 = vst [vmem:[#allocation82_spill] sm:$0xff] %v8587_v16 }
 0x7c0   : > { %3928 = vmatpush1.bf16.xpose.msra.mxu1 %v6244_v63  ;;  %v8593_v3 = vpop.f32.mrf.mxu0  ;;  %v4451_v63 = vmax.f32 %v8545_v11, %v8547_v4 }
 0x7c1   : > { %3929 = vmatprep.subr.bf16.mxu1 %v6246_v24  ;;  %3328 = vperm.xlu0 %6033, %v8423_v9   ;;  %v3733_v9 = vsub.f32 %v8225_v30, %v8475_v0  ;;  %v3829_v30 = vmul.bf16 1069105081, %v3794_v6  ;;  %v10081_v24 = vld [vmem:[#allocation93_spill] sm:$0xff] }
 0x7c2   : > { %v8596_v12 = vpop.f32.mrf.mxu0  ;;  %v4433_v15 = vmax.f32 %v10082_v34, %v10081_v24  ;;  %v10087_v6 = vld [vmem:[#allocation17_spill] sm:$0xff] }
 0x7c3   : > { %10072 = vst [vmem:[#allocation79_spill] sm:$0xff] %v8596_v12  ;;  %v3795_v51 = vpack.c.bf16 %v3735_v52, %v3733_v9  ;;  %v6258_v44 = vpop.eup %6257 }
 0x7c4   : > { %v8598_v62 = vpop.f32.mrf.mxu0 }
 0x7c5   : > { %10073 = vst [vmem:[#allocation76_spill] sm:$0xff] %v8598_v62  ;;  %6036 = vset.pattern.permute.xlu0 %v10002_v10  ;;  %v3832_v0 = vmul.bf16 1069105081, %v3795_v51 }
 0x7c6   : > { %v8605_v29 = vpop.f32.mrf.mxu0 }
 0x7c7   : > { %6259 = vpow.bf16 %v3832_v0  ;;  %v4409_v0 = vmax.f32 %v10088_v57, %v10087_v6 }
 0x7c8   : > { %3930 = vmatpush1.bf16.xpose.msra.mxu1 %v6248_v33  ;;  %v8611_v60 = vpop.f32.mrf.mxu0  ;;  %6261 = vpow.bf16 %v3829_v30  ;;  %v10084_v33 = vld [vmem:[#allocation75_spill] sm:$0xff] }
 0x7c9   : > { %3931 = vmatprep.subr.bf16.mxu1 %v6250_v14  ;;  %6263 = vpow.bf16 %v3826_v32  ;;  %v4415_v9 = vmax.f32 %v10084_v33, %v10083_v55  ;;  %v8665_v32 = vpop.xlane.xlu0 %3688 }
 0x7ca   : > { %v8613_v48 = vpop.f32.mrf.mxu0 }
 0x7cb   : > { %10074 = vst [vmem:[#allocation78_spill] sm:$0xff] %v8613_v48 }
 0x7cc   : > { %v8615_v26 = vpop.f32.mrf.mxu0 }
 0x7cd   : > { %10075 = vst [vmem:[#allocation13_spill] sm:$0xff] %v8615_v26 }
 0x7ce   : > { %v8619_v53 = vpop.f32.mrf.mxu0 }
 0x7d0   : > { %3932 = vmatpush1.bf16.xpose.msra.mxu1 %v6252_v47  ;;  %v8623_v1 = vpop.f32.mrf.mxu0 }
 0x7d1   : > { %3933 = vmatprep.subr.bf16.mxu1 %v6254_v18 }
 0x7d2   : > { %v8625_v13 = vpop.f32.mrf.mxu0 }
 0x7d3   : > { %10077 = vst [vmem:[#allocation11_spill] sm:$0xff] %v8625_v13 }
 0x7d4   : > { %v8627_v20 = vpop.f32.mrf.mxu0 }
 0x7d5   : > { %10078 = vst [vmem:[#allocation15_spill] sm:$0xff] %v8627_v20  ;;  %v6260_v52 = vpop.eup %6259 }
 0x7d6   : > { %v8629_v61 = vpop.f32.mrf.mxu0  ;;  %v6262_v19 = vpop.eup %6261 }
 0x7d7   : > { %v6264_v47 = vpop.eup %6263 }
 0x7d8   : > { %3934 = vmatpush1.bf16.xpose.msra.mxu1 %v6256_v37  ;;  %v8631_v27 = vpop.f32.mrf.mxu0  ;;  %v8667_v37 = vpop.xlane.xlu1 %3697 }
 0x7d9   : > { %3935 = vmatprep.subr.bf16.mxu1 %v6258_v44  ;;  %v5840_v44 = vld [vmem:[%s9491_s6 + $0x8] sm:$0x7] }
 0x7da   : > { %v8633_v54 = vpop.f32.mrf.mxu0 }
 0x7db   : > { %10079 = vst [vmem:[#allocation2_spill] sm:$0xff] %v8633_v54 }
 0x7dc   : > { %v8637_v50 = vpop.f32.mrf.mxu0  ;;  %4452 = vmax.xlane.f32.xlu1 %v4451_v63 }
 0x7dd   : > { %10080 = vst [vmem:[#allocation44_spill] sm:$0xff] %v8637_v50  ;;  %v4487_v57 = vmax.f32 %v8633_v54, %v8637_v50 }
 0x7de   : > { %v8641_v40 = vpop.f32.mrf.mxu0 }
 0x7e0   : > { %3936 = vmatpush1.bf16.xpose.msra.mxu1 %v6260_v52  ;;  %4434 = vmax.xlane.f32.xlu0 %v4433_v15  ;;  %v8643_v39 = vpop.f32.mrf.mxu0  ;;  %v8676_v52 = vpop.xlane.xlu0 %3694 }
 0x7e1   : > { %3937 = vmatprep.subr.bf16.mxu1 %v6262_v19  ;;  %v8678_v19 = vpop.xlane.xlu1 %3703 }
 0x7e2   : > { %v8647_v14 = vpop.f32.mrf.mxu0 }
 0x7e3   : > { %10085 = vst [vmem:[#allocation47_spill] sm:$0xff] %v8647_v14 }
 0x7e4   : > { %4416 = vmax.xlane.f32.xlu0 %v4415_v9  ;;  %v8651_v51 = vpop.f32.mrf.mxu0 }
 0x7e5   : > { %10086 = vst [vmem:[#allocation48_spill] sm:$0xff] %v8651_v51  ;;  %v4493_v9 = vmax.f32 %v8647_v14, %v8651_v51  ;;  %v4475_v14 = vmax.f32 %v8613_v48, %v8615_v26  ;;  %v4469_v51 = vmax.f32 %v8596_v12, %v8598_v62  ;;  %v10093_v48 = vld [vmem:[#allocation23_spill] sm:$0xff] }
 0x7e6   : > { %v8655_v30 = vpop.f32.mrf.mxu0  ;;  %v10096_v62 = vld [vmem:[#allocation19_spill] sm:$0xff] }
 0x7e8   : > { %3938 = vmatpush1.bf16.xpose.msra.mxu1 %v6264_v47  ;;  %4410 = vmax.xlane.f32.xlu0 %v4409_v0  ;;  %v8661_v18 = vpop.f32.mrf.mxu0  ;;  %v8682_v0 = vpop.xlane.xlu0 %3700 }
 0x7e9   : > { %v8684_v47 = vpop.xlane.xlu1 %3709 }
 0x7ea   : > { %v8663_v59 = vpop.f32.mrf.mxu0 }
 0x7eb   : > { %10089 = vst [vmem:[#allocation38_spill] sm:$0xff] %v8663_v59 }
 0x7ec   : > { %v8672_v63 = vpop.f32.mrf.mxu0  ;;  %v8688_v6 = vpop.xlane.xlu0 %3706 }
 0x7ed   : > { %10090 = vst [vmem:[#allocation97_spill] sm:$0xff] %v8672_v63  ;;  %v4499_v15 = vmax.f32 %v8663_v59, %v8672_v63  ;;  %3345 = vperm.xlu1 %6035, %v5840_v44   ;;  %v3716_v59 = vpop.xlane.xlu1 %3715  ;;  %v4481_v44 = vmax.f32 %v8625_v13, %v8627_v20  ;;  %v10092_v13 = vld [vmem:[#allocation24_spill] sm:$0xff] }
 0x7ee   : > { %v3784_v8 = vsub.f32 %v10098_v31, %v3716_v59  ;;  %v10104_v31 = vld [vmem:[#allocation28_spill] sm:$0xff] }
 0x7ef   : > { %4500 = vmax.xlane.f32.xlu0 %v4499_v15 }
 0x7f0   : > { %v3713_v63 = vpop.xlane.xlu0 %3712 }
 0x7f1   : > { %v3722_v15 = vpop.xlane.xlu1 %3721 }
 0x7f3   : > { %4494 = vmax.xlane.f32.xlu0 %v4493_v9  ;;  %v10091_v9 = vld [vmem:[#allocation22_spill] sm:$0xff] }
 0x7f4   : > { %v3719_v33 = vpop.xlane.xlu0 %3718  ;;  %v3788_v50 = vsub.f32 %v10091_v9, %v3722_v15 }
 0x7f5   : > { %v8696_v54 = vpop.permute.xlu1 %3320  ;;  %v3786_v20 = vsub.f32 %v10092_v13, %v3719_v33 }
 0x7f7   : > { %4488 = vmax.xlane.f32.xlu0 %v4487_v57  ;;  %v4463_v57 = vmax.f32 %v8578_v45, %v8580_v7  ;;  %v3822_v5 = vpack.c.bf16 %v3788_v50, %v3786_v20  ;;  %v3787_v45 = vsub.f32 %v10097_v21, %v3722_v15  ;;  %v10102_v50 = vld [vmem:[#allocation96_spill] sm:$0xff] }
 0x7f8   : > { %v3725_v55 = vpop.xlane.xlu0 %3724 }
 0x7f9   : > { %v3789_v26 = vsub.f32 %v10093_v48, %v3725_v55  ;;  %v3913_v48 = vmul.bf16 1069105081, %v3822_v5  ;;  %v3780_v5 = vsub.f32 %v10104_v31, %v8684_v47  ;;  %v10113_v31 = vld [vmem:[#allocation71_spill] sm:$0xff] }
 0x7fb   : > { %4482 = vmax.xlane.f32.xlu0 %v4481_v44  ;;  %v10094_v44 = vld [vmem:[#allocation20_spill] sm:$0xff] }
 0x7fc   : > { %v3790_v34 = vsub.f32 %v10094_v44, %v3725_v55  ;;  %v10099_v55 = vld [vmem:[#allocation27_spill] sm:$0xff] }
 0x7fd   : > { %v3785_v44 = vsub.f32 %v10099_v55, %v3719_v33  ;;  %v10106_v33 = vld [vmem:[#allocation58_spill] sm:$0xff] }
 0x7ff   : > { %4476 = vmax.xlane.f32.xlu0 %v4475_v14  ;;  %v3821_v20 = vpack.c.bf16 %v3787_v45, %v3785_v44  ;;  %v10108_v45 = vld [vmem:[#allocation55_spill] sm:$0xff] }
 0x803   : > { %4470 = vmax.xlane.f32.xlu0 %v4469_v51  ;;  %v4457_v51 = vmax.f32 %v8561_v36, %v8563_v17 }
 0x805   : > { %v3728_v24 = vpop.xlane.xlu1 %3727 }
 0x806   : > { %v3791_v12 = vsub.f32 %v10095_v35, %v3728_v24  ;;  %v3792_v14 = vsub.f32 %v10096_v62, %v3728_v24  ;;  %v10100_v35 = vld [vmem:[#allocation51_spill] sm:$0xff] }
 0x807   : > { %4464 = vmax.xlane.f32.xlu0 %v4463_v57  ;;  %v3782_v62 = vsub.f32 %v10100_v35, %v3713_v63  ;;  %v10105_v57 = vld [vmem:[#allocation57_spill] sm:$0xff]  ;;  %v10111_v35 = vld [vmem:[#allocation31_spill] sm:$0xff] }
 0x808   : > { %v3823_v10 = vpack.c.bf16 %v3791_v12, %v3789_v26  ;;  %v3824_v9 = vpack.c.bf16 %v3792_v14, %v3790_v34  ;;  %v10101_v26 = vld [vmem:[#allocation95_spill] sm:$0xff]  ;;  %v10103_v34 = vld [vmem:[#allocation29_spill] sm:$0xff]  ;;  %v10107_v14 = vld [vmem:[#allocation52_spill] sm:$0xff] }
 0x809   : > { %v3820_v12 = vpack.c.bf16 %v3784_v8, %v3782_v62  ;;  %v4430_v24 = vmax.f32 %v10102_v50, %v10101_v26  ;;  %v3783_v21 = vsub.f32 %v10103_v34, %v3716_v59  ;;  %v3778_v8 = vsub.f32 %v10108_v45, %v8688_v6  ;;  %v10109_v59 = vld [vmem:[#allocation53_spill] sm:$0xff]  ;;  %v8737_v45 = vld [vmem:[%s9490_s5 + $0xc] sm:$0x7] }
 0x80a   : > { %v3916_v7 = vmul.bf16 1069105081, %v3823_v10  ;;  %v3919_v13 = vmul.bf16 1069105081, %v3824_v9  ;;  %v3910_v10 = vmul.bf16 1069105081, %v3821_v20  ;;  %v3781_v9 = vsub.f32 %v10107_v14, %v3713_v63 }
 0x80b   : > { %4458 = vmax.xlane.f32.xlu0 %v4457_v51  ;;  %v3907_v15 = vmul.bf16 1069105081, %v3820_v12  ;;  %v3779_v62 = vsub.f32 %v10111_v35, %v8684_v47  ;;  %v10112_v63 = vld [vmem:[#allocation30_spill] sm:$0xff]  ;;  %v10116_v14 = vld [vmem:[#allocation61_spill] sm:$0xff] }
 0x80c   : > { %6265 = vpow.bf16 %v3916_v7  ;;  %v4424_v7 = vmax.f32 %v10106_v33, %v10105_v57  ;;  %v3819_v51 = vpack.c.bf16 %v3783_v21, %v3781_v9  ;;  %v10114_v21 = vld [vmem:[#allocation73_spill] sm:$0xff]  ;;  %v3774_v9 = vsub.f32 %v10116_v14, %v8682_v0 }
 0x80d   : > { %6267 = vpow.bf16 %v3919_v13  ;;  %v3818_v13 = vpack.c.bf16 %v3780_v5, %v3778_v8  ;;  %v10115_v5 = vld [vmem:[#allocation56_spill] sm:$0xff] }
 0x80e   : > { %6269 = vpow.bf16 %v3913_v48  ;;  %v10110_v48 = vld [vmem:[#allocation54_spill] sm:$0xff]  ;;  %v3904_v20 = vmul.bf16 1069105081, %v3819_v51 }
 0x80f   : > { %6271 = vpow.bf16 %v3910_v10  ;;  %v4427_v55 = vmax.f32 %v10110_v48, %v10109_v59  ;;  %v3901_v34 = vmul.bf16 1069105081, %v3818_v13  ;;  %v4418_v10 = vmax.f32 %v10114_v21, %v10113_v31  ;;  %v10117_v51 = vld [vmem:[#allocation70_spill] sm:$0xff]  ;;  %v10118_v13 = vld [vmem:[#allocation69_spill] sm:$0xff] }
 0x810   : > { %6273 = vpow.bf16 %v3907_v15  ;;  %v3777_v15 = vsub.f32 %v10115_v5, %v8688_v6  ;;  %v4421_v6 = vmax.f32 %v10118_v13, %v10117_v51 }
 0x811   : > { %4431 = vmax.xlane.f32.xlu1 %v4430_v24  ;;  %v3776_v24 = vsub.f32 %v10112_v63, %v8678_v19  ;;  %6275 = vpow.bf16 %v3904_v20  ;;  %v10120_v20 = vld [vmem:[#allocation32_spill] sm:$0xff] }
 0x812   : > { %v3817_v47 = vpack.c.bf16 %v3779_v62, %v3777_v15  ;;  %6277 = vpow.bf16 %v3901_v34  ;;  %v8747_v62 = vld [vmem:[%s9494_s9 + $0x38] sm:$0xff]  ;;  %v10121_v34 = vld [vmem:[#allocation74_spill] sm:$0xff] }
 0x813   : > { %v3816_v8 = vpack.c.bf16 %v3776_v24, %v3774_v9  ;;  %v10123_v15 = vld [vmem:[#allocation62_spill] sm:$0xff] }
 0x815   : > { %4425 = vmax.xlane.f32.xlu1 %v4424_v7  ;;  %v3895_v63 = vmul.bf16 1069105081, %v3816_v8  ;;  %v10125_v8 = vld [vmem:[#allocation14_spill] sm:$0xff] }
 0x819   : > { %4428 = vmax.xlane.f32.xlu1 %v4427_v55  ;;  %v10119_v55 = vld [vmem:[#allocation33_spill] sm:$0xff] }
 0x81a   : > { %v6266_v44 = vpop.eup %6265  ;;  %v3775_v35 = vsub.f32 %v10119_v55, %v8678_v19  ;;  %v10124_v19 = vld [vmem:[#allocation59_spill] sm:$0xff]  ;;  %v10126_v55 = vld [vmem:[#allocation12_spill] sm:$0xff] }
 0x81b   : > { %v6268_v12 = vpop.eup %6267  ;;  %v3770_v9 = vsub.f32 %v10124_v19, %v8676_v52  ;;  %v10130_v19 = vld [vmem:[#allocation65_spill] sm:$0xff] }
 0x81c   : > { %3939 = vmatprep.subr.bf16.mxu1 %v6268_v12  ;;  %v6270_v7 = vpop.eup %6269  ;;  %v3772_v12 = vsub.f32 %v10120_v20, %v8667_v37  ;;  %v4406_v20 = vmax.f32 %v10126_v55, %v10125_v8 }
 0x81d   : > { %3940 = vmatpush2.bf16.xpose.msra.mxu1 %v6266_v44  ;;  %4419 = vmax.xlane.f32.xlu1 %v4418_v10  ;;  %v3898_v44 = vmul.bf16 1069105081, %v3817_v47  ;;  %v6272_v24 = vpop.eup %6271  ;;  %v10122_v10 = vld [vmem:[#allocation18_spill] sm:$0xff] }
 0x81e   : > { %3941 = vmatprep.subr.bf16.mxu1 %v6270_v7  ;;  %v4412_v5 = vmax.f32 %v10122_v10, %v10121_v34  ;;  %v3773_v7 = vsub.f32 %v10123_v15, %v8682_v0  ;;  %v6274_v14 = vpop.eup %6273  ;;  %v10127_v0 = vld [vmem:[#allocation35_spill] sm:$0xff] }
 0x81f   : > { %6279 = vpow.bf16 %v3898_v44  ;;  %v3771_v15 = vsub.f32 %v10127_v0, %v8667_v37 }
 0x820   : > { %v3815_v47 = vpack.c.bf16 %v3775_v35, %v3773_v7  ;;  %6281 = vpow.bf16 %v3895_v63  ;;  %v10128_v35 = vld [vmem:[#allocation34_spill] sm:$0xff]  ;;  %v6276_v7 = vpop.eup %6275 }
 0x821   : > { %4093 = vperm.xlu0 %6036, %v8737_v45   ;;  %4422 = vmax.xlane.f32.xlu1 %v4421_v6  ;;  %v3814_v6 = vpack.c.bf16 %v3772_v12, %v3770_v9  ;;  %v3768_v44 = vsub.f32 %v10128_v35, %v8659_v25  ;;  %v10129_v12 = vld [vmem:[#allocation60_spill] sm:$0xff]  ;;  %v3766_v9 = vsub.f32 %v10130_v19, %v8665_v32 }
 0x822   : > { %v3892_v36 = vmul.bf16 1069105081, %v3815_v47  ;;  %v3769_v63 = vsub.f32 %v10129_v12, %v8676_v52  ;;  %v4490_v47 = vmax.f32 %v8641_v40, %v8643_v39  ;;  %v10132_v52 = vld [vmem:[#allocation36_spill] sm:$0xff] }
 0x823   : > { %v3812_v37 = vpack.c.bf16 %v3768_v44, %v3766_v9  ;;  %v3764_v35 = vsub.f32 %v10132_v52, %v8649_v46 }
 0x824   : > { %v3813_v17 = vpack.c.bf16 %v3771_v15, %v3769_v63  ;;  %6283 = vpow.bf16 %v3892_v36  ;;  %v10133_v15 = vld [vmem:[#allocation66_spill] sm:$0xff] }
 0x825   : > { %3942 = vmatpush2.bf16.xpose.msra.mxu1 %v6272_v24  ;;  %4944 = vperm.xlu0 %6036, %v8747_v62   ;;  %v4496_v24 = vmax.f32 %v8655_v30, %v8661_v18  ;;  %v3883_v12 = vmul.bf16 1069105081, %v3812_v37  ;;  %v3765_v36 = vsub.f32 %v10133_v15, %v8665_v32  ;;  %v4460_v15 = vmax.f32 %v8569_v41, %v8575_v38  ;;  %v10145_v38 = vld [vmem:[#allocation67_spill] sm:$0xff] }
 0x826   : > { %4413 = vmax.xlane.f32.xlu1 %v4412_v5  ;;  %3943 = vmatprep.subr.bf16.mxu1 %v6274_v14  ;;  %v3889_v5 = vmul.bf16 1069105081, %v3814_v6  ;;  %v6278_v14 = vpop.eup %6277  ;;  %v10131_v6 = vld [vmem:[#allocation37_spill] sm:$0xff]  ;;  %v3886_v0 = vmul.bf16 1069105081, %v3813_v17 }
 0x828   : > { %6285 = vpow.bf16 %v3889_v5  ;;  %v10134_v5 = vld [vmem:[#allocation63_spill] sm:$0xff] }
 0x829   : > { %6050 = vset.pattern.permute.xlu0 %v10001_v2  ;;  %6287 = vpow.bf16 %v3886_v0 }
 0x82a   : > { %4407 = vmax.xlane.f32.xlu1 %v4406_v20  ;;  %v3767_v20 = vsub.f32 %v10131_v6, %v8659_v25  ;;  %6289 = vpow.bf16 %v3883_v12  ;;  %v4478_v25 = vmax.f32 %v8619_v53, %v8623_v1  ;;  %v10136_v6 = vld [vmem:[#allocation64_spill] sm:$0xff] }
 0x82b   : > { %v3761_v52 = vsub.f32 %v10136_v6, %v8657_v22 }
 0x82c   : > { %v3811_v63 = vpack.c.bf16 %v3767_v20, %v3765_v36  ;;  %v4472_v20 = vmax.f32 %v8605_v29, %v8611_v60  ;;  %v4454_v36 = vmax.f32 %v8553_v23, %v8559_v43 }
 0x82d   : > { %3944 = vmatpush2.bf16.xpose.msra.mxu1 %v6276_v7  ;;  %v6280_v19 = vpop.eup %6279  ;;  %v3762_v7 = vsub.f32 %v10134_v5, %v8657_v22 }
 0x82e   : > { %4497 = vmax.xlane.f32.xlu1 %v4496_v24  ;;  %3945 = vmatprep.subr.bf16.mxu1 %v6278_v14  ;;  %v4484_v24 = vmax.f32 %v8629_v61, %v8631_v27  ;;  %v6282_v44 = vpop.eup %6281  ;;  %v10135_v14 = vld [vmem:[#allocation39_spill] sm:$0xff]  ;;  %v3880_v9 = vmul.bf16 1069105081, %v3811_v63  ;;  %v5844_v63 = vld [vmem:[%s9493_s8 + $0x4] sm:$0xf] }
 0x82f   : > { %v3810_v17 = vpack.c.bf16 %v3764_v35, %v3762_v7  ;;  %v3763_v32 = vsub.f32 %v10135_v14, %v8649_v46  ;;  %v4466_v46 = vmax.f32 %v8587_v16, %v8593_v3  ;;  %3160 = vperm.xlu0 %6050, %v5844_v63   ;;  %v8802_v14 = vpop.xlane.xlu1 %4437  ;;  %v10146_v16 = vld [vmem:[#allocation41_spill] sm:$0xff] }
 0x830   : > { %6291 = vpow.bf16 %v3880_v9 }
 0x831   : > { %v3877_v37 = vmul.bf16 1069105081, %v3810_v17  ;;  %v3809_v35 = vpack.c.bf16 %v3763_v32, %v3761_v52  ;;  %v10138_v52 = vld [vmem:[#allocation45_spill] sm:$0xff] }
 0x832   : > { %4491 = vmax.xlane.f32.xlu1 %v4490_v47  ;;  %v6284_v47 = vpop.eup %6283 }
 0x833   : > { %6293 = vpow.bf16 %v3877_v37  ;;  %v3874_v12 = vmul.bf16 1069105081, %v3809_v35  ;;  %v4447_v9 = vpop.xlane.xlu1 %4446  ;;  %v10140_v35 = vld [vmem:[#allocation42_spill] sm:$0xff] }
 0x835   : > { %3946 = vmatpush2.bf16.xpose.msra.mxu1 %v6280_v19  ;;  %6295 = vpow.bf16 %v3874_v12  ;;  %v10141_v12 = vld [vmem:[#allocation43_spill] sm:$0xff] }
 0x836   : > { %4485 = vmax.xlane.f32.xlu1 %v4484_v24  ;;  %3947 = vmatprep.subr.bf16.mxu1 %v6282_v44  ;;  %v6286_v0 = vpop.eup %6285  ;;  %v3315_v44 = vpop.permute.xlu0 %3314 }
 0x837   : > { %v6288_v19 = vpop.eup %6287 }
 0x838   : > { %v6290_v22 = vpop.eup %6289 }
 0x83a   : > { %4479 = vmax.xlane.f32.xlu1 %v4478_v25  ;;  %v8797_v7 = vpop.xlane.xlu0 %4440 }
 0x83d   : > { %3948 = vmatpush2.bf16.xpose.msra.mxu1 %v6284_v47  ;;  %v10137_v47 = vld [vmem:[#allocation50_spill] sm:$0xff] }
 0x83e   : > { %4473 = vmax.xlane.f32.xlu1 %v4472_v20  ;;  %3949 = vmatprep.subr.bf16.mxu1 %v6286_v0  ;;  %v6292_v24 = vpop.eup %6291  ;;  %v4444_v25 = vpop.xlane.xlu0 %4443  ;;  %v3317_v6 = vmul.f32 %v3315_v44, %v10137_v47  ;;  %v3318_v20 = vmul.f32 %v3315_v44, %v10138_v52  ;;  %v10139_v0 = vmov 2   ;;  %v4529_v47 = vsub.f32 %v8528_v58, %v4447_v9 }
 0x83f   : > { %v10144_v44 = vmov 3  }
 0x841   : > { %v6294_v5 = vpop.eup %6293 }
 0x842   : > { %4467 = vmax.xlane.f32.xlu1 %v4466_v46  ;;  %v4450_v32 = vpop.xlane.xlu0 %4449  ;;  %v3323_v46 = vmul.f32 %v8696_v54, %v10140_v35  ;;  %v4527_v35 = vsub.f32 %v8522_v28, %v4444_v25 }
 0x843   : > { %v6296_v17 = vpop.eup %6295  ;;  %v4530_v41 = vsub.f32 %v8535_v49, %v4450_v32 }
 0x844   : > { %v3325_v63 = vadd.f32 %v3323_v46, %v3317_v6  ;;  %v5841_v46 = vld [vmem:[%s9491_s6 + $0xc] sm:$0x7] }
 0x845   : > { %3950 = vmatpush2.bf16.xpose.msra.mxu1 %v6288_v19  ;;  %v3324_v19 = vmul.f32 %v8696_v54, %v10141_v12  ;;  %v4531_v54 = vsub.f32 %v8541_v56, %v4450_v32  ;;  %v4528_v32 = vsub.f32 %v8526_v42, %v4447_v9  ;;  %v10149_v42 = vld [vmem:[#allocation91_spill] sm:$0xff] }
 0x846   : > { %4461 = vmax.xlane.f32.xlu1 %v4460_v15  ;;  %3951 = vmatprep.subr.bf16.mxu1 %v6290_v22  ;;  %v3329_v37 = vpop.permute.xlu0 %3328  ;;  %v10142_v15 = vld [vmem:[#allocation40_spill] sm:$0xff]  ;;  %v4523_v9 = vsub.f32 %v10149_v42, %v8802_v14 }
 0x847   : > { %v3331_v22 = vmul.f32 %v3329_v37, %v10142_v15 }
 0x849   : > { %v3333_v23 = vadd.f32 %v3331_v22, %v3325_v63 }
 0x84a   : > { %4455 = vmax.xlane.f32.xlu1 %v4454_v36  ;;  %v10143_v36 = vld [vmem:[#allocation68_spill] sm:$0xff] }
 0x84d   : > { %3952 = vmatpush2.bf16.xpose.msra.mxu1 %v6292_v24  ;;  %v3332_v24 = vmul.f32 %v3329_v37, %v10143_v36 }
 0x84e   : > { %3953 = vmatprep.subr.bf16.mxu1 %v6294_v5  ;;  %v3337_v5 = vpop.permute.xlu1 %3336 }
 0x84f   : > { %v3339_v37 = vmul.f32 %v3337_v5, %v10145_v38  ;;  %v3340_v6 = vmul.f32 %v3337_v5, %v10146_v16 }
 0x851   : > { %v3341_v49 = vadd.f32 %v3339_v37, %v3333_v23 }
 0x855   : > { %3954 = vmatpush2.bf16.xpose.msra.mxu1 %v6296_v17  ;;  %v3326_v17 = vadd.f32 %v3324_v19, %v3318_v20 }
 0x857   : > { %v3334_v43 = vadd.f32 %v3332_v24, %v3326_v17 }
 0x859   : > { %v3342_v56 = vadd.f32 %v3340_v6, %v3334_v43  ;;  %v10150_v6 = vmov 1  }
 0x85b   : > { %4087 = vperm.xlu1 %6035, %v8737_v45  }
 0x85f   : > { %6037 = vset.pattern.permute.xlu1 %v10139_v0 }
 0x860   : > { %4101 = vperm.xlu1 %6037, %v8737_v45  }
 0x864   : > { %6038 = vset.pattern.permute.xlu1 %v10144_v44 }
 0x865   : > { %4109 = vperm.xlu1 %6038, %v8737_v45   ;;  %v4453_v15 = vpop.xlane.xlu1 %4452  ;;  %v4579_v45 = vpack.c.bf16 %v4529_v47, %v4527_v35  ;;  %v10147_v47 = vld [vmem:[#allocation89_spill] sm:$0xff] }
 0x866   : > { %v4532_v20 = vsub.f32 %v8545_v11, %v4453_v15  ;;  %v4533_v58 = vsub.f32 %v8547_v4, %v4453_v15  ;;  %v5842_v4 = vld [vmem:[%s9492_s7 + $0x8] sm:$0xf]  ;;  %v10148_v15 = vld [vmem:[#allocation88_spill] sm:$0xff] }
 0x867   : > { %v4638_v35 = vmul.bf16 1069105081, %v4579_v45  ;;  %v4526_v17 = vsub.f32 %v10148_v15, %v4444_v25  ;;  %v10152_v45 = vld [vmem:[#allocation92_spill] sm:$0xff] }
 0x868   : > { %v4580_v19 = vpack.c.bf16 %v4532_v20, %v4530_v41  ;;  %v4581_v28 = vpack.c.bf16 %v4533_v58, %v4531_v54  ;;  %v4525_v41 = vsub.f32 %v10147_v47, %v8797_v7  ;;  %v10151_v20 = vld [vmem:[#allocation90_spill] sm:$0xff] }
 0x869   : > { %6039 = vset.pattern.permute.xlu1 %v10001_v2  ;;  %v3346_v22 = vpop.permute.xlu1 %3345  ;;  %v4578_v54 = vpack.c.bf16 %v4528_v32, %v4526_v17  ;;  %v4524_v58 = vsub.f32 %v10151_v20, %v8797_v7  ;;  %v5843_v7 = vld [vmem:[%s9492_s7 + $0xc] sm:$0xf]  ;;  %v8859_v47 = vld [vmem:[%s9494_s9 + $0x20] sm:$0xff]  ;;  %v10154_v17 = vld [vmem:[#allocation93_spill] sm:$0xff] }
 0x86a   : > { %4118 = vperm.xlu1 %6039, %v5841_v46   ;;  %v4641_v24 = vmul.bf16 1069105081, %v4580_v19  ;;  %v4644_v5 = vmul.bf16 1069105081, %v4581_v28  ;;  %v3348_v11 = vadd.f32 %v3346_v22, %v3341_v49  ;;  %v3349_v63 = vadd.f32 %v3346_v22, %v3342_v56  ;;  %4886 = vperm.xlu0 %6050, %v8859_v47  }
 0x86b   : > { %v4577_v37 = vpack.c.bf16 %v4525_v41, %v4523_v9  ;;  %v4635_v46 = vmul.bf16 1069105081, %v4578_v54  ;;  %v4522_v19 = vsub.f32 %v10152_v45, %v8802_v14  ;;  %v5882_v9 = vld [vmem:[%s9494_s9 + $0x28] sm:$0xff]  ;;  %v8873_v45 = vld [vmem:[%s9494_s9 + $0x30] sm:$0xff] }
 0x86c   : > { %6297 = vpow.bf16 %v4641_v24  ;;  %v3921_v23 = vpack.c.bf16 %v3348_v11, %v3348_v11  ;;  %v3922_v43 = vpack.c.bf16 %v3349_v63, %v3349_v63  ;;  %v5880_v63 = vld [vmem:[%s9499_s14 + $0x4] sm:$0xf] }
 0x86d   : > { %6299 = vpow.bf16 %v4644_v5  ;;  %v4632_v25 = vmul.bf16 1069105081, %v4577_v37  ;;  %v4576_v28 = vpack.c.bf16 %v4524_v58, %v4522_v19  ;;  %v5879_v5 = vld [vmem:[%s9498_s13 + $0x4] sm:$0xf] }
 0x86e   : > { %3978 = vperm.xlu1 %6039, %v5842_v4   ;;  %3955 = vmatprep.mubr.bf16.mxu1 %v3922_v43  ;;  %6301 = vpow.bf16 %v4638_v35  ;;  %v10153_v35 = vld [vmem:[#allocation94_spill] sm:$0xff] }
 0x86f   : > { %3956 = vmatmul.mubr.bf16.vlgmr.msra.gmra.mxu1 %v3921_v23  ;;  %6303 = vpow.bf16 %v4635_v46  ;;  %v4629_v56 = vmul.bf16 1069105081, %v4576_v28  ;;  %4891 = vperm.xlu0 %6050, %v5882_v9  }
 0x870   : > { %6305 = vpow.bf16 %v4632_v25 }
 0x871   : > { %6307 = vpow.bf16 %v4629_v56 }
 0x872   : > { %6040 = vset.pattern.permute.xlu1 %v10150_v6 }
 0x873   : > { %3992 = vperm.xlu1 %6040, %v5842_v4   ;;  %v4435_v4 = vpop.xlane.xlu0 %4434  ;;  %4896 = vperm.xlu0 %6050, %v8873_v45  }
 0x874   : > { %v4520_v15 = vsub.f32 %v10153_v35, %v4435_v4  ;;  %v4521_v23 = vsub.f32 %v10154_v17, %v4435_v4 }
 0x877   : > { %6041 = vset.pattern.permute.xlu1 %v10001_v2  ;;  %v4417_v25 = vpop.xlane.xlu0 %4416 }
 0x878   : > { %4751 = vperm.xlu1 %6041, %v5843_v7  }
 0x87a   : > { %v6298_v49 = vpop.eup %6297 }
 0x87b   : > { %v6300_v32 = vpop.eup %6299 }
 0x87c   : > { %4696 = vmatprep.subr.bf16.mxu1 %v6300_v32  ;;  %v6302_v22 = vpop.eup %6301  ;;  %6042 = vset.pattern.permute.xlu1 %v10150_v6 }
 0x87d   : > { %4697 = vmatpush1.bf16.xpose.msra.mxu1 %v6298_v49  ;;  %v6304_v24 = vpop.eup %6303  ;;  %4765 = vperm.xlu1 %6042, %v5843_v7   ;;  %v4411_v7 = vpop.xlane.xlu0 %4410 }
 0x87e   : > { %4698 = vmatprep.subr.bf16.mxu1 %v6302_v22  ;;  %v6306_v14 = vpop.eup %6305 }
 0x87f   : > { %v6308_v11 = vpop.eup %6307 }
 0x881   : > { %6043 = vset.pattern.permute.xlu1 %v10001_v2 }
 0x882   : > { %4850 = vperm.xlu1 %6043, %v5879_v5   ;;  %v8883_v5 = vpop.xlane.xlu0 %4500 }
 0x885   : > { %4699 = vmatpush1.bf16.xpose.msra.mxu1 %v6304_v24 }
 0x886   : > { %4700 = vmatprep.subr.bf16.mxu1 %v6306_v14  ;;  %4863 = vperm.xlu1 %6043, %v5880_v63  }
 0x88a   : > { %6044 = vset.pattern.permute.xlu1 %v10150_v6 }
 0x88b   : > { %4932 = vperm.xlu1 %6044, %v8859_v47  }
 0x88d   : > { %4701 = vmatpush1.bf16.xpose.msra.mxu1 %v6308_v11 }
 0x88f   : > { %4936 = vperm.xlu1 %6044, %v5882_v9  }
 0x893   : > { %6045 = vset.pattern.permute.xlu1 %v10139_v0 }
 0x894   : > { %4986 = vperm.xlu1 %6045, %v5882_v9  }
 0x898   : > { %6046 = vset.pattern.permute.xlu1 %v10144_v44 }
 0x899   : > { %5032 = vperm.xlu1 %6046, %v8859_v47  }
 0x89a   : > { %v4432_v41 = vpop.xlane.xlu1 %4431 }
 0x89b   : > { %v4518_v43 = vsub.f32 %v10102_v50, %v4432_v41  ;;  %v4519_v42 = vsub.f32 %v10101_v26, %v4432_v41  ;;  %v10155_v41 = vld [vmem:[#allocation72_spill] sm:$0xff] }
 0x89c   : > { %v4509_v35 = vsub.f32 %v10155_v41, %v4417_v25 }
 0x89d   : > { %v4574_v54 = vpack.c.bf16 %v4520_v15, %v4518_v43  ;;  %v4575_v37 = vpack.c.bf16 %v4521_v23, %v4519_v42  ;;  %6047 = vset.pattern.permute.xlu1 %v10150_v6 }
 0x89e   : > { %v4426_v20 = vpop.xlane.xlu1 %4425  ;;  %4940 = vperm.xlu1 %6047, %v8873_v45  }
 0x89f   : > { %v4623_v58 = vmul.bf16 1069105081, %v4574_v54  ;;  %v4626_v46 = vmul.bf16 1069105081, %v4575_v37  ;;  %v4514_v50 = vsub.f32 %v10106_v33, %v4426_v20  ;;  %v4515_v19 = vsub.f32 %v10105_v57, %v4426_v20 }
 0x8a1   : > { %6309 = vpow.bf16 %v4623_v58  ;;  %v10157_v58 = vld [vmem:[#allocation17_spill] sm:$0xff] }
 0x8a2   : > { %6311 = vpow.bf16 %v4626_v46  ;;  %v4429_v26 = vpop.xlane.xlu1 %4428  ;;  %6048 = vset.pattern.permute.xlu1 %v10144_v44  ;;  %v4505_v46 = vsub.f32 %v10157_v58, %v4411_v7 }
 0x8a3   : > { %v4516_v28 = vsub.f32 %v10110_v48, %v4429_v26  ;;  %v4517_v49 = vsub.f32 %v10109_v59, %v4429_v26  ;;  %5036 = vperm.xlu1 %6048, %v5882_v9  }
 0x8a5   : > { %v4572_v56 = vpack.c.bf16 %v4516_v28, %v4514_v50  ;;  %v4573_v32 = vpack.c.bf16 %v4517_v49, %v4515_v19 }
 0x8a6   : > { %v4420_v22 = vpop.xlane.xlu1 %4419 }
 0x8a7   : > { %v4617_v24 = vmul.bf16 1069105081, %v4572_v56  ;;  %v4620_v14 = vmul.bf16 1069105081, %v4573_v32  ;;  %v4510_v57 = vsub.f32 %v10114_v21, %v4420_v22  ;;  %v4511_v59 = vsub.f32 %v10113_v31, %v4420_v22  ;;  %6049 = vset.pattern.permute.xlu1 %v10001_v2 }
 0x8a9   : > { %6313 = vpow.bf16 %v4617_v24  ;;  %v10158_v24 = vld [vmem:[#allocation16_spill] sm:$0xff] }
 0x8aa   : > { %6315 = vpow.bf16 %v4620_v14  ;;  %v4423_v33 = vpop.xlane.xlu1 %4422  ;;  %v4504_v14 = vsub.f32 %v10158_v24, %v4411_v7 }
 0x8ab   : > { %v4512_v48 = vsub.f32 %v10118_v13, %v4423_v33  ;;  %v4513_v11 = vsub.f32 %v10117_v51, %v4423_v33  ;;  %v10156_v13 = vld [vmem:[#allocation75_spill] sm:$0xff]  ;;  %v8895_v51 = vpop.xlane.xlu0 %4494 }
 0x8ac   : > { %v4508_v54 = vsub.f32 %v10156_v13, %v4417_v25 }
 0x8ad   : > { %v4570_v63 = vpack.c.bf16 %v4512_v48, %v4510_v57  ;;  %v4571_v4 = vpack.c.bf16 %v4513_v11, %v4511_v59 }
 0x8af   : > { %v4414_v15 = vpop.xlane.xlu1 %4413  ;;  %v6310_v17 = vpop.eup %6309  ;;  %v4611_v23 = vmul.bf16 1069105081, %v4570_v63  ;;  %v4614_v43 = vmul.bf16 1069105081, %v4571_v4 }
 0x8b0   : > { %v4506_v21 = vsub.f32 %v10122_v10, %v4414_v15  ;;  %v4507_v31 = vsub.f32 %v10121_v34, %v4414_v15  ;;  %v6312_v42 = vpop.eup %6311  ;;  %v8901_v28 = vpop.xlane.xlu0 %4488  ;;  %v10160_v15 = vld [vmem:[#allocation38_spill] sm:$0xff] }
 0x8b1   : > { %6317 = vpow.bf16 %v4611_v23  ;;  %4702 = vmatprep.subr.bf16.mxu1 %v6312_v42  ;;  %v10161_v23 = vld [vmem:[#allocation48_spill] sm:$0xff] }
 0x8b2   : > { %v4569_v37 = vpack.c.bf16 %v4509_v35, %v4507_v31  ;;  %6319 = vpow.bf16 %v4614_v43  ;;  %4703 = vmatpush1.bf16.xpose.msra.mxu1 %v6310_v17  ;;  %v4568_v26 = vpack.c.bf16 %v4508_v54, %v4506_v21  ;;  %v4564_v17 = vsub.f32 %v10160_v15, %v8883_v5  ;;  %v5885_v31 = vld [vmem:[%s9495_s10 + $0x20] sm:$0xff] }
 0x8b3   : > { %v4408_v20 = vpop.xlane.xlu1 %4407  ;;  %v4561_v43 = vsub.f32 %v10161_v23, %v8895_v51  ;;  %5083 = vperm.xlu1 %6049, %v5885_v31   ;;  %v5887_v23 = vld [vmem:[%s9495_s10 + $0x30] sm:$0xff] }
 0x8b4   : > { %v4608_v10 = vmul.bf16 1069105081, %v4569_v37  ;;  %v4503_v34 = vsub.f32 %v10125_v8, %v4408_v20  ;;  %v4605_v49 = vmul.bf16 1069105081, %v4568_v26  ;;  %v4502_v56 = vsub.f32 %v10126_v55, %v4408_v20  ;;  %v10159_v8 = vld [vmem:[#allocation97_spill] sm:$0xff]  ;;  %v8908_v11 = vpop.xlane.xlu0 %4482  ;;  %v10162_v26 = vld [vmem:[#allocation47_spill] sm:$0xff] }
 0x8b5   : > { %v4565_v33 = vsub.f32 %v10159_v8, %v8883_v5 }
 0x8b6   : > { %v4567_v50 = vpack.c.bf16 %v4505_v46, %v4503_v34  ;;  %6321 = vpow.bf16 %v4608_v10  ;;  %v4566_v59 = vpack.c.bf16 %v4504_v14, %v4502_v56  ;;  %v4560_v10 = vsub.f32 %v10162_v26, %v8895_v51 }
 0x8b7   : > { %v4498_v25 = vpop.xlane.xlu1 %4497  ;;  %v6314_v19 = vpop.eup %6313  ;;  %6323 = vpow.bf16 %v4605_v49  ;;  %4901 = vperm.xlu1 %6049, %v8747_v62   ;;  %v10169_v26 = vmov 4  }
 0x8b8   : > { %v6316_v32 = vpop.eup %6315  ;;  %v4602_v22 = vmul.bf16 1069105081, %v4567_v50  ;;  %v4563_v9 = vsub.f32 %v8661_v18, %v4498_v25  ;;  %v4599_v4 = vmul.bf16 1069105081, %v4566_v59  ;;  %v4562_v41 = vsub.f32 %v8655_v30, %v4498_v25  ;;  %v8921_v42 = vpop.xlane.xlu0 %4476  ;;  %v10163_v25 = vld [vmem:[#allocation44_spill] sm:$0xff]  ;;  %v10165_v59 = vld [vmem:[#allocation2_spill] sm:$0xff] }
 0x8b9   : > { %4704 = vmatprep.subr.bf16.mxu1 %v6316_v32  ;;  %v5886_v32 = vld [vmem:[%s9495_s10 + $0x28] sm:$0xff] }
 0x8ba   : > { %4705 = vmatpush1.bf16.xpose.msra.mxu1 %v6314_v19  ;;  %6325 = vpow.bf16 %v4602_v22  ;;  %v4597_v48 = vpack.c.bf16 %v4565_v33, %v4563_v9  ;;  %v4596_v30 = vpack.c.bf16 %v4564_v17, %v4562_v41  ;;  %v4557_v19 = vsub.f32 %v10163_v25, %v8901_v28 }
 0x8bb   : > { %v4492_v57 = vpop.xlane.xlu1 %4491  ;;  %6327 = vpow.bf16 %v4599_v4  ;;  %6051 = vset.pattern.permute.xlu1 %v10144_v44  ;;  %v10164_v33 = vmov 5   ;;  %v10166_v4 = vld [vmem:[#allocation15_spill] sm:$0xff] }
 0x8bc   : > { %v4692_v35 = vmul.bf16 1069105081, %v4597_v48  ;;  %v4559_v7 = vsub.f32 %v8643_v39, %v4492_v57  ;;  %v4689_v54 = vmul.bf16 1069105081, %v4596_v30  ;;  %v4558_v37 = vsub.f32 %v8641_v40, %v4492_v57  ;;  %v8930_v34 = vpop.xlane.xlu0 %4470  ;;  %5040 = vperm.xlu1 %6051, %v8873_v45  }
 0x8bd   : > { %v4556_v48 = vsub.f32 %v10165_v59, %v8901_v28  ;;  %v4553_v41 = vsub.f32 %v10166_v4, %v8908_v11  ;;  %v10174_v59 = vmov 12   ;;  %v10176_v4 = vmov 8  }
 0x8be   : > { %6329 = vpow.bf16 %v4692_v35  ;;  %v4595_v13 = vpack.c.bf16 %v4561_v43, %v4559_v7  ;;  %v4594_v40 = vpack.c.bf16 %v4560_v10, %v4558_v37 }
 0x8bf   : > { %v4486_v63 = vpop.xlane.xlu1 %4485  ;;  %v6318_v55 = vpop.eup %6317  ;;  %6331 = vpow.bf16 %v4689_v54 }
 0x8c0   : > { %v6320_v18 = vpop.eup %6319  ;;  %v4686_v20 = vmul.bf16 1069105081, %v4595_v13  ;;  %v4555_v58 = vsub.f32 %v8631_v27, %v4486_v63  ;;  %v8940_v27 = vld [vmem:[%s9496_s11 + $0x4] sm:$0xf]  ;;  %v8949_v22 = vpop.xlane.xlu0 %4464  ;;  %v4683_v9 = vmul.bf16 1069105081, %v4594_v40  ;;  %v4554_v24 = vsub.f32 %v8629_v61, %v4486_v63  ;;  %6052 = vset.pattern.permute.xlu1 %v10001_v2 }
 0x8c1   : > { %4706 = vmatprep.subr.bf16.mxu1 %v6320_v18  ;;  %5123 = vperm.xlu0 %6050, %v8940_v27  }
 0x8c2   : > { %4707 = vmatpush1.bf16.xpose.msra.mxu1 %v6318_v55  ;;  %6333 = vpow.bf16 %v4686_v20  ;;  %v4593_v51 = vpack.c.bf16 %v4557_v19, %v4555_v58  ;;  %5088 = vperm.xlu1 %6052, %v5886_v32   ;;  %v10171_v19 = vld [vmem:[#allocation76_spill] sm:$0xff] }
 0x8c3   : > { %v8916_v21 = vpop.xlane.xlu1 %4479  ;;  %6335 = vpow.bf16 %v4683_v9  ;;  %v4545_v40 = vsub.f32 %v10171_v19, %v8930_v34  ;;  %v10172_v9 = vld [vmem:[#allocation82_spill] sm:$0xff]  ;;  %v10190_v19 = vmov 10  }
 0x8c4   : > { %v6322_v39 = vpop.eup %6321  ;;  %v4680_v14 = vmul.bf16 1069105081, %v4593_v51  ;;  %v4551_v8 = vsub.f32 %v8623_v1, %v8916_v21  ;;  %v4592_v1 = vpack.c.bf16 %v4556_v48, %v4554_v24  ;;  %v8963_v18 = vpop.xlane.xlu0 %4458  ;;  %v4550_v7 = vsub.f32 %v8619_v53, %v8916_v21 }
 0x8c5   : > { %4708 = vmatprep.subr.bf16.mxu1 %v6322_v39  ;;  %v6324_v46 = vpop.eup %6323  ;;  %6057 = vset.pattern.permute.xlu0 %v10164_v33  ;;  %v10173_v33 = vld [vmem:[#allocation83_spill] sm:$0xff] }
 0x8c6   : > { %5263 = vperm.xlu0 %6057, %v8940_v27   ;;  %6337 = vpow.bf16 %v4680_v14  ;;  %v4591_v63 = vpack.c.bf16 %v4553_v41, %v4551_v8  ;;  %6053 = vset.pattern.permute.xlu1 %v10144_v44  ;;  %v4677_v35 = vmul.bf16 1069105081, %v4592_v1  ;;  %v10177_v1 = vld [vmem:[#allocation77_spill] sm:$0xff] }
 0x8c7   : > { %v8923_v5 = vpop.xlane.xlu1 %4473  ;;  %5044 = vperm.xlu1 %6053, %v8747_v62  }
 0x8c8   : > { %v6326_v50 = vpop.eup %6325  ;;  %v4674_v15 = vmul.bf16 1069105081, %v4591_v63  ;;  %v4547_v17 = vsub.f32 %v8611_v60, %v8923_v5  ;;  %v8980_v30 = vpop.permute.xlu0 %4093  ;;  %6339 = vpow.bf16 %v4677_v35  ;;  %v4546_v58 = vsub.f32 %v8605_v29, %v8923_v5 }
 0x8c9   : > { %v6328_v57 = vpop.eup %6327  ;;  %v4541_v63 = vsub.f32 %v10177_v1, %v8949_v22  ;;  %v10201_v1 = vmov 21  }
 0x8ca   : > { %4709 = vmatpush1.bf16.xpose.msra.mxu1 %v6324_v46  ;;  %6058 = vset.pattern.permute.xlu0 %v10139_v0  ;;  %v10167_v0 = vld [vmem:[#allocation11_spill] sm:$0xff]  ;;  %6341 = vpow.bf16 %v4674_v15  ;;  %v10179_v15 = vld [vmem:[#allocation85_spill] sm:$0xff] }
 0x8cb   : > { %v8934_v49 = vpop.xlane.xlu1 %4467  ;;  %4710 = vmatprep.subr.bf16.mxu1 %v6326_v50  ;;  %4982 = vperm.xlu0 %6058, %v8859_v47   ;;  %v4552_v31 = vsub.f32 %v10167_v0, %v8908_v11  ;;  %v10168_v47 = vld [vmem:[#allocation13_spill] sm:$0xff]  ;;  %v4097_v11 = vmul.f32 %v8980_v30, %v10141_v12 }
 0x8cc   : > { %v6330_v55 = vpop.eup %6329  ;;  %v4549_v13 = vsub.f32 %v10168_v47, %v8921_v42  ;;  %6054 = vset.pattern.permute.xlu1 %v10001_v2  ;;  %v4543_v12 = vsub.f32 %v8593_v3, %v8934_v49  ;;  %v4542_v24 = vsub.f32 %v10172_v9, %v8934_v49 }
 0x8cd   : > { %v6332_v43 = vpop.eup %6331  ;;  %v4590_v60 = vpack.c.bf16 %v4552_v31, %v4550_v7  ;;  %5093 = vperm.xlu1 %6054, %v5887_v23   ;;  %v10178_v7 = vmov 9  }
 0x8ce   : > { %v4589_v54 = vpack.c.bf16 %v4549_v13, %v4547_v17  ;;  %v4587_v32 = vpack.c.bf16 %v4545_v40, %v4543_v12  ;;  %v10191_v40 = vmov 22  }
 0x8cf   : > { %v8944_v56 = vpop.xlane.xlu1 %4461  ;;  %4990 = vperm.xlu0 %6058, %v8873_v45   ;;  %v4671_v20 = vmul.bf16 1069105081, %v4590_v60  ;;  %v10170_v45 = vld [vmem:[#allocation78_spill] sm:$0xff] }
 0x8d0   : > { %v6334_v39 = vpop.eup %6333  ;;  %v4668_v10 = vmul.bf16 1069105081, %v4589_v54  ;;  %v4548_v29 = vsub.f32 %v10170_v45, %v8921_v42  ;;  %v4662_v8 = vmul.bf16 1069105081, %v4587_v32  ;;  %v4538_v17 = vsub.f32 %v10179_v15, %v8944_v56 }
 0x8d1   : > { %6055 = vset.pattern.permute.xlu1 %v10169_v26  ;;  %6343 = vpow.bf16 %v4671_v20  ;;  %v10184_v54 = vmov 17   ;;  %v10188_v45 = vmov 13   ;;  %v10193_v32 = vmov 7  }
 0x8d2   : > { %4711 = vmatpush1.bf16.xpose.msra.mxu1 %v6328_v57  ;;  %5137 = vperm.xlu1 %6055, %v8940_v27   ;;  %v4588_v3 = vpack.c.bf16 %v4548_v29, %v4546_v58  ;;  %6345 = vpow.bf16 %v4668_v10  ;;  %v4539_v57 = vsub.f32 %v10173_v33, %v8944_v56  ;;  %v10186_v10 = vld [vmem:[#allocation84_spill] sm:$0xff] }
 0x8d3   : > { %v8961_v61 = vpop.xlane.xlu1 %4455  ;;  %4712 = vmatprep.subr.bf16.mxu1 %v6330_v55  ;;  %4994 = vperm.xlu0 %6058, %v8747_v62   ;;  %v4536_v12 = vsub.f32 %v10186_v10, %v8963_v18 }
 0x8d4   : > { %v4665_v42 = vmul.bf16 1069105081, %v4588_v3  ;;  %v4585_v35 = vpack.c.bf16 %v4541_v63, %v4539_v57  ;;  %v10202_v63 = vmov 18  }
 0x8d6   : > { %6056 = vset.pattern.permute.xlu1 %v10150_v6  ;;  %v10175_v6 = vld [vmem:[#allocation79_spill] sm:$0xff]  ;;  %6347 = vpow.bf16 %v4665_v42  ;;  %v4656_v23 = vmul.bf16 1069105081, %v4585_v35  ;;  %v10194_v42 = vld [vmem:[#allocation42_spill] sm:$0xff] }
 0x8d7   : > { %v8967_v28 = vpop.permute.xlu1 %4087  ;;  %5375 = vperm.xlu0 %6058, %v8940_v27   ;;  %5249 = vperm.xlu1 %6056, %v8940_v27   ;;  %v4544_v55 = vsub.f32 %v10175_v6, %v8930_v34  ;;  %6349 = vpow.bf16 %v4662_v8  ;;  %v4096_v9 = vmul.f32 %v8980_v30, %v10194_v42  ;;  %v10196_v8 = vmov 29  }
 0x8d8   : > { %v4091_v53 = vmul.f32 %v8967_v28, %v10138_v52  ;;  %v10198_v30 = vmov 30  }
 0x8d9   : > { %v4586_v49 = vpack.c.bf16 %v4544_v55, %v4542_v24  ;;  %v10195_v24 = vld [vmem:[#allocation40_spill] sm:$0xff]  ;;  %v10199_v55 = vmov 14  }
 0x8da   : > { %4713 = vmatpush2.bf16.xpose.msra.mxu1 %v6332_v43  ;;  %v4099_v52 = vadd.f32 %v4097_v11, %v4091_v53  ;;  %v10180_v43 = vld [vmem:[#allocation86_spill] sm:$0xff]  ;;  %v10182_v53 = vld [vmem:[#allocation81_spill] sm:$0xff]  ;;  %v10183_v11 = vmov 6  }
 0x8db   : > { %v8986_v21 = vpop.permute.xlu1 %4101  ;;  %4714 = vmatprep.subr.bf16.mxu1 %v6334_v39  ;;  %6063 = vset.pattern.permute.xlu0 %v10174_v59  ;;  %v4659_v34 = vmul.bf16 1069105081, %v4586_v49  ;;  %v4535_v0 = vsub.f32 %v10180_v43, %v8961_v61  ;;  %v10181_v39 = vld [vmem:[#allocation80_spill] sm:$0xff]  ;;  %v4537_v60 = vsub.f32 %v10182_v53, %v8963_v18  ;;  %v10197_v59 = vmov 16  }
 0x8dc   : > { %v4105_v37 = vmul.f32 %v8986_v21, %v10143_v36  ;;  %v6336_v36 = vpop.eup %6335  ;;  %6059 = vset.pattern.permute.xlu1 %v10176_v4  ;;  %5169 = vperm.xlu0 %6063, %v8940_v27   ;;  %v4540_v47 = vsub.f32 %v10181_v39, %v8949_v22  ;;  %v5888_v22 = vld [vmem:[%s9495_s10 + $0x38] sm:$0xff]  ;;  %v5890_v4 = vld [vmem:[%s9497_s12 + $0x4] sm:$0xf]  ;;  %v10203_v49 = vmov 24   ;;  %v10207_v43 = vmov 26   ;;  %v10208_v39 = vld [vmem:[#allocation7_spill] sm:$0xff] }
 0x8dd   : > { %v6338_v5 = vpop.eup %6337  ;;  %5153 = vperm.xlu1 %6059, %v8940_v27   ;;  %6351 = vpow.bf16 %v4659_v34 }
 0x8de   : > { %v4107_v50 = vadd.f32 %v4105_v37, %v4099_v52  ;;  %v6340_v48 = vpop.eup %6339  ;;  %v4584_v56 = vpack.c.bf16 %v4540_v47, %v4538_v17  ;;  %6353 = vpow.bf16 %v4656_v23  ;;  %v10185_v52 = vld [vmem:[#allocation87_spill] sm:$0xff]  ;;  %v10206_v17 = vmov 28  }
 0x8df   : > { %v6342_v41 = vpop.eup %6341  ;;  %v4534_v20 = vsub.f32 %v10185_v52, %v8961_v61  ;;  %v10189_v61 = vmov 15  }
 0x8e0   : > { %v8996_v46 = vpop.permute.xlu1 %4109  ;;  %6066 = vset.pattern.permute.xlu0 %v10144_v44  ;;  %v6344_v31 = vpop.eup %6343  ;;  %v4583_v44 = vpack.c.bf16 %v4537_v60, %v4535_v0  ;;  %v4653_v37 = vmul.bf16 1069105081, %v4584_v56 }
 0x8e1   : > { %v4113_v25 = vmul.f32 %v8996_v46, %v10146_v16  ;;  %6060 = vset.pattern.permute.xlu1 %v10178_v7  ;;  %5501 = vperm.xlu0 %6066, %v8940_v27   ;;  %v6346_v13 = vpop.eup %6345  ;;  %v10205_v7 = vmov 19  }
 0x8e2   : > { %4715 = vmatpush2.bf16.xpose.msra.mxu1 %v6336_v36  ;;  %5279 = vperm.xlu1 %6060, %v8940_v27   ;;  %v4650_v58 = vmul.bf16 1069105081, %v4583_v44  ;;  %6355 = vpow.bf16 %v4653_v37  ;;  %v4582_v36 = vpack.c.bf16 %v4536_v12, %v4534_v20  ;;  %v10211_v37 = vld [vmem:[#allocation5_spill] sm:$0xff]  ;;  %v10212_v20 = vmov 27  }
 0x8e3   : > { %v4115_v51 = vadd.f32 %v4113_v25, %v4107_v50  ;;  %4716 = vmatprep.subr.bf16.mxu1 %v6338_v5  ;;  %v10187_v50 = vmov 20  }
 0x8e4   : > { %v6348_v26 = vpop.eup %6347  ;;  %6357 = vpow.bf16 %v4650_v58  ;;  %v4647_v29 = vmul.bf16 1069105081, %v4582_v36 }
 0x8e5   : > { %v9009_v16 = vpop.permute.xlu1 %4118  ;;  %6069 = vset.pattern.permute.xlu0 %v10184_v54  ;;  %v6350_v25 = vpop.eup %6349  ;;  %v10210_v54 = vld [vmem:[#allocation3_spill] sm:$0xff] }
 0x8e6   : > { %v4122_v62 = vadd.f32 %v9009_v16, %v4115_v51  ;;  %6061 = vset.pattern.permute.xlu1 %v10183_v11  ;;  %5311 = vperm.xlu0 %6069, %v8940_v27   ;;  %6359 = vpow.bf16 %v4647_v29  ;;  %v10192_v51 = vld [vmem:[#allocation50_spill] sm:$0xff] }
 0x8e7   : > { %5389 = vperm.xlu1 %6061, %v8940_v27   ;;  %v4090_v3 = vmul.f32 %v8967_v28, %v10192_v51  ;;  %v4112_v28 = vmul.f32 %v8996_v46, %v10145_v38  ;;  %v10200_v46 = vmov 11   ;;  %v5891_v29 = vld [vmem:[%s9500_s15 + $0x4] sm:$0xf] }
 0x8e8   : > { %v4695_v14 = vpack.c.bf16 %v4122_v62, %v4122_v62 }
 0x8e9   : > { %v4098_v57 = vadd.f32 %v4096_v9, %v4090_v3 }
 0x8ea   : > { %4728 = vmatprep.mubr.bf16.mxu1 %v4695_v14  ;;  %4717 = vmatpush2.bf16.xpose.msra.mxu1 %v6340_v48  ;;  %v4104_v14 = vmul.f32 %v8986_v21, %v10195_v24 }
 0x8eb   : > { %4718 = vmatprep.subr.bf16.mxu1 %v6342_v41  ;;  %6062 = vset.pattern.permute.xlu1 %v10001_v2  ;;  %v6352_v18 = vpop.eup %6351 }
 0x8ec   : > { %5098 = vperm.xlu1 %6062, %v5888_v22   ;;  %6072 = vset.pattern.permute.xlu0 %v10187_v50  ;;  %v6354_v5 = vpop.eup %6353  ;;  %v4106_v48 = vadd.f32 %v4104_v14, %v4098_v57 }
 0x8ed   : > { %5201 = vperm.xlu0 %6072, %v8940_v27  }
 0x8ee   : > { %v4114_v6 = vadd.f32 %v4112_v28, %v4106_v48 }
 0x8f0   : > { %6064 = vset.pattern.permute.xlu1 %v10188_v45  ;;  %v6356_v62 = vpop.eup %6355  ;;  %v4121_v38 = vadd.f32 %v9009_v16, %v4114_v6  ;;  %v10204_v16 = vmov 25  }
 0x8f1   : > { %5295 = vperm.xlu1 %6064, %v8940_v27   ;;  %6075 = vset.pattern.permute.xlu0 %v10189_v61  ;;  %v10213_v61 = vmov 31  }
 0x8f2   : > { %4719 = vmatpush2.bf16.xpose.msra.mxu1 %v6344_v31  ;;  %5547 = vperm.xlu0 %6075, %v8940_v27   ;;  %v6358_v33 = vpop.eup %6357  ;;  %v4694_v41 = vpack.c.bf16 %v4121_v38, %v4121_v38  ;;  %v3979_v31 = vpop.permute.xlu1 %3978 }
 0x8f3   : > { %4720 = vmatprep.subr.bf16.mxu1 %v6346_v13  ;;  %v10209_v13 = vmov 23  }
 0x8f4   : > { %v6360_v21 = vpop.eup %6359 }
 0x8f5   : > { %6065 = vset.pattern.permute.xlu1 %v10190_v19 }
 0x8f6   : > { %5405 = vperm.xlu1 %6065, %v8940_v27   ;;  %6078 = vset.pattern.permute.xlu0 %v10191_v40  ;;  %v3993_v11 = vpop.permute.xlu1 %3992 }
 0x8f7   : > { %5453 = vperm.xlu0 %6078, %v8940_v27  }
 0x8fa   : > { %4721 = vmatpush2.bf16.xpose.msra.mxu1 %v6348_v26  ;;  %6067 = vset.pattern.permute.xlu1 %v10193_v32 }
 0x8fb   : > { %4722 = vmatprep.subr.bf16.mxu1 %v6350_v25  ;;  %5515 = vperm.xlu1 %6067, %v8940_v27  }
 0x8fc   : > { %6081 = vset.pattern.permute.xlu0 %v10196_v8 }
 0x8fd   : > { %5359 = vperm.xlu0 %6081, %v8940_v27  }
 0x8ff   : > { %6068 = vset.pattern.permute.xlu1 %v10197_v59 }
 0x900   : > { %5185 = vperm.xlu1 %6068, %v8940_v27  }
 0x901   : > { %6084 = vset.pattern.permute.xlu0 %v10198_v30 }
 0x902   : > { %4723 = vmatpush2.bf16.xpose.msra.mxu1 %v6352_v18  ;;  %5485 = vperm.xlu0 %6084, %v8940_v27   ;;  %v5892_v18 = vld [vmem:[%s9501_s16 + $0x4] sm:$0xf] }
 0x903   : > { %4724 = vmatprep.subr.bf16.mxu1 %v6354_v5  ;;  %v4752_v5 = vpop.permute.xlu1 %4751 }
 0x904   : > { %6070 = vset.pattern.permute.xlu1 %v10199_v55 }
 0x905   : > { %5421 = vperm.xlu1 %6070, %v8940_v27  }
 0x906   : > { %6087 = vset.pattern.permute.xlu0 %v10001_v2 }
 0x907   : > { %5634 = vperm.xlu0 %6087, %v5890_v4   ;;  %v4766_v19 = vpop.permute.xlu1 %4765 }
 0x909   : > { %6071 = vset.pattern.permute.xlu1 %v10200_v46 }
 0x90a   : > { %4725 = vmatpush2.bf16.xpose.msra.mxu1 %v6356_v62  ;;  %5531 = vperm.xlu1 %6071, %v8940_v27  }
 0x90b   : > { %4726 = vmatprep.subr.bf16.mxu1 %v6358_v33  ;;  %v9119_v40 = vpop.permute.xlu1 %4850 }
 0x90e   : > { %6073 = vset.pattern.permute.xlu1 %v10201_v1 }
 0x90f   : > { %5327 = vperm.xlu1 %6073, %v8940_v27   ;;  %v9121_v51 = vpop.permute.xlu1 %4863 }
 0x912   : > { %4727 = vmatpush2.bf16.xpose.msra.mxu1 %v6360_v21 }
 0x913   : > { %6074 = vset.pattern.permute.xlu1 %v10202_v63  ;;  %v9123_v3 = vpop.permute.xlu1 %4932 }
 0x914   : > { %5437 = vperm.xlu1 %6074, %v8940_v27  }
 0x918   : > { %6076 = vset.pattern.permute.xlu1 %v10203_v49 }
 0x919   : > { %4729 = vmatmul.mubr.bf16.vlgmr.msra.gmra.mxu1 %v4694_v41  ;;  %5217 = vperm.xlu1 %6076, %v8940_v27   ;;  %v9151_v41 = vpop.permute.xlu0 %4944 }
 0x91d   : > { %6077 = vset.pattern.permute.xlu1 %v10204_v16 }
 0x91e   : > { %5343 = vperm.xlu1 %6077, %v8940_v27  }
 0x922   : > { %6079 = vset.pattern.permute.xlu1 %v10205_v7 }
 0x923   : > { %5563 = vperm.xlu1 %6079, %v8940_v27  }
 0x927   : > { %6080 = vset.pattern.permute.xlu1 %v10206_v17 }
 0x928   : > { %5233 = vperm.xlu1 %6080, %v8940_v27  }
 0x92c   : > { %6082 = vset.pattern.permute.xlu1 %v10207_v43 }
 0x92d   : > { %5469 = vperm.xlu1 %6082, %v8940_v27  }
 0x92f   : > { %v3957_v35 = vpop.f32.mrf.mxu1 }
 0x930   : > { %6361 = vrcp.f32 %v3957_v35 }
 0x931   : > { %v3959_v34 = vpop.f32.mrf.mxu1  ;;  %6083 = vset.pattern.permute.xlu1 %v10209_v13 }
 0x932   : > { %6363 = vrcp.f32 %v3959_v34  ;;  %5579 = vperm.xlu1 %6083, %v8940_v27  }
 0x933   : > { %v3961_v15 = vpop.f32.mrf.mxu1 }
 0x934   : > { %v3161_v15 = vpop.permute.xlu0 %3160 }
 0x935   : > { %v3962_v23 = vpop.f32.mrf.mxu1 }
 0x936   : > { %6085 = vset.pattern.permute.xlu1 %v10212_v20 }
 0x937   : > { %5595 = vperm.xlu1 %6085, %v8940_v27  }
 0x93b   : > { %6086 = vset.pattern.permute.xlu1 %v10213_v61 }
 0x93c   : > { %5611 = vperm.xlu1 %6086, %v8940_v27   ;;  %v9125_v27 = vpop.permute.xlu1 %4936 }
 0x93d   : > { %v6362_v0 = vpop.eup %6361 }
 0x93e   : > { %v3969_v47 = vrot.slane %v6362_v0, %v10208_v39 }
 0x93f   : > { %v6364_v53 = vpop.eup %6363 }
 0x940   : > { %v3974_v60 = vmul.f32 %v3969_v47, %v3957_v35  ;;  %v3973_v56 = vrot.slane %v6364_v53, %v10208_v39  ;;  %6088 = vset.pattern.permute.xlu1 %v10001_v2  ;;  %v9127_v2 = vpop.permute.xlu1 %4986 }
 0x941   : > { %5707 = vperm.xlu1 %6088, %v5891_v29  }
 0x942   : > { %v3975_v44 = vmul.f32 %v3973_v56, %v3959_v34  ;;  %v3984_v22 = vrot.slane %v3974_v60, %v10210_v54  ;;  %v3998_v52 = vrot.slane %v3974_v60, %v10211_v37 }
 0x944   : > { %v3988_v58 = vrot.slane %v3975_v44, %v10210_v54  ;;  %v3989_v26 = vmul.f32 %v3984_v22, %v3979_v31  ;;  %v4002_v10 = vrot.slane %v3975_v44, %v10211_v37  ;;  %v4003_v12 = vmul.f32 %v3998_v52, %v3993_v11  ;;  %v9129_v32 = vpop.permute.xlu1 %5032  ;;  %v10215_v44 = vld [vmem:[#allocation49_spill] sm:$0xff] }
 0x945   : > { %5720 = vperm.xlu1 %6088, %v5892_v18  }
 0x946   : > { %v3990_v50 = vmul.f32 %v3988_v58, %v3979_v31  ;;  %v4004_v25 = vmul.f32 %v4002_v10, %v3993_v11  ;;  %v4005_v36 = vadd.f32 %v4003_v12, %v3989_v26 }
 0x948   : > { %v4006_v45 = vadd.f32 %v4004_v25, %v3990_v50  ;;  %v9131_v62 = vpop.permute.xlu1 %4940  ;;  %v4007_v31 = vadd.f32 %v4005_v36, %v3161_v15 }
 0x94a   : > { %v4008_v47 = vadd.f32 %v4006_v45, %v3161_v15 }
 0x94c   : > { %v9133_v42 = vpop.permute.xlu1 %5036 }
 0x950   : > { %v9135_v9 = vpop.permute.xlu1 %5083 }
 0x954   : > { %v9137_v24 = vpop.permute.xlu1 %4901 }
 0x958   : > { %v9139_v14 = vpop.permute.xlu1 %5040 }
 0x95c   : > { %v9141_v8 = vpop.permute.xlu1 %5088 }
 0x960   : > { %v9143_v59 = vpop.permute.xlu1 %5044 }
 0x964   : > { %v9145_v30 = vpop.permute.xlu1 %5093 }
 0x968   : > { %v9149_v46 = vpop.permute.xlu1 %5137 }
 0x96c   : > { %v9157_v0 = vpop.permute.xlu1 %5249 }
 0x96d   : > { %10214 = vst [vmem:[#allocation22_spill] sm:$0xff] %v9157_v0 }
 0x970   : > { %v9159_v11 = vpop.permute.xlu1 %5153 }
 0x974   : > { %v9165_v25 = vpop.permute.xlu1 %5279 }
 0x975   : > { %10216 = vst [vmem:[#allocation24_spill] sm:$0xff] %v9165_v25 }
 0x9d9   : > { %v4730_v33 = vpop.f32.mrf.mxu1 }
 0x9da   : > { %6365 = vrcp.f32 %v4730_v33 }
 0x9db   : > { %v4732_v57 = vpop.f32.mrf.mxu1 }
 0x9dc   : > { %6367 = vrcp.f32 %v4732_v57 }
 0x9dd   : > { %v4734_v28 = vpop.f32.mrf.mxu1 }
 0x9df   : > { %v4735_v48 = vpop.f32.mrf.mxu1 }
 0x9e7   : > { %v6366_v6 = vpop.eup %6365 }
 0x9e8   : > { %v4742_v21 = vrot.slane %v6366_v6, %v10208_v39 }
 0x9e9   : > { %v6368_v55 = vpop.eup %6367 }
 0x9ea   : > { %v4747_v4 = vmul.f32 %v4742_v21, %v4730_v33  ;;  %v4746_v38 = vrot.slane %v6368_v55, %v10208_v39  ;;  %v9168_v21 = vpop.permute.xlu1 %5389 }
 0x9ec   : > { %v4757_v1 = vrot.slane %v4747_v4, %v10210_v54  ;;  %v4771_v63 = vrot.slane %v4747_v4, %v10211_v37  ;;  %v4748_v49 = vmul.f32 %v4746_v38, %v4732_v57 }
 0x9ee   : > { %v4762_v16 = vmul.f32 %v4757_v1, %v4752_v5  ;;  %v4776_v35 = vmul.f32 %v4771_v63, %v4766_v19  ;;  %v4761_v7 = vrot.slane %v4748_v49, %v10210_v54  ;;  %v4775_v34 = vrot.slane %v4748_v49, %v10211_v37 }
 0x9f0   : > { %v4778_v17 = vadd.f32 %v4776_v35, %v4762_v16  ;;  %v4763_v23 = vmul.f32 %v4761_v7, %v4752_v5  ;;  %v4777_v43 = vmul.f32 %v4775_v34, %v4766_v19 }
 0x9f2   : > { %v4779_v13 = vadd.f32 %v4777_v43, %v4763_v23  ;;  %v4780_v53 = vadd.f32 %v4778_v17, %v4007_v31  ;;  %v9170_v23 = vpop.permute.xlu1 %5098 }
 0x9f4   : > { %v4781_v60 = vadd.f32 %v4779_v13, %v4008_v47 }
 0x9f6   : > { %v4788_v56 = vcombine.low %v4780_v53, %v4781_v60  ;;  %v4887_v53 = vpop.permute.xlu0 %4886 }
 0x9f8   : > { %v4790_v22 = vadd.f32 %v4788_v56, %v10215_v44 }
 0x9fa   : > { %v4792_v52 = vcombine.high %v4790_v22, %v4790_v22  ;;  %v4794_v20 = vsel %vm2202_vm2, %v4790_v22, 0.0  ;;  %v4810_v58 = vmul.f32 %v4790_v22, %v4790_v22 }
 0x9fb   : > { %v4795_v26 = vrot.slane %v4794_v20, 4 }
 0x9fc   : > { %v4801_v10 = vsel %vm2202_vm2, %v4792_v52, 0.0  ;;  %v4812_v12 = vcombine.high %v4810_v58, %v4810_v58  ;;  %v4814_v50 = vsel %vm2202_vm2, %v4810_v58, 0.0  ;;  %v9172_v58 = vpop.permute.xlu1 %5295 }
 0x9fd   : > { %v4796_v36 = vadd.f32 %v4795_v26, %v4794_v20  ;;  %v4802_v45 = vrot.slane %v4801_v10, 4  ;;  %v4815_v61 = vrot.slane %v4814_v50, 4 }
 0x9fe   : > { %v4821_v29 = vsel %vm2202_vm2, %v4812_v12, 0.0 }
 0x9ff   : > { %v4797_v18 = vrot.slane %v4796_v36, 2  ;;  %v4803_v5 = vadd.f32 %v4802_v45, %v4801_v10  ;;  %v4816_v19 = vadd.f32 %v4815_v61, %v4814_v50  ;;  %v4822_v33 = vrot.slane %v4821_v29, 4  ;;  %v4892_v10 = vpop.permute.xlu0 %4891 }
 0xa00   : > { %v9174_v12 = vpop.permute.xlu1 %5405 }
 0xa01   : > { %v4798_v57 = vadd.f32 %v4797_v18, %v4796_v36  ;;  %v4804_v28 = vrot.slane %v4803_v5, 2  ;;  %v4817_v48 = vrot.slane %v4816_v19, 2  ;;  %v4823_v6 = vadd.f32 %v4822_v33, %v4821_v29 }
 0xa03   : > { %v4799_v55 = vrot.slane %v4798_v57, 1  ;;  %v4805_v4 = vadd.f32 %v4804_v28, %v4803_v5  ;;  %v4818_v38 = vadd.f32 %v4817_v48, %v4816_v19  ;;  %v4824_v1 = vrot.slane %v4823_v6, 2  ;;  %v4897_v50 = vpop.permute.xlu0 %4896  ;;  %v10220_v28 = vld [vmem:[#allocation46_spill] sm:$0xff] }
 0xa04   : > { %v9176_v36 = vpop.permute.xlu1 %5515  ;;  %v4858_v48 = vrot.slane %v9119_v40, %v10220_v28  ;;  %v10224_v40 = vld [vmem:[#allocation4_spill] sm:$0xff] }
 0xa05   : > { %v4800_v63 = vadd.f32 %v4799_v55, %v4798_v57  ;;  %v4806_v49 = vrot.slane %v4805_v4, 1  ;;  %v4819_v16 = vrot.slane %v4818_v38, 1  ;;  %v4825_v35 = vadd.f32 %v4824_v1, %v4823_v6  ;;  %10217 = vst [vmem:[#allocation23_spill] sm:$0xff] %v9176_v36 }
 0xa06   : > { %v4871_v55 = vrot.slane %v9121_v51, %v10220_v28 }
 0xa07   : > { %v4807_v7 = vadd.f32 %v4806_v49, %v4805_v4  ;;  %v4808_v34 = vmul.f32 0.25, %v4800_v63  ;;  %v4820_v15 = vadd.f32 %v4819_v16, %v4818_v38  ;;  %v4826_v17 = vrot.slane %v4825_v35, 1  ;;  %v9178_v61 = vpop.permute.xlu0 %5123  ;;  %v10222_v49 = vld [vmem:[#allocation9_spill] sm:$0xff]  ;;  %v10223_v16 = vld [vmem:[#allocation10_spill] sm:$0xff] }
 0xa08   : > { %v9182_v57 = vpop.permute.xlu1 %5185 }
 0xa09   : > { %v4809_v43 = vmul.f32 0.25, %v4807_v7  ;;  %v4827_v31 = vadd.f32 %v4826_v17, %v4825_v35  ;;  %v4828_v47 = vmul.f32 0.25, %v4820_v15  ;;  %v4830_v13 = vmul.f32 %v4808_v34, %v4808_v34  ;;  %10219 = vst [vmem:[#allocation21_spill] sm:$0xff] %v9182_v57  ;;  %v10225_v15 = vld [vmem:[#allocation6_spill] sm:$0xff] }
 0xa0b   : > { %v4829_v60 = vmul.f32 0.25, %v4827_v31  ;;  %v4831_v56 = vmul.f32 %v4809_v43, %v4809_v43  ;;  %v4832_v44 = vsub.f32 %v4828_v47, %v4830_v13  ;;  %v4836_v45 = vcombine.low %v4808_v34, %v4809_v43  ;;  %v9180_v33 = vpop.permute.xlu0 %5263  ;;  %v10226_v31 = vld [vmem:[#allocation8_spill] sm:$0xff] }
 0xa0c   : > { %10218 = vst [vmem:[#allocation20_spill] sm:$0xff] %v9180_v33  ;;  %v9190_v63 = vpop.permute.xlu1 %5421 }
 0xa0d   : > { %v4833_v52 = vsub.f32 %v4829_v60, %v4831_v56  ;;  %v4839_v20 = vadd.f32 1e-05, %v4832_v44  ;;  %v4838_v5 = vsub.f32 %v4790_v22, %v4836_v45 }
 0xa0f   : > { %v4840_v26 = vadd.f32 1e-05, %v4833_v52  ;;  %6369 = vrsqrt.f32 %v4839_v20  ;;  %v4983_v1 = vpop.permute.xlu0 %4982 }
 0xa11   : > { %6371 = vrsqrt.f32 %v4840_v26 }
 0xa1c   : > { %v6370_v29 = vpop.eup %6369 }
 0xa1e   : > { %v6372_v18 = vpop.eup %6371 }
 0xa1f   : > { %v4845_v19 = vcombine.low %v6370_v29, %v6372_v18 }
 0xa21   : > { %v4847_v6 = vmul.f32 %v4845_v19, %v4838_v5 }
 0xa23   : > { %v4860_v4 = vmul.f32 %v4858_v48, %v4847_v6 }
 0xa25   : > { %v9188_v38 = vadd.f32 %v4871_v55, %v4860_v4 }
 0xa27   : > { %10221 = vst [vmem:[#allocation19_spill] sm:$0xff] %v9188_v38  ;;  %v5050_v22 = vrot.slane %v9188_v38, %v10222_v49  ;;  %v5054_v35 = vrot.slane %v9188_v38, %v10223_v16  ;;  %v4908_v7 = vrot.slane %v9188_v38, %v10210_v54  ;;  %v4912_v34 = vrot.slane %v9188_v38, %v10224_v40 }
 0xa28   : > { %v4950_v51 = vrot.slane %v9188_v38, %v10211_v37  ;;  %v4954_v17 = vrot.slane %v9188_v38, %v10225_v15  ;;  %v5000_v43 = vrot.slane %v9188_v38, %v10208_v39  ;;  %v5004_v47 = vrot.slane %v9188_v38, %v10226_v31 }
 0xa29   : > { %v5060_v13 = vrot.slane %v5050_v22, %v10222_v49  ;;  %v5064_v60 = vrot.slane %v5054_v35, %v10222_v49  ;;  %v4918_v56 = vrot.slane %v4908_v7, %v10210_v54  ;;  %v4922_v44 = vrot.slane %v4912_v34, %v10210_v54  ;;  %v4991_v22 = vpop.permute.xlu0 %4990  ;;  %v9228_v35 = vpop.permute.xlu1 %5531 }
 0xa2a   : > { %v4960_v52 = vrot.slane %v4950_v51, %v10211_v37  ;;  %v4964_v20 = vrot.slane %v4954_v17, %v10211_v37  ;;  %v9215_v26 = vrot.slane %v5000_v43, %v10208_v39  ;;  %v9218_v45 = vrot.slane %v5004_v47, %v10208_v39 }
 0xa2b   : > { %v9221_v29 = vmul.f32 %v5060_v13, %v9143_v59  ;;  %v9224_v18 = vmul.f32 %v5064_v60, %v9143_v59  ;;  %v4923_v5 = vmul.f32 %v4918_v56, %v4887_v53  ;;  %v4924_v19 = vmul.f32 %v4922_v44, %v4887_v53 }
 0xa2c   : > { %v4965_v48 = vmul.f32 %v4960_v52, %v9123_v3  ;;  %v4966_v6 = vmul.f32 %v4964_v20, %v9123_v3  ;;  %v4925_v55 = vmul.f32 %v4918_v56, %v4892_v10  ;;  %v4926_v4 = vmul.f32 %v4922_v44, %v4892_v10 }
 0xa2d   : > { %v4967_v7 = vmul.f32 %v4960_v52, %v9125_v27  ;;  %v4968_v34 = vmul.f32 %v4964_v20, %v9125_v27  ;;  %v5017_v51 = vmul.f32 %v9215_v26, %v9127_v2  ;;  %v5018_v59 = vmul.f32 %v9218_v45, %v9127_v2 }
 0xa2e   : > { %v4973_v53 = vadd.f32 %v4965_v48, %v4923_v5  ;;  %v4974_v17 = vadd.f32 %v4966_v6, %v4924_v19  ;;  %v5067_v43 = vmul.f32 %v5060_v13, %v9133_v42  ;;  %v5068_v3 = vmul.f32 %v5064_v60, %v9133_v42 }
 0xa2f   : > { %v4975_v10 = vadd.f32 %v4967_v7, %v4925_v55  ;;  %v4976_v47 = vadd.f32 %v4968_v34, %v4926_v4  ;;  %v4927_v28 = vmul.f32 %v4918_v56, %v4897_v50  ;;  %v4928_v38 = vmul.f32 %v4922_v44, %v4897_v50  ;;  %v4995_v4 = vpop.permute.xlu0 %4994  ;;  %v5328_v50 = vpop.permute.xlu1 %5327 }
 0xa30   : > { %v4969_v57 = vmul.f32 %v4960_v52, %v9131_v62  ;;  %v4970_v27 = vmul.f32 %v4964_v20, %v9131_v62  ;;  %v5015_v25 = vmul.f32 %v9215_v26, %v4983_v1  ;;  %v5016_v33 = vmul.f32 %v9218_v45, %v4983_v1 }
 0xa31   : > { %v5025_v0 = vadd.f32 %v5017_v51, %v4975_v10  ;;  %v5026_v2 = vadd.f32 %v5018_v59, %v4976_v47  ;;  %v5065_v5 = vmul.f32 %v5060_v13, %v9129_v32  ;;  %v5066_v19 = vmul.f32 %v5064_v60, %v9129_v32 }
 0xa32   : > { %v4977_v48 = vadd.f32 %v4969_v57, %v4927_v28  ;;  %v4978_v42 = vadd.f32 %v4970_v27, %v4928_v38  ;;  %v5023_v6 = vadd.f32 %v5015_v25, %v4973_v53  ;;  %v5024_v55 = vadd.f32 %v5016_v33, %v4974_v17 }
 0xa33   : > { %v5075_v7 = vadd.f32 %v5067_v43, %v5025_v0  ;;  %v5076_v34 = vadd.f32 %v5068_v3, %v5026_v2  ;;  %v5019_v62 = vmul.f32 %v9215_v26, %v4991_v22  ;;  %v5020_v37 = vmul.f32 %v9218_v45, %v4991_v22 }
 0xa34   : > { %v5073_v36 = vadd.f32 %v5065_v5, %v5023_v6  ;;  %v5074_v1 = vadd.f32 %v5066_v19, %v5024_v55  ;;  %v5069_v51 = vmul.f32 %v5060_v13, %v9139_v14  ;;  %v5070_v59 = vmul.f32 %v5064_v60, %v9139_v14 }
 0xa35   : > { %v5103_v32 = vadd.f32 %v9141_v8, %v5075_v7  ;;  %v5104_v57 = vadd.f32 %v9141_v8, %v5076_v34  ;;  %v5027_v25 = vadd.f32 %v5019_v62, %v4977_v48  ;;  %v5028_v33 = vadd.f32 %v5020_v37, %v4978_v42 }
 0xa36   : > { %v5101_v28 = vadd.f32 %v9135_v9, %v5073_v36  ;;  %v5102_v0 = vadd.f32 %v9135_v9, %v5074_v1  ;;  %v4929_v38 = vmul.f32 %v4918_v56, %v9137_v24  ;;  %v4930_v22 = vmul.f32 %v4922_v44, %v9137_v24  ;;  %v5376_v36 = vpop.permute.xlu0 %5375  ;;  %v5438_v9 = vpop.permute.xlu1 %5437 }
 0xa37   : > { %v9254_v53 = vmax.f32 %v5103_v32, 0.0  ;;  %v9256_v17 = vmax.f32 %v5104_v57, 0.0  ;;  %v5077_v13 = vadd.f32 %v5069_v51, %v5027_v25  ;;  %v5078_v14 = vadd.f32 %v5070_v59, %v5028_v33 }
 0xa38   : > { %v9258_v60 = vmax.f32 %v5101_v28, 0.0  ;;  %v9260_v43 = vmax.f32 %v5102_v0, 0.0  ;;  %v4971_v37 = vmul.f32 %v4960_v52, %v9151_v41  ;;  %v4972_v8 = vmul.f32 %v4964_v20, %v9151_v41 }
 0xa39   : > { %v5301_v56 = vrot.slane %v9254_v53, %v10225_v15  ;;  %v5305_v24 = vrot.slane %v9256_v17, %v10225_v15  ;;  %v5411_v44 = vrot.slane %v9254_v53, %v10208_v39  ;;  %v5415_v3 = vrot.slane %v9256_v17, %v10208_v39 }
 0xa3a   : > { %v5427_v10 = vrot.slane %v9254_v53, %v10226_v31  ;;  %v5431_v41 = vrot.slane %v9256_v17, %v10226_v31  ;;  %v5105_v52 = vadd.f32 %v9145_v30, %v5077_v13  ;;  %v5106_v20 = vadd.f32 %v9145_v30, %v5078_v14  ;;  %v5170_v55 = vpop.permute.xlu0 %5169  ;;  %v5218_v51 = vpop.permute.xlu1 %5217 }
 0xa3b   : > { %v9279_v47 = vmul.f32 %v5301_v56, %v9172_v58  ;;  %v9282_v27 = vmul.f32 %v5305_v24, %v9172_v58  ;;  %v5416_v2 = vmul.f32 %v5411_v44, %v9174_v12  ;;  %v5417_v5 = vmul.f32 %v5415_v3, %v9174_v12 }
 0xa3c   : > { %v5432_v19 = vmul.f32 %v5427_v10, %v9190_v63  ;;  %v5433_v48 = vmul.f32 %v5431_v41, %v9190_v63  ;;  %v9288_v42 = vmax.f32 %v5105_v52, 0.0  ;;  %v9290_v6 = vmax.f32 %v5106_v20, 0.0 }
 0xa3d   : > { %v5537_v30 = vrot.slane %v9254_v53, %v10222_v49  ;;  %v5541_v58 = vrot.slane %v9256_v17, %v10222_v49  ;;  %v4979_v7 = vadd.f32 %v4971_v37, %v4929_v38  ;;  %v4980_v34 = vadd.f32 %v4972_v8, %v4930_v22 }
 0xa3e   : > { %v5021_v62 = vmul.f32 %v9215_v26, %v4995_v4  ;;  %v5022_v12 = vmul.f32 %v9218_v45, %v4995_v4  ;;  %v5333_v63 = vrot.slane %v9288_v42, %v10225_v15  ;;  %v5337_v1 = vrot.slane %v9290_v6, %v10225_v15  ;;  %v5344_v10 = vpop.permute.xlu1 %5343 }
 0xa3f   : > { %v9303_v59 = vmul.f32 %v5537_v30, %v9228_v35  ;;  %v9306_v32 = vmul.f32 %v5541_v58, %v9228_v35  ;;  %v5381_v57 = vrot.slane %v9258_v60, %v10208_v39  ;;  %v5385_v26 = vrot.slane %v9260_v43, %v10208_v39 }
 0xa40   : > { %v5029_v45 = vadd.f32 %v5021_v62, %v4979_v7  ;;  %v5030_v4 = vadd.f32 %v5022_v12, %v4980_v34  ;;  %v9312_v25 = vmul.f32 %v5333_v63, %v5328_v50  ;;  %v9314_v33 = vmul.f32 %v5337_v1, %v5328_v50  ;;  %v5502_v50 = vpop.permute.xlu0 %5501 }
 0xa41   : > { %v5386_v28 = vmul.f32 %v5381_v57, %v5376_v36  ;;  %v5387_v0 = vmul.f32 %v5385_v26, %v5376_v36  ;;  %v5395_v38 = vrot.slane %v9258_v60, %v10226_v31  ;;  %v5399_v35 = vrot.slane %v9260_v43, %v10226_v31 }
 0xa42   : > { %v5079_v22 = vadd.f32 %v9221_v29, %v5029_v45  ;;  %v5080_v13 = vadd.f32 %v9224_v18, %v5030_v4  ;;  %v5443_v14 = vrot.slane %v9288_v42, %v10208_v39  ;;  %v5447_v37 = vrot.slane %v9290_v6, %v10208_v39 }
 0xa43   : > { %v5400_v8 = vmul.f32 %v5395_v38, %v9168_v21  ;;  %v5401_v36 = vmul.f32 %v5399_v35, %v9168_v21  ;;  %v5129_v56 = vrot.slane %v9258_v60, %v10210_v54  ;;  %v5133_v24 = vrot.slane %v9260_v43, %v10210_v54 }
 0xa44   : > { %v5107_v29 = vadd.f32 %v9170_v23, %v5079_v22  ;;  %v5108_v18 = vadd.f32 %v9170_v23, %v5080_v13  ;;  %v5448_v44 = vmul.f32 %v5443_v14, %v5438_v9  ;;  %v5449_v3 = vmul.f32 %v5447_v37, %v5438_v9  ;;  %v5312_v26 = vpop.permute.xlu0 %5311  ;;  %v5564_v22 = vpop.permute.xlu1 %5563 }
 0xa45   : > { %v5402_v41 = vadd.f32 %v5400_v8, %v5386_v28  ;;  %v5403_v52 = vadd.f32 %v5401_v36, %v5387_v0  ;;  %v5134_v20 = vmul.f32 %v5129_v56, %v9178_v61  ;;  %v5135_v30 = vmul.f32 %v5133_v24, %v9178_v61 }
 0xa46   : > { %v9336_v21 = vmax.f32 %v5107_v29, 0.0  ;;  %v9338_v58 = vmax.f32 %v5108_v18, 0.0  ;;  %v5143_v7 = vrot.slane %v9258_v60, %v10224_v40  ;;  %v5147_v34 = vrot.slane %v9260_v43, %v10224_v40 }
 0xa47   : > { %v5418_v23 = vadd.f32 %v5416_v2, %v5402_v41  ;;  %v5419_v62 = vadd.f32 %v5417_v5, %v5403_v52  ;;  %v5159_v9 = vrot.slane %v9254_v53, %v10210_v54  ;;  %v5163_v12 = vrot.slane %v9256_v17, %v10210_v54  ;;  %v10227_v52 = vld [vmem:[#allocation23_spill] sm:$0xff] }
 0xa48   : > { %v5148_v61 = vmul.f32 %v5143_v7, %v9149_v46  ;;  %v5149_v63 = vmul.f32 %v5147_v34, %v9149_v46  ;;  %v5175_v1 = vrot.slane %v9254_v53, %v10224_v40  ;;  %v5179_v57 = vrot.slane %v9256_v17, %v10224_v40  ;;  %v5202_v41 = vpop.permute.xlu0 %5201  ;;  %v10228_v7 = vld [vmem:[#allocation5_spill] sm:$0xff] }
 0xa49   : > { %v5434_v45 = vadd.f32 %v5432_v19, %v5418_v23  ;;  %v5435_v2 = vadd.f32 %v5433_v48, %v5419_v62  ;;  %v5164_v5 = vmul.f32 %v5159_v9, %v9159_v11  ;;  %v5165_v4 = vmul.f32 %v5163_v12, %v9159_v11  ;;  %v5234_v12 = vpop.permute.xlu1 %5233 }
 0xa4a   : > { %v5150_v28 = vadd.f32 %v5148_v61, %v5134_v20  ;;  %v5151_v0 = vadd.f32 %v5149_v63, %v5135_v30  ;;  %v5180_v38 = vmul.f32 %v5175_v1, %v5170_v55  ;;  %v5181_v35 = vmul.f32 %v5179_v57, %v5170_v55 }
 0xa4b   : > { %v9356_v13 = vadd.f32 %v5448_v44, %v5434_v45  ;;  %v9358_v46 = vadd.f32 %v5449_v3, %v5435_v2  ;;  %v5223_v14 = vrot.slane %v9336_v21, %v10210_v54  ;;  %v5227_v19 = vrot.slane %v9338_v58, %v10210_v54  ;;  %v10229_v45 = vld [vmem:[#allocation22_spill] sm:$0xff] }
 0xa4c   : > { %v5166_v48 = vadd.f32 %v5164_v5, %v5150_v28  ;;  %v5167_v37 = vadd.f32 %v5165_v4, %v5151_v0  ;;  %v5507_v11 = vrot.slane %v9258_v60, %v10222_v49  ;;  %v5511_v8 = vrot.slane %v9260_v43, %v10222_v49  ;;  %v10230_v4 = vld [vmem:[#allocation20_spill] sm:$0xff] }
 0xa4d   : > { %v9368_v55 = vmul.f32 %v5223_v14, %v5218_v51  ;;  %v9370_v36 = vmul.f32 %v5227_v19, %v5218_v51  ;;  %v5521_v56 = vrot.slane %v9258_v60, %v10223_v16  ;;  %v5525_v24 = vrot.slane %v9260_v43, %v10223_v16 }
 0xa4e   : > { %v5182_v29 = vadd.f32 %v5180_v38, %v5166_v48  ;;  %v5183_v18 = vadd.f32 %v5181_v35, %v5167_v37  ;;  %v5512_v44 = vmul.f32 %v5507_v11, %v5502_v50  ;;  %v5513_v3 = vmul.f32 %v5511_v8, %v5502_v50  ;;  %v5548_v37 = vpop.permute.xlu0 %5547  ;;  %v10231_v11 = vld [vmem:[#allocation24_spill] sm:$0xff] }
 0xa4f   : > { %v5526_v20 = vmul.f32 %v5521_v56, %v10227_v52  ;;  %v5527_v30 = vmul.f32 %v5525_v24, %v10227_v52  ;;  %v5349_v34 = vrot.slane %v9336_v21, %v10228_v7  ;;  %v5353_v51 = vrot.slane %v9338_v58, %v10228_v7 }
 0xa50   : > { %v5255_v23 = vrot.slane %v9258_v60, %v10228_v7  ;;  %v5259_v62 = vrot.slane %v9260_v43, %v10228_v7  ;;  %v5269_v50 = vrot.slane %v9258_v60, %v10225_v15  ;;  %v5273_v9 = vrot.slane %v9260_v43, %v10225_v15 }
 0xa51   : > { %v5528_v61 = vadd.f32 %v5526_v20, %v5512_v44  ;;  %v5529_v63 = vadd.f32 %v5527_v30, %v5513_v3  ;;  %v9390_v1 = vmul.f32 %v5349_v34, %v5344_v10  ;;  %v9392_v57 = vmul.f32 %v5353_v51, %v5344_v10 }
 0xa52   : > { %v5260_v2 = vmul.f32 %v5255_v23, %v10229_v45  ;;  %v5261_v5 = vmul.f32 %v5259_v62, %v10229_v45  ;;  %v5274_v28 = vmul.f32 %v5269_v50, %v10230_v4  ;;  %v5275_v0 = vmul.f32 %v5273_v9, %v10230_v4  ;;  %v10232_v50 = vld [vmem:[#allocation21_spill] sm:$0xff] }
 0xa53   : > { %v5285_v60 = vrot.slane %v9254_v53, %v10228_v7  ;;  %v5289_v43 = vrot.slane %v9256_v17, %v10228_v7  ;;  %v5317_v38 = vrot.slane %v9288_v42, %v10228_v7  ;;  %v5321_v10 = vrot.slane %v9290_v6, %v10228_v7  ;;  %v5470_v7 = vpop.permute.xlu1 %5469 }
 0xa54   : > { %v5276_v35 = vadd.f32 %v5274_v28, %v5260_v2  ;;  %v5277_v14 = vadd.f32 %v5275_v0, %v5261_v5  ;;  %v5569_v19 = vrot.slane %v9288_v42, %v10222_v49  ;;  %v5573_v48 = vrot.slane %v9290_v6, %v10222_v49 }
 0xa55   : > { %v5290_v8 = vmul.f32 %v5285_v60, %v10231_v11  ;;  %v5291_v56 = vmul.f32 %v5289_v43, %v10231_v11  ;;  %v5322_v24 = vmul.f32 %v5317_v38, %v5312_v26  ;;  %v5323_v44 = vmul.f32 %v5321_v10, %v5312_v26  ;;  %v5454_v38 = vpop.permute.xlu0 %5453 }
 0xa56   : > { %v5574_v3 = vmul.f32 %v5569_v19, %v5564_v22  ;;  %v5575_v52 = vmul.f32 %v5573_v48, %v5564_v22  ;;  %v5191_v20 = vrot.slane %v9288_v42, %v10210_v54  ;;  %v5195_v30 = vrot.slane %v9290_v6, %v10210_v54 }
 0xa57   : > { %v5292_v34 = vadd.f32 %v5290_v8, %v5276_v35  ;;  %v5293_v51 = vadd.f32 %v5291_v56, %v5277_v14  ;;  %v5207_v23 = vrot.slane %v9288_v42, %v10224_v40  ;;  %v5211_v62 = vrot.slane %v9290_v6, %v10224_v40 }
 0xa58   : > { %v5196_v9 = vmul.f32 %v5191_v20, %v10232_v50  ;;  %v5197_v26 = vmul.f32 %v5195_v30, %v10232_v50  ;;  %v5239_v22 = vrot.slane %v9336_v21, %v10224_v40  ;;  %v5243_v45 = vrot.slane %v9338_v58, %v10224_v40 }
 0xa59   : > { %v5308_v54 = vadd.f32 %v9279_v47, %v5292_v34  ;;  %v5309_v2 = vadd.f32 %v9282_v27, %v5293_v51  ;;  %v5212_v5 = vmul.f32 %v5207_v23, %v5202_v41  ;;  %v5213_v4 = vmul.f32 %v5211_v62, %v5202_v41  ;;  %v5580_v27 = vpop.permute.xlu1 %5579  ;;  %v5360_v20 = vpop.permute.xlu0 %5359 }
 0xa5a   : > { %v5198_v28 = vadd.f32 %v5196_v9, %v5182_v29  ;;  %v5199_v0 = vadd.f32 %v5197_v26, %v5183_v18  ;;  %v5244_v60 = vmul.f32 %v5239_v22, %v5234_v12  ;;  %v5245_v43 = vmul.f32 %v5243_v45, %v5234_v12 }
 0xa5b   : > { %v5324_v10 = vadd.f32 %v5322_v24, %v5308_v54  ;;  %v5325_v35 = vadd.f32 %v5323_v44, %v5309_v2  ;;  %v5544_v14 = vadd.f32 %v9303_v59, %v5528_v61  ;;  %v5545_v19 = vadd.f32 %v9306_v32, %v5529_v63 }
 0xa5c   : > { %v5214_v48 = vadd.f32 %v5212_v5, %v5198_v28  ;;  %v5215_v11 = vadd.f32 %v5213_v4, %v5199_v0  ;;  %v5553_v40 = vrot.slane %v9254_v53, %v10223_v16  ;;  %v5557_v47 = vrot.slane %v9256_v17, %v10223_v16 }
 0xa5d   : > { %v5340_v29 = vadd.f32 %v9312_v25, %v5324_v10  ;;  %v5341_v18 = vadd.f32 %v9314_v33, %v5325_v35  ;;  %v5475_v41 = vrot.slane %v9336_v21, %v10208_v39  ;;  %v5479_v59 = vrot.slane %v9338_v58, %v10208_v39  ;;  %v5596_v23 = vpop.permute.xlu1 %5595  ;;  %v5486_v5 = vpop.permute.xlu0 %5485 }
 0xa5e   : > { %v5230_v32 = vadd.f32 %v9368_v55, %v5214_v48  ;;  %v5231_v12 = vadd.f32 %v9370_v36, %v5215_v11  ;;  %v5558_v61 = vmul.f32 %v5553_v40, %v5548_v37  ;;  %v5559_v53 = vmul.f32 %v5557_v47, %v5548_v37 }
 0xa5f   : > { %v5480_v63 = vmul.f32 %v5475_v41, %v5470_v7  ;;  %v5481_v8 = vmul.f32 %v5479_v59, %v5470_v7  ;;  %v5459_v17 = vrot.slane %v9288_v42, %v10226_v31  ;;  %v5463_v25 = vrot.slane %v9290_v6, %v10226_v31 }
 0xa60   : > { %v5246_v33 = vadd.f32 %v5244_v60, %v5230_v32  ;;  %v5247_v56 = vadd.f32 %v5245_v43, %v5231_v12  ;;  %v5560_v24 = vadd.f32 %v5558_v61, %v5544_v14  ;;  %v5561_v44 = vadd.f32 %v5559_v53, %v5545_v19  ;;  %v10233_v61 = vld [vmem:[#allocation19_spill] sm:$0xff] }
 0xa61   : > { %v5464_v39 = vmul.f32 %v5459_v17, %v5454_v38  ;;  %v5465_v30 = vmul.f32 %v5463_v25, %v5454_v38  ;;  %v5585_v55 = vrot.slane %v9288_v42, %v10223_v16  ;;  %v5589_v36 = vrot.slane %v9290_v6, %v10223_v16  ;;  %v5612_v43 = vpop.permute.xlu1 %5611  ;;  %v5635_v41 = vpop.permute.xlu0 %5634 }
 0xa62   : > { %v5576_v37 = vadd.f32 %v5574_v3, %v5560_v24  ;;  %v5577_v7 = vadd.f32 %v5575_v52, %v5561_v44  ;;  %v5356_v34 = vadd.f32 %v9390_v1, %v5340_v29  ;;  %v5357_v51 = vadd.f32 %v9392_v57, %v5341_v18 }
 0xa63   : > { %v5466_v62 = vadd.f32 %v5464_v39, %v9356_v13  ;;  %v5467_v50 = vadd.f32 %v5465_v30, %v9358_v46  ;;  %v5590_v9 = vmul.f32 %v5585_v55, %v5580_v27  ;;  %v5591_v26 = vmul.f32 %v5589_v36, %v5580_v27 }
 0xa64   : > { %v5365_v22 = vrot.slane %v9336_v21, %v10225_v15  ;;  %v5369_v42 = vrot.slane %v9338_v58, %v10225_v15  ;;  %v5601_v6 = vrot.slane %v9336_v21, %v10222_v49  ;;  %v5605_v1 = vrot.slane %v9338_v58, %v10222_v49 }
 0xa65   : > { %v5592_v57 = vadd.f32 %v5590_v9, %v5576_v37  ;;  %v5593_v3 = vadd.f32 %v5591_v26, %v5577_v7  ;;  %v5482_v52 = vadd.f32 %v5480_v63, %v5466_v62  ;;  %v5483_v13 = vadd.f32 %v5481_v8, %v5467_v50 }
 0xa66   : > { %v5370_v45 = vmul.f32 %v5365_v22, %v5360_v20  ;;  %v5371_v46 = vmul.f32 %v5369_v42, %v5360_v20  ;;  %v5606_v54 = vmul.f32 %v5601_v6, %v5596_v23  ;;  %v5607_v2 = vmul.f32 %v5605_v1, %v5596_v23 }
 0xa67   : > { %v5491_v4 = vrot.slane %v9336_v21, %v10226_v31  ;;  %v5495_v15 = vrot.slane %v9338_v58, %v10226_v31  ;;  %v5617_v28 = vrot.slane %v9336_v21, %v10223_v16  ;;  %v5621_v49 = vrot.slane %v9338_v58, %v10223_v16 }
 0xa68   : > { %v5372_v0 = vadd.f32 %v5370_v45, %v5356_v34  ;;  %v5373_v60 = vadd.f32 %v5371_v46, %v5357_v51  ;;  %v5608_v38 = vadd.f32 %v5606_v54, %v5592_v57  ;;  %v5609_v10 = vadd.f32 %v5607_v2, %v5593_v3 }
 0xa69   : > { %v5496_v35 = vmul.f32 %v5491_v4, %v5486_v5  ;;  %v5497_v14 = vmul.f32 %v5495_v15, %v5486_v5  ;;  %v5622_v47 = vmul.f32 %v5617_v28, %v5612_v43  ;;  %v5623_v27 = vmul.f32 %v5621_v49, %v5612_v43  ;;  %v5708_v43 = vpop.permute.xlu1 %5707 }
 0xa6a   : > { %v5626_v19 = vadd.f32 %v5372_v0, %v5246_v33  ;;  %v5627_v48 = vadd.f32 %v5373_v60, %v5247_v56 }
 0xa6b   : > { %v5498_v11 = vadd.f32 %v5496_v35, %v5482_v52  ;;  %v5499_v40 = vadd.f32 %v5497_v14, %v5483_v13  ;;  %v5624_v31 = vadd.f32 %v5622_v47, %v5608_v38  ;;  %v5625_v29 = vadd.f32 %v5623_v27, %v5609_v10 }
 0xa6d   : > { %v5628_v18 = vadd.f32 %v5626_v19, %v5498_v11  ;;  %v5629_v21 = vadd.f32 %v5627_v48, %v5499_v40  ;;  %v5721_v48 = vpop.permute.xlu1 %5720  ;;  %v10234_v40 = vld [vmem:[#allocation46_spill] sm:$0xff] }
 0xa6e   : > { %v5715_v47 = vrot.slane %v5708_v43, %v10234_v40 }
 0xa6f   : > { %v5630_v59 = vadd.f32 %v5628_v18, %v5624_v31  ;;  %v5631_v16 = vadd.f32 %v5629_v21, %v5625_v29  ;;  %v5728_v31 = vrot.slane %v5721_v48, %v10234_v40 }
 0xa71   : > { %v5637_v58 = vadd.f32 %v5635_v41, %v5630_v59  ;;  %v5638_v32 = vadd.f32 %v5635_v41, %v5631_v16 }
 0xa73   : > { %v5645_v12 = vcombine.low %v5637_v58, %v5638_v32 }
 0xa75   : > { %v5647_v53 = vadd.f32 %v5645_v12, %v10233_v61 }
 0xa77   : > { %v5649_v63 = vcombine.high %v5647_v53, %v5647_v53  ;;  %v5651_v8 = vsel %vm2202_vm2, %v5647_v53, 0.0  ;;  %v5667_v17 = vmul.f32 %v5647_v53, %v5647_v53 }
 0xa78   : > { %v5652_v25 = vrot.slane %v5651_v8, 4 }
 0xa79   : > { %v5658_v33 = vsel %vm2202_vm2, %v5649_v63, 0.0  ;;  %v5669_v56 = vcombine.high %v5667_v17, %v5667_v17  ;;  %v5671_v24 = vsel %vm2202_vm2, %v5667_v17, 0.0 }
 0xa7a   : > { %v5653_v44 = vadd.f32 %v5652_v25, %v5651_v8  ;;  %v5659_v20 = vrot.slane %v5658_v33, 4  ;;  %v5672_v39 = vrot.slane %v5671_v24, 4 }
 0xa7b   : > { %v5678_v30 = vsel %vm2202_vm2, %v5669_v56, 0.0 }
 0xa7c   : > { %v5673_v55 = vadd.f32 %v5672_v39, %v5671_v24  ;;  %v5679_v36 = vrot.slane %v5678_v30, 4  ;;  %v5654_v37 = vrot.slane %v5653_v44, 2  ;;  %v5660_v7 = vadd.f32 %v5659_v20, %v5658_v33 }
 0xa7e   : > { %v5674_v34 = vrot.slane %v5673_v55, 2  ;;  %v5680_v51 = vadd.f32 %v5679_v36, %v5678_v30  ;;  %v5655_v23 = vadd.f32 %v5654_v37, %v5653_v44  ;;  %v5661_v62 = vrot.slane %v5660_v7, 2 }
 0xa80   : > { %v5675_v50 = vadd.f32 %v5674_v34, %v5673_v55  ;;  %v5681_v9 = vrot.slane %v5680_v51, 2  ;;  %v5656_v26 = vrot.slane %v5655_v23, 1  ;;  %v5662_v22 = vadd.f32 %v5661_v62, %v5660_v7 }
 0xa82   : > { %v5657_v42 = vadd.f32 %v5656_v26, %v5655_v23  ;;  %v5663_v6 = vrot.slane %v5662_v22, 1  ;;  %v5676_v1 = vrot.slane %v5675_v50, 1  ;;  %v5682_v57 = vadd.f32 %v5681_v9, %v5680_v51 }
 0xa84   : > { %v5664_v3 = vadd.f32 %v5663_v6, %v5662_v22  ;;  %v5665_v52 = vmul.f32 0.25, %v5657_v42  ;;  %v5677_v13 = vadd.f32 %v5676_v1, %v5675_v50  ;;  %v5683_v45 = vrot.slane %v5682_v57, 1 }
 0xa86   : > { %v5666_v46 = vmul.f32 0.25, %v5664_v3  ;;  %v5684_v54 = vadd.f32 %v5683_v45, %v5682_v57  ;;  %v5685_v2 = vmul.f32 0.25, %v5677_v13  ;;  %v5687_v5 = vmul.f32 %v5665_v52, %v5665_v52 }
 0xa88   : > { %v5686_v4 = vmul.f32 0.25, %v5684_v54  ;;  %v5688_v15 = vmul.f32 %v5666_v46, %v5666_v46  ;;  %v5689_v28 = vsub.f32 %v5685_v2, %v5687_v5  ;;  %v5693_v38 = vcombine.low %v5665_v52, %v5666_v46 }
 0xa8a   : > { %v5690_v49 = vsub.f32 %v5686_v4, %v5688_v15  ;;  %v5696_v0 = vadd.f32 1e-05, %v5689_v28  ;;  %v5695_v14 = vsub.f32 %v5647_v53, %v5693_v38 }
 0xa8c   : > { %v5697_v60 = vadd.f32 1e-05, %v5690_v49  ;;  %6373 = vrsqrt.f32 %v5696_v0 }
 0xa8e   : > { %6375 = vrsqrt.f32 %v5697_v60 }
 0xa99   : > { %v6374_v10 = vpop.eup %6373 }
 0xa9b   : > { %v6376_v35 = vpop.eup %6375 }
 0xa9c   : > { %v5702_v19 = vcombine.low %v6374_v10, %v6376_v35 }
 0xa9e   : > { %v5704_v11 = vmul.f32 %v5702_v19, %v5695_v14 }
 0xaa0   : > { %v5717_v27 = vmul.f32 %v5715_v47, %v5704_v11 }
 0xaa2   : > { %v5730_v29 = vadd.f32 %v5728_v31, %v5717_v27 }
 0xaa4   : > { %5731 = vst [vmem:[%s548_s19] sm:$0xff] %v5730_v29 }
 0xaa5 PF: > { %s27_s24 = sadd.s32 1, %s6384_s24  }
 0xaa6   : > { %p24_p4 = scmp.ge.s32.totalorder %s27_s24, 4  }
 0xaa8   :  { %26 = sbr.rel (!%p24_p4) target bundleno = 3 (0x3), region = 134 }

</bundles_post_ra>
